<compile_context>
chip_gen: v6e
topology: v6e:2x2x1
jax: 0.10.0
libtpu: 0.0.40
codegen_flags: <defaults>
</compile_context>

<pallas_src>
import functools

import jax
import jax.numpy as jnp
from jax.experimental import pallas as pl
from jax.experimental.pallas import tpu as pltpu


def _round_up(x, m):
    return ((x + m - 1) // m) * m


def _conv3d_tap_kernel(x_ref, w_ref, b_ref, o_ref, *, taps, td, wp, col):
    """One grid step = one batch element x one output depth tile.

    x_ref : (1, dslab, Cin, PLANE_W)  halo'd input slab (compute dtype), VMEM
    w_ref : (T, Cout, Cin)            per-tap weight matrices (compute dtype)
    b_ref : (Cout, 1)                 bias (f32)
    o_ref : (1, td, Cout, COL)        output tile; COL is a multiple of 128
    """
    bias = b_ref[...]                                        # (Cout, 1) f32
    for od in range(td):                                     # static unroll (td small)
        acc = None
        for t, (zd, zh, zw) in enumerate(taps):
            off = zh * wp + zw                               # static lane offset
            xs = x_ref[0, od + zd, :, off:off + col]          # (Cin, COL)
            y = jnp.dot(w_ref[t], xs, preferred_element_type=jnp.float32)
            acc = y if acc is None else acc + y
        o_ref[0, od] = (acc + bias).astype(o_ref.dtype)


def conv3d_module_forward(x, weight, bias, *, stride=1, padding=0,
                          compute_dtype=jnp.bfloat16, depth_tile_cap=8):
    """Forward pass of Conv3dModule (conv only; norm/act are None).

    x      : (N, Cin, D, H, W)        -- PyTorch NCDHW layout
    weight : (Cout, Cin, KD, KH, KW)  -- PyTorch Conv3d weight layout
    bias   : (Cout,)
    returns: (N, Cout, Dout, Hout, Wout)
    """
    if isinstance(stride, int):
        stride = (stride,) * 3
    if isinstance(padding, int):
        padding = (padding,) * 3
    sd, sh, sw = stride
    pad_d, pad_h, pad_w = padding

    n, c_in, d, h, w = x.shape
    c_out, c_in_w, kd, kh, kw = weight.shape
    assert c_in == c_in_w, "groups != 1 not implemented"  # TODO(synk): grouped conv

    # Stride-1 "virtual" output extents (strided conv = stride-1 conv, subsampled).
    d1 = d + 2 * pad_d - kd + 1
    h1 = h + 2 * pad_h - kh + 1
    w1 = w + 2 * pad_w - kw + 1
    assert d1 >= 1 and h1 >= 1 and w1 >= 1
    dp, hp, wp = d + 2 * pad_d, h + 2 * pad_h, w + 2 * pad_w

    # Lane-dense per-plane layout: COL output columns / plane (multiple of 128),
    # PLANE_W input lanes / plane (multiple of 128, includes shift slack so every
    # tap slice stays in-bounds).
    col = _round_up(h1 * wp, 128)
    plane_w = _round_up(col + (kh - 1) * wp + (kw - 1), 128)

    # ---- wrapper-side packing: pad only (no im2col), ~1x activation bytes ----
    x_c = x.astype(compute_dtype)
    x_pad = jnp.pad(x_c, ((0, 0), (0, 0), (pad_d, pad_d), (pad_h, pad_h), (pad_w, pad_w)))
    x_lay = jnp.transpose(x_pad, (0, 2, 1, 3, 4)).reshape(n, dp, c_in, hp * wp)
    x_lay = jnp.pad(x_lay, ((0, 0), (0, 0), (0, 0), (0, plane_w - hp * wp)))

    # ---- VMEM-budget-aware depth tile (generation aware via get_tpu_info) ----
    try:
        vmem_cap = int(pltpu.get_tpu_info().vmem_capacity_bytes)
    except Exception:
        vmem_cap = 64 << 20                      # conservative (v7x per-TC)
    budget = (3 * vmem_cap) // 4                 # ~48 MiB v7x, ~96 MiB v5e/v6e

    in_it = jnp.dtype(compute_dtype).itemsize
    out_it = jnp.dtype(x.dtype).itemsize

    def footprint(td_):
        dslab_ = td_ + kd - 1
        return (2 * dslab_ * c_in * plane_w * in_it          # double-buffered input slab
                + 2 * td_ * c_out * col * out_it             # double-buffered output tile
                + kd * kh * kw * c_out * c_in * in_it        # resident weights
                + c_out * 4 + (1 << 20))                     # bias + headroom

    need_split = (n == 1 and d1 > 1)             # keep both v7x TensorCores busy at N==1
    td = 1
    for cand in range(min(depth_tile_cap, d1), 0, -1):
        if d1 % cand:
            continue
        if need_split and d1 // cand < 2:
            continue
        if footprint(cand) <= budget:
            td = cand
            break
    n_dt = d1 // td
    dslab = td + kd - 1

    # ---- depth-halo'd slabs: (N*n_dt, dslab, Cin, PLANE_W) ----------------
    # n_dt == 1 is a pure reshape (no duplication); n_dt > 1 duplicates only the
    # (kd-1)-plane halo (<= (td+kd-1)/td of the input) -- vs ~27x for HBM im2col.
    # TODO(synk): a pl.ANY + make_async_copy halo fetch would remove even that.
    if n_dt == 1:
        x_slabs = x_lay
    else:
        x_slabs = jnp.stack(
            [x_lay[:, i * td:i * td + dslab] for i in range(n_dt)],
            axis=1).reshape(n * n_dt, dslab, c_in, plane_w)

    # ---- weights: (Cout,Cin,kd,kh,kw) -> (T, Cout, Cin), tap order (zd,zh,zw) ----
    n_taps = kd * kh * kw
    w_taps = jnp.transpose(weight, (2, 3, 4, 0, 1)).reshape(n_taps, c_out, c_in)
    w_taps = w_taps.astype(compute_dtype)
    b2d = bias.reshape(c_out, 1).astype(jnp.float32)

    taps = [(zd, zh, zw) for zd in range(kd) for zh in range(kh) for zw in range(kw)]
    kernel = functools.partial(_conv3d_tap_kernel, taps=taps, td=td, wp=wp, col=col)

    grid = (n, n_dt)
    vmem_limit = int(min(budget, max(footprint(td) * 5 // 4, 8 << 20)))

    out = pl.pallas_call(
        kernel,
        out_shape=jax.ShapeDtypeStruct((n, d1, c_out, col), x.dtype),
        grid_spec=pltpu.PrefetchScalarGridSpec(
            num_scalar_prefetch=0,
            grid=grid,
            in_specs=[
                pl.BlockSpec((1, dslab, c_in, plane_w),
                             lambda b, dt: (b * n_dt + dt, 0, 0, 0)),
                pl.BlockSpec((n_taps, c_out, c_in), lambda b, dt: (0, 0, 0)),
                pl.BlockSpec((c_out, 1), lambda b, dt: (0, 0)),
            ],
            out_specs=pl.BlockSpec((1, td, c_out, col),
                                   lambda b, dt: (b, dt, 0, 0)),
        ),
        compiler_params=pltpu.CompilerParams(
            dimension_semantics=("parallel", "parallel"),
            vmem_limit_bytes=vmem_limit),
    )(x_slabs, w_taps, b2d)

    # (N, D1, Cout, COL) -> drop shifted-frame pad columns -> NCDHW.
    out = out[..., :h1 * wp].reshape(n, d1, c_out, h1, wp)[..., :w1]
    out = jnp.transpose(out, (0, 2, 1, 3, 4))

    if (sd, sh, sw) != (1, 1, 1):
        # TODO(synk): strided conv is computed as stride-1 conv + subsample
        # (correct but not traffic-optimal for large strides).
        out = out[:, :, ::sd, ::sh, ::sw]
    return out


if __name__ == "__main__":
    # Conv3dModule(in_channels=4, out_channels=8, kernel_size=3, stride=1,
    #              padding=1, groups=1, norm_cfg=None, act_cfg=None)
    N, CIN, COUT, D, H, W, K = 2, 4, 8, 8, 8, 8, 3
    STRIDE, PAD = 1, 1

    key = jax.random.PRNGKey(0)
    kx, kw_, kb = jax.random.split(key, 3)
    x = jax.random.normal(kx, (N, CIN, D, H, W), dtype=jnp.float32)
    weight = jax.random.normal(kw_, (COUT, CIN, K, K, K), dtype=jnp.float32) * 0.1
    bias = jax.random.normal(kb, (COUT,), dtype=jnp.float32) * 0.1

    out = conv3d_module_forward(x, weight, bias, stride=STRIDE, padding=PAD)
    out = jax.block_until_ready(out)

    # Reference: same bf16 input rounding as the kernel, f32 accumulation.
    xb = x.astype(jnp.bfloat16).astype(jnp.float32)
    wb = weight.astype(jnp.bfloat16).astype(jnp.float32)
    ref = jax.lax.conv_general_dilated(
        xb, wb, window_strides=(STRIDE,) * 3,
        padding=[(PAD, PAD)] * 3,
        dimension_numbers=("NCDHW", "OIDHW", "NCDHW"),
    ) + bias.reshape(1, COUT, 1, 1, 1)

    assert out.shape == (N, COUT, D, H, W)
    err = float(jnp.max(jnp.abs(out - ref)))
    assert jnp.allclose(out, ref, atol=2e-3, rtol=2e-3), f"max abs err {err}"

    print("KERNEL_OK")
</pallas_src>

<mosaic_0001>
module attributes {stable_mosaic.version = 11 : i64} {
  func.func @_conv3d_tap_kernel(%arg0: i32, %arg1: i32, %arg2: memref<1x10x4x256xbf16, #tpu.memory_space<vmem>>, %arg3: memref<27x8x4xbf16, #tpu.memory_space<vmem>>, %arg4: memref<8x1xf32, #tpu.memory_space<vmem>>, %arg5: memref<1x8x8x128xf32, #tpu.memory_space<vmem>>) attributes {dimension_semantics = [#tpu.dimension_semantics<parallel>, #tpu.dimension_semantics<parallel>], iteration_bounds = array<i64: 2, 1>, scalar_prefetch = 0 : i64, scratch_operands = 0 : i64, tpu.core_type = #tpu.core_type<tc>, window_params = [{transform_indices = @transform_0, window_bounds = array<i64: 1, 10, 4, 256>}, {pipeline_mode = #tpu.pipeline_mode<synchronous>, transform_indices = @transform_1, window_bounds = array<i64: 27, 8, 4>}, {pipeline_mode = #tpu.pipeline_mode<synchronous>, transform_indices = @transform_2, window_bounds = array<i64: 8, 1>}, {transform_indices = @transform_3, window_bounds = array<i64: 1, 8, 8, 128>}]} {
    %c0 = arith.constant 0 : index
    %c0_0 = arith.constant 0 : index
    %0 = vector.load %arg4[%c0, %c0_0] : memref<8x1xf32, #tpu.memory_space<vmem>>, vector<8x1xf32>
    %c0_1 = arith.constant 0 : index
    %c0_2 = arith.constant 0 : index
    %c0_3 = arith.constant 0 : index
    %c0_4 = arith.constant 0 : index
    %1 = vector.load %arg2[%c0_1, %c0_2, %c0_3, %c0_4] : memref<1x10x4x256xbf16, #tpu.memory_space<vmem>>, vector<1x1x4x128xbf16>
    %2 = vector.shape_cast %1 : vector<1x1x4x128xbf16> to vector<4x128xbf16>
    %c0_5 = arith.constant 0 : index
    %c0_6 = arith.constant 0 : index
    %c0_7 = arith.constant 0 : index
    %3 = vector.load %arg3[%c0_5, %c0_6, %c0_7] : memref<27x8x4xbf16, #tpu.memory_space<vmem>>, vector<1x8x4xbf16>
    %4 = vector.shape_cast %3 : vector<1x8x4xbf16> to vector<8x4xbf16>
    %cst = arith.constant dense<0.000000e+00> : vector<8x128xf32>
    %5 = tpu.matmul %4, %2, %cst {dimension_numbers = #tpu.dot_dimension_numbers<[1], [0], [0], [1], [0, 0, 1, 1], [], []>} : vector<8x4xbf16>, vector<4x128xbf16>, vector<8x128xf32> -> vector<8x128xf32>
    %c0_8 = arith.constant 0 : index
    %c0_9 = arith.constant 0 : index
    %c0_10 = arith.constant 0 : index
    %c1 = arith.constant 1 : index
    %6 = vector.load %arg2[%c0_8, %c0_9, %c0_10, %c1] : memref<1x10x4x256xbf16, #tpu.memory_space<vmem>>, vector<1x1x4x128xbf16>
    %7 = vector.shape_cast %6 : vector<1x1x4x128xbf16> to vector<4x128xbf16>
    %c1_11 = arith.constant 1 : index
    %c0_12 = arith.constant 0 : index
    %c0_13 = arith.constant 0 : index
    %8 = vector.load %arg3[%c1_11, %c0_12, %c0_13] : memref<27x8x4xbf16, #tpu.memory_space<vmem>>, vector<1x8x4xbf16>
    %9 = vector.shape_cast %8 : vector<1x8x4xbf16> to vector<8x4xbf16>
    %cst_14 = arith.constant dense<0.000000e+00> : vector<8x128xf32>
    %10 = tpu.matmul %9, %7, %cst_14 {dimension_numbers = #tpu.dot_dimension_numbers<[1], [0], [0], [1], [0, 0, 1, 1], [], []>} : vector<8x4xbf16>, vector<4x128xbf16>, vector<8x128xf32> -> vector<8x128xf32>
    %11 = arith.addf %5, %10 : vector<8x128xf32>
    %c0_15 = arith.constant 0 : index
    %c0_16 = arith.constant 0 : index
    %c0_17 = arith.constant 0 : index
    %c2 = arith.constant 2 : index
    %12 = vector.load %arg2[%c0_15, %c0_16, %c0_17, %c2] : memref<1x10x4x256xbf16, #tpu.memory_space<vmem>>, vector<1x1x4x128xbf16>
    %13 = vector.shape_cast %12 : vector<1x1x4x128xbf16> to vector<4x128xbf16>
    %c2_18 = arith.constant 2 : index
    %c0_19 = arith.constant 0 : index
    %c0_20 = arith.constant 0 : index
    %14 = vector.load %arg3[%c2_18, %c0_19, %c0_20] : memref<27x8x4xbf16, #tpu.memory_space<vmem>>, vector<1x8x4xbf16>
    %15 = vector.shape_cast %14 : vector<1x8x4xbf16> to vector<8x4xbf16>
    %cst_21 = arith.constant dense<0.000000e+00> : vector<8x128xf32>
    %16 = tpu.matmul %15, %13, %cst_21 {dimension_numbers = #tpu.dot_dimension_numbers<[1], [0], [0], [1], [0, 0, 1, 1], [], []>} : vector<8x4xbf16>, vector<4x128xbf16>, vector<8x128xf32> -> vector<8x128xf32>
    %17 = arith.addf %11, %16 : vector<8x128xf32>
    %c0_22 = arith.constant 0 : index
    %c0_23 = arith.constant 0 : index
    %c0_24 = arith.constant 0 : index
    %c10 = arith.constant 10 : index
    %18 = vector.load %arg2[%c0_22, %c0_23, %c0_24, %c10] : memref<1x10x4x256xbf16, #tpu.memory_space<vmem>>, vector<1x1x4x128xbf16>
    %19 = vector.shape_cast %18 : vector<1x1x4x128xbf16> to vector<4x128xbf16>
    %c3 = arith.constant 3 : index
    %c0_25 = arith.constant 0 : index
    %c0_26 = arith.constant 0 : index
    %20 = vector.load %arg3[%c3, %c0_25, %c0_26] : memref<27x8x4xbf16, #tpu.memory_space<vmem>>, vector<1x8x4xbf16>
    %21 = vector.shape_cast %20 : vector<1x8x4xbf16> to vector<8x4xbf16>
    %cst_27 = arith.constant dense<0.000000e+00> : vector<8x128xf32>
    %22 = tpu.matmul %21, %19, %cst_27 {dimension_numbers = #tpu.dot_dimension_numbers<[1], [0], [0], [1], [0, 0, 1, 1], [], []>} : vector<8x4xbf16>, vector<4x128xbf16>, vector<8x128xf32> -> vector<8x128xf32>
    %23 = arith.addf %17, %22 : vector<8x128xf32>
    %c0_28 = arith.constant 0 : index
    %c0_29 = arith.constant 0 : index
    %c0_30 = arith.constant 0 : index
    %c11 = arith.constant 11 : index
    %24 = vector.load %arg2[%c0_28, %c0_29, %c0_30, %c11] : memref<1x10x4x256xbf16, #tpu.memory_space<vmem>>, vector<1x1x4x128xbf16>
    %25 = vector.shape_cast %24 : vector<1x1x4x128xbf16> to vector<4x128xbf16>
    %c4 = arith.constant 4 : index
    %c0_31 = arith.constant 0 : index
    %c0_32 = arith.constant 0 : index
    %26 = vector.load %arg3[%c4, %c0_31, %c0_32] : memref<27x8x4xbf16, #tpu.memory_space<vmem>>, vector<1x8x4xbf16>
    %27 = vector.shape_cast %26 : vector<1x8x4xbf16> to vector<8x4xbf16>
    %cst_33 = arith.constant dense<0.000000e+00> : vector<8x128xf32>
    %28 = tpu.matmul %27, %25, %cst_33 {dimension_numbers = #tpu.dot_dimension_numbers<[1], [0], [0], [1], [0, 0, 1, 1], [], []>} : vector<8x4xbf16>, vector<4x128xbf16>, vector<8x128xf32> -> vector<8x128xf32>
    %29 = arith.addf %23, %28 : vector<8x128xf32>
    %c0_34 = arith.constant 0 : index
    %c0_35 = arith.constant 0 : index
    %c0_36 = arith.constant 0 : index
    %c12 = arith.constant 12 : index
    %30 = vector.load %arg2[%c0_34, %c0_35, %c0_36, %c12] : memref<1x10x4x256xbf16, #tpu.memory_space<vmem>>, vector<1x1x4x128xbf16>
    %31 = vector.shape_cast %30 : vector<1x1x4x128xbf16> to vector<4x128xbf16>
    %c5 = arith.constant 5 : index
    %c0_37 = arith.constant 0 : index
    %c0_38 = arith.constant 0 : index
    %32 = vector.load %arg3[%c5, %c0_37, %c0_38] : memref<27x8x4xbf16, #tpu.memory_space<vmem>>, vector<1x8x4xbf16>
    %33 = vector.shape_cast %32 : vector<1x8x4xbf16> to vector<8x4xbf16>
    %cst_39 = arith.constant dense<0.000000e+00> : vector<8x128xf32>
    %34 = tpu.matmul %33, %31, %cst_39 {dimension_numbers = #tpu.dot_dimension_numbers<[1], [0], [0], [1], [0, 0, 1, 1], [], []>} : vector<8x4xbf16>, vector<4x128xbf16>, vector<8x128xf32> -> vector<8x128xf32>
    %35 = arith.addf %29, %34 : vector<8x128xf32>
    %c0_40 = arith.constant 0 : index
    %c0_41 = arith.constant 0 : index
    %c0_42 = arith.constant 0 : index
    %c20 = arith.constant 20 : index
    %36 = vector.load %arg2[%c0_40, %c0_41, %c0_42, %c20] : memref<1x10x4x256xbf16, #tpu.memory_space<vmem>>, vector<1x1x4x128xbf16>
    %37 = vector.shape_cast %36 : vector<1x1x4x128xbf16> to vector<4x128xbf16>
    %c6 = arith.constant 6 : index
    %c0_43 = arith.constant 0 : index
    %c0_44 = arith.constant 0 : index
    %38 = vector.load %arg3[%c6, %c0_43, %c0_44] : memref<27x8x4xbf16, #tpu.memory_space<vmem>>, vector<1x8x4xbf16>
    %39 = vector.shape_cast %38 : vector<1x8x4xbf16> to vector<8x4xbf16>
    %cst_45 = arith.constant dense<0.000000e+00> : vector<8x128xf32>
    %40 = tpu.matmul %39, %37, %cst_45 {dimension_numbers = #tpu.dot_dimension_numbers<[1], [0], [0], [1], [0, 0, 1, 1], [], []>} : vector<8x4xbf16>, vector<4x128xbf16>, vector<8x128xf32> -> vector<8x128xf32>
    %41 = arith.addf %35, %40 : vector<8x128xf32>
    %c0_46 = arith.constant 0 : index
    %c0_47 = arith.constant 0 : index
    %c0_48 = arith.constant 0 : index
    %c21 = arith.constant 21 : index
    %42 = vector.load %arg2[%c0_46, %c0_47, %c0_48, %c21] : memref<1x10x4x256xbf16, #tpu.memory_space<vmem>>, vector<1x1x4x128xbf16>
    %43 = vector.shape_cast %42 : vector<1x1x4x128xbf16> to vector<4x128xbf16>
    %c7 = arith.constant 7 : index
    %c0_49 = arith.constant 0 : index
    %c0_50 = arith.constant 0 : index
    %44 = vector.load %arg3[%c7, %c0_49, %c0_50] : memref<27x8x4xbf16, #tpu.memory_space<vmem>>, vector<1x8x4xbf16>
    %45 = vector.shape_cast %44 : vector<1x8x4xbf16> to vector<8x4xbf16>
    %cst_51 = arith.constant dense<0.000000e+00> : vector<8x128xf32>
    %46 = tpu.matmul %45, %43, %cst_51 {dimension_numbers = #tpu.dot_dimension_numbers<[1], [0], [0], [1], [0, 0, 1, 1], [], []>} : vector<8x4xbf16>, vector<4x128xbf16>, vector<8x128xf32> -> vector<8x128xf32>
    %47 = arith.addf %41, %46 : vector<8x128xf32>
    %c0_52 = arith.constant 0 : index
    %c0_53 = arith.constant 0 : index
    %c0_54 = arith.constant 0 : index
    %c22 = arith.constant 22 : index
    %48 = vector.load %arg2[%c0_52, %c0_53, %c0_54, %c22] : memref<1x10x4x256xbf16, #tpu.memory_space<vmem>>, vector<1x1x4x128xbf16>
    %49 = vector.shape_cast %48 : vector<1x1x4x128xbf16> to vector<4x128xbf16>
    %c8 = arith.constant 8 : index
    %c0_55 = arith.constant 0 : index
    %c0_56 = arith.constant 0 : index
    %50 = vector.load %arg3[%c8, %c0_55, %c0_56] : memref<27x8x4xbf16, #tpu.memory_space<vmem>>, vector<1x8x4xbf16>
    %51 = vector.shape_cast %50 : vector<1x8x4xbf16> to vector<8x4xbf16>
    %cst_57 = arith.constant dense<0.000000e+00> : vector<8x128xf32>
    %52 = tpu.matmul %51, %49, %cst_57 {dimension_numbers = #tpu.dot_dimension_numbers<[1], [0], [0], [1], [0, 0, 1, 1], [], []>} : vector<8x4xbf16>, vector<4x128xbf16>, vector<8x128xf32> -> vector<8x128xf32>
    %53 = arith.addf %47, %52 : vector<8x128xf32>
    %c0_58 = arith.constant 0 : index
    %c1_59 = arith.constant 1 : index
    %c0_60 = arith.constant 0 : index
    %c0_61 = arith.constant 0 : index
    %54 = vector.load %arg2[%c0_58, %c1_59, %c0_60, %c0_61] : memref<1x10x4x256xbf16, #tpu.memory_space<vmem>>, vector<1x1x4x128xbf16>
    %55 = vector.shape_cast %54 : vector<1x1x4x128xbf16> to vector<4x128xbf16>
    %c9 = arith.constant 9 : index
    %c0_62 = arith.constant 0 : index
    %c0_63 = arith.constant 0 : index
    %56 = vector.load %arg3[%c9, %c0_62, %c0_63] : memref<27x8x4xbf16, #tpu.memory_space<vmem>>, vector<1x8x4xbf16>
    %57 = vector.shape_cast %56 : vector<1x8x4xbf16> to vector<8x4xbf16>
    %cst_64 = arith.constant dense<0.000000e+00> : vector<8x128xf32>
    %58 = tpu.matmul %57, %55, %cst_64 {dimension_numbers = #tpu.dot_dimension_numbers<[1], [0], [0], [1], [0, 0, 1, 1], [], []>} : vector<8x4xbf16>, vector<4x128xbf16>, vector<8x128xf32> -> vector<8x128xf32>
    %59 = arith.addf %53, %58 : vector<8x128xf32>
    %c0_65 = arith.constant 0 : index
    %c1_66 = arith.constant 1 : index
    %c0_67 = arith.constant 0 : index
    %c1_68 = arith.constant 1 : index
    %60 = vector.load %arg2[%c0_65, %c1_66, %c0_67, %c1_68] : memref<1x10x4x256xbf16, #tpu.memory_space<vmem>>, vector<1x1x4x128xbf16>
    %61 = vector.shape_cast %60 : vector<1x1x4x128xbf16> to vector<4x128xbf16>
    %c10_69 = arith.constant 10 : index
    %c0_70 = arith.constant 0 : index
    %c0_71 = arith.constant 0 : index
    %62 = vector.load %arg3[%c10_69, %c0_70, %c0_71] : memref<27x8x4xbf16, #tpu.memory_space<vmem>>, vector<1x8x4xbf16>
    %63 = vector.shape_cast %62 : vector<1x8x4xbf16> to vector<8x4xbf16>
    %cst_72 = arith.constant dense<0.000000e+00> : vector<8x128xf32>
    %64 = tpu.matmul %63, %61, %cst_72 {dimension_numbers = #tpu.dot_dimension_numbers<[1], [0], [0], [1], [0, 0, 1, 1], [], []>} : vector<8x4xbf16>, vector<4x128xbf16>, vector<8x128xf32> -> vector<8x128xf32>
    %65 = arith.addf %59, %64 : vector<8x128xf32>
    %c0_73 = arith.constant 0 : index
    %c1_74 = arith.constant 1 : index
    %c0_75 = arith.constant 0 : index
    %c2_76 = arith.constant 2 : index
    %66 = vector.load %arg2[%c0_73, %c1_74, %c0_75, %c2_76] : memref<1x10x4x256xbf16, #tpu.memory_space<vmem>>, vector<1x1x4x128xbf16>
    %67 = vector.shape_cast %66 : vector<1x1x4x128xbf16> to vector<4x128xbf16>
    %c11_77 = arith.constant 11 : index
    %c0_78 = arith.constant 0 : index
    %c0_79 = arith.constant 0 : index
    %68 = vector.load %arg3[%c11_77, %c0_78, %c0_79] : memref<27x8x4xbf16, #tpu.memory_space<vmem>>, vector<1x8x4xbf16>
    %69 = vector.shape_cast %68 : vector<1x8x4xbf16> to vector<8x4xbf16>
    %cst_80 = arith.constant dense<0.000000e+00> : vector<8x128xf32>
    %70 = tpu.matmul %69, %67, %cst_80 {dimension_numbers = #tpu.dot_dimension_numbers<[1], [0], [0], [1], [0, 0, 1, 1], [], []>} : vector<8x4xbf16>, vector<4x128xbf16>, vector<8x128xf32> -> vector<8x128xf32>
    %71 = arith.addf %65, %70 : vector<8x128xf32>
    %c0_81 = arith.constant 0 : index
    %c1_82 = arith.constant 1 : index
    %c0_83 = arith.constant 0 : index
    %c10_84 = arith.constant 10 : index
    %72 = vector.load %arg2[%c0_81, %c1_82, %c0_83, %c10_84] : memref<1x10x4x256xbf16, #tpu.memory_space<vmem>>, vector<1x1x4x128xbf16>
    %73 = vector.shape_cast %72 : vector<1x1x4x128xbf16> to vector<4x128xbf16>
    %c12_85 = arith.constant 12 : index
    %c0_86 = arith.constant 0 : index
    %c0_87 = arith.constant 0 : index
    %74 = vector.load %arg3[%c12_85, %c0_86, %c0_87] : memref<27x8x4xbf16, #tpu.memory_space<vmem>>, vector<1x8x4xbf16>
    %75 = vector.shape_cast %74 : vector<1x8x4xbf16> to vector<8x4xbf16>
    %cst_88 = arith.constant dense<0.000000e+00> : vector<8x128xf32>
    %76 = tpu.matmul %75, %73, %cst_88 {dimension_numbers = #tpu.dot_dimension_numbers<[1], [0], [0], [1], [0, 0, 1, 1], [], []>} : vector<8x4xbf16>, vector<4x128xbf16>, vector<8x128xf32> -> vector<8x128xf32>
    %77 = arith.addf %71, %76 : vector<8x128xf32>
    %c0_89 = arith.constant 0 : index
    %c1_90 = arith.constant 1 : index
    %c0_91 = arith.constant 0 : index
    %c11_92 = arith.constant 11 : index
    %78 = vector.load %arg2[%c0_89, %c1_90, %c0_91, %c11_92] : memref<1x10x4x256xbf16, #tpu.memory_space<vmem>>, vector<1x1x4x128xbf16>
    %79 = vector.shape_cast %78 : vector<1x1x4x128xbf16> to vector<4x128xbf16>
    %c13 = arith.constant 13 : index
    %c0_93 = arith.constant 0 : index
    %c0_94 = arith.constant 0 : index
    %80 = vector.load %arg3[%c13, %c0_93, %c0_94] : memref<27x8x4xbf16, #tpu.memory_space<vmem>>, vector<1x8x4xbf16>
    %81 = vector.shape_cast %80 : vector<1x8x4xbf16> to vector<8x4xbf16>
    %cst_95 = arith.constant dense<0.000000e+00> : vector<8x128xf32>
    %82 = tpu.matmul %81, %79, %cst_95 {dimension_numbers = #tpu.dot_dimension_numbers<[1], [0], [0], [1], [0, 0, 1, 1], [], []>} : vector<8x4xbf16>, vector<4x128xbf16>, vector<8x128xf32> -> vector<8x128xf32>
    %83 = arith.addf %77, %82 : vector<8x128xf32>
    %c0_96 = arith.constant 0 : index
    %c1_97 = arith.constant 1 : index
    %c0_98 = arith.constant 0 : index
    %c12_99 = arith.constant 12 : index
    %84 = vector.load %arg2[%c0_96, %c1_97, %c0_98, %c12_99] : memref<1x10x4x256xbf16, #tpu.memory_space<vmem>>, vector<1x1x4x128xbf16>
    %85 = vector.shape_cast %84 : vector<1x1x4x128xbf16> to vector<4x128xbf16>
    %c14 = arith.constant 14 : index
    %c0_100 = arith.constant 0 : index
    %c0_101 = arith.constant 0 : index
    %86 = vector.load %arg3[%c14, %c0_100, %c0_101] : memref<27x8x4xbf16, #tpu.memory_space<vmem>>, vector<1x8x4xbf16>
    %87 = vector.shape_cast %86 : vector<1x8x4xbf16> to vector<8x4xbf16>
    %cst_102 = arith.constant dense<0.000000e+00> : vector<8x128xf32>
    %88 = tpu.matmul %87, %85, %cst_102 {dimension_numbers = #tpu.dot_dimension_numbers<[1], [0], [0], [1], [0, 0, 1, 1], [], []>} : vector<8x4xbf16>, vector<4x128xbf16>, vector<8x128xf32> -> vector<8x128xf32>
    %89 = arith.addf %83, %88 : vector<8x128xf32>
    %c0_103 = arith.constant 0 : index
    %c1_104 = arith.constant 1 : index
    %c0_105 = arith.constant 0 : index
    %c20_106 = arith.constant 20 : index
    %90 = vector.load %arg2[%c0_103, %c1_104, %c0_105, %c20_106] : memref<1x10x4x256xbf16, #tpu.memory_space<vmem>>, vector<1x1x4x128xbf16>
    %91 = vector.shape_cast %90 : vector<1x1x4x128xbf16> to vector<4x128xbf16>
    %c15 = arith.constant 15 : index
    %c0_107 = arith.constant 0 : index
    %c0_108 = arith.constant 0 : index
    %92 = vector.load %arg3[%c15, %c0_107, %c0_108] : memref<27x8x4xbf16, #tpu.memory_space<vmem>>, vector<1x8x4xbf16>
    %93 = vector.shape_cast %92 : vector<1x8x4xbf16> to vector<8x4xbf16>
    %cst_109 = arith.constant dense<0.000000e+00> : vector<8x128xf32>
    %94 = tpu.matmul %93, %91, %cst_109 {dimension_numbers = #tpu.dot_dimension_numbers<[1], [0], [0], [1], [0, 0, 1, 1], [], []>} : vector<8x4xbf16>, vector<4x128xbf16>, vector<8x128xf32> -> vector<8x128xf32>
    %95 = arith.addf %89, %94 : vector<8x128xf32>
    %c0_110 = arith.constant 0 : index
    %c1_111 = arith.constant 1 : index
    %c0_112 = arith.constant 0 : index
    %c21_113 = arith.constant 21 : index
    %96 = vector.load %arg2[%c0_110, %c1_111, %c0_112, %c21_113] : memref<1x10x4x256xbf16, #tpu.memory_space<vmem>>, vector<1x1x4x128xbf16>
    %97 = vector.shape_cast %96 : vector<1x1x4x128xbf16> to vector<4x128xbf16>
    %c16 = arith.constant 16 : index
    %c0_114 = arith.constant 0 : index
    %c0_115 = arith.constant 0 : index
    %98 = vector.load %arg3[%c16, %c0_114, %c0_115] : memref<27x8x4xbf16, #tpu.memory_space<vmem>>, vector<1x8x4xbf16>
    %99 = vector.shape_cast %98 : vector<1x8x4xbf16> to vector<8x4xbf16>
    %cst_116 = arith.constant dense<0.000000e+00> : vector<8x128xf32>
    %100 = tpu.matmul %99, %97, %cst_116 {dimension_numbers = #tpu.dot_dimension_numbers<[1], [0], [0], [1], [0, 0, 1, 1], [], []>} : vector<8x4xbf16>, vector<4x128xbf16>, vector<8x128xf32> -> vector<8x128xf32>
    %101 = arith.addf %95, %100 : vector<8x128xf32>
    %c0_117 = arith.constant 0 : index
    %c1_118 = arith.constant 1 : index
    %c0_119 = arith.constant 0 : index
    %c22_120 = arith.constant 22 : index
    %102 = vector.load %arg2[%c0_117, %c1_118, %c0_119, %c22_120] : memref<1x10x4x256xbf16, #tpu.memory_space<vmem>>, vector<1x1x4x128xbf16>
    %103 = vector.shape_cast %102 : vector<1x1x4x128xbf16> to vector<4x128xbf16>
    %c17 = arith.constant 17 : index
    %c0_121 = arith.constant 0 : index
    %c0_122 = arith.constant 0 : index
    %104 = vector.load %arg3[%c17, %c0_121, %c0_122] : memref<27x8x4xbf16, #tpu.memory_space<vmem>>, vector<1x8x4xbf16>
    %105 = vector.shape_cast %104 : vector<1x8x4xbf16> to vector<8x4xbf16>
    %cst_123 = arith.constant dense<0.000000e+00> : vector<8x128xf32>
    %106 = tpu.matmul %105, %103, %cst_123 {dimension_numbers = #tpu.dot_dimension_numbers<[1], [0], [0], [1], [0, 0, 1, 1], [], []>} : vector<8x4xbf16>, vector<4x128xbf16>, vector<8x128xf32> -> vector<8x128xf32>
    %107 = arith.addf %101, %106 : vector<8x128xf32>
    %c0_124 = arith.constant 0 : index
    %c2_125 = arith.constant 2 : index
    %c0_126 = arith.constant 0 : index
    %c0_127 = arith.constant 0 : index
    %108 = vector.load %arg2[%c0_124, %c2_125, %c0_126, %c0_127] : memref<1x10x4x256xbf16, #tpu.memory_space<vmem>>, vector<1x1x4x128xbf16>
    %109 = vector.shape_cast %108 : vector<1x1x4x128xbf16> to vector<4x128xbf16>
    %c18 = arith.constant 18 : index
    %c0_128 = arith.constant 0 : index
    %c0_129 = arith.constant 0 : index
    %110 = vector.load %arg3[%c18, %c0_128, %c0_129] : memref<27x8x4xbf16, #tpu.memory_space<vmem>>, vector<1x8x4xbf16>
    %111 = vector.shape_cast %110 : vector<1x8x4xbf16> to vector<8x4xbf16>
    %cst_130 = arith.constant dense<0.000000e+00> : vector<8x128xf32>
    %112 = tpu.matmul %111, %109, %cst_130 {dimension_numbers = #tpu.dot_dimension_numbers<[1], [0], [0], [1], [0, 0, 1, 1], [], []>} : vector<8x4xbf16>, vector<4x128xbf16>, vector<8x128xf32> -> vector<8x128xf32>
    %113 = arith.addf %107, %112 : vector<8x128xf32>
    %c0_131 = arith.constant 0 : index
    %c2_132 = arith.constant 2 : index
    %c0_133 = arith.constant 0 : index
    %c1_134 = arith.constant 1 : index
    %114 = vector.load %arg2[%c0_131, %c2_132, %c0_133, %c1_134] : memref<1x10x4x256xbf16, #tpu.memory_space<vmem>>, vector<1x1x4x128xbf16>
    %115 = vector.shape_cast %114 : vector<1x1x4x128xbf16> to vector<4x128xbf16>
    %c19 = arith.constant 19 : index
    %c0_135 = arith.constant 0 : index
    %c0_136 = arith.constant 0 : index
    %116 = vector.load %arg3[%c19, %c0_135, %c0_136] : memref<27x8x4xbf16, #tpu.memory_space<vmem>>, vector<1x8x4xbf16>
    %117 = vector.shape_cast %116 : vector<1x8x4xbf16> to vector<8x4xbf16>
    %cst_137 = arith.constant dense<0.000000e+00> : vector<8x128xf32>
    %118 = tpu.matmul %117, %115, %cst_137 {dimension_numbers = #tpu.dot_dimension_numbers<[1], [0], [0], [1], [0, 0, 1, 1], [], []>} : vector<8x4xbf16>, vector<4x128xbf16>, vector<8x128xf32> -> vector<8x128xf32>
    %119 = arith.addf %113, %118 : vector<8x128xf32>
    %c0_138 = arith.constant 0 : index
    %c2_139 = arith.constant 2 : index
    %c0_140 = arith.constant 0 : index
    %c2_141 = arith.constant 2 : index
    %120 = vector.load %arg2[%c0_138, %c2_139, %c0_140, %c2_141] : memref<1x10x4x256xbf16, #tpu.memory_space<vmem>>, vector<1x1x4x128xbf16>
    %121 = vector.shape_cast %120 : vector<1x1x4x128xbf16> to vector<4x128xbf16>
    %c20_142 = arith.constant 20 : index
    %c0_143 = arith.constant 0 : index
    %c0_144 = arith.constant 0 : index
    %122 = vector.load %arg3[%c20_142, %c0_143, %c0_144] : memref<27x8x4xbf16, #tpu.memory_space<vmem>>, vector<1x8x4xbf16>
    %123 = vector.shape_cast %122 : vector<1x8x4xbf16> to vector<8x4xbf16>
    %cst_145 = arith.constant dense<0.000000e+00> : vector<8x128xf32>
    %124 = tpu.matmul %123, %121, %cst_145 {dimension_numbers = #tpu.dot_dimension_numbers<[1], [0], [0], [1], [0, 0, 1, 1], [], []>} : vector<8x4xbf16>, vector<4x128xbf16>, vector<8x128xf32> -> vector<8x128xf32>
    %125 = arith.addf %119, %124 : vector<8x128xf32>
    %c0_146 = arith.constant 0 : index
    %c2_147 = arith.constant 2 : index
    %c0_148 = arith.constant 0 : index
    %c10_149 = arith.constant 10 : index
    %126 = vector.load %arg2[%c0_146, %c2_147, %c0_148, %c10_149] : memref<1x10x4x256xbf16, #tpu.memory_space<vmem>>, vector<1x1x4x128xbf16>
    %127 = vector.shape_cast %126 : vector<1x1x4x128xbf16> to vector<4x128xbf16>
    %c21_150 = arith.constant 21 : index
    %c0_151 = arith.constant 0 : index
    %c0_152 = arith.constant 0 : index
    %128 = vector.load %arg3[%c21_150, %c0_151, %c0_152] : memref<27x8x4xbf16, #tpu.memory_space<vmem>>, vector<1x8x4xbf16>
    %129 = vector.shape_cast %128 : vector<1x8x4xbf16> to vector<8x4xbf16>
    %cst_153 = arith.constant dense<0.000000e+00> : vector<8x128xf32>
    %130 = tpu.matmul %129, %127, %cst_153 {dimension_numbers = #tpu.dot_dimension_numbers<[1], [0], [0], [1], [0, 0, 1, 1], [], []>} : vector<8x4xbf16>, vector<4x128xbf16>, vector<8x128xf32> -> vector<8x128xf32>
    %131 = arith.addf %125, %130 : vector<8x128xf32>
    %c0_154 = arith.constant 0 : index
    %c2_155 = arith.constant 2 : index
    %c0_156 = arith.constant 0 : index
    %c11_157 = arith.constant 11 : index
    %132 = vector.load %arg2[%c0_154, %c2_155, %c0_156, %c11_157] : memref<1x10x4x256xbf16, #tpu.memory_space<vmem>>, vector<1x1x4x128xbf16>
    %133 = vector.shape_cast %132 : vector<1x1x4x128xbf16> to vector<4x128xbf16>
    %c22_158 = arith.constant 22 : index
    %c0_159 = arith.constant 0 : index
    %c0_160 = arith.constant 0 : index
    %134 = vector.load %arg3[%c22_158, %c0_159, %c0_160] : memref<27x8x4xbf16, #tpu.memory_space<vmem>>, vector<1x8x4xbf16>
    %135 = vector.shape_cast %134 : vector<1x8x4xbf16> to vector<8x4xbf16>
    %cst_161 = arith.constant dense<0.000000e+00> : vector<8x128xf32>
    %136 = tpu.matmul %135, %133, %cst_161 {dimension_numbers = #tpu.dot_dimension_numbers<[1], [0], [0], [1], [0, 0, 1, 1], [], []>} : vector<8x4xbf16>, vector<4x128xbf16>, vector<8x128xf32> -> vector<8x128xf32>
    %137 = arith.addf %131, %136 : vector<8x128xf32>
    %c0_162 = arith.constant 0 : index
    %c2_163 = arith.constant 2 : index
    %c0_164 = arith.constant 0 : index
    %c12_165 = arith.constant 12 : index
    %138 = vector.load %arg2[%c0_162, %c2_163, %c0_164, %c12_165] : memref<1x10x4x256xbf16, #tpu.memory_space<vmem>>, vector<1x1x4x128xbf16>
    %139 = vector.shape_cast %138 : vector<1x1x4x128xbf16> to vector<4x128xbf16>
    %c23 = arith.constant 23 : index
    %c0_166 = arith.constant 0 : index
    %c0_167 = arith.constant 0 : index
    %140 = vector.load %arg3[%c23, %c0_166, %c0_167] : memref<27x8x4xbf16, #tpu.memory_space<vmem>>, vector<1x8x4xbf16>
    %141 = vector.shape_cast %140 : vector<1x8x4xbf16> to vector<8x4xbf16>
    %cst_168 = arith.constant dense<0.000000e+00> : vector<8x128xf32>
    %142 = tpu.matmul %141, %139, %cst_168 {dimension_numbers = #tpu.dot_dimension_numbers<[1], [0], [0], [1], [0, 0, 1, 1], [], []>} : vector<8x4xbf16>, vector<4x128xbf16>, vector<8x128xf32> -> vector<8x128xf32>
    %143 = arith.addf %137, %142 : vector<8x128xf32>
    %c0_169 = arith.constant 0 : index
    %c2_170 = arith.constant 2 : index
    %c0_171 = arith.constant 0 : index
    %c20_172 = arith.constant 20 : index
    %144 = vector.load %arg2[%c0_169, %c2_170, %c0_171, %c20_172] : memref<1x10x4x256xbf16, #tpu.memory_space<vmem>>, vector<1x1x4x128xbf16>
    %145 = vector.shape_cast %144 : vector<1x1x4x128xbf16> to vector<4x128xbf16>
    %c24 = arith.constant 24 : index
    %c0_173 = arith.constant 0 : index
    %c0_174 = arith.constant 0 : index
    %146 = vector.load %arg3[%c24, %c0_173, %c0_174] : memref<27x8x4xbf16, #tpu.memory_space<vmem>>, vector<1x8x4xbf16>
    %147 = vector.shape_cast %146 : vector<1x8x4xbf16> to vector<8x4xbf16>
    %cst_175 = arith.constant dense<0.000000e+00> : vector<8x128xf32>
    %148 = tpu.matmul %147, %145, %cst_175 {dimension_numbers = #tpu.dot_dimension_numbers<[1], [0], [0], [1], [0, 0, 1, 1], [], []>} : vector<8x4xbf16>, vector<4x128xbf16>, vector<8x128xf32> -> vector<8x128xf32>
    %149 = arith.addf %143, %148 : vector<8x128xf32>
    %c0_176 = arith.constant 0 : index
    %c2_177 = arith.constant 2 : index
    %c0_178 = arith.constant 0 : index
    %c21_179 = arith.constant 21 : index
    %150 = vector.load %arg2[%c0_176, %c2_177, %c0_178, %c21_179] : memref<1x10x4x256xbf16, #tpu.memory_space<vmem>>, vector<1x1x4x128xbf16>
    %151 = vector.shape_cast %150 : vector<1x1x4x128xbf16> to vector<4x128xbf16>
    %c25 = arith.constant 25 : index
    %c0_180 = arith.constant 0 : index
    %c0_181 = arith.constant 0 : index
    %152 = vector.load %arg3[%c25, %c0_180, %c0_181] : memref<27x8x4xbf16, #tpu.memory_space<vmem>>, vector<1x8x4xbf16>
    %153 = vector.shape_cast %152 : vector<1x8x4xbf16> to vector<8x4xbf16>
    %cst_182 = arith.constant dense<0.000000e+00> : vector<8x128xf32>
    %154 = tpu.matmul %153, %151, %cst_182 {dimension_numbers = #tpu.dot_dimension_numbers<[1], [0], [0], [1], [0, 0, 1, 1], [], []>} : vector<8x4xbf16>, vector<4x128xbf16>, vector<8x128xf32> -> vector<8x128xf32>
    %155 = arith.addf %149, %154 : vector<8x128xf32>
    %c0_183 = arith.constant 0 : index
    %c2_184 = arith.constant 2 : index
    %c0_185 = arith.constant 0 : index
    %c22_186 = arith.constant 22 : index
    %156 = vector.load %arg2[%c0_183, %c2_184, %c0_185, %c22_186] : memref<1x10x4x256xbf16, #tpu.memory_space<vmem>>, vector<1x1x4x128xbf16>
    %157 = vector.shape_cast %156 : vector<1x1x4x128xbf16> to vector<4x128xbf16>
    %c26 = arith.constant 26 : index
    %c0_187 = arith.constant 0 : index
    %c0_188 = arith.constant 0 : index
    %158 = vector.load %arg3[%c26, %c0_187, %c0_188] : memref<27x8x4xbf16, #tpu.memory_space<vmem>>, vector<1x8x4xbf16>
    %159 = vector.shape_cast %158 : vector<1x8x4xbf16> to vector<8x4xbf16>
    %cst_189 = arith.constant dense<0.000000e+00> : vector<8x128xf32>
    %160 = tpu.matmul %159, %157, %cst_189 {dimension_numbers = #tpu.dot_dimension_numbers<[1], [0], [0], [1], [0, 0, 1, 1], [], []>} : vector<8x4xbf16>, vector<4x128xbf16>, vector<8x128xf32> -> vector<8x128xf32>
    %161 = arith.addf %155, %160 : vector<8x128xf32>
    %162 = vector.broadcast %0 : vector<8x1xf32> to vector<8x128xf32>
    %163 = arith.addf %161, %162 : vector<8x128xf32>
    %c0_190 = arith.constant 0 : index
    %c0_191 = arith.constant 0 : index
    %c0_192 = arith.constant 0 : index
    %c0_193 = arith.constant 0 : index
    %164 = vector.load %arg5[%c0_190, %c0_191, %c0_192, %c0_193] : memref<1x8x8x128xf32, #tpu.memory_space<vmem>>, vector<1x1x8x128xf32>
    %165 = vector.shape_cast %164 : vector<1x1x8x128xf32> to vector<8x128xf32>
    %166 = vector.shape_cast %163 : vector<8x128xf32> to vector<1x1x8x128xf32>
    tpu.vector_store %arg5[%c0_190, %c0_191, %c0_192, %c0_193], %166 {strides = array<i32>} : memref<1x8x8x128xf32, #tpu.memory_space<vmem>>, vector<1x1x8x128xf32>,
    %c0_194 = arith.constant 0 : index
    %c1_195 = arith.constant 1 : index
    %c0_196 = arith.constant 0 : index
    %c0_197 = arith.constant 0 : index
    %167 = vector.load %arg2[%c0_194, %c1_195, %c0_196, %c0_197] : memref<1x10x4x256xbf16, #tpu.memory_space<vmem>>, vector<1x1x4x128xbf16>
    %168 = vector.shape_cast %167 : vector<1x1x4x128xbf16> to vector<4x128xbf16>
    %c0_198 = arith.constant 0 : index
    %c0_199 = arith.constant 0 : index
    %c0_200 = arith.constant 0 : index
    %169 = vector.load %arg3[%c0_198, %c0_199, %c0_200] : memref<27x8x4xbf16, #tpu.memory_space<vmem>>, vector<1x8x4xbf16>
    %170 = vector.shape_cast %169 : vector<1x8x4xbf16> to vector<8x4xbf16>
    %cst_201 = arith.constant dense<0.000000e+00> : vector<8x128xf32>
    %171 = tpu.matmul %170, %168, %cst_201 {dimension_numbers = #tpu.dot_dimension_numbers<[1], [0], [0], [1], [0, 0, 1, 1], [], []>} : vector<8x4xbf16>, vector<4x128xbf16>, vector<8x128xf32> -> vector<8x128xf32>
    %c0_202 = arith.constant 0 : index
    %c1_203 = arith.constant 1 : index
    %c0_204 = arith.constant 0 : index
    %c1_205 = arith.constant 1 : index
    %172 = vector.load %arg2[%c0_202, %c1_203, %c0_204, %c1_205] : memref<1x10x4x256xbf16, #tpu.memory_space<vmem>>, vector<1x1x4x128xbf16>
    %173 = vector.shape_cast %172 : vector<1x1x4x128xbf16> to vector<4x128xbf16>
    %c1_206 = arith.constant 1 : index
    %c0_207 = arith.constant 0 : index
    %c0_208 = arith.constant 0 : index
    %174 = vector.load %arg3[%c1_206, %c0_207, %c0_208] : memref<27x8x4xbf16, #tpu.memory_space<vmem>>, vector<1x8x4xbf16>
    %175 = vector.shape_cast %174 : vector<1x8x4xbf16> to vector<8x4xbf16>
    %cst_209 = arith.constant dense<0.000000e+00> : vector<8x128xf32>
    %176 = tpu.matmul %175, %173, %cst_209 {dimension_numbers = #tpu.dot_dimension_numbers<[1], [0], [0], [1], [0, 0, 1, 1], [], []>} : vector<8x4xbf16>, vector<4x128xbf16>, vector<8x128xf32> -> vector<8x128xf32>
    %177 = arith.addf %171, %176 : vector<8x128xf32>
    %c0_210 = arith.constant 0 : index
    %c1_211 = arith.constant 1 : index
    %c0_212 = arith.constant 0 : index
    %c2_213 = arith.constant 2 : index
    %178 = vector.load %arg2[%c0_210, %c1_211, %c0_212, %c2_213] : memref<1x10x4x256xbf16, #tpu.memory_space<vmem>>, vector<1x1x4x128xbf16>
    %179 = vector.shape_cast %178 : vector<1x1x4x128xbf16> to vector<4x128xbf16>
    %c2_214 = arith.constant 2 : index
    %c0_215 = arith.constant 0 : index
    %c0_216 = arith.constant 0 : index
    %180 = vector.load %arg3[%c2_214, %c0_215, %c0_216] : memref<27x8x4xbf16, #tpu.memory_space<vmem>>, vector<1x8x4xbf16>
    %181 = vector.shape_cast %180 : vector<1x8x4xbf16> to vector<8x4xbf16>
    %cst_217 = arith.constant dense<0.000000e+00> : vector<8x128xf32>
    %182 = tpu.matmul %181, %179, %cst_217 {dimension_numbers = #tpu.dot_dimension_numbers<[1], [0], [0], [1], [0, 0, 1, 1], [], []>} : vector<8x4xbf16>, vector<4x128xbf16>, vector<8x128xf32> -> vector<8x128xf32>
    %183 = arith.addf %177, %182 : vector<8x128xf32>
    %c0_218 = arith.constant 0 : index
    %c1_219 = arith.constant 1 : index
    %c0_220 = arith.constant 0 : index
    %c10_221 = arith.constant 10 : index
    %184 = vector.load %arg2[%c0_218, %c1_219, %c0_220, %c10_221] : memref<1x10x4x256xbf16, #tpu.memory_space<vmem>>, vector<1x1x4x128xbf16>
    %185 = vector.shape_cast %184 : vector<1x1x4x128xbf16> to vector<4x128xbf16>
    %c3_222 = arith.constant 3 : index
    %c0_223 = arith.constant 0 : index
    %c0_224 = arith.constant 0 : index
    %186 = vector.load %arg3[%c3_222, %c0_223, %c0_224] : memref<27x8x4xbf16, #tpu.memory_space<vmem>>, vector<1x8x4xbf16>
    %187 = vector.shape_cast %186 : vector<1x8x4xbf16> to vector<8x4xbf16>
    %cst_225 = arith.constant dense<0.000000e+00> : vector<8x128xf32>
    %188 = tpu.matmul %187, %185, %cst_225 {dimension_numbers = #tpu.dot_dimension_numbers<[1], [0], [0], [1], [0, 0, 1, 1], [], []>} : vector<8x4xbf16>, vector<4x128xbf16>, vector<8x128xf32> -> vector<8x128xf32>
    %189 = arith.addf %183, %188 : vector<8x128xf32>
    %c0_226 = arith.constant 0 : index
    %c1_227 = arith.constant 1 : index
    %c0_228 = arith.constant 0 : index
    %c11_229 = arith.constant 11 : index
    %190 = vector.load %arg2[%c0_226, %c1_227, %c0_228, %c11_229] : memref<1x10x4x256xbf16, #tpu.memory_space<vmem>>, vector<1x1x4x128xbf16>
    %191 = vector.shape_cast %190 : vector<1x1x4x128xbf16> to vector<4x128xbf16>
    %c4_230 = arith.constant 4 : index
    %c0_231 = arith.constant 0 : index
    %c0_232 = arith.constant 0 : index
    %192 = vector.load %arg3[%c4_230, %c0_231, %c0_232] : memref<27x8x4xbf16, #tpu.memory_space<vmem>>, vector<1x8x4xbf16>
    %193 = vector.shape_cast %192 : vector<1x8x4xbf16> to vector<8x4xbf16>
    %cst_233 = arith.constant dense<0.000000e+00> : vector<8x128xf32>
    %194 = tpu.matmul %193, %191, %cst_233 {dimension_numbers = #tpu.dot_dimension_numbers<[1], [0], [0], [1], [0, 0, 1, 1], [], []>} : vector<8x4xbf16>, vector<4x128xbf16>, vector<8x128xf32> -> vector<8x128xf32>
    %195 = arith.addf %189, %194 : vector<8x128xf32>
    %c0_234 = arith.constant 0 : index
    %c1_235 = arith.constant 1 : index
    %c0_236 = arith.constant 0 : index
    %c12_237 = arith.constant 12 : index
    %196 = vector.load %arg2[%c0_234, %c1_235, %c0_236, %c12_237] : memref<1x10x4x256xbf16, #tpu.memory_space<vmem>>, vector<1x1x4x128xbf16>
    %197 = vector.shape_cast %196 : vector<1x1x4x128xbf16> to vector<4x128xbf16>
    %c5_238 = arith.constant 5 : index
    %c0_239 = arith.constant 0 : index
    %c0_240 = arith.constant 0 : index
    %198 = vector.load %arg3[%c5_238, %c0_239, %c0_240] : memref<27x8x4xbf16, #tpu.memory_space<vmem>>, vector<1x8x4xbf16>
    %199 = vector.shape_cast %198 : vector<1x8x4xbf16> to vector<8x4xbf16>
    %cst_241 = arith.constant dense<0.000000e+00> : vector<8x128xf32>
    %200 = tpu.matmul %199, %197, %cst_241 {dimension_numbers = #tpu.dot_dimension_numbers<[1], [0], [0], [1], [0, 0, 1, 1], [], []>} : vector<8x4xbf16>, vector<4x128xbf16>, vector<8x128xf32> -> vector<8x128xf32>
    %201 = arith.addf %195, %200 : vector<8x128xf32>
    %c0_242 = arith.constant 0 : index
    %c1_243 = arith.constant 1 : index
    %c0_244 = arith.constant 0 : index
    %c20_245 = arith.constant 20 : index
    %202 = vector.load %arg2[%c0_242, %c1_243, %c0_244, %c20_245] : memref<1x10x4x256xbf16, #tpu.memory_space<vmem>>, vector<1x1x4x128xbf16>
    %203 = vector.shape_cast %202 : vector<1x1x4x128xbf16> to vector<4x128xbf16>
    %c6_246 = arith.constant 6 : index
    %c0_247 = arith.constant 0 : index
    %c0_248 = arith.constant 0 : index
    %204 = vector.load %arg3[%c6_246, %c0_247, %c0_248] : memref<27x8x4xbf16, #tpu.memory_space<vmem>>, vector<1x8x4xbf16>
    %205 = vector.shape_cast %204 : vector<1x8x4xbf16> to vector<8x4xbf16>
    %cst_249 = arith.constant dense<0.000000e+00> : vector<8x128xf32>
    %206 = tpu.matmul %205, %203, %cst_249 {dimension_numbers = #tpu.dot_dimension_numbers<[1], [0], [0], [1], [0, 0, 1, 1], [], []>} : vector<8x4xbf16>, vector<4x128xbf16>, vector<8x128xf32> -> vector<8x128xf32>
    %207 = arith.addf %201, %206 : vector<8x128xf32>
    %c0_250 = arith.constant 0 : index
    %c1_251 = arith.constant 1 : index
    %c0_252 = arith.constant 0 : index
    %c21_253 = arith.constant 21 : index
    %208 = vector.load %arg2[%c0_250, %c1_251, %c0_252, %c21_253] : memref<1x10x4x256xbf16, #tpu.memory_space<vmem>>, vector<1x1x4x128xbf16>
    %209 = vector.shape_cast %208 : vector<1x1x4x128xbf16> to vector<4x128xbf16>
    %c7_254 = arith.constant 7 : index
    %c0_255 = arith.constant 0 : index
    %c0_256 = arith.constant 0 : index
    %210 = vector.load %arg3[%c7_254, %c0_255, %c0_256] : memref<27x8x4xbf16, #tpu.memory_space<vmem>>, vector<1x8x4xbf16>
    %211 = vector.shape_cast %210 : vector<1x8x4xbf16> to vector<8x4xbf16>
    %cst_257 = arith.constant dense<0.000000e+00> : vector<8x128xf32>
    %212 = tpu.matmul %211, %209, %cst_257 {dimension_numbers = #tpu.dot_dimension_numbers<[1], [0], [0], [1], [0, 0, 1, 1], [], []>} : vector<8x4xbf16>, vector<4x128xbf16>, vector<8x128xf32> -> vector<8x128xf32>
    %213 = arith.addf %207, %212 : vector<8x128xf32>
    %c0_258 = arith.constant 0 : index
    %c1_259 = arith.constant 1 : index
    %c0_260 = arith.constant 0 : index
    %c22_261 = arith.constant 22 : index
    %214 = vector.load %arg2[%c0_258, %c1_259, %c0_260, %c22_261] : memref<1x10x4x256xbf16, #tpu.memory_space<vmem>>, vector<1x1x4x128xbf16>
    %215 = vector.shape_cast %214 : vector<1x1x4x128xbf16> to vector<4x128xbf16>
    %c8_262 = arith.constant 8 : index
    %c0_263 = arith.constant 0 : index
    %c0_264 = arith.constant 0 : index
    %216 = vector.load %arg3[%c8_262, %c0_263, %c0_264] : memref<27x8x4xbf16, #tpu.memory_space<vmem>>, vector<1x8x4xbf16>
    %217 = vector.shape_cast %216 : vector<1x8x4xbf16> to vector<8x4xbf16>
    %cst_265 = arith.constant dense<0.000000e+00> : vector<8x128xf32>
    %218 = tpu.matmul %217, %215, %cst_265 {dimension_numbers = #tpu.dot_dimension_numbers<[1], [0], [0], [1], [0, 0, 1, 1], [], []>} : vector<8x4xbf16>, vector<4x128xbf16>, vector<8x128xf32> -> vector<8x128xf32>
    %219 = arith.addf %213, %218 : vector<8x128xf32>
    %c0_266 = arith.constant 0 : index
    %c2_267 = arith.constant 2 : index
    %c0_268 = arith.constant 0 : index
    %c0_269 = arith.constant 0 : index
    %220 = vector.load %arg2[%c0_266, %c2_267, %c0_268, %c0_269] : memref<1x10x4x256xbf16, #tpu.memory_space<vmem>>, vector<1x1x4x128xbf16>
    %221 = vector.shape_cast %220 : vector<1x1x4x128xbf16> to vector<4x128xbf16>
    %c9_270 = arith.constant 9 : index
    %c0_271 = arith.constant 0 : index
    %c0_272 = arith.constant 0 : index
    %222 = vector.load %arg3[%c9_270, %c0_271, %c0_272] : memref<27x8x4xbf16, #tpu.memory_space<vmem>>, vector<1x8x4xbf16>
    %223 = vector.shape_cast %222 : vector<1x8x4xbf16> to vector<8x4xbf16>
    %cst_273 = arith.constant dense<0.000000e+00> : vector<8x128xf32>
    %224 = tpu.matmul %223, %221, %cst_273 {dimension_numbers = #tpu.dot_dimension_numbers<[1], [0], [0], [1], [0, 0, 1, 1], [], []>} : vector<8x4xbf16>, vector<4x128xbf16>, vector<8x128xf32> -> vector<8x128xf32>
    %225 = arith.addf %219, %224 : vector<8x128xf32>
    %c0_274 = arith.constant 0 : index
    %c2_275 = arith.constant 2 : index
    %c0_276 = arith.constant 0 : index
    %c1_277 = arith.constant 1 : index
    %226 = vector.load %arg2[%c0_274, %c2_275, %c0_276, %c1_277] : memref<1x10x4x256xbf16, #tpu.memory_space<vmem>>, vector<1x1x4x128xbf16>
    %227 = vector.shape_cast %226 : vector<1x1x4x128xbf16> to vector<4x128xbf16>
    %c10_278 = arith.constant 10 : index
    %c0_279 = arith.constant 0 : index
    %c0_280 = arith.constant 0 : index
    %228 = vector.load %arg3[%c10_278, %c0_279, %c0_280] : memref<27x8x4xbf16, #tpu.memory_space<vmem>>, vector<1x8x4xbf16>
    %229 = vector.shape_cast %228 : vector<1x8x4xbf16> to vector<8x4xbf16>
    %cst_281 = arith.constant dense<0.000000e+00> : vector<8x128xf32>
    %230 = tpu.matmul %229, %227, %cst_281 {dimension_numbers = #tpu.dot_dimension_numbers<[1], [0], [0], [1], [0, 0, 1, 1], [], []>} : vector<8x4xbf16>, vector<4x128xbf16>, vector<8x128xf32> -> vector<8x128xf32>
    %231 = arith.addf %225, %230 : vector<8x128xf32>
    %c0_282 = arith.constant 0 : index
    %c2_283 = arith.constant 2 : index
    %c0_284 = arith.constant 0 : index
    %c2_285 = arith.constant 2 : index
    %232 = vector.load %arg2[%c0_282, %c2_283, %c0_284, %c2_285] : memref<1x10x4x256xbf16, #tpu.memory_space<vmem>>, vector<1x1x4x128xbf16>
    %233 = vector.shape_cast %232 : vector<1x1x4x128xbf16> to vector<4x128xbf16>
    %c11_286 = arith.constant 11 : index
    %c0_287 = arith.constant 0 : index
    %c0_288 = arith.constant 0 : index
    %234 = vector.load %arg3[%c11_286, %c0_287, %c0_288] : memref<27x8x4xbf16, #tpu.memory_space<vmem>>, vector<1x8x4xbf16>
    %235 = vector.shape_cast %234 : vector<1x8x4xbf16> to vector<8x4xbf16>
    %cst_289 = arith.constant dense<0.000000e+00> : vector<8x128xf32>
    %236 = tpu.matmul %235, %233, %cst_289 {dimension_numbers = #tpu.dot_dimension_numbers<[1], [0], [0], [1], [0, 0, 1, 1], [], []>} : vector<8x4xbf16>, vector<4x128xbf16>, vector<8x128xf32> -> vector<8x128xf32>
    %237 = arith.addf %231, %236 : vector<8x128xf32>
    %c0_290 = arith.constant 0 : index
    %c2_291 = arith.constant 2 : index
    %c0_292 = arith.constant 0 : index
    %c10_293 = arith.constant 10 : index
    %238 = vector.load %arg2[%c0_290, %c2_291, %c0_292, %c10_293] : memref<1x10x4x256xbf16, #tpu.memory_space<vmem>>, vector<1x1x4x128xbf16>
    %239 = vector.shape_cast %238 : vector<1x1x4x128xbf16> to vector<4x128xbf16>
    %c12_294 = arith.constant 12 : index
    %c0_295 = arith.constant 0 : index
    %c0_296 = arith.constant 0 : index
    %240 = vector.load %arg3[%c12_294, %c0_295, %c0_296] : memref<27x8x4xbf16, #tpu.memory_space<vmem>>, vector<1x8x4xbf16>
    %241 = vector.shape_cast %240 : vector<1x8x4xbf16> to vector<8x4xbf16>
    %cst_297 = arith.constant dense<0.000000e+00> : vector<8x128xf32>
    %242 = tpu.matmul %241, %239, %cst_297 {dimension_numbers = #tpu.dot_dimension_numbers<[1], [0], [0], [1], [0, 0, 1, 1], [], []>} : vector<8x4xbf16>, vector<4x128xbf16>, vector<8x128xf32> -> vector<8x128xf32>
    %243 = arith.addf %237, %242 : vector<8x128xf32>
    %c0_298 = arith.constant 0 : index
    %c2_299 = arith.constant 2 : index
    %c0_300 = arith.constant 0 : index
    %c11_301 = arith.constant 11 : index
    %244 = vector.load %arg2[%c0_298, %c2_299, %c0_300, %c11_301] : memref<1x10x4x256xbf16, #tpu.memory_space<vmem>>, vector<1x1x4x128xbf16>
    %245 = vector.shape_cast %244 : vector<1x1x4x128xbf16> to vector<4x128xbf16>
    %c13_302 = arith.constant 13 : index
    %c0_303 = arith.constant 0 : index
    %c0_304 = arith.constant 0 : index
    %246 = vector.load %arg3[%c13_302, %c0_303, %c0_304] : memref<27x8x4xbf16, #tpu.memory_space<vmem>>, vector<1x8x4xbf16>
    %247 = vector.shape_cast %246 : vector<1x8x4xbf16> to vector<8x4xbf16>
    %cst_305 = arith.constant dense<0.000000e+00> : vector<8x128xf32>
    %248 = tpu.matmul %247, %245, %cst_305 {dimension_numbers = #tpu.dot_dimension_numbers<[1], [0], [0], [1], [0, 0, 1, 1], [], []>} : vector<8x4xbf16>, vector<4x128xbf16>, vector<8x128xf32> -> vector<8x128xf32>
    %249 = arith.addf %243, %248 : vector<8x128xf32>
    %c0_306 = arith.constant 0 : index
    %c2_307 = arith.constant 2 : index
    %c0_308 = arith.constant 0 : index
    %c12_309 = arith.constant 12 : index
    %250 = vector.load %arg2[%c0_306, %c2_307, %c0_308, %c12_309] : memref<1x10x4x256xbf16, #tpu.memory_space<vmem>>, vector<1x1x4x128xbf16>
    %251 = vector.shape_cast %250 : vector<1x1x4x128xbf16> to vector<4x128xbf16>
    %c14_310 = arith.constant 14 : index
    %c0_311 = arith.constant 0 : index
    %c0_312 = arith.constant 0 : index
    %252 = vector.load %arg3[%c14_310, %c0_311, %c0_312] : memref<27x8x4xbf16, #tpu.memory_space<vmem>>, vector<1x8x4xbf16>
    %253 = vector.shape_cast %252 : vector<1x8x4xbf16> to vector<8x4xbf16>
    %cst_313 = arith.constant dense<0.000000e+00> : vector<8x128xf32>
    %254 = tpu.matmul %253, %251, %cst_313 {dimension_numbers = #tpu.dot_dimension_numbers<[1], [0], [0], [1], [0, 0, 1, 1], [], []>} : vector<8x4xbf16>, vector<4x128xbf16>, vector<8x128xf32> -> vector<8x128xf32>
    %255 = arith.addf %249, %254 : vector<8x128xf32>
    %c0_314 = arith.constant 0 : index
    %c2_315 = arith.constant 2 : index
    %c0_316 = arith.constant 0 : index
    %c20_317 = arith.constant 20 : index
    %256 = vector.load %arg2[%c0_314, %c2_315, %c0_316, %c20_317] : memref<1x10x4x256xbf16, #tpu.memory_space<vmem>>, vector<1x1x4x128xbf16>
    %257 = vector.shape_cast %256 : vector<1x1x4x128xbf16> to vector<4x128xbf16>
    %c15_318 = arith.constant 15 : index
    %c0_319 = arith.constant 0 : index
    %c0_320 = arith.constant 0 : index
    %258 = vector.load %arg3[%c15_318, %c0_319, %c0_320] : memref<27x8x4xbf16, #tpu.memory_space<vmem>>, vector<1x8x4xbf16>
    %259 = vector.shape_cast %258 : vector<1x8x4xbf16> to vector<8x4xbf16>
    %cst_321 = arith.constant dense<0.000000e+00> : vector<8x128xf32>
    %260 = tpu.matmul %259, %257, %cst_321 {dimension_numbers = #tpu.dot_dimension_numbers<[1], [0], [0], [1], [0, 0, 1, 1], [], []>} : vector<8x4xbf16>, vector<4x128xbf16>, vector<8x128xf32> -> vector<8x128xf32>
    %261 = arith.addf %255, %260 : vector<8x128xf32>
    %c0_322 = arith.constant 0 : index
    %c2_323 = arith.constant 2 : index
    %c0_324 = arith.constant 0 : index
    %c21_325 = arith.constant 21 : index
    %262 = vector.load %arg2[%c0_322, %c2_323, %c0_324, %c21_325] : memref<1x10x4x256xbf16, #tpu.memory_space<vmem>>, vector<1x1x4x128xbf16>
    %263 = vector.shape_cast %262 : vector<1x1x4x128xbf16> to vector<4x128xbf16>
    %c16_326 = arith.constant 16 : index
    %c0_327 = arith.constant 0 : index
    %c0_328 = arith.constant 0 : index
    %264 = vector.load %arg3[%c16_326, %c0_327, %c0_328] : memref<27x8x4xbf16, #tpu.memory_space<vmem>>, vector<1x8x4xbf16>
    %265 = vector.shape_cast %264 : vector<1x8x4xbf16> to vector<8x4xbf16>
    %cst_329 = arith.constant dense<0.000000e+00> : vector<8x128xf32>
    %266 = tpu.matmul %265, %263, %cst_329 {dimension_numbers = #tpu.dot_dimension_numbers<[1], [0], [0], [1], [0, 0, 1, 1], [], []>} : vector<8x4xbf16>, vector<4x128xbf16>, vector<8x128xf32> -> vector<8x128xf32>
    %267 = arith.addf %261, %266 : vector<8x128xf32>
    %c0_330 = arith.constant 0 : index
    %c2_331 = arith.constant 2 : index
    %c0_332 = arith.constant 0 : index
    %c22_333 = arith.constant 22 : index
    %268 = vector.load %arg2[%c0_330, %c2_331, %c0_332, %c22_333] : memref<1x10x4x256xbf16, #tpu.memory_space<vmem>>, vector<1x1x4x128xbf16>
    %269 = vector.shape_cast %268 : vector<1x1x4x128xbf16> to vector<4x128xbf16>
    %c17_334 = arith.constant 17 : index
    %c0_335 = arith.constant 0 : index
    %c0_336 = arith.constant 0 : index
    %270 = vector.load %arg3[%c17_334, %c0_335, %c0_336] : memref<27x8x4xbf16, #tpu.memory_space<vmem>>, vector<1x8x4xbf16>
    %271 = vector.shape_cast %270 : vector<1x8x4xbf16> to vector<8x4xbf16>
    %cst_337 = arith.constant dense<0.000000e+00> : vector<8x128xf32>
    %272 = tpu.matmul %271, %269, %cst_337 {dimension_numbers = #tpu.dot_dimension_numbers<[1], [0], [0], [1], [0, 0, 1, 1], [], []>} : vector<8x4xbf16>, vector<4x128xbf16>, vector<8x128xf32> -> vector<8x128xf32>
    %273 = arith.addf %267, %272 : vector<8x128xf32>
    %c0_338 = arith.constant 0 : index
    %c3_339 = arith.constant 3 : index
    %c0_340 = arith.constant 0 : index
    %c0_341 = arith.constant 0 : index
    %274 = vector.load %arg2[%c0_338, %c3_339, %c0_340, %c0_341] : memref<1x10x4x256xbf16, #tpu.memory_space<vmem>>, vector<1x1x4x128xbf16>
    %275 = vector.shape_cast %274 : vector<1x1x4x128xbf16> to vector<4x128xbf16>
    %c18_342 = arith.constant 18 : index
    %c0_343 = arith.constant 0 : index
    %c0_344 = arith.constant 0 : index
    %276 = vector.load %arg3[%c18_342, %c0_343, %c0_344] : memref<27x8x4xbf16, #tpu.memory_space<vmem>>, vector<1x8x4xbf16>
    %277 = vector.shape_cast %276 : vector<1x8x4xbf16> to vector<8x4xbf16>
    %cst_345 = arith.constant dense<0.000000e+00> : vector<8x128xf32>
    %278 = tpu.matmul %277, %275, %cst_345 {dimension_numbers = #tpu.dot_dimension_numbers<[1], [0], [0], [1], [0, 0, 1, 1], [], []>} : vector<8x4xbf16>, vector<4x128xbf16>, vector<8x128xf32> -> vector<8x128xf32>
    %279 = arith.addf %273, %278 : vector<8x128xf32>
    %c0_346 = arith.constant 0 : index
    %c3_347 = arith.constant 3 : index
    %c0_348 = arith.constant 0 : index
    %c1_349 = arith.constant 1 : index
    %280 = vector.load %arg2[%c0_346, %c3_347, %c0_348, %c1_349] : memref<1x10x4x256xbf16, #tpu.memory_space<vmem>>, vector<1x1x4x128xbf16>
    %281 = vector.shape_cast %280 : vector<1x1x4x128xbf16> to vector<4x128xbf16>
    %c19_350 = arith.constant 19 : index
    %c0_351 = arith.constant 0 : index
    %c0_352 = arith.constant 0 : index
    %282 = vector.load %arg3[%c19_350, %c0_351, %c0_352] : memref<27x8x4xbf16, #tpu.memory_space<vmem>>, vector<1x8x4xbf16>
    %283 = vector.shape_cast %282 : vector<1x8x4xbf16> to vector<8x4xbf16>
    %cst_353 = arith.constant dense<0.000000e+00> : vector<8x128xf32>
    %284 = tpu.matmul %283, %281, %cst_353 {dimension_numbers = #tpu.dot_dimension_numbers<[1], [0], [0], [1], [0, 0, 1, 1], [], []>} : vector<8x4xbf16>, vector<4x128xbf16>, vector<8x128xf32> -> vector<8x128xf32>
    %285 = arith.addf %279, %284 : vector<8x128xf32>
    %c0_354 = arith.constant 0 : index
    %c3_355 = arith.constant 3 : index
    %c0_356 = arith.constant 0 : index
    %c2_357 = arith.constant 2 : index
    %286 = vector.load %arg2[%c0_354, %c3_355, %c0_356, %c2_357] : memref<1x10x4x256xbf16, #tpu.memory_space<vmem>>, vector<1x1x4x128xbf16>
    %287 = vector.shape_cast %286 : vector<1x1x4x128xbf16> to vector<4x128xbf16>
    %c20_358 = arith.constant 20 : index
    %c0_359 = arith.constant 0 : index
    %c0_360 = arith.constant 0 : index
    %288 = vector.load %arg3[%c20_358, %c0_359, %c0_360] : memref<27x8x4xbf16, #tpu.memory_space<vmem>>, vector<1x8x4xbf16>
    %289 = vector.shape_cast %288 : vector<1x8x4xbf16> to vector<8x4xbf16>
    %cst_361 = arith.constant dense<0.000000e+00> : vector<8x128xf32>
    %290 = tpu.matmul %289, %287, %cst_361 {dimension_numbers = #tpu.dot_dimension_numbers<[1], [0], [0], [1], [0, 0, 1, 1], [], []>} : vector<8x4xbf16>, vector<4x128xbf16>, vector<8x128xf32> -> vector<8x128xf32>
    %291 = arith.addf %285, %290 : vector<8x128xf32>
    %c0_362 = arith.constant 0 : index
    %c3_363 = arith.constant 3 : index
    %c0_364 = arith.constant 0 : index
    %c10_365 = arith.constant 10 : index
    %292 = vector.load %arg2[%c0_362, %c3_363, %c0_364, %c10_365] : memref<1x10x4x256xbf16, #tpu.memory_space<vmem>>, vector<1x1x4x128xbf16>
    %293 = vector.shape_cast %292 : vector<1x1x4x128xbf16> to vector<4x128xbf16>
    %c21_366 = arith.constant 21 : index
    %c0_367 = arith.constant 0 : index
    %c0_368 = arith.constant 0 : index
    %294 = vector.load %arg3[%c21_366, %c0_367, %c0_368] : memref<27x8x4xbf16, #tpu.memory_space<vmem>>, vector<1x8x4xbf16>
    %295 = vector.shape_cast %294 : vector<1x8x4xbf16> to vector<8x4xbf16>
    %cst_369 = arith.constant dense<0.000000e+00> : vector<8x128xf32>
    %296 = tpu.matmul %295, %293, %cst_369 {dimension_numbers = #tpu.dot_dimension_numbers<[1], [0], [0], [1], [0, 0, 1, 1], [], []>} : vector<8x4xbf16>, vector<4x128xbf16>, vector<8x128xf32> -> vector<8x128xf32>
    %297 = arith.addf %291, %296 : vector<8x128xf32>
    %c0_370 = arith.constant 0 : index
    %c3_371 = arith.constant 3 : index
    %c0_372 = arith.constant 0 : index
    %c11_373 = arith.constant 11 : index
    %298 = vector.load %arg2[%c0_370, %c3_371, %c0_372, %c11_373] : memref<1x10x4x256xbf16, #tpu.memory_space<vmem>>, vector<1x1x4x128xbf16>
    %299 = vector.shape_cast %298 : vector<1x1x4x128xbf16> to vector<4x128xbf16>
    %c22_374 = arith.constant 22 : index
    %c0_375 = arith.constant 0 : index
    %c0_376 = arith.constant 0 : index
    %300 = vector.load %arg3[%c22_374, %c0_375, %c0_376] : memref<27x8x4xbf16, #tpu.memory_space<vmem>>, vector<1x8x4xbf16>
    %301 = vector.shape_cast %300 : vector<1x8x4xbf16> to vector<8x4xbf16>
    %cst_377 = arith.constant dense<0.000000e+00> : vector<8x128xf32>
    %302 = tpu.matmul %301, %299, %cst_377 {dimension_numbers = #tpu.dot_dimension_numbers<[1], [0], [0], [1], [0, 0, 1, 1], [], []>} : vector<8x4xbf16>, vector<4x128xbf16>, vector<8x128xf32> -> vector<8x128xf32>
    %303 = arith.addf %297, %302 : vector<8x128xf32>
    %c0_378 = arith.constant 0 : index
    %c3_379 = arith.constant 3 : index
    %c0_380 = arith.constant 0 : index
    %c12_381 = arith.constant 12 : index
    %304 = vector.load %arg2[%c0_378, %c3_379, %c0_380, %c12_381] : memref<1x10x4x256xbf16, #tpu.memory_space<vmem>>, vector<1x1x4x128xbf16>
    %305 = vector.shape_cast %304 : vector<1x1x4x128xbf16> to vector<4x128xbf16>
    %c23_382 = arith.constant 23 : index
    %c0_383 = arith.constant 0 : index
    %c0_384 = arith.constant 0 : index
    %306 = vector.load %arg3[%c23_382, %c0_383, %c0_384] : memref<27x8x4xbf16, #tpu.memory_space<vmem>>, vector<1x8x4xbf16>
    %307 = vector.shape_cast %306 : vector<1x8x4xbf16> to vector<8x4xbf16>
    %cst_385 = arith.constant dense<0.000000e+00> : vector<8x128xf32>
    %308 = tpu.matmul %307, %305, %cst_385 {dimension_numbers = #tpu.dot_dimension_numbers<[1], [0], [0], [1], [0, 0, 1, 1], [], []>} : vector<8x4xbf16>, vector<4x128xbf16>, vector<8x128xf32> -> vector<8x128xf32>
    %309 = arith.addf %303, %308 : vector<8x128xf32>
    %c0_386 = arith.constant 0 : index
    %c3_387 = arith.constant 3 : index
    %c0_388 = arith.constant 0 : index
    %c20_389 = arith.constant 20 : index
    %310 = vector.load %arg2[%c0_386, %c3_387, %c0_388, %c20_389] : memref<1x10x4x256xbf16, #tpu.memory_space<vmem>>, vector<1x1x4x128xbf16>
    %311 = vector.shape_cast %310 : vector<1x1x4x128xbf16> to vector<4x128xbf16>
    %c24_390 = arith.constant 24 : index
    %c0_391 = arith.constant 0 : index
    %c0_392 = arith.constant 0 : index
    %312 = vector.load %arg3[%c24_390, %c0_391, %c0_392] : memref<27x8x4xbf16, #tpu.memory_space<vmem>>, vector<1x8x4xbf16>
    %313 = vector.shape_cast %312 : vector<1x8x4xbf16> to vector<8x4xbf16>
    %cst_393 = arith.constant dense<0.000000e+00> : vector<8x128xf32>
    %314 = tpu.matmul %313, %311, %cst_393 {dimension_numbers = #tpu.dot_dimension_numbers<[1], [0], [0], [1], [0, 0, 1, 1], [], []>} : vector<8x4xbf16>, vector<4x128xbf16>, vector<8x128xf32> -> vector<8x128xf32>
    %315 = arith.addf %309, %314 : vector<8x128xf32>
    %c0_394 = arith.constant 0 : index
    %c3_395 = arith.constant 3 : index
    %c0_396 = arith.constant 0 : index
    %c21_397 = arith.constant 21 : index
    %316 = vector.load %arg2[%c0_394, %c3_395, %c0_396, %c21_397] : memref<1x10x4x256xbf16, #tpu.memory_space<vmem>>, vector<1x1x4x128xbf16>
    %317 = vector.shape_cast %316 : vector<1x1x4x128xbf16> to vector<4x128xbf16>
    %c25_398 = arith.constant 25 : index
    %c0_399 = arith.constant 0 : index
    %c0_400 = arith.constant 0 : index
    %318 = vector.load %arg3[%c25_398, %c0_399, %c0_400] : memref<27x8x4xbf16, #tpu.memory_space<vmem>>, vector<1x8x4xbf16>
    %319 = vector.shape_cast %318 : vector<1x8x4xbf16> to vector<8x4xbf16>
    %cst_401 = arith.constant dense<0.000000e+00> : vector<8x128xf32>
    %320 = tpu.matmul %319, %317, %cst_401 {dimension_numbers = #tpu.dot_dimension_numbers<[1], [0], [0], [1], [0, 0, 1, 1], [], []>} : vector<8x4xbf16>, vector<4x128xbf16>, vector<8x128xf32> -> vector<8x128xf32>
    %321 = arith.addf %315, %320 : vector<8x128xf32>
    %c0_402 = arith.constant 0 : index
    %c3_403 = arith.constant 3 : index
    %c0_404 = arith.constant 0 : index
    %c22_405 = arith.constant 22 : index
    %322 = vector.load %arg2[%c0_402, %c3_403, %c0_404, %c22_405] : memref<1x10x4x256xbf16, #tpu.memory_space<vmem>>, vector<1x1x4x128xbf16>
    %323 = vector.shape_cast %322 : vector<1x1x4x128xbf16> to vector<4x128xbf16>
    %c26_406 = arith.constant 26 : index
    %c0_407 = arith.constant 0 : index
    %c0_408 = arith.constant 0 : index
    %324 = vector.load %arg3[%c26_406, %c0_407, %c0_408] : memref<27x8x4xbf16, #tpu.memory_space<vmem>>, vector<1x8x4xbf16>
    %325 = vector.shape_cast %324 : vector<1x8x4xbf16> to vector<8x4xbf16>
    %cst_409 = arith.constant dense<0.000000e+00> : vector<8x128xf32>
    %326 = tpu.matmul %325, %323, %cst_409 {dimension_numbers = #tpu.dot_dimension_numbers<[1], [0], [0], [1], [0, 0, 1, 1], [], []>} : vector<8x4xbf16>, vector<4x128xbf16>, vector<8x128xf32> -> vector<8x128xf32>
    %327 = arith.addf %321, %326 : vector<8x128xf32>
    %328 = vector.broadcast %0 : vector<8x1xf32> to vector<8x128xf32>
    %329 = arith.addf %327, %328 : vector<8x128xf32>
    %c0_410 = arith.constant 0 : index
    %c1_411 = arith.constant 1 : index
    %c0_412 = arith.constant 0 : index
    %c0_413 = arith.constant 0 : index
    %330 = vector.load %arg5[%c0_410, %c1_411, %c0_412, %c0_413] : memref<1x8x8x128xf32, #tpu.memory_space<vmem>>, vector<1x1x8x128xf32>
    %331 = vector.shape_cast %330 : vector<1x1x8x128xf32> to vector<8x128xf32>
    %332 = vector.shape_cast %329 : vector<8x128xf32> to vector<1x1x8x128xf32>
    tpu.vector_store %arg5[%c0_410, %c1_411, %c0_412, %c0_413], %332 {strides = array<i32>} : memref<1x8x8x128xf32, #tpu.memory_space<vmem>>, vector<1x1x8x128xf32>,
    %c0_414 = arith.constant 0 : index
    %c2_415 = arith.constant 2 : index
    %c0_416 = arith.constant 0 : index
    %c0_417 = arith.constant 0 : index
    %333 = vector.load %arg2[%c0_414, %c2_415, %c0_416, %c0_417] : memref<1x10x4x256xbf16, #tpu.memory_space<vmem>>, vector<1x1x4x128xbf16>
    %334 = vector.shape_cast %333 : vector<1x1x4x128xbf16> to vector<4x128xbf16>
    %c0_418 = arith.constant 0 : index
    %c0_419 = arith.constant 0 : index
    %c0_420 = arith.constant 0 : index
    %335 = vector.load %arg3[%c0_418, %c0_419, %c0_420] : memref<27x8x4xbf16, #tpu.memory_space<vmem>>, vector<1x8x4xbf16>
    %336 = vector.shape_cast %335 : vector<1x8x4xbf16> to vector<8x4xbf16>
    %cst_421 = arith.constant dense<0.000000e+00> : vector<8x128xf32>
    %337 = tpu.matmul %336, %334, %cst_421 {dimension_numbers = #tpu.dot_dimension_numbers<[1], [0], [0], [1], [0, 0, 1, 1], [], []>} : vector<8x4xbf16>, vector<4x128xbf16>, vector<8x128xf32> -> vector<8x128xf32>
    %c0_422 = arith.constant 0 : index
    %c2_423 = arith.constant 2 : index
    %c0_424 = arith.constant 0 : index
    %c1_425 = arith.constant 1 : index
    %338 = vector.load %arg2[%c0_422, %c2_423, %c0_424, %c1_425] : memref<1x10x4x256xbf16, #tpu.memory_space<vmem>>, vector<1x1x4x128xbf16>
    %339 = vector.shape_cast %338 : vector<1x1x4x128xbf16> to vector<4x128xbf16>
    %c1_426 = arith.constant 1 : index
    %c0_427 = arith.constant 0 : index
    %c0_428 = arith.constant 0 : index
    %340 = vector.load %arg3[%c1_426, %c0_427, %c0_428] : memref<27x8x4xbf16, #tpu.memory_space<vmem>>, vector<1x8x4xbf16>
    %341 = vector.shape_cast %340 : vector<1x8x4xbf16> to vector<8x4xbf16>
    %cst_429 = arith.constant dense<0.000000e+00> : vector<8x128xf32>
    %342 = tpu.matmul %341, %339, %cst_429 {dimension_numbers = #tpu.dot_dimension_numbers<[1], [0], [0], [1], [0, 0, 1, 1], [], []>} : vector<8x4xbf16>, vector<4x128xbf16>, vector<8x128xf32> -> vector<8x128xf32>
    %343 = arith.addf %337, %342 : vector<8x128xf32>
    %c0_430 = arith.constant 0 : index
    %c2_431 = arith.constant 2 : index
    %c0_432 = arith.constant 0 : index
    %c2_433 = arith.constant 2 : index
    %344 = vector.load %arg2[%c0_430, %c2_431, %c0_432, %c2_433] : memref<1x10x4x256xbf16, #tpu.memory_space<vmem>>, vector<1x1x4x128xbf16>
    %345 = vector.shape_cast %344 : vector<1x1x4x128xbf16> to vector<4x128xbf16>
    %c2_434 = arith.constant 2 : index
    %c0_435 = arith.constant 0 : index
    %c0_436 = arith.constant 0 : index
    %346 = vector.load %arg3[%c2_434, %c0_435, %c0_436] : memref<27x8x4xbf16, #tpu.memory_space<vmem>>, vector<1x8x4xbf16>
    %347 = vector.shape_cast %346 : vector<1x8x4xbf16> to vector<8x4xbf16>
    %cst_437 = arith.constant dense<0.000000e+00> : vector<8x128xf32>
    %348 = tpu.matmul %347, %345, %cst_437 {dimension_numbers = #tpu.dot_dimension_numbers<[1], [0], [0], [1], [0, 0, 1, 1], [], []>} : vector<8x4xbf16>, vector<4x128xbf16>, vector<8x128xf32> -> vector<8x128xf32>
    %349 = arith.addf %343, %348 : vector<8x128xf32>
    %c0_438 = arith.constant 0 : index
    %c2_439 = arith.constant 2 : index
    %c0_440 = arith.constant 0 : index
    %c10_441 = arith.constant 10 : index
    %350 = vector.load %arg2[%c0_438, %c2_439, %c0_440, %c10_441] : memref<1x10x4x256xbf16, #tpu.memory_space<vmem>>, vector<1x1x4x128xbf16>
    %351 = vector.shape_cast %350 : vector<1x1x4x128xbf16> to vector<4x128xbf16>
    %c3_442 = arith.constant 3 : index
    %c0_443 = arith.constant 0 : index
    %c0_444 = arith.constant 0 : index
    %352 = vector.load %arg3[%c3_442, %c0_443, %c0_444] : memref<27x8x4xbf16, #tpu.memory_space<vmem>>, vector<1x8x4xbf16>
    %353 = vector.shape_cast %352 : vector<1x8x4xbf16> to vector<8x4xbf16>
    %cst_445 = arith.constant dense<0.000000e+00> : vector<8x128xf32>
    %354 = tpu.matmul %353, %351, %cst_445 {dimension_numbers = #tpu.dot_dimension_numbers<[1], [0], [0], [1], [0, 0, 1, 1], [], []>} : vector<8x4xbf16>, vector<4x128xbf16>, vector<8x128xf32> -> vector<8x128xf32>
    %355 = arith.addf %349, %354 : vector<8x128xf32>
    %c0_446 = arith.constant 0 : index
    %c2_447 = arith.constant 2 : index
    %c0_448 = arith.constant 0 : index
    %c11_449 = arith.constant 11 : index
    %356 = vector.load %arg2[%c0_446, %c2_447, %c0_448, %c11_449] : memref<1x10x4x256xbf16, #tpu.memory_space<vmem>>, vector<1x1x4x128xbf16>
    %357 = vector.shape_cast %356 : vector<1x1x4x128xbf16> to vector<4x128xbf16>
    %c4_450 = arith.constant 4 : index
    %c0_451 = arith.constant 0 : index
    %c0_452 = arith.constant 0 : index
    %358 = vector.load %arg3[%c4_450, %c0_451, %c0_452] : memref<27x8x4xbf16, #tpu.memory_space<vmem>>, vector<1x8x4xbf16>
    %359 = vector.shape_cast %358 : vector<1x8x4xbf16> to vector<8x4xbf16>
    %cst_453 = arith.constant dense<0.000000e+00> : vector<8x128xf32>
    %360 = tpu.matmul %359, %357, %cst_453 {dimension_numbers = #tpu.dot_dimension_numbers<[1], [0], [0], [1], [0, 0, 1, 1], [], []>} : vector<8x4xbf16>, vector<4x128xbf16>, vector<8x128xf32> -> vector<8x128xf32>
    %361 = arith.addf %355, %360 : vector<8x128xf32>
    %c0_454 = arith.constant 0 : index
    %c2_455 = arith.constant 2 : index
    %c0_456 = arith.constant 0 : index
    %c12_457 = arith.constant 12 : index
    %362 = vector.load %arg2[%c0_454, %c2_455, %c0_456, %c12_457] : memref<1x10x4x256xbf16, #tpu.memory_space<vmem>>, vector<1x1x4x128xbf16>
    %363 = vector.shape_cast %362 : vector<1x1x4x128xbf16> to vector<4x128xbf16>
    %c5_458 = arith.constant 5 : index
    %c0_459 = arith.constant 0 : index
    %c0_460 = arith.constant 0 : index
    %364 = vector.load %arg3[%c5_458, %c0_459, %c0_460] : memref<27x8x4xbf16, #tpu.memory_space<vmem>>, vector<1x8x4xbf16>
    %365 = vector.shape_cast %364 : vector<1x8x4xbf16> to vector<8x4xbf16>
    %cst_461 = arith.constant dense<0.000000e+00> : vector<8x128xf32>
    %366 = tpu.matmul %365, %363, %cst_461 {dimension_numbers = #tpu.dot_dimension_numbers<[1], [0], [0], [1], [0, 0, 1, 1], [], []>} : vector<8x4xbf16>, vector<4x128xbf16>, vector<8x128xf32> -> vector<8x128xf32>
    %367 = arith.addf %361, %366 : vector<8x128xf32>
    %c0_462 = arith.constant 0 : index
    %c2_463 = arith.constant 2 : index
    %c0_464 = arith.constant 0 : index
    %c20_465 = arith.constant 20 : index
    %368 = vector.load %arg2[%c0_462, %c2_463, %c0_464, %c20_465] : memref<1x10x4x256xbf16, #tpu.memory_space<vmem>>, vector<1x1x4x128xbf16>
    %369 = vector.shape_cast %368 : vector<1x1x4x128xbf16> to vector<4x128xbf16>
    %c6_466 = arith.constant 6 : index
    %c0_467 = arith.constant 0 : index
    %c0_468 = arith.constant 0 : index
    %370 = vector.load %arg3[%c6_466, %c0_467, %c0_468] : memref<27x8x4xbf16, #tpu.memory_space<vmem>>, vector<1x8x4xbf16>
    %371 = vector.shape_cast %370 : vector<1x8x4xbf16> to vector<8x4xbf16>
    %cst_469 = arith.constant dense<0.000000e+00> : vector<8x128xf32>
    %372 = tpu.matmul %371, %369, %cst_469 {dimension_numbers = #tpu.dot_dimension_numbers<[1], [0], [0], [1], [0, 0, 1, 1], [], []>} : vector<8x4xbf16>, vector<4x128xbf16>, vector<8x128xf32> -> vector<8x128xf32>
    %373 = arith.addf %367, %372 : vector<8x128xf32>
    %c0_470 = arith.constant 0 : index
    %c2_471 = arith.constant 2 : index
    %c0_472 = arith.constant 0 : index
    %c21_473 = arith.constant 21 : index
    %374 = vector.load %arg2[%c0_470, %c2_471, %c0_472, %c21_473] : memref<1x10x4x256xbf16, #tpu.memory_space<vmem>>, vector<1x1x4x128xbf16>
    %375 = vector.shape_cast %374 : vector<1x1x4x128xbf16> to vector<4x128xbf16>
    %c7_474 = arith.constant 7 : index
    %c0_475 = arith.constant 0 : index
    %c0_476 = arith.constant 0 : index
    %376 = vector.load %arg3[%c7_474, %c0_475, %c0_476] : memref<27x8x4xbf16, #tpu.memory_space<vmem>>, vector<1x8x4xbf16>
    %377 = vector.shape_cast %376 : vector<1x8x4xbf16> to vector<8x4xbf16>
    %cst_477 = arith.constant dense<0.000000e+00> : vector<8x128xf32>
    %378 = tpu.matmul %377, %375, %cst_477 {dimension_numbers = #tpu.dot_dimension_numbers<[1], [0], [0], [1], [0, 0, 1, 1], [], []>} : vector<8x4xbf16>, vector<4x128xbf16>, vector<8x128xf32> -> vector<8x128xf32>
    %379 = arith.addf %373, %378 : vector<8x128xf32>
    %c0_478 = arith.constant 0 : index
    %c2_479 = arith.constant 2 : index
    %c0_480 = arith.constant 0 : index
    %c22_481 = arith.constant 22 : index
    %380 = vector.load %arg2[%c0_478, %c2_479, %c0_480, %c22_481] : memref<1x10x4x256xbf16, #tpu.memory_space<vmem>>, vector<1x1x4x128xbf16>
    %381 = vector.shape_cast %380 : vector<1x1x4x128xbf16> to vector<4x128xbf16>
    %c8_482 = arith.constant 8 : index
    %c0_483 = arith.constant 0 : index
    %c0_484 = arith.constant 0 : index
    %382 = vector.load %arg3[%c8_482, %c0_483, %c0_484] : memref<27x8x4xbf16, #tpu.memory_space<vmem>>, vector<1x8x4xbf16>
    %383 = vector.shape_cast %382 : vector<1x8x4xbf16> to vector<8x4xbf16>
    %cst_485 = arith.constant dense<0.000000e+00> : vector<8x128xf32>
    %384 = tpu.matmul %383, %381, %cst_485 {dimension_numbers = #tpu.dot_dimension_numbers<[1], [0], [0], [1], [0, 0, 1, 1], [], []>} : vector<8x4xbf16>, vector<4x128xbf16>, vector<8x128xf32> -> vector<8x128xf32>
    %385 = arith.addf %379, %384 : vector<8x128xf32>
    %c0_486 = arith.constant 0 : index
    %c3_487 = arith.constant 3 : index
    %c0_488 = arith.constant 0 : index
    %c0_489 = arith.constant 0 : index
    %386 = vector.load %arg2[%c0_486, %c3_487, %c0_488, %c0_489] : memref<1x10x4x256xbf16, #tpu.memory_space<vmem>>, vector<1x1x4x128xbf16>
    %387 = vector.shape_cast %386 : vector<1x1x4x128xbf16> to vector<4x128xbf16>
    %c9_490 = arith.constant 9 : index
    %c0_491 = arith.constant 0 : index
    %c0_492 = arith.constant 0 : index
    %388 = vector.load %arg3[%c9_490, %c0_491, %c0_492] : memref<27x8x4xbf16, #tpu.memory_space<vmem>>, vector<1x8x4xbf16>
    %389 = vector.shape_cast %388 : vector<1x8x4xbf16> to vector<8x4xbf16>
    %cst_493 = arith.constant dense<0.000000e+00> : vector<8x128xf32>
    %390 = tpu.matmul %389, %387, %cst_493 {dimension_numbers = #tpu.dot_dimension_numbers<[1], [0], [0], [1], [0, 0, 1, 1], [], []>} : vector<8x4xbf16>, vector<4x128xbf16>, vector<8x128xf32> -> vector<8x128xf32>
    %391 = arith.addf %385, %390 : vector<8x128xf32>
    %c0_494 = arith.constant 0 : index
    %c3_495 = arith.constant 3 : index
    %c0_496 = arith.constant 0 : index
    %c1_497 = arith.constant 1 : index
    %392 = vector.load %arg2[%c0_494, %c3_495, %c0_496, %c1_497] : memref<1x10x4x256xbf16, #tpu.memory_space<vmem>>, vector<1x1x4x128xbf16>
    %393 = vector.shape_cast %392 : vector<1x1x4x128xbf16> to vector<4x128xbf16>
    %c10_498 = arith.constant 10 : index
    %c0_499 = arith.constant 0 : index
    %c0_500 = arith.constant 0 : index
    %394 = vector.load %arg3[%c10_498, %c0_499, %c0_500] : memref<27x8x4xbf16, #tpu.memory_space<vmem>>, vector<1x8x4xbf16>
    %395 = vector.shape_cast %394 : vector<1x8x4xbf16> to vector<8x4xbf16>
    %cst_501 = arith.constant dense<0.000000e+00> : vector<8x128xf32>
    %396 = tpu.matmul %395, %393, %cst_501 {dimension_numbers = #tpu.dot_dimension_numbers<[1], [0], [0], [1], [0, 0, 1, 1], [], []>} : vector<8x4xbf16>, vector<4x128xbf16>, vector<8x128xf32> -> vector<8x128xf32>
    %397 = arith.addf %391, %396 : vector<8x128xf32>
    %c0_502 = arith.constant 0 : index
    %c3_503 = arith.constant 3 : index
    %c0_504 = arith.constant 0 : index
    %c2_505 = arith.constant 2 : index
    %398 = vector.load %arg2[%c0_502, %c3_503, %c0_504, %c2_505] : memref<1x10x4x256xbf16, #tpu.memory_space<vmem>>, vector<1x1x4x128xbf16>
    %399 = vector.shape_cast %398 : vector<1x1x4x128xbf16> to vector<4x128xbf16>
    %c11_506 = arith.constant 11 : index
    %c0_507 = arith.constant 0 : index
    %c0_508 = arith.constant 0 : index
    %400 = vector.load %arg3[%c11_506, %c0_507, %c0_508] : memref<27x8x4xbf16, #tpu.memory_space<vmem>>, vector<1x8x4xbf16>
    %401 = vector.shape_cast %400 : vector<1x8x4xbf16> to vector<8x4xbf16>
    %cst_509 = arith.constant dense<0.000000e+00> : vector<8x128xf32>
    %402 = tpu.matmul %401, %399, %cst_509 {dimension_numbers = #tpu.dot_dimension_numbers<[1], [0], [0], [1], [0, 0, 1, 1], [], []>} : vector<8x4xbf16>, vector<4x128xbf16>, vector<8x128xf32> -> vector<8x128xf32>
    %403 = arith.addf %397, %402 : vector<8x128xf32>
    %c0_510 = arith.constant 0 : index
    %c3_511 = arith.constant 3 : index
    %c0_512 = arith.constant 0 : index
    %c10_513 = arith.constant 10 : index
    %404 = vector.load %arg2[%c0_510, %c3_511, %c0_512, %c10_513] : memref<1x10x4x256xbf16, #tpu.memory_space<vmem>>, vector<1x1x4x128xbf16>
    %405 = vector.shape_cast %404 : vector<1x1x4x128xbf16> to vector<4x128xbf16>
    %c12_514 = arith.constant 12 : index
    %c0_515 = arith.constant 0 : index
    %c0_516 = arith.constant 0 : index
    %406 = vector.load %arg3[%c12_514, %c0_515, %c0_516] : memref<27x8x4xbf16, #tpu.memory_space<vmem>>, vector<1x8x4xbf16>
    %407 = vector.shape_cast %406 : vector<1x8x4xbf16> to vector<8x4xbf16>
    %cst_517 = arith.constant dense<0.000000e+00> : vector<8x128xf32>
    %408 = tpu.matmul %407, %405, %cst_517 {dimension_numbers = #tpu.dot_dimension_numbers<[1], [0], [0], [1], [0, 0, 1, 1], [], []>} : vector<8x4xbf16>, vector<4x128xbf16>, vector<8x128xf32> -> vector<8x128xf32>
    %409 = arith.addf %403, %408 : vector<8x128xf32>
    %c0_518 = arith.constant 0 : index
    %c3_519 = arith.constant 3 : index
    %c0_520 = arith.constant 0 : index
    %c11_521 = arith.constant 11 : index
    %410 = vector.load %arg2[%c0_518, %c3_519, %c0_520, %c11_521] : memref<1x10x4x256xbf16, #tpu.memory_space<vmem>>, vector<1x1x4x128xbf16>
    %411 = vector.shape_cast %410 : vector<1x1x4x128xbf16> to vector<4x128xbf16>
    %c13_522 = arith.constant 13 : index
    %c0_523 = arith.constant 0 : index
    %c0_524 = arith.constant 0 : index
    %412 = vector.load %arg3[%c13_522, %c0_523, %c0_524] : memref<27x8x4xbf16, #tpu.memory_space<vmem>>, vector<1x8x4xbf16>
    %413 = vector.shape_cast %412 : vector<1x8x4xbf16> to vector<8x4xbf16>
    %cst_525 = arith.constant dense<0.000000e+00> : vector<8x128xf32>
    %414 = tpu.matmul %413, %411, %cst_525 {dimension_numbers = #tpu.dot_dimension_numbers<[1], [0], [0], [1], [0, 0, 1, 1], [], []>} : vector<8x4xbf16>, vector<4x128xbf16>, vector<8x128xf32> -> vector<8x128xf32>
    %415 = arith.addf %409, %414 : vector<8x128xf32>
    %c0_526 = arith.constant 0 : index
    %c3_527 = arith.constant 3 : index
    %c0_528 = arith.constant 0 : index
    %c12_529 = arith.constant 12 : index
    %416 = vector.load %arg2[%c0_526, %c3_527, %c0_528, %c12_529] : memref<1x10x4x256xbf16, #tpu.memory_space<vmem>>, vector<1x1x4x128xbf16>
    %417 = vector.shape_cast %416 : vector<1x1x4x128xbf16> to vector<4x128xbf16>
    %c14_530 = arith.constant 14 : index
    %c0_531 = arith.constant 0 : index
    %c0_532 = arith.constant 0 : index
    %418 = vector.load %arg3[%c14_530, %c0_531, %c0_532] : memref<27x8x4xbf16, #tpu.memory_space<vmem>>, vector<1x8x4xbf16>
    %419 = vector.shape_cast %418 : vector<1x8x4xbf16> to vector<8x4xbf16>
    %cst_533 = arith.constant dense<0.000000e+00> : vector<8x128xf32>
    %420 = tpu.matmul %419, %417, %cst_533 {dimension_numbers = #tpu.dot_dimension_numbers<[1], [0], [0], [1], [0, 0, 1, 1], [], []>} : vector<8x4xbf16>, vector<4x128xbf16>, vector<8x128xf32> -> vector<8x128xf32>
    %421 = arith.addf %415, %420 : vector<8x128xf32>
    %c0_534 = arith.constant 0 : index
    %c3_535 = arith.constant 3 : index
    %c0_536 = arith.constant 0 : index
    %c20_537 = arith.constant 20 : index
    %422 = vector.load %arg2[%c0_534, %c3_535, %c0_536, %c20_537] : memref<1x10x4x256xbf16, #tpu.memory_space<vmem>>, vector<1x1x4x128xbf16>
    %423 = vector.shape_cast %422 : vector<1x1x4x128xbf16> to vector<4x128xbf16>
    %c15_538 = arith.constant 15 : index
    %c0_539 = arith.constant 0 : index
    %c0_540 = arith.constant 0 : index
    %424 = vector.load %arg3[%c15_538, %c0_539, %c0_540] : memref<27x8x4xbf16, #tpu.memory_space<vmem>>, vector<1x8x4xbf16>
    %425 = vector.shape_cast %424 : vector<1x8x4xbf16> to vector<8x4xbf16>
    %cst_541 = arith.constant dense<0.000000e+00> : vector<8x128xf32>
    %426 = tpu.matmul %425, %423, %cst_541 {dimension_numbers = #tpu.dot_dimension_numbers<[1], [0], [0], [1], [0, 0, 1, 1], [], []>} : vector<8x4xbf16>, vector<4x128xbf16>, vector<8x128xf32> -> vector<8x128xf32>
    %427 = arith.addf %421, %426 : vector<8x128xf32>
    %c0_542 = arith.constant 0 : index
    %c3_543 = arith.constant 3 : index
    %c0_544 = arith.constant 0 : index
    %c21_545 = arith.constant 21 : index
    %428 = vector.load %arg2[%c0_542, %c3_543, %c0_544, %c21_545] : memref<1x10x4x256xbf16, #tpu.memory_space<vmem>>, vector<1x1x4x128xbf16>
    %429 = vector.shape_cast %428 : vector<1x1x4x128xbf16> to vector<4x128xbf16>
    %c16_546 = arith.constant 16 : index
    %c0_547 = arith.constant 0 : index
    %c0_548 = arith.constant 0 : index
    %430 = vector.load %arg3[%c16_546, %c0_547, %c0_548] : memref<27x8x4xbf16, #tpu.memory_space<vmem>>, vector<1x8x4xbf16>
    %431 = vector.shape_cast %430 : vector<1x8x4xbf16> to vector<8x4xbf16>
    %cst_549 = arith.constant dense<0.000000e+00> : vector<8x128xf32>
    %432 = tpu.matmul %431, %429, %cst_549 {dimension_numbers = #tpu.dot_dimension_numbers<[1], [0], [0], [1], [0, 0, 1, 1], [], []>} : vector<8x4xbf16>, vector<4x128xbf16>, vector<8x128xf32> -> vector<8x128xf32>
    %433 = arith.addf %427, %432 : vector<8x128xf32>
    %c0_550 = arith.constant 0 : index
    %c3_551 = arith.constant 3 : index
    %c0_552 = arith.constant 0 : index
    %c22_553 = arith.constant 22 : index
    %434 = vector.load %arg2[%c0_550, %c3_551, %c0_552, %c22_553] : memref<1x10x4x256xbf16, #tpu.memory_space<vmem>>, vector<1x1x4x128xbf16>
    %435 = vector.shape_cast %434 : vector<1x1x4x128xbf16> to vector<4x128xbf16>
    %c17_554 = arith.constant 17 : index
    %c0_555 = arith.constant 0 : index
    %c0_556 = arith.constant 0 : index
    %436 = vector.load %arg3[%c17_554, %c0_555, %c0_556] : memref<27x8x4xbf16, #tpu.memory_space<vmem>>, vector<1x8x4xbf16>
    %437 = vector.shape_cast %436 : vector<1x8x4xbf16> to vector<8x4xbf16>
    %cst_557 = arith.constant dense<0.000000e+00> : vector<8x128xf32>
    %438 = tpu.matmul %437, %435, %cst_557 {dimension_numbers = #tpu.dot_dimension_numbers<[1], [0], [0], [1], [0, 0, 1, 1], [], []>} : vector<8x4xbf16>, vector<4x128xbf16>, vector<8x128xf32> -> vector<8x128xf32>
    %439 = arith.addf %433, %438 : vector<8x128xf32>
    %c0_558 = arith.constant 0 : index
    %c4_559 = arith.constant 4 : index
    %c0_560 = arith.constant 0 : index
    %c0_561 = arith.constant 0 : index
    %440 = vector.load %arg2[%c0_558, %c4_559, %c0_560, %c0_561] : memref<1x10x4x256xbf16, #tpu.memory_space<vmem>>, vector<1x1x4x128xbf16>
    %441 = vector.shape_cast %440 : vector<1x1x4x128xbf16> to vector<4x128xbf16>
    %c18_562 = arith.constant 18 : index
    %c0_563 = arith.constant 0 : index
    %c0_564 = arith.constant 0 : index
    %442 = vector.load %arg3[%c18_562, %c0_563, %c0_564] : memref<27x8x4xbf16, #tpu.memory_space<vmem>>, vector<1x8x4xbf16>
    %443 = vector.shape_cast %442 : vector<1x8x4xbf16> to vector<8x4xbf16>
    %cst_565 = arith.constant dense<0.000000e+00> : vector<8x128xf32>
    %444 = tpu.matmul %443, %441, %cst_565 {dimension_numbers = #tpu.dot_dimension_numbers<[1], [0], [0], [1], [0, 0, 1, 1], [], []>} : vector<8x4xbf16>, vector<4x128xbf16>, vector<8x128xf32> -> vector<8x128xf32>
    %445 = arith.addf %439, %444 : vector<8x128xf32>
    %c0_566 = arith.constant 0 : index
    %c4_567 = arith.constant 4 : index
    %c0_568 = arith.constant 0 : index
    %c1_569 = arith.constant 1 : index
    %446 = vector.load %arg2[%c0_566, %c4_567, %c0_568, %c1_569] : memref<1x10x4x256xbf16, #tpu.memory_space<vmem>>, vector<1x1x4x128xbf16>
    %447 = vector.shape_cast %446 : vector<1x1x4x128xbf16> to vector<4x128xbf16>
    %c19_570 = arith.constant 19 : index
    %c0_571 = arith.constant 0 : index
    %c0_572 = arith.constant 0 : index
    %448 = vector.load %arg3[%c19_570, %c0_571, %c0_572] : memref<27x8x4xbf16, #tpu.memory_space<vmem>>, vector<1x8x4xbf16>
    %449 = vector.shape_cast %448 : vector<1x8x4xbf16> to vector<8x4xbf16>
    %cst_573 = arith.constant dense<0.000000e+00> : vector<8x128xf32>
    %450 = tpu.matmul %449, %447, %cst_573 {dimension_numbers = #tpu.dot_dimension_numbers<[1], [0], [0], [1], [0, 0, 1, 1], [], []>} : vector<8x4xbf16>, vector<4x128xbf16>, vector<8x128xf32> -> vector<8x128xf32>
    %451 = arith.addf %445, %450 : vector<8x128xf32>
    %c0_574 = arith.constant 0 : index
    %c4_575 = arith.constant 4 : index
    %c0_576 = arith.constant 0 : index
    %c2_577 = arith.constant 2 : index
    %452 = vector.load %arg2[%c0_574, %c4_575, %c0_576, %c2_577] : memref<1x10x4x256xbf16, #tpu.memory_space<vmem>>, vector<1x1x4x128xbf16>
    %453 = vector.shape_cast %452 : vector<1x1x4x128xbf16> to vector<4x128xbf16>
    %c20_578 = arith.constant 20 : index
    %c0_579 = arith.constant 0 : index
    %c0_580 = arith.constant 0 : index
    %454 = vector.load %arg3[%c20_578, %c0_579, %c0_580] : memref<27x8x4xbf16, #tpu.memory_space<vmem>>, vector<1x8x4xbf16>
    %455 = vector.shape_cast %454 : vector<1x8x4xbf16> to vector<8x4xbf16>
    %cst_581 = arith.constant dense<0.000000e+00> : vector<8x128xf32>
    %456 = tpu.matmul %455, %453, %cst_581 {dimension_numbers = #tpu.dot_dimension_numbers<[1], [0], [0], [1], [0, 0, 1, 1], [], []>} : vector<8x4xbf16>, vector<4x128xbf16>, vector<8x128xf32> -> vector<8x128xf32>
    %457 = arith.addf %451, %456 : vector<8x128xf32>
    %c0_582 = arith.constant 0 : index
    %c4_583 = arith.constant 4 : index
    %c0_584 = arith.constant 0 : index
    %c10_585 = arith.constant 10 : index
    %458 = vector.load %arg2[%c0_582, %c4_583, %c0_584, %c10_585] : memref<1x10x4x256xbf16, #tpu.memory_space<vmem>>, vector<1x1x4x128xbf16>
    %459 = vector.shape_cast %458 : vector<1x1x4x128xbf16> to vector<4x128xbf16>
    %c21_586 = arith.constant 21 : index
    %c0_587 = arith.constant 0 : index
    %c0_588 = arith.constant 0 : index
    %460 = vector.load %arg3[%c21_586, %c0_587, %c0_588] : memref<27x8x4xbf16, #tpu.memory_space<vmem>>, vector<1x8x4xbf16>
    %461 = vector.shape_cast %460 : vector<1x8x4xbf16> to vector<8x4xbf16>
    %cst_589 = arith.constant dense<0.000000e+00> : vector<8x128xf32>
    %462 = tpu.matmul %461, %459, %cst_589 {dimension_numbers = #tpu.dot_dimension_numbers<[1], [0], [0], [1], [0, 0, 1, 1], [], []>} : vector<8x4xbf16>, vector<4x128xbf16>, vector<8x128xf32> -> vector<8x128xf32>
    %463 = arith.addf %457, %462 : vector<8x128xf32>
    %c0_590 = arith.constant 0 : index
    %c4_591 = arith.constant 4 : index
    %c0_592 = arith.constant 0 : index
    %c11_593 = arith.constant 11 : index
    %464 = vector.load %arg2[%c0_590, %c4_591, %c0_592, %c11_593] : memref<1x10x4x256xbf16, #tpu.memory_space<vmem>>, vector<1x1x4x128xbf16>
    %465 = vector.shape_cast %464 : vector<1x1x4x128xbf16> to vector<4x128xbf16>
    %c22_594 = arith.constant 22 : index
    %c0_595 = arith.constant 0 : index
    %c0_596 = arith.constant 0 : index
    %466 = vector.load %arg3[%c22_594, %c0_595, %c0_596] : memref<27x8x4xbf16, #tpu.memory_space<vmem>>, vector<1x8x4xbf16>
    %467 = vector.shape_cast %466 : vector<1x8x4xbf16> to vector<8x4xbf16>
    %cst_597 = arith.constant dense<0.000000e+00> : vector<8x128xf32>
    %468 = tpu.matmul %467, %465, %cst_597 {dimension_numbers = #tpu.dot_dimension_numbers<[1], [0], [0], [1], [0, 0, 1, 1], [], []>} : vector<8x4xbf16>, vector<4x128xbf16>, vector<8x128xf32> -> vector<8x128xf32>
    %469 = arith.addf %463, %468 : vector<8x128xf32>
    %c0_598 = arith.constant 0 : index
    %c4_599 = arith.constant 4 : index
    %c0_600 = arith.constant 0 : index
    %c12_601 = arith.constant 12 : index
    %470 = vector.load %arg2[%c0_598, %c4_599, %c0_600, %c12_601] : memref<1x10x4x256xbf16, #tpu.memory_space<vmem>>, vector<1x1x4x128xbf16>
    %471 = vector.shape_cast %470 : vector<1x1x4x128xbf16> to vector<4x128xbf16>
    %c23_602 = arith.constant 23 : index
    %c0_603 = arith.constant 0 : index
    %c0_604 = arith.constant 0 : index
    %472 = vector.load %arg3[%c23_602, %c0_603, %c0_604] : memref<27x8x4xbf16, #tpu.memory_space<vmem>>, vector<1x8x4xbf16>
    %473 = vector.shape_cast %472 : vector<1x8x4xbf16> to vector<8x4xbf16>
    %cst_605 = arith.constant dense<0.000000e+00> : vector<8x128xf32>
    %474 = tpu.matmul %473, %471, %cst_605 {dimension_numbers = #tpu.dot_dimension_numbers<[1], [0], [0], [1], [0, 0, 1, 1], [], []>} : vector<8x4xbf16>, vector<4x128xbf16>, vector<8x128xf32> -> vector<8x128xf32>
    %475 = arith.addf %469, %474 : vector<8x128xf32>
    %c0_606 = arith.constant 0 : index
    %c4_607 = arith.constant 4 : index
    %c0_608 = arith.constant 0 : index
    %c20_609 = arith.constant 20 : index
    %476 = vector.load %arg2[%c0_606, %c4_607, %c0_608, %c20_609] : memref<1x10x4x256xbf16, #tpu.memory_space<vmem>>, vector<1x1x4x128xbf16>
    %477 = vector.shape_cast %476 : vector<1x1x4x128xbf16> to vector<4x128xbf16>
    %c24_610 = arith.constant 24 : index
    %c0_611 = arith.constant 0 : index
    %c0_612 = arith.constant 0 : index
    %478 = vector.load %arg3[%c24_610, %c0_611, %c0_612] : memref<27x8x4xbf16, #tpu.memory_space<vmem>>, vector<1x8x4xbf16>
    %479 = vector.shape_cast %478 : vector<1x8x4xbf16> to vector<8x4xbf16>
    %cst_613 = arith.constant dense<0.000000e+00> : vector<8x128xf32>
    %480 = tpu.matmul %479, %477, %cst_613 {dimension_numbers = #tpu.dot_dimension_numbers<[1], [0], [0], [1], [0, 0, 1, 1], [], []>} : vector<8x4xbf16>, vector<4x128xbf16>, vector<8x128xf32> -> vector<8x128xf32>
    %481 = arith.addf %475, %480 : vector<8x128xf32>
    %c0_614 = arith.constant 0 : index
    %c4_615 = arith.constant 4 : index
    %c0_616 = arith.constant 0 : index
    %c21_617 = arith.constant 21 : index
    %482 = vector.load %arg2[%c0_614, %c4_615, %c0_616, %c21_617] : memref<1x10x4x256xbf16, #tpu.memory_space<vmem>>, vector<1x1x4x128xbf16>
    %483 = vector.shape_cast %482 : vector<1x1x4x128xbf16> to vector<4x128xbf16>
    %c25_618 = arith.constant 25 : index
    %c0_619 = arith.constant 0 : index
    %c0_620 = arith.constant 0 : index
    %484 = vector.load %arg3[%c25_618, %c0_619, %c0_620] : memref<27x8x4xbf16, #tpu.memory_space<vmem>>, vector<1x8x4xbf16>
    %485 = vector.shape_cast %484 : vector<1x8x4xbf16> to vector<8x4xbf16>
    %cst_621 = arith.constant dense<0.000000e+00> : vector<8x128xf32>
    %486 = tpu.matmul %485, %483, %cst_621 {dimension_numbers = #tpu.dot_dimension_numbers<[1], [0], [0], [1], [0, 0, 1, 1], [], []>} : vector<8x4xbf16>, vector<4x128xbf16>, vector<8x128xf32> -> vector<8x128xf32>
    %487 = arith.addf %481, %486 : vector<8x128xf32>
    %c0_622 = arith.constant 0 : index
    %c4_623 = arith.constant 4 : index
    %c0_624 = arith.constant 0 : index
    %c22_625 = arith.constant 22 : index
    %488 = vector.load %arg2[%c0_622, %c4_623, %c0_624, %c22_625] : memref<1x10x4x256xbf16, #tpu.memory_space<vmem>>, vector<1x1x4x128xbf16>
    %489 = vector.shape_cast %488 : vector<1x1x4x128xbf16> to vector<4x128xbf16>
    %c26_626 = arith.constant 26 : index
    %c0_627 = arith.constant 0 : index
    %c0_628 = arith.constant 0 : index
    %490 = vector.load %arg3[%c26_626, %c0_627, %c0_628] : memref<27x8x4xbf16, #tpu.memory_space<vmem>>, vector<1x8x4xbf16>
    %491 = vector.shape_cast %490 : vector<1x8x4xbf16> to vector<8x4xbf16>
    %cst_629 = arith.constant dense<0.000000e+00> : vector<8x128xf32>
    %492 = tpu.matmul %491, %489, %cst_629 {dimension_numbers = #tpu.dot_dimension_numbers<[1], [0], [0], [1], [0, 0, 1, 1], [], []>} : vector<8x4xbf16>, vector<4x128xbf16>, vector<8x128xf32> -> vector<8x128xf32>
    %493 = arith.addf %487, %492 : vector<8x128xf32>
    %494 = vector.broadcast %0 : vector<8x1xf32> to vector<8x128xf32>
    %495 = arith.addf %493, %494 : vector<8x128xf32>
    %c0_630 = arith.constant 0 : index
    %c2_631 = arith.constant 2 : index
    %c0_632 = arith.constant 0 : index
    %c0_633 = arith.constant 0 : index
    %496 = vector.load %arg5[%c0_630, %c2_631, %c0_632, %c0_633] : memref<1x8x8x128xf32, #tpu.memory_space<vmem>>, vector<1x1x8x128xf32>
    %497 = vector.shape_cast %496 : vector<1x1x8x128xf32> to vector<8x128xf32>
    %498 = vector.shape_cast %495 : vector<8x128xf32> to vector<1x1x8x128xf32>
    tpu.vector_store %arg5[%c0_630, %c2_631, %c0_632, %c0_633], %498 {strides = array<i32>} : memref<1x8x8x128xf32, #tpu.memory_space<vmem>>, vector<1x1x8x128xf32>,
    %c0_634 = arith.constant 0 : index
    %c3_635 = arith.constant 3 : index
    %c0_636 = arith.constant 0 : index
    %c0_637 = arith.constant 0 : index
    %499 = vector.load %arg2[%c0_634, %c3_635, %c0_636, %c0_637] : memref<1x10x4x256xbf16, #tpu.memory_space<vmem>>, vector<1x1x4x128xbf16>
    %500 = vector.shape_cast %499 : vector<1x1x4x128xbf16> to vector<4x128xbf16>
    %c0_638 = arith.constant 0 : index
    %c0_639 = arith.constant 0 : index
    %c0_640 = arith.constant 0 : index
    %501 = vector.load %arg3[%c0_638, %c0_639, %c0_640] : memref<27x8x4xbf16, #tpu.memory_space<vmem>>, vector<1x8x4xbf16>
    %502 = vector.shape_cast %501 : vector<1x8x4xbf16> to vector<8x4xbf16>
    %cst_641 = arith.constant dense<0.000000e+00> : vector<8x128xf32>
    %503 = tpu.matmul %502, %500, %cst_641 {dimension_numbers = #tpu.dot_dimension_numbers<[1], [0], [0], [1], [0, 0, 1, 1], [], []>} : vector<8x4xbf16>, vector<4x128xbf16>, vector<8x128xf32> -> vector<8x128xf32>
    %c0_642 = arith.constant 0 : index
    %c3_643 = arith.constant 3 : index
    %c0_644 = arith.constant 0 : index
    %c1_645 = arith.constant 1 : index
    %504 = vector.load %arg2[%c0_642, %c3_643, %c0_644, %c1_645] : memref<1x10x4x256xbf16, #tpu.memory_space<vmem>>, vector<1x1x4x128xbf16>
    %505 = vector.shape_cast %504 : vector<1x1x4x128xbf16> to vector<4x128xbf16>
    %c1_646 = arith.constant 1 : index
    %c0_647 = arith.constant 0 : index
    %c0_648 = arith.constant 0 : index
    %506 = vector.load %arg3[%c1_646, %c0_647, %c0_648] : memref<27x8x4xbf16, #tpu.memory_space<vmem>>, vector<1x8x4xbf16>
    %507 = vector.shape_cast %506 : vector<1x8x4xbf16> to vector<8x4xbf16>
    %cst_649 = arith.constant dense<0.000000e+00> : vector<8x128xf32>
    %508 = tpu.matmul %507, %505, %cst_649 {dimension_numbers = #tpu.dot_dimension_numbers<[1], [0], [0], [1], [0, 0, 1, 1], [], []>} : vector<8x4xbf16>, vector<4x128xbf16>, vector<8x128xf32> -> vector<8x128xf32>
    %509 = arith.addf %503, %508 : vector<8x128xf32>
    %c0_650 = arith.constant 0 : index
    %c3_651 = arith.constant 3 : index
    %c0_652 = arith.constant 0 : index
    %c2_653 = arith.constant 2 : index
    %510 = vector.load %arg2[%c0_650, %c3_651, %c0_652, %c2_653] : memref<1x10x4x256xbf16, #tpu.memory_space<vmem>>, vector<1x1x4x128xbf16>
    %511 = vector.shape_cast %510 : vector<1x1x4x128xbf16> to vector<4x128xbf16>
    %c2_654 = arith.constant 2 : index
    %c0_655 = arith.constant 0 : index
    %c0_656 = arith.constant 0 : index
    %512 = vector.load %arg3[%c2_654, %c0_655, %c0_656] : memref<27x8x4xbf16, #tpu.memory_space<vmem>>, vector<1x8x4xbf16>
    %513 = vector.shape_cast %512 : vector<1x8x4xbf16> to vector<8x4xbf16>
    %cst_657 = arith.constant dense<0.000000e+00> : vector<8x128xf32>
    %514 = tpu.matmul %513, %511, %cst_657 {dimension_numbers = #tpu.dot_dimension_numbers<[1], [0], [0], [1], [0, 0, 1, 1], [], []>} : vector<8x4xbf16>, vector<4x128xbf16>, vector<8x128xf32> -> vector<8x128xf32>
    %515 = arith.addf %509, %514 : vector<8x128xf32>
    %c0_658 = arith.constant 0 : index
    %c3_659 = arith.constant 3 : index
    %c0_660 = arith.constant 0 : index
    %c10_661 = arith.constant 10 : index
    %516 = vector.load %arg2[%c0_658, %c3_659, %c0_660, %c10_661] : memref<1x10x4x256xbf16, #tpu.memory_space<vmem>>, vector<1x1x4x128xbf16>
    %517 = vector.shape_cast %516 : vector<1x1x4x128xbf16> to vector<4x128xbf16>
    %c3_662 = arith.constant 3 : index
    %c0_663 = arith.constant 0 : index
    %c0_664 = arith.constant 0 : index
    %518 = vector.load %arg3[%c3_662, %c0_663, %c0_664] : memref<27x8x4xbf16, #tpu.memory_space<vmem>>, vector<1x8x4xbf16>
    %519 = vector.shape_cast %518 : vector<1x8x4xbf16> to vector<8x4xbf16>
    %cst_665 = arith.constant dense<0.000000e+00> : vector<8x128xf32>
    %520 = tpu.matmul %519, %517, %cst_665 {dimension_numbers = #tpu.dot_dimension_numbers<[1], [0], [0], [1], [0, 0, 1, 1], [], []>} : vector<8x4xbf16>, vector<4x128xbf16>, vector<8x128xf32> -> vector<8x128xf32>
    %521 = arith.addf %515, %520 : vector<8x128xf32>
    %c0_666 = arith.constant 0 : index
    %c3_667 = arith.constant 3 : index
    %c0_668 = arith.constant 0 : index
    %c11_669 = arith.constant 11 : index
    %522 = vector.load %arg2[%c0_666, %c3_667, %c0_668, %c11_669] : memref<1x10x4x256xbf16, #tpu.memory_space<vmem>>, vector<1x1x4x128xbf16>
    %523 = vector.shape_cast %522 : vector<1x1x4x128xbf16> to vector<4x128xbf16>
    %c4_670 = arith.constant 4 : index
    %c0_671 = arith.constant 0 : index
    %c0_672 = arith.constant 0 : index
    %524 = vector.load %arg3[%c4_670, %c0_671, %c0_672] : memref<27x8x4xbf16, #tpu.memory_space<vmem>>, vector<1x8x4xbf16>
    %525 = vector.shape_cast %524 : vector<1x8x4xbf16> to vector<8x4xbf16>
    %cst_673 = arith.constant dense<0.000000e+00> : vector<8x128xf32>
    %526 = tpu.matmul %525, %523, %cst_673 {dimension_numbers = #tpu.dot_dimension_numbers<[1], [0], [0], [1], [0, 0, 1, 1], [], []>} : vector<8x4xbf16>, vector<4x128xbf16>, vector<8x128xf32> -> vector<8x128xf32>
    %527 = arith.addf %521, %526 : vector<8x128xf32>
    %c0_674 = arith.constant 0 : index
    %c3_675 = arith.constant 3 : index
    %c0_676 = arith.constant 0 : index
    %c12_677 = arith.constant 12 : index
    %528 = vector.load %arg2[%c0_674, %c3_675, %c0_676, %c12_677] : memref<1x10x4x256xbf16, #tpu.memory_space<vmem>>, vector<1x1x4x128xbf16>
    %529 = vector.shape_cast %528 : vector<1x1x4x128xbf16> to vector<4x128xbf16>
    %c5_678 = arith.constant 5 : index
    %c0_679 = arith.constant 0 : index
    %c0_680 = arith.constant 0 : index
    %530 = vector.load %arg3[%c5_678, %c0_679, %c0_680] : memref<27x8x4xbf16, #tpu.memory_space<vmem>>, vector<1x8x4xbf16>
    %531 = vector.shape_cast %530 : vector<1x8x4xbf16> to vector<8x4xbf16>
    %cst_681 = arith.constant dense<0.000000e+00> : vector<8x128xf32>
    %532 = tpu.matmul %531, %529, %cst_681 {dimension_numbers = #tpu.dot_dimension_numbers<[1], [0], [0], [1], [0, 0, 1, 1], [], []>} : vector<8x4xbf16>, vector<4x128xbf16>, vector<8x128xf32> -> vector<8x128xf32>
    %533 = arith.addf %527, %532 : vector<8x128xf32>
    %c0_682 = arith.constant 0 : index
    %c3_683 = arith.constant 3 : index
    %c0_684 = arith.constant 0 : index
    %c20_685 = arith.constant 20 : index
    %534 = vector.load %arg2[%c0_682, %c3_683, %c0_684, %c20_685] : memref<1x10x4x256xbf16, #tpu.memory_space<vmem>>, vector<1x1x4x128xbf16>
    %535 = vector.shape_cast %534 : vector<1x1x4x128xbf16> to vector<4x128xbf16>
    %c6_686 = arith.constant 6 : index
    %c0_687 = arith.constant 0 : index
    %c0_688 = arith.constant 0 : index
    %536 = vector.load %arg3[%c6_686, %c0_687, %c0_688] : memref<27x8x4xbf16, #tpu.memory_space<vmem>>, vector<1x8x4xbf16>
    %537 = vector.shape_cast %536 : vector<1x8x4xbf16> to vector<8x4xbf16>
    %cst_689 = arith.constant dense<0.000000e+00> : vector<8x128xf32>
    %538 = tpu.matmul %537, %535, %cst_689 {dimension_numbers = #tpu.dot_dimension_numbers<[1], [0], [0], [1], [0, 0, 1, 1], [], []>} : vector<8x4xbf16>, vector<4x128xbf16>, vector<8x128xf32> -> vector<8x128xf32>
    %539 = arith.addf %533, %538 : vector<8x128xf32>
    %c0_690 = arith.constant 0 : index
    %c3_691 = arith.constant 3 : index
    %c0_692 = arith.constant 0 : index
    %c21_693 = arith.constant 21 : index
    %540 = vector.load %arg2[%c0_690, %c3_691, %c0_692, %c21_693] : memref<1x10x4x256xbf16, #tpu.memory_space<vmem>>, vector<1x1x4x128xbf16>
    %541 = vector.shape_cast %540 : vector<1x1x4x128xbf16> to vector<4x128xbf16>
    %c7_694 = arith.constant 7 : index
    %c0_695 = arith.constant 0 : index
    %c0_696 = arith.constant 0 : index
    %542 = vector.load %arg3[%c7_694, %c0_695, %c0_696] : memref<27x8x4xbf16, #tpu.memory_space<vmem>>, vector<1x8x4xbf16>
    %543 = vector.shape_cast %542 : vector<1x8x4xbf16> to vector<8x4xbf16>
    %cst_697 = arith.constant dense<0.000000e+00> : vector<8x128xf32>
    %544 = tpu.matmul %543, %541, %cst_697 {dimension_numbers = #tpu.dot_dimension_numbers<[1], [0], [0], [1], [0, 0, 1, 1], [], []>} : vector<8x4xbf16>, vector<4x128xbf16>, vector<8x128xf32> -> vector<8x128xf32>
    %545 = arith.addf %539, %544 : vector<8x128xf32>
    %c0_698 = arith.constant 0 : index
    %c3_699 = arith.constant 3 : index
    %c0_700 = arith.constant 0 : index
    %c22_701 = arith.constant 22 : index
    %546 = vector.load %arg2[%c0_698, %c3_699, %c0_700, %c22_701] : memref<1x10x4x256xbf16, #tpu.memory_space<vmem>>, vector<1x1x4x128xbf16>
    %547 = vector.shape_cast %546 : vector<1x1x4x128xbf16> to vector<4x128xbf16>
    %c8_702 = arith.constant 8 : index
    %c0_703 = arith.constant 0 : index
    %c0_704 = arith.constant 0 : index
    %548 = vector.load %arg3[%c8_702, %c0_703, %c0_704] : memref<27x8x4xbf16, #tpu.memory_space<vmem>>, vector<1x8x4xbf16>
    %549 = vector.shape_cast %548 : vector<1x8x4xbf16> to vector<8x4xbf16>
    %cst_705 = arith.constant dense<0.000000e+00> : vector<8x128xf32>
    %550 = tpu.matmul %549, %547, %cst_705 {dimension_numbers = #tpu.dot_dimension_numbers<[1], [0], [0], [1], [0, 0, 1, 1], [], []>} : vector<8x4xbf16>, vector<4x128xbf16>, vector<8x128xf32> -> vector<8x128xf32>
    %551 = arith.addf %545, %550 : vector<8x128xf32>
    %c0_706 = arith.constant 0 : index
    %c4_707 = arith.constant 4 : index
    %c0_708 = arith.constant 0 : index
    %c0_709 = arith.constant 0 : index
    %552 = vector.load %arg2[%c0_706, %c4_707, %c0_708, %c0_709] : memref<1x10x4x256xbf16, #tpu.memory_space<vmem>>, vector<1x1x4x128xbf16>
    %553 = vector.shape_cast %552 : vector<1x1x4x128xbf16> to vector<4x128xbf16>
    %c9_710 = arith.constant 9 : index
    %c0_711 = arith.constant 0 : index
    %c0_712 = arith.constant 0 : index
    %554 = vector.load %arg3[%c9_710, %c0_711, %c0_712] : memref<27x8x4xbf16, #tpu.memory_space<vmem>>, vector<1x8x4xbf16>
    %555 = vector.shape_cast %554 : vector<1x8x4xbf16> to vector<8x4xbf16>
    %cst_713 = arith.constant dense<0.000000e+00> : vector<8x128xf32>
    %556 = tpu.matmul %555, %553, %cst_713 {dimension_numbers = #tpu.dot_dimension_numbers<[1], [0], [0], [1], [0, 0, 1, 1], [], []>} : vector<8x4xbf16>, vector<4x128xbf16>, vector<8x128xf32> -> vector<8x128xf32>
    %557 = arith.addf %551, %556 : vector<8x128xf32>
    %c0_714 = arith.constant 0 : index
    %c4_715 = arith.constant 4 : index
    %c0_716 = arith.constant 0 : index
    %c1_717 = arith.constant 1 : index
    %558 = vector.load %arg2[%c0_714, %c4_715, %c0_716, %c1_717] : memref<1x10x4x256xbf16, #tpu.memory_space<vmem>>, vector<1x1x4x128xbf16>
    %559 = vector.shape_cast %558 : vector<1x1x4x128xbf16> to vector<4x128xbf16>
    %c10_718 = arith.constant 10 : index
    %c0_719 = arith.constant 0 : index
    %c0_720 = arith.constant 0 : index
    %560 = vector.load %arg3[%c10_718, %c0_719, %c0_720] : memref<27x8x4xbf16, #tpu.memory_space<vmem>>, vector<1x8x4xbf16>
    %561 = vector.shape_cast %560 : vector<1x8x4xbf16> to vector<8x4xbf16>
    %cst_721 = arith.constant dense<0.000000e+00> : vector<8x128xf32>
    %562 = tpu.matmul %561, %559, %cst_721 {dimension_numbers = #tpu.dot_dimension_numbers<[1], [0], [0], [1], [0, 0, 1, 1], [], []>} : vector<8x4xbf16>, vector<4x128xbf16>, vector<8x128xf32> -> vector<8x128xf32>
    %563 = arith.addf %557, %562 : vector<8x128xf32>
    %c0_722 = arith.constant 0 : index
    %c4_723 = arith.constant 4 : index
    %c0_724 = arith.constant 0 : index
    %c2_725 = arith.constant 2 : index
    %564 = vector.load %arg2[%c0_722, %c4_723, %c0_724, %c2_725] : memref<1x10x4x256xbf16, #tpu.memory_space<vmem>>, vector<1x1x4x128xbf16>
    %565 = vector.shape_cast %564 : vector<1x1x4x128xbf16> to vector<4x128xbf16>
    %c11_726 = arith.constant 11 : index
    %c0_727 = arith.constant 0 : index
    %c0_728 = arith.constant 0 : index
    %566 = vector.load %arg3[%c11_726, %c0_727, %c0_728] : memref<27x8x4xbf16, #tpu.memory_space<vmem>>, vector<1x8x4xbf16>
    %567 = vector.shape_cast %566 : vector<1x8x4xbf16> to vector<8x4xbf16>
    %cst_729 = arith.constant dense<0.000000e+00> : vector<8x128xf32>
    %568 = tpu.matmul %567, %565, %cst_729 {dimension_numbers = #tpu.dot_dimension_numbers<[1], [0], [0], [1], [0, 0, 1, 1], [], []>} : vector<8x4xbf16>, vector<4x128xbf16>, vector<8x128xf32> -> vector<8x128xf32>
    %569 = arith.addf %563, %568 : vector<8x128xf32>
    %c0_730 = arith.constant 0 : index
    %c4_731 = arith.constant 4 : index
    %c0_732 = arith.constant 0 : index
    %c10_733 = arith.constant 10 : index
    %570 = vector.load %arg2[%c0_730, %c4_731, %c0_732, %c10_733] : memref<1x10x4x256xbf16, #tpu.memory_space<vmem>>, vector<1x1x4x128xbf16>
    %571 = vector.shape_cast %570 : vector<1x1x4x128xbf16> to vector<4x128xbf16>
    %c12_734 = arith.constant 12 : index
    %c0_735 = arith.constant 0 : index
    %c0_736 = arith.constant 0 : index
    %572 = vector.load %arg3[%c12_734, %c0_735, %c0_736] : memref<27x8x4xbf16, #tpu.memory_space<vmem>>, vector<1x8x4xbf16>
    %573 = vector.shape_cast %572 : vector<1x8x4xbf16> to vector<8x4xbf16>
    %cst_737 = arith.constant dense<0.000000e+00> : vector<8x128xf32>
    %574 = tpu.matmul %573, %571, %cst_737 {dimension_numbers = #tpu.dot_dimension_numbers<[1], [0], [0], [1], [0, 0, 1, 1], [], []>} : vector<8x4xbf16>, vector<4x128xbf16>, vector<8x128xf32> -> vector<8x128xf32>
    %575 = arith.addf %569, %574 : vector<8x128xf32>
    %c0_738 = arith.constant 0 : index
    %c4_739 = arith.constant 4 : index
    %c0_740 = arith.constant 0 : index
    %c11_741 = arith.constant 11 : index
    %576 = vector.load %arg2[%c0_738, %c4_739, %c0_740, %c11_741] : memref<1x10x4x256xbf16, #tpu.memory_space<vmem>>, vector<1x1x4x128xbf16>
    %577 = vector.shape_cast %576 : vector<1x1x4x128xbf16> to vector<4x128xbf16>
    %c13_742 = arith.constant 13 : index
    %c0_743 = arith.constant 0 : index
    %c0_744 = arith.constant 0 : index
    %578 = vector.load %arg3[%c13_742, %c0_743, %c0_744] : memref<27x8x4xbf16, #tpu.memory_space<vmem>>, vector<1x8x4xbf16>
    %579 = vector.shape_cast %578 : vector<1x8x4xbf16> to vector<8x4xbf16>
    %cst_745 = arith.constant dense<0.000000e+00> : vector<8x128xf32>
    %580 = tpu.matmul %579, %577, %cst_745 {dimension_numbers = #tpu.dot_dimension_numbers<[1], [0], [0], [1], [0, 0, 1, 1], [], []>} : vector<8x4xbf16>, vector<4x128xbf16>, vector<8x128xf32> -> vector<8x128xf32>
    %581 = arith.addf %575, %580 : vector<8x128xf32>
    %c0_746 = arith.constant 0 : index
    %c4_747 = arith.constant 4 : index
    %c0_748 = arith.constant 0 : index
    %c12_749 = arith.constant 12 : index
    %582 = vector.load %arg2[%c0_746, %c4_747, %c0_748, %c12_749] : memref<1x10x4x256xbf16, #tpu.memory_space<vmem>>, vector<1x1x4x128xbf16>
    %583 = vector.shape_cast %582 : vector<1x1x4x128xbf16> to vector<4x128xbf16>
    %c14_750 = arith.constant 14 : index
    %c0_751 = arith.constant 0 : index
    %c0_752 = arith.constant 0 : index
    %584 = vector.load %arg3[%c14_750, %c0_751, %c0_752] : memref<27x8x4xbf16, #tpu.memory_space<vmem>>, vector<1x8x4xbf16>
    %585 = vector.shape_cast %584 : vector<1x8x4xbf16> to vector<8x4xbf16>
    %cst_753 = arith.constant dense<0.000000e+00> : vector<8x128xf32>
    %586 = tpu.matmul %585, %583, %cst_753 {dimension_numbers = #tpu.dot_dimension_numbers<[1], [0], [0], [1], [0, 0, 1, 1], [], []>} : vector<8x4xbf16>, vector<4x128xbf16>, vector<8x128xf32> -> vector<8x128xf32>
    %587 = arith.addf %581, %586 : vector<8x128xf32>
    %c0_754 = arith.constant 0 : index
    %c4_755 = arith.constant 4 : index
    %c0_756 = arith.constant 0 : index
    %c20_757 = arith.constant 20 : index
    %588 = vector.load %arg2[%c0_754, %c4_755, %c0_756, %c20_757] : memref<1x10x4x256xbf16, #tpu.memory_space<vmem>>, vector<1x1x4x128xbf16>
    %589 = vector.shape_cast %588 : vector<1x1x4x128xbf16> to vector<4x128xbf16>
    %c15_758 = arith.constant 15 : index
    %c0_759 = arith.constant 0 : index
    %c0_760 = arith.constant 0 : index
    %590 = vector.load %arg3[%c15_758, %c0_759, %c0_760] : memref<27x8x4xbf16, #tpu.memory_space<vmem>>, vector<1x8x4xbf16>
    %591 = vector.shape_cast %590 : vector<1x8x4xbf16> to vector<8x4xbf16>
    %cst_761 = arith.constant dense<0.000000e+00> : vector<8x128xf32>
    %592 = tpu.matmul %591, %589, %cst_761 {dimension_numbers = #tpu.dot_dimension_numbers<[1], [0], [0], [1], [0, 0, 1, 1], [], []>} : vector<8x4xbf16>, vector<4x128xbf16>, vector<8x128xf32> -> vector<8x128xf32>
    %593 = arith.addf %587, %592 : vector<8x128xf32>
    %c0_762 = arith.constant 0 : index
    %c4_763 = arith.constant 4 : index
    %c0_764 = arith.constant 0 : index
    %c21_765 = arith.constant 21 : index
    %594 = vector.load %arg2[%c0_762, %c4_763, %c0_764, %c21_765] : memref<1x10x4x256xbf16, #tpu.memory_space<vmem>>, vector<1x1x4x128xbf16>
    %595 = vector.shape_cast %594 : vector<1x1x4x128xbf16> to vector<4x128xbf16>
    %c16_766 = arith.constant 16 : index
    %c0_767 = arith.constant 0 : index
    %c0_768 = arith.constant 0 : index
    %596 = vector.load %arg3[%c16_766, %c0_767, %c0_768] : memref<27x8x4xbf16, #tpu.memory_space<vmem>>, vector<1x8x4xbf16>
    %597 = vector.shape_cast %596 : vector<1x8x4xbf16> to vector<8x4xbf16>
    %cst_769 = arith.constant dense<0.000000e+00> : vector<8x128xf32>
    %598 = tpu.matmul %597, %595, %cst_769 {dimension_numbers = #tpu.dot_dimension_numbers<[1], [0], [0], [1], [0, 0, 1, 1], [], []>} : vector<8x4xbf16>, vector<4x128xbf16>, vector<8x128xf32> -> vector<8x128xf32>
    %599 = arith.addf %593, %598 : vector<8x128xf32>
    %c0_770 = arith.constant 0 : index
    %c4_771 = arith.constant 4 : index
    %c0_772 = arith.constant 0 : index
    %c22_773 = arith.constant 22 : index
    %600 = vector.load %arg2[%c0_770, %c4_771, %c0_772, %c22_773] : memref<1x10x4x256xbf16, #tpu.memory_space<vmem>>, vector<1x1x4x128xbf16>
    %601 = vector.shape_cast %600 : vector<1x1x4x128xbf16> to vector<4x128xbf16>
    %c17_774 = arith.constant 17 : index
    %c0_775 = arith.constant 0 : index
    %c0_776 = arith.constant 0 : index
    %602 = vector.load %arg3[%c17_774, %c0_775, %c0_776] : memref<27x8x4xbf16, #tpu.memory_space<vmem>>, vector<1x8x4xbf16>
    %603 = vector.shape_cast %602 : vector<1x8x4xbf16> to vector<8x4xbf16>
    %cst_777 = arith.constant dense<0.000000e+00> : vector<8x128xf32>
    %604 = tpu.matmul %603, %601, %cst_777 {dimension_numbers = #tpu.dot_dimension_numbers<[1], [0], [0], [1], [0, 0, 1, 1], [], []>} : vector<8x4xbf16>, vector<4x128xbf16>, vector<8x128xf32> -> vector<8x128xf32>
    %605 = arith.addf %599, %604 : vector<8x128xf32>
    %c0_778 = arith.constant 0 : index
    %c5_779 = arith.constant 5 : index
    %c0_780 = arith.constant 0 : index
    %c0_781 = arith.constant 0 : index
    %606 = vector.load %arg2[%c0_778, %c5_779, %c0_780, %c0_781] : memref<1x10x4x256xbf16, #tpu.memory_space<vmem>>, vector<1x1x4x128xbf16>
    %607 = vector.shape_cast %606 : vector<1x1x4x128xbf16> to vector<4x128xbf16>
    %c18_782 = arith.constant 18 : index
    %c0_783 = arith.constant 0 : index
    %c0_784 = arith.constant 0 : index
    %608 = vector.load %arg3[%c18_782, %c0_783, %c0_784] : memref<27x8x4xbf16, #tpu.memory_space<vmem>>, vector<1x8x4xbf16>
    %609 = vector.shape_cast %608 : vector<1x8x4xbf16> to vector<8x4xbf16>
    %cst_785 = arith.constant dense<0.000000e+00> : vector<8x128xf32>
    %610 = tpu.matmul %609, %607, %cst_785 {dimension_numbers = #tpu.dot_dimension_numbers<[1], [0], [0], [1], [0, 0, 1, 1], [], []>} : vector<8x4xbf16>, vector<4x128xbf16>, vector<8x128xf32> -> vector<8x128xf32>
    %611 = arith.addf %605, %610 : vector<8x128xf32>
    %c0_786 = arith.constant 0 : index
    %c5_787 = arith.constant 5 : index
    %c0_788 = arith.constant 0 : index
    %c1_789 = arith.constant 1 : index
    %612 = vector.load %arg2[%c0_786, %c5_787, %c0_788, %c1_789] : memref<1x10x4x256xbf16, #tpu.memory_space<vmem>>, vector<1x1x4x128xbf16>
    %613 = vector.shape_cast %612 : vector<1x1x4x128xbf16> to vector<4x128xbf16>
    %c19_790 = arith.constant 19 : index
    %c0_791 = arith.constant 0 : index
    %c0_792 = arith.constant 0 : index
    %614 = vector.load %arg3[%c19_790, %c0_791, %c0_792] : memref<27x8x4xbf16, #tpu.memory_space<vmem>>, vector<1x8x4xbf16>
    %615 = vector.shape_cast %614 : vector<1x8x4xbf16> to vector<8x4xbf16>
    %cst_793 = arith.constant dense<0.000000e+00> : vector<8x128xf32>
    %616 = tpu.matmul %615, %613, %cst_793 {dimension_numbers = #tpu.dot_dimension_numbers<[1], [0], [0], [1], [0, 0, 1, 1], [], []>} : vector<8x4xbf16>, vector<4x128xbf16>, vector<8x128xf32> -> vector<8x128xf32>
    %617 = arith.addf %611, %616 : vector<8x128xf32>
    %c0_794 = arith.constant 0 : index
    %c5_795 = arith.constant 5 : index
    %c0_796 = arith.constant 0 : index
    %c2_797 = arith.constant 2 : index
    %618 = vector.load %arg2[%c0_794, %c5_795, %c0_796, %c2_797] : memref<1x10x4x256xbf16, #tpu.memory_space<vmem>>, vector<1x1x4x128xbf16>
    %619 = vector.shape_cast %618 : vector<1x1x4x128xbf16> to vector<4x128xbf16>
    %c20_798 = arith.constant 20 : index
    %c0_799 = arith.constant 0 : index
    %c0_800 = arith.constant 0 : index
    %620 = vector.load %arg3[%c20_798, %c0_799, %c0_800] : memref<27x8x4xbf16, #tpu.memory_space<vmem>>, vector<1x8x4xbf16>
    %621 = vector.shape_cast %620 : vector<1x8x4xbf16> to vector<8x4xbf16>
    %cst_801 = arith.constant dense<0.000000e+00> : vector<8x128xf32>
    %622 = tpu.matmul %621, %619, %cst_801 {dimension_numbers = #tpu.dot_dimension_numbers<[1], [0], [0], [1], [0, 0, 1, 1], [], []>} : vector<8x4xbf16>, vector<4x128xbf16>, vector<8x128xf32> -> vector<8x128xf32>
    %623 = arith.addf %617, %622 : vector<8x128xf32>
    %c0_802 = arith.constant 0 : index
    %c5_803 = arith.constant 5 : index
    %c0_804 = arith.constant 0 : index
    %c10_805 = arith.constant 10 : index
    %624 = vector.load %arg2[%c0_802, %c5_803, %c0_804, %c10_805] : memref<1x10x4x256xbf16, #tpu.memory_space<vmem>>, vector<1x1x4x128xbf16>
    %625 = vector.shape_cast %624 : vector<1x1x4x128xbf16> to vector<4x128xbf16>
    %c21_806 = arith.constant 21 : index
    %c0_807 = arith.constant 0 : index
    %c0_808 = arith.constant 0 : index
    %626 = vector.load %arg3[%c21_806, %c0_807, %c0_808] : memref<27x8x4xbf16, #tpu.memory_space<vmem>>, vector<1x8x4xbf16>
    %627 = vector.shape_cast %626 : vector<1x8x4xbf16> to vector<8x4xbf16>
    %cst_809 = arith.constant dense<0.000000e+00> : vector<8x128xf32>
    %628 = tpu.matmul %627, %625, %cst_809 {dimension_numbers = #tpu.dot_dimension_numbers<[1], [0], [0], [1], [0, 0, 1, 1], [], []>} : vector<8x4xbf16>, vector<4x128xbf16>, vector<8x128xf32> -> vector<8x128xf32>
    %629 = arith.addf %623, %628 : vector<8x128xf32>
    %c0_810 = arith.constant 0 : index
    %c5_811 = arith.constant 5 : index
    %c0_812 = arith.constant 0 : index
    %c11_813 = arith.constant 11 : index
    %630 = vector.load %arg2[%c0_810, %c5_811, %c0_812, %c11_813] : memref<1x10x4x256xbf16, #tpu.memory_space<vmem>>, vector<1x1x4x128xbf16>
    %631 = vector.shape_cast %630 : vector<1x1x4x128xbf16> to vector<4x128xbf16>
    %c22_814 = arith.constant 22 : index
    %c0_815 = arith.constant 0 : index
    %c0_816 = arith.constant 0 : index
    %632 = vector.load %arg3[%c22_814, %c0_815, %c0_816] : memref<27x8x4xbf16, #tpu.memory_space<vmem>>, vector<1x8x4xbf16>
    %633 = vector.shape_cast %632 : vector<1x8x4xbf16> to vector<8x4xbf16>
    %cst_817 = arith.constant dense<0.000000e+00> : vector<8x128xf32>
    %634 = tpu.matmul %633, %631, %cst_817 {dimension_numbers = #tpu.dot_dimension_numbers<[1], [0], [0], [1], [0, 0, 1, 1], [], []>} : vector<8x4xbf16>, vector<4x128xbf16>, vector<8x128xf32> -> vector<8x128xf32>
    %635 = arith.addf %629, %634 : vector<8x128xf32>
    %c0_818 = arith.constant 0 : index
    %c5_819 = arith.constant 5 : index
    %c0_820 = arith.constant 0 : index
    %c12_821 = arith.constant 12 : index
    %636 = vector.load %arg2[%c0_818, %c5_819, %c0_820, %c12_821] : memref<1x10x4x256xbf16, #tpu.memory_space<vmem>>, vector<1x1x4x128xbf16>
    %637 = vector.shape_cast %636 : vector<1x1x4x128xbf16> to vector<4x128xbf16>
    %c23_822 = arith.constant 23 : index
    %c0_823 = arith.constant 0 : index
    %c0_824 = arith.constant 0 : index
    %638 = vector.load %arg3[%c23_822, %c0_823, %c0_824] : memref<27x8x4xbf16, #tpu.memory_space<vmem>>, vector<1x8x4xbf16>
    %639 = vector.shape_cast %638 : vector<1x8x4xbf16> to vector<8x4xbf16>
    %cst_825 = arith.constant dense<0.000000e+00> : vector<8x128xf32>
    %640 = tpu.matmul %639, %637, %cst_825 {dimension_numbers = #tpu.dot_dimension_numbers<[1], [0], [0], [1], [0, 0, 1, 1], [], []>} : vector<8x4xbf16>, vector<4x128xbf16>, vector<8x128xf32> -> vector<8x128xf32>
    %641 = arith.addf %635, %640 : vector<8x128xf32>
    %c0_826 = arith.constant 0 : index
    %c5_827 = arith.constant 5 : index
    %c0_828 = arith.constant 0 : index
    %c20_829 = arith.constant 20 : index
    %642 = vector.load %arg2[%c0_826, %c5_827, %c0_828, %c20_829] : memref<1x10x4x256xbf16, #tpu.memory_space<vmem>>, vector<1x1x4x128xbf16>
    %643 = vector.shape_cast %642 : vector<1x1x4x128xbf16> to vector<4x128xbf16>
    %c24_830 = arith.constant 24 : index
    %c0_831 = arith.constant 0 : index
    %c0_832 = arith.constant 0 : index
    %644 = vector.load %arg3[%c24_830, %c0_831, %c0_832] : memref<27x8x4xbf16, #tpu.memory_space<vmem>>, vector<1x8x4xbf16>
    %645 = vector.shape_cast %644 : vector<1x8x4xbf16> to vector<8x4xbf16>
    %cst_833 = arith.constant dense<0.000000e+00> : vector<8x128xf32>
    %646 = tpu.matmul %645, %643, %cst_833 {dimension_numbers = #tpu.dot_dimension_numbers<[1], [0], [0], [1], [0, 0, 1, 1], [], []>} : vector<8x4xbf16>, vector<4x128xbf16>, vector<8x128xf32> -> vector<8x128xf32>
    %647 = arith.addf %641, %646 : vector<8x128xf32>
    %c0_834 = arith.constant 0 : index
    %c5_835 = arith.constant 5 : index
    %c0_836 = arith.constant 0 : index
    %c21_837 = arith.constant 21 : index
    %648 = vector.load %arg2[%c0_834, %c5_835, %c0_836, %c21_837] : memref<1x10x4x256xbf16, #tpu.memory_space<vmem>>, vector<1x1x4x128xbf16>
    %649 = vector.shape_cast %648 : vector<1x1x4x128xbf16> to vector<4x128xbf16>
    %c25_838 = arith.constant 25 : index
    %c0_839 = arith.constant 0 : index
    %c0_840 = arith.constant 0 : index
    %650 = vector.load %arg3[%c25_838, %c0_839, %c0_840] : memref<27x8x4xbf16, #tpu.memory_space<vmem>>, vector<1x8x4xbf16>
    %651 = vector.shape_cast %650 : vector<1x8x4xbf16> to vector<8x4xbf16>
    %cst_841 = arith.constant dense<0.000000e+00> : vector<8x128xf32>
    %652 = tpu.matmul %651, %649, %cst_841 {dimension_numbers = #tpu.dot_dimension_numbers<[1], [0], [0], [1], [0, 0, 1, 1], [], []>} : vector<8x4xbf16>, vector<4x128xbf16>, vector<8x128xf32> -> vector<8x128xf32>
    %653 = arith.addf %647, %652 : vector<8x128xf32>
    %c0_842 = arith.constant 0 : index
    %c5_843 = arith.constant 5 : index
    %c0_844 = arith.constant 0 : index
    %c22_845 = arith.constant 22 : index
    %654 = vector.load %arg2[%c0_842, %c5_843, %c0_844, %c22_845] : memref<1x10x4x256xbf16, #tpu.memory_space<vmem>>, vector<1x1x4x128xbf16>
    %655 = vector.shape_cast %654 : vector<1x1x4x128xbf16> to vector<4x128xbf16>
    %c26_846 = arith.constant 26 : index
    %c0_847 = arith.constant 0 : index
    %c0_848 = arith.constant 0 : index
    %656 = vector.load %arg3[%c26_846, %c0_847, %c0_848] : memref<27x8x4xbf16, #tpu.memory_space<vmem>>, vector<1x8x4xbf16>
    %657 = vector.shape_cast %656 : vector<1x8x4xbf16> to vector<8x4xbf16>
    %cst_849 = arith.constant dense<0.000000e+00> : vector<8x128xf32>
    %658 = tpu.matmul %657, %655, %cst_849 {dimension_numbers = #tpu.dot_dimension_numbers<[1], [0], [0], [1], [0, 0, 1, 1], [], []>} : vector<8x4xbf16>, vector<4x128xbf16>, vector<8x128xf32> -> vector<8x128xf32>
    %659 = arith.addf %653, %658 : vector<8x128xf32>
    %660 = vector.broadcast %0 : vector<8x1xf32> to vector<8x128xf32>
    %661 = arith.addf %659, %660 : vector<8x128xf32>
    %c0_850 = arith.constant 0 : index
    %c3_851 = arith.constant 3 : index
    %c0_852 = arith.constant 0 : index
    %c0_853 = arith.constant 0 : index
    %662 = vector.load %arg5[%c0_850, %c3_851, %c0_852, %c0_853] : memref<1x8x8x128xf32, #tpu.memory_space<vmem>>, vector<1x1x8x128xf32>
    %663 = vector.shape_cast %662 : vector<1x1x8x128xf32> to vector<8x128xf32>
    %664 = vector.shape_cast %661 : vector<8x128xf32> to vector<1x1x8x128xf32>
    tpu.vector_store %arg5[%c0_850, %c3_851, %c0_852, %c0_853], %664 {strides = array<i32>} : memref<1x8x8x128xf32, #tpu.memory_space<vmem>>, vector<1x1x8x128xf32>,
    %c0_854 = arith.constant 0 : index
    %c4_855 = arith.constant 4 : index
    %c0_856 = arith.constant 0 : index
    %c0_857 = arith.constant 0 : index
    %665 = vector.load %arg2[%c0_854, %c4_855, %c0_856, %c0_857] : memref<1x10x4x256xbf16, #tpu.memory_space<vmem>>, vector<1x1x4x128xbf16>
    %666 = vector.shape_cast %665 : vector<1x1x4x128xbf16> to vector<4x128xbf16>
    %c0_858 = arith.constant 0 : index
    %c0_859 = arith.constant 0 : index
    %c0_860 = arith.constant 0 : index
    %667 = vector.load %arg3[%c0_858, %c0_859, %c0_860] : memref<27x8x4xbf16, #tpu.memory_space<vmem>>, vector<1x8x4xbf16>
    %668 = vector.shape_cast %667 : vector<1x8x4xbf16> to vector<8x4xbf16>
    %cst_861 = arith.constant dense<0.000000e+00> : vector<8x128xf32>
    %669 = tpu.matmul %668, %666, %cst_861 {dimension_numbers = #tpu.dot_dimension_numbers<[1], [0], [0], [1], [0, 0, 1, 1], [], []>} : vector<8x4xbf16>, vector<4x128xbf16>, vector<8x128xf32> -> vector<8x128xf32>
    %c0_862 = arith.constant 0 : index
    %c4_863 = arith.constant 4 : index
    %c0_864 = arith.constant 0 : index
    %c1_865 = arith.constant 1 : index
    %670 = vector.load %arg2[%c0_862, %c4_863, %c0_864, %c1_865] : memref<1x10x4x256xbf16, #tpu.memory_space<vmem>>, vector<1x1x4x128xbf16>
    %671 = vector.shape_cast %670 : vector<1x1x4x128xbf16> to vector<4x128xbf16>
    %c1_866 = arith.constant 1 : index
    %c0_867 = arith.constant 0 : index
    %c0_868 = arith.constant 0 : index
    %672 = vector.load %arg3[%c1_866, %c0_867, %c0_868] : memref<27x8x4xbf16, #tpu.memory_space<vmem>>, vector<1x8x4xbf16>
    %673 = vector.shape_cast %672 : vector<1x8x4xbf16> to vector<8x4xbf16>
    %cst_869 = arith.constant dense<0.000000e+00> : vector<8x128xf32>
    %674 = tpu.matmul %673, %671, %cst_869 {dimension_numbers = #tpu.dot_dimension_numbers<[1], [0], [0], [1], [0, 0, 1, 1], [], []>} : vector<8x4xbf16>, vector<4x128xbf16>, vector<8x128xf32> -> vector<8x128xf32>
    %675 = arith.addf %669, %674 : vector<8x128xf32>
    %c0_870 = arith.constant 0 : index
    %c4_871 = arith.constant 4 : index
    %c0_872 = arith.constant 0 : index
    %c2_873 = arith.constant 2 : index
    %676 = vector.load %arg2[%c0_870, %c4_871, %c0_872, %c2_873] : memref<1x10x4x256xbf16, #tpu.memory_space<vmem>>, vector<1x1x4x128xbf16>
    %677 = vector.shape_cast %676 : vector<1x1x4x128xbf16> to vector<4x128xbf16>
    %c2_874 = arith.constant 2 : index
    %c0_875 = arith.constant 0 : index
    %c0_876 = arith.constant 0 : index
    %678 = vector.load %arg3[%c2_874, %c0_875, %c0_876] : memref<27x8x4xbf16, #tpu.memory_space<vmem>>, vector<1x8x4xbf16>
    %679 = vector.shape_cast %678 : vector<1x8x4xbf16> to vector<8x4xbf16>
    %cst_877 = arith.constant dense<0.000000e+00> : vector<8x128xf32>
    %680 = tpu.matmul %679, %677, %cst_877 {dimension_numbers = #tpu.dot_dimension_numbers<[1], [0], [0], [1], [0, 0, 1, 1], [], []>} : vector<8x4xbf16>, vector<4x128xbf16>, vector<8x128xf32> -> vector<8x128xf32>
    %681 = arith.addf %675, %680 : vector<8x128xf32>
    %c0_878 = arith.constant 0 : index
    %c4_879 = arith.constant 4 : index
    %c0_880 = arith.constant 0 : index
    %c10_881 = arith.constant 10 : index
    %682 = vector.load %arg2[%c0_878, %c4_879, %c0_880, %c10_881] : memref<1x10x4x256xbf16, #tpu.memory_space<vmem>>, vector<1x1x4x128xbf16>
    %683 = vector.shape_cast %682 : vector<1x1x4x128xbf16> to vector<4x128xbf16>
    %c3_882 = arith.constant 3 : index
    %c0_883 = arith.constant 0 : index
    %c0_884 = arith.constant 0 : index
    %684 = vector.load %arg3[%c3_882, %c0_883, %c0_884] : memref<27x8x4xbf16, #tpu.memory_space<vmem>>, vector<1x8x4xbf16>
    %685 = vector.shape_cast %684 : vector<1x8x4xbf16> to vector<8x4xbf16>
    %cst_885 = arith.constant dense<0.000000e+00> : vector<8x128xf32>
    %686 = tpu.matmul %685, %683, %cst_885 {dimension_numbers = #tpu.dot_dimension_numbers<[1], [0], [0], [1], [0, 0, 1, 1], [], []>} : vector<8x4xbf16>, vector<4x128xbf16>, vector<8x128xf32> -> vector<8x128xf32>
    %687 = arith.addf %681, %686 : vector<8x128xf32>
    %c0_886 = arith.constant 0 : index
    %c4_887 = arith.constant 4 : index
    %c0_888 = arith.constant 0 : index
    %c11_889 = arith.constant 11 : index
    %688 = vector.load %arg2[%c0_886, %c4_887, %c0_888, %c11_889] : memref<1x10x4x256xbf16, #tpu.memory_space<vmem>>, vector<1x1x4x128xbf16>
    %689 = vector.shape_cast %688 : vector<1x1x4x128xbf16> to vector<4x128xbf16>
    %c4_890 = arith.constant 4 : index
    %c0_891 = arith.constant 0 : index
    %c0_892 = arith.constant 0 : index
    %690 = vector.load %arg3[%c4_890, %c0_891, %c0_892] : memref<27x8x4xbf16, #tpu.memory_space<vmem>>, vector<1x8x4xbf16>
    %691 = vector.shape_cast %690 : vector<1x8x4xbf16> to vector<8x4xbf16>
    %cst_893 = arith.constant dense<0.000000e+00> : vector<8x128xf32>
    %692 = tpu.matmul %691, %689, %cst_893 {dimension_numbers = #tpu.dot_dimension_numbers<[1], [0], [0], [1], [0, 0, 1, 1], [], []>} : vector<8x4xbf16>, vector<4x128xbf16>, vector<8x128xf32> -> vector<8x128xf32>
    %693 = arith.addf %687, %692 : vector<8x128xf32>
    %c0_894 = arith.constant 0 : index
    %c4_895 = arith.constant 4 : index
    %c0_896 = arith.constant 0 : index
    %c12_897 = arith.constant 12 : index
    %694 = vector.load %arg2[%c0_894, %c4_895, %c0_896, %c12_897] : memref<1x10x4x256xbf16, #tpu.memory_space<vmem>>, vector<1x1x4x128xbf16>
    %695 = vector.shape_cast %694 : vector<1x1x4x128xbf16> to vector<4x128xbf16>
    %c5_898 = arith.constant 5 : index
    %c0_899 = arith.constant 0 : index
    %c0_900 = arith.constant 0 : index
    %696 = vector.load %arg3[%c5_898, %c0_899, %c0_900] : memref<27x8x4xbf16, #tpu.memory_space<vmem>>, vector<1x8x4xbf16>
    %697 = vector.shape_cast %696 : vector<1x8x4xbf16> to vector<8x4xbf16>
    %cst_901 = arith.constant dense<0.000000e+00> : vector<8x128xf32>
    %698 = tpu.matmul %697, %695, %cst_901 {dimension_numbers = #tpu.dot_dimension_numbers<[1], [0], [0], [1], [0, 0, 1, 1], [], []>} : vector<8x4xbf16>, vector<4x128xbf16>, vector<8x128xf32> -> vector<8x128xf32>
    %699 = arith.addf %693, %698 : vector<8x128xf32>
    %c0_902 = arith.constant 0 : index
    %c4_903 = arith.constant 4 : index
    %c0_904 = arith.constant 0 : index
    %c20_905 = arith.constant 20 : index
    %700 = vector.load %arg2[%c0_902, %c4_903, %c0_904, %c20_905] : memref<1x10x4x256xbf16, #tpu.memory_space<vmem>>, vector<1x1x4x128xbf16>
    %701 = vector.shape_cast %700 : vector<1x1x4x128xbf16> to vector<4x128xbf16>
    %c6_906 = arith.constant 6 : index
    %c0_907 = arith.constant 0 : index
    %c0_908 = arith.constant 0 : index
    %702 = vector.load %arg3[%c6_906, %c0_907, %c0_908] : memref<27x8x4xbf16, #tpu.memory_space<vmem>>, vector<1x8x4xbf16>
    %703 = vector.shape_cast %702 : vector<1x8x4xbf16> to vector<8x4xbf16>
    %cst_909 = arith.constant dense<0.000000e+00> : vector<8x128xf32>
    %704 = tpu.matmul %703, %701, %cst_909 {dimension_numbers = #tpu.dot_dimension_numbers<[1], [0], [0], [1], [0, 0, 1, 1], [], []>} : vector<8x4xbf16>, vector<4x128xbf16>, vector<8x128xf32> -> vector<8x128xf32>
    %705 = arith.addf %699, %704 : vector<8x128xf32>
    %c0_910 = arith.constant 0 : index
    %c4_911 = arith.constant 4 : index
    %c0_912 = arith.constant 0 : index
    %c21_913 = arith.constant 21 : index
    %706 = vector.load %arg2[%c0_910, %c4_911, %c0_912, %c21_913] : memref<1x10x4x256xbf16, #tpu.memory_space<vmem>>, vector<1x1x4x128xbf16>
    %707 = vector.shape_cast %706 : vector<1x1x4x128xbf16> to vector<4x128xbf16>
    %c7_914 = arith.constant 7 : index
    %c0_915 = arith.constant 0 : index
    %c0_916 = arith.constant 0 : index
    %708 = vector.load %arg3[%c7_914, %c0_915, %c0_916] : memref<27x8x4xbf16, #tpu.memory_space<vmem>>, vector<1x8x4xbf16>
    %709 = vector.shape_cast %708 : vector<1x8x4xbf16> to vector<8x4xbf16>
    %cst_917 = arith.constant dense<0.000000e+00> : vector<8x128xf32>
    %710 = tpu.matmul %709, %707, %cst_917 {dimension_numbers = #tpu.dot_dimension_numbers<[1], [0], [0], [1], [0, 0, 1, 1], [], []>} : vector<8x4xbf16>, vector<4x128xbf16>, vector<8x128xf32> -> vector<8x128xf32>
    %711 = arith.addf %705, %710 : vector<8x128xf32>
    %c0_918 = arith.constant 0 : index
    %c4_919 = arith.constant 4 : index
    %c0_920 = arith.constant 0 : index
    %c22_921 = arith.constant 22 : index
    %712 = vector.load %arg2[%c0_918, %c4_919, %c0_920, %c22_921] : memref<1x10x4x256xbf16, #tpu.memory_space<vmem>>, vector<1x1x4x128xbf16>
    %713 = vector.shape_cast %712 : vector<1x1x4x128xbf16> to vector<4x128xbf16>
    %c8_922 = arith.constant 8 : index
    %c0_923 = arith.constant 0 : index
    %c0_924 = arith.constant 0 : index
    %714 = vector.load %arg3[%c8_922, %c0_923, %c0_924] : memref<27x8x4xbf16, #tpu.memory_space<vmem>>, vector<1x8x4xbf16>
    %715 = vector.shape_cast %714 : vector<1x8x4xbf16> to vector<8x4xbf16>
    %cst_925 = arith.constant dense<0.000000e+00> : vector<8x128xf32>
    %716 = tpu.matmul %715, %713, %cst_925 {dimension_numbers = #tpu.dot_dimension_numbers<[1], [0], [0], [1], [0, 0, 1, 1], [], []>} : vector<8x4xbf16>, vector<4x128xbf16>, vector<8x128xf32> -> vector<8x128xf32>
    %717 = arith.addf %711, %716 : vector<8x128xf32>
    %c0_926 = arith.constant 0 : index
    %c5_927 = arith.constant 5 : index
    %c0_928 = arith.constant 0 : index
    %c0_929 = arith.constant 0 : index
    %718 = vector.load %arg2[%c0_926, %c5_927, %c0_928, %c0_929] : memref<1x10x4x256xbf16, #tpu.memory_space<vmem>>, vector<1x1x4x128xbf16>
    %719 = vector.shape_cast %718 : vector<1x1x4x128xbf16> to vector<4x128xbf16>
    %c9_930 = arith.constant 9 : index
    %c0_931 = arith.constant 0 : index
    %c0_932 = arith.constant 0 : index
    %720 = vector.load %arg3[%c9_930, %c0_931, %c0_932] : memref<27x8x4xbf16, #tpu.memory_space<vmem>>, vector<1x8x4xbf16>
    %721 = vector.shape_cast %720 : vector<1x8x4xbf16> to vector<8x4xbf16>
    %cst_933 = arith.constant dense<0.000000e+00> : vector<8x128xf32>
    %722 = tpu.matmul %721, %719, %cst_933 {dimension_numbers = #tpu.dot_dimension_numbers<[1], [0], [0], [1], [0, 0, 1, 1], [], []>} : vector<8x4xbf16>, vector<4x128xbf16>, vector<8x128xf32> -> vector<8x128xf32>
    %723 = arith.addf %717, %722 : vector<8x128xf32>
    %c0_934 = arith.constant 0 : index
    %c5_935 = arith.constant 5 : index
    %c0_936 = arith.constant 0 : index
    %c1_937 = arith.constant 1 : index
    %724 = vector.load %arg2[%c0_934, %c5_935, %c0_936, %c1_937] : memref<1x10x4x256xbf16, #tpu.memory_space<vmem>>, vector<1x1x4x128xbf16>
    %725 = vector.shape_cast %724 : vector<1x1x4x128xbf16> to vector<4x128xbf16>
    %c10_938 = arith.constant 10 : index
    %c0_939 = arith.constant 0 : index
    %c0_940 = arith.constant 0 : index
    %726 = vector.load %arg3[%c10_938, %c0_939, %c0_940] : memref<27x8x4xbf16, #tpu.memory_space<vmem>>, vector<1x8x4xbf16>
    %727 = vector.shape_cast %726 : vector<1x8x4xbf16> to vector<8x4xbf16>
    %cst_941 = arith.constant dense<0.000000e+00> : vector<8x128xf32>
    %728 = tpu.matmul %727, %725, %cst_941 {dimension_numbers = #tpu.dot_dimension_numbers<[1], [0], [0], [1], [0, 0, 1, 1], [], []>} : vector<8x4xbf16>, vector<4x128xbf16>, vector<8x128xf32> -> vector<8x128xf32>
    %729 = arith.addf %723, %728 : vector<8x128xf32>
    %c0_942 = arith.constant 0 : index
    %c5_943 = arith.constant 5 : index
    %c0_944 = arith.constant 0 : index
    %c2_945 = arith.constant 2 : index
    %730 = vector.load %arg2[%c0_942, %c5_943, %c0_944, %c2_945] : memref<1x10x4x256xbf16, #tpu.memory_space<vmem>>, vector<1x1x4x128xbf16>
    %731 = vector.shape_cast %730 : vector<1x1x4x128xbf16> to vector<4x128xbf16>
    %c11_946 = arith.constant 11 : index
    %c0_947 = arith.constant 0 : index
    %c0_948 = arith.constant 0 : index
    %732 = vector.load %arg3[%c11_946, %c0_947, %c0_948] : memref<27x8x4xbf16, #tpu.memory_space<vmem>>, vector<1x8x4xbf16>
    %733 = vector.shape_cast %732 : vector<1x8x4xbf16> to vector<8x4xbf16>
    %cst_949 = arith.constant dense<0.000000e+00> : vector<8x128xf32>
    %734 = tpu.matmul %733, %731, %cst_949 {dimension_numbers = #tpu.dot_dimension_numbers<[1], [0], [0], [1], [0, 0, 1, 1], [], []>} : vector<8x4xbf16>, vector<4x128xbf16>, vector<8x128xf32> -> vector<8x128xf32>
    %735 = arith.addf %729, %734 : vector<8x128xf32>
    %c0_950 = arith.constant 0 : index
    %c5_951 = arith.constant 5 : index
    %c0_952 = arith.constant 0 : index
    %c10_953 = arith.constant 10 : index
    %736 = vector.load %arg2[%c0_950, %c5_951, %c0_952, %c10_953] : memref<1x10x4x256xbf16, #tpu.memory_space<vmem>>, vector<1x1x4x128xbf16>
    %737 = vector.shape_cast %736 : vector<1x1x4x128xbf16> to vector<4x128xbf16>
    %c12_954 = arith.constant 12 : index
    %c0_955 = arith.constant 0 : index
    %c0_956 = arith.constant 0 : index
    %738 = vector.load %arg3[%c12_954, %c0_955, %c0_956] : memref<27x8x4xbf16, #tpu.memory_space<vmem>>, vector<1x8x4xbf16>
    %739 = vector.shape_cast %738 : vector<1x8x4xbf16> to vector<8x4xbf16>
    %cst_957 = arith.constant dense<0.000000e+00> : vector<8x128xf32>
    %740 = tpu.matmul %739, %737, %cst_957 {dimension_numbers = #tpu.dot_dimension_numbers<[1], [0], [0], [1], [0, 0, 1, 1], [], []>} : vector<8x4xbf16>, vector<4x128xbf16>, vector<8x128xf32> -> vector<8x128xf32>
    %741 = arith.addf %735, %740 : vector<8x128xf32>
    %c0_958 = arith.constant 0 : index
    %c5_959 = arith.constant 5 : index
    %c0_960 = arith.constant 0 : index
    %c11_961 = arith.constant 11 : index
    %742 = vector.load %arg2[%c0_958, %c5_959, %c0_960, %c11_961] : memref<1x10x4x256xbf16, #tpu.memory_space<vmem>>, vector<1x1x4x128xbf16>
    %743 = vector.shape_cast %742 : vector<1x1x4x128xbf16> to vector<4x128xbf16>
    %c13_962 = arith.constant 13 : index
    %c0_963 = arith.constant 0 : index
    %c0_964 = arith.constant 0 : index
    %744 = vector.load %arg3[%c13_962, %c0_963, %c0_964] : memref<27x8x4xbf16, #tpu.memory_space<vmem>>, vector<1x8x4xbf16>
    %745 = vector.shape_cast %744 : vector<1x8x4xbf16> to vector<8x4xbf16>
    %cst_965 = arith.constant dense<0.000000e+00> : vector<8x128xf32>
    %746 = tpu.matmul %745, %743, %cst_965 {dimension_numbers = #tpu.dot_dimension_numbers<[1], [0], [0], [1], [0, 0, 1, 1], [], []>} : vector<8x4xbf16>, vector<4x128xbf16>, vector<8x128xf32> -> vector<8x128xf32>
    %747 = arith.addf %741, %746 : vector<8x128xf32>
    %c0_966 = arith.constant 0 : index
    %c5_967 = arith.constant 5 : index
    %c0_968 = arith.constant 0 : index
    %c12_969 = arith.constant 12 : index
    %748 = vector.load %arg2[%c0_966, %c5_967, %c0_968, %c12_969] : memref<1x10x4x256xbf16, #tpu.memory_space<vmem>>, vector<1x1x4x128xbf16>
    %749 = vector.shape_cast %748 : vector<1x1x4x128xbf16> to vector<4x128xbf16>
    %c14_970 = arith.constant 14 : index
    %c0_971 = arith.constant 0 : index
    %c0_972 = arith.constant 0 : index
    %750 = vector.load %arg3[%c14_970, %c0_971, %c0_972] : memref<27x8x4xbf16, #tpu.memory_space<vmem>>, vector<1x8x4xbf16>
    %751 = vector.shape_cast %750 : vector<1x8x4xbf16> to vector<8x4xbf16>
    %cst_973 = arith.constant dense<0.000000e+00> : vector<8x128xf32>
    %752 = tpu.matmul %751, %749, %cst_973 {dimension_numbers = #tpu.dot_dimension_numbers<[1], [0], [0], [1], [0, 0, 1, 1], [], []>} : vector<8x4xbf16>, vector<4x128xbf16>, vector<8x128xf32> -> vector<8x128xf32>
    %753 = arith.addf %747, %752 : vector<8x128xf32>
    %c0_974 = arith.constant 0 : index
    %c5_975 = arith.constant 5 : index
    %c0_976 = arith.constant 0 : index
    %c20_977 = arith.constant 20 : index
    %754 = vector.load %arg2[%c0_974, %c5_975, %c0_976, %c20_977] : memref<1x10x4x256xbf16, #tpu.memory_space<vmem>>, vector<1x1x4x128xbf16>
    %755 = vector.shape_cast %754 : vector<1x1x4x128xbf16> to vector<4x128xbf16>
    %c15_978 = arith.constant 15 : index
    %c0_979 = arith.constant 0 : index
    %c0_980 = arith.constant 0 : index
    %756 = vector.load %arg3[%c15_978, %c0_979, %c0_980] : memref<27x8x4xbf16, #tpu.memory_space<vmem>>, vector<1x8x4xbf16>
    %757 = vector.shape_cast %756 : vector<1x8x4xbf16> to vector<8x4xbf16>
    %cst_981 = arith.constant dense<0.000000e+00> : vector<8x128xf32>
    %758 = tpu.matmul %757, %755, %cst_981 {dimension_numbers = #tpu.dot_dimension_numbers<[1], [0], [0], [1], [0, 0, 1, 1], [], []>} : vector<8x4xbf16>, vector<4x128xbf16>, vector<8x128xf32> -> vector<8x128xf32>
    %759 = arith.addf %753, %758 : vector<8x128xf32>
    %c0_982 = arith.constant 0 : index
    %c5_983 = arith.constant 5 : index
    %c0_984 = arith.constant 0 : index
    %c21_985 = arith.constant 21 : index
    %760 = vector.load %arg2[%c0_982, %c5_983, %c0_984, %c21_985] : memref<1x10x4x256xbf16, #tpu.memory_space<vmem>>, vector<1x1x4x128xbf16>
    %761 = vector.shape_cast %760 : vector<1x1x4x128xbf16> to vector<4x128xbf16>
    %c16_986 = arith.constant 16 : index
    %c0_987 = arith.constant 0 : index
    %c0_988 = arith.constant 0 : index
    %762 = vector.load %arg3[%c16_986, %c0_987, %c0_988] : memref<27x8x4xbf16, #tpu.memory_space<vmem>>, vector<1x8x4xbf16>
    %763 = vector.shape_cast %762 : vector<1x8x4xbf16> to vector<8x4xbf16>
    %cst_989 = arith.constant dense<0.000000e+00> : vector<8x128xf32>
    %764 = tpu.matmul %763, %761, %cst_989 {dimension_numbers = #tpu.dot_dimension_numbers<[1], [0], [0], [1], [0, 0, 1, 1], [], []>} : vector<8x4xbf16>, vector<4x128xbf16>, vector<8x128xf32> -> vector<8x128xf32>
    %765 = arith.addf %759, %764 : vector<8x128xf32>
    %c0_990 = arith.constant 0 : index
    %c5_991 = arith.constant 5 : index
    %c0_992 = arith.constant 0 : index
    %c22_993 = arith.constant 22 : index
    %766 = vector.load %arg2[%c0_990, %c5_991, %c0_992, %c22_993] : memref<1x10x4x256xbf16, #tpu.memory_space<vmem>>, vector<1x1x4x128xbf16>
    %767 = vector.shape_cast %766 : vector<1x1x4x128xbf16> to vector<4x128xbf16>
    %c17_994 = arith.constant 17 : index
    %c0_995 = arith.constant 0 : index
    %c0_996 = arith.constant 0 : index
    %768 = vector.load %arg3[%c17_994, %c0_995, %c0_996] : memref<27x8x4xbf16, #tpu.memory_space<vmem>>, vector<1x8x4xbf16>
    %769 = vector.shape_cast %768 : vector<1x8x4xbf16> to vector<8x4xbf16>
    %cst_997 = arith.constant dense<0.000000e+00> : vector<8x128xf32>
    %770 = tpu.matmul %769, %767, %cst_997 {dimension_numbers = #tpu.dot_dimension_numbers<[1], [0], [0], [1], [0, 0, 1, 1], [], []>} : vector<8x4xbf16>, vector<4x128xbf16>, vector<8x128xf32> -> vector<8x128xf32>
    %771 = arith.addf %765, %770 : vector<8x128xf32>
    %c0_998 = arith.constant 0 : index
    %c6_999 = arith.constant 6 : index
    %c0_1000 = arith.constant 0 : index
    %c0_1001 = arith.constant 0 : index
    %772 = vector.load %arg2[%c0_998, %c6_999, %c0_1000, %c0_1001] : memref<1x10x4x256xbf16, #tpu.memory_space<vmem>>, vector<1x1x4x128xbf16>
    %773 = vector.shape_cast %772 : vector<1x1x4x128xbf16> to vector<4x128xbf16>
    %c18_1002 = arith.constant 18 : index
    %c0_1003 = arith.constant 0 : index
    %c0_1004 = arith.constant 0 : index
    %774 = vector.load %arg3[%c18_1002, %c0_1003, %c0_1004] : memref<27x8x4xbf16, #tpu.memory_space<vmem>>, vector<1x8x4xbf16>
    %775 = vector.shape_cast %774 : vector<1x8x4xbf16> to vector<8x4xbf16>
    %cst_1005 = arith.constant dense<0.000000e+00> : vector<8x128xf32>
    %776 = tpu.matmul %775, %773, %cst_1005 {dimension_numbers = #tpu.dot_dimension_numbers<[1], [0], [0], [1], [0, 0, 1, 1], [], []>} : vector<8x4xbf16>, vector<4x128xbf16>, vector<8x128xf32> -> vector<8x128xf32>
    %777 = arith.addf %771, %776 : vector<8x128xf32>
    %c0_1006 = arith.constant 0 : index
    %c6_1007 = arith.constant 6 : index
    %c0_1008 = arith.constant 0 : index
    %c1_1009 = arith.constant 1 : index
    %778 = vector.load %arg2[%c0_1006, %c6_1007, %c0_1008, %c1_1009] : memref<1x10x4x256xbf16, #tpu.memory_space<vmem>>, vector<1x1x4x128xbf16>
    %779 = vector.shape_cast %778 : vector<1x1x4x128xbf16> to vector<4x128xbf16>
    %c19_1010 = arith.constant 19 : index
    %c0_1011 = arith.constant 0 : index
    %c0_1012 = arith.constant 0 : index
    %780 = vector.load %arg3[%c19_1010, %c0_1011, %c0_1012] : memref<27x8x4xbf16, #tpu.memory_space<vmem>>, vector<1x8x4xbf16>
    %781 = vector.shape_cast %780 : vector<1x8x4xbf16> to vector<8x4xbf16>
    %cst_1013 = arith.constant dense<0.000000e+00> : vector<8x128xf32>
    %782 = tpu.matmul %781, %779, %cst_1013 {dimension_numbers = #tpu.dot_dimension_numbers<[1], [0], [0], [1], [0, 0, 1, 1], [], []>} : vector<8x4xbf16>, vector<4x128xbf16>, vector<8x128xf32> -> vector<8x128xf32>
    %783 = arith.addf %777, %782 : vector<8x128xf32>
    %c0_1014 = arith.constant 0 : index
    %c6_1015 = arith.constant 6 : index
    %c0_1016 = arith.constant 0 : index
    %c2_1017 = arith.constant 2 : index
    %784 = vector.load %arg2[%c0_1014, %c6_1015, %c0_1016, %c2_1017] : memref<1x10x4x256xbf16, #tpu.memory_space<vmem>>, vector<1x1x4x128xbf16>
    %785 = vector.shape_cast %784 : vector<1x1x4x128xbf16> to vector<4x128xbf16>
    %c20_1018 = arith.constant 20 : index
    %c0_1019 = arith.constant 0 : index
    %c0_1020 = arith.constant 0 : index
    %786 = vector.load %arg3[%c20_1018, %c0_1019, %c0_1020] : memref<27x8x4xbf16, #tpu.memory_space<vmem>>, vector<1x8x4xbf16>
    %787 = vector.shape_cast %786 : vector<1x8x4xbf16> to vector<8x4xbf16>
    %cst_1021 = arith.constant dense<0.000000e+00> : vector<8x128xf32>
    %788 = tpu.matmul %787, %785, %cst_1021 {dimension_numbers = #tpu.dot_dimension_numbers<[1], [0], [0], [1], [0, 0, 1, 1], [], []>} : vector<8x4xbf16>, vector<4x128xbf16>, vector<8x128xf32> -> vector<8x128xf32>
    %789 = arith.addf %783, %788 : vector<8x128xf32>
    %c0_1022 = arith.constant 0 : index
    %c6_1023 = arith.constant 6 : index
    %c0_1024 = arith.constant 0 : index
    %c10_1025 = arith.constant 10 : index
    %790 = vector.load %arg2[%c0_1022, %c6_1023, %c0_1024, %c10_1025] : memref<1x10x4x256xbf16, #tpu.memory_space<vmem>>, vector<1x1x4x128xbf16>
    %791 = vector.shape_cast %790 : vector<1x1x4x128xbf16> to vector<4x128xbf16>
    %c21_1026 = arith.constant 21 : index
    %c0_1027 = arith.constant 0 : index
    %c0_1028 = arith.constant 0 : index
    %792 = vector.load %arg3[%c21_1026, %c0_1027, %c0_1028] : memref<27x8x4xbf16, #tpu.memory_space<vmem>>, vector<1x8x4xbf16>
    %793 = vector.shape_cast %792 : vector<1x8x4xbf16> to vector<8x4xbf16>
    %cst_1029 = arith.constant dense<0.000000e+00> : vector<8x128xf32>
    %794 = tpu.matmul %793, %791, %cst_1029 {dimension_numbers = #tpu.dot_dimension_numbers<[1], [0], [0], [1], [0, 0, 1, 1], [], []>} : vector<8x4xbf16>, vector<4x128xbf16>, vector<8x128xf32> -> vector<8x128xf32>
    %795 = arith.addf %789, %794 : vector<8x128xf32>
    %c0_1030 = arith.constant 0 : index
    %c6_1031 = arith.constant 6 : index
    %c0_1032 = arith.constant 0 : index
    %c11_1033 = arith.constant 11 : index
    %796 = vector.load %arg2[%c0_1030, %c6_1031, %c0_1032, %c11_1033] : memref<1x10x4x256xbf16, #tpu.memory_space<vmem>>, vector<1x1x4x128xbf16>
    %797 = vector.shape_cast %796 : vector<1x1x4x128xbf16> to vector<4x128xbf16>
    %c22_1034 = arith.constant 22 : index
    %c0_1035 = arith.constant 0 : index
    %c0_1036 = arith.constant 0 : index
    %798 = vector.load %arg3[%c22_1034, %c0_1035, %c0_1036] : memref<27x8x4xbf16, #tpu.memory_space<vmem>>, vector<1x8x4xbf16>
    %799 = vector.shape_cast %798 : vector<1x8x4xbf16> to vector<8x4xbf16>
    %cst_1037 = arith.constant dense<0.000000e+00> : vector<8x128xf32>
    %800 = tpu.matmul %799, %797, %cst_1037 {dimension_numbers = #tpu.dot_dimension_numbers<[1], [0], [0], [1], [0, 0, 1, 1], [], []>} : vector<8x4xbf16>, vector<4x128xbf16>, vector<8x128xf32> -> vector<8x128xf32>
    %801 = arith.addf %795, %800 : vector<8x128xf32>
    %c0_1038 = arith.constant 0 : index
    %c6_1039 = arith.constant 6 : index
    %c0_1040 = arith.constant 0 : index
    %c12_1041 = arith.constant 12 : index
    %802 = vector.load %arg2[%c0_1038, %c6_1039, %c0_1040, %c12_1041] : memref<1x10x4x256xbf16, #tpu.memory_space<vmem>>, vector<1x1x4x128xbf16>
    %803 = vector.shape_cast %802 : vector<1x1x4x128xbf16> to vector<4x128xbf16>
    %c23_1042 = arith.constant 23 : index
    %c0_1043 = arith.constant 0 : index
    %c0_1044 = arith.constant 0 : index
    %804 = vector.load %arg3[%c23_1042, %c0_1043, %c0_1044] : memref<27x8x4xbf16, #tpu.memory_space<vmem>>, vector<1x8x4xbf16>
    %805 = vector.shape_cast %804 : vector<1x8x4xbf16> to vector<8x4xbf16>
    %cst_1045 = arith.constant dense<0.000000e+00> : vector<8x128xf32>
    %806 = tpu.matmul %805, %803, %cst_1045 {dimension_numbers = #tpu.dot_dimension_numbers<[1], [0], [0], [1], [0, 0, 1, 1], [], []>} : vector<8x4xbf16>, vector<4x128xbf16>, vector<8x128xf32> -> vector<8x128xf32>
    %807 = arith.addf %801, %806 : vector<8x128xf32>
    %c0_1046 = arith.constant 0 : index
    %c6_1047 = arith.constant 6 : index
    %c0_1048 = arith.constant 0 : index
    %c20_1049 = arith.constant 20 : index
    %808 = vector.load %arg2[%c0_1046, %c6_1047, %c0_1048, %c20_1049] : memref<1x10x4x256xbf16, #tpu.memory_space<vmem>>, vector<1x1x4x128xbf16>
    %809 = vector.shape_cast %808 : vector<1x1x4x128xbf16> to vector<4x128xbf16>
    %c24_1050 = arith.constant 24 : index
    %c0_1051 = arith.constant 0 : index
    %c0_1052 = arith.constant 0 : index
    %810 = vector.load %arg3[%c24_1050, %c0_1051, %c0_1052] : memref<27x8x4xbf16, #tpu.memory_space<vmem>>, vector<1x8x4xbf16>
    %811 = vector.shape_cast %810 : vector<1x8x4xbf16> to vector<8x4xbf16>
    %cst_1053 = arith.constant dense<0.000000e+00> : vector<8x128xf32>
    %812 = tpu.matmul %811, %809, %cst_1053 {dimension_numbers = #tpu.dot_dimension_numbers<[1], [0], [0], [1], [0, 0, 1, 1], [], []>} : vector<8x4xbf16>, vector<4x128xbf16>, vector<8x128xf32> -> vector<8x128xf32>
    %813 = arith.addf %807, %812 : vector<8x128xf32>
    %c0_1054 = arith.constant 0 : index
    %c6_1055 = arith.constant 6 : index
    %c0_1056 = arith.constant 0 : index
    %c21_1057 = arith.constant 21 : index
    %814 = vector.load %arg2[%c0_1054, %c6_1055, %c0_1056, %c21_1057] : memref<1x10x4x256xbf16, #tpu.memory_space<vmem>>, vector<1x1x4x128xbf16>
    %815 = vector.shape_cast %814 : vector<1x1x4x128xbf16> to vector<4x128xbf16>
    %c25_1058 = arith.constant 25 : index
    %c0_1059 = arith.constant 0 : index
    %c0_1060 = arith.constant 0 : index
    %816 = vector.load %arg3[%c25_1058, %c0_1059, %c0_1060] : memref<27x8x4xbf16, #tpu.memory_space<vmem>>, vector<1x8x4xbf16>
    %817 = vector.shape_cast %816 : vector<1x8x4xbf16> to vector<8x4xbf16>
    %cst_1061 = arith.constant dense<0.000000e+00> : vector<8x128xf32>
    %818 = tpu.matmul %817, %815, %cst_1061 {dimension_numbers = #tpu.dot_dimension_numbers<[1], [0], [0], [1], [0, 0, 1, 1], [], []>} : vector<8x4xbf16>, vector<4x128xbf16>, vector<8x128xf32> -> vector<8x128xf32>
    %819 = arith.addf %813, %818 : vector<8x128xf32>
    %c0_1062 = arith.constant 0 : index
    %c6_1063 = arith.constant 6 : index
    %c0_1064 = arith.constant 0 : index
    %c22_1065 = arith.constant 22 : index
    %820 = vector.load %arg2[%c0_1062, %c6_1063, %c0_1064, %c22_1065] : memref<1x10x4x256xbf16, #tpu.memory_space<vmem>>, vector<1x1x4x128xbf16>
    %821 = vector.shape_cast %820 : vector<1x1x4x128xbf16> to vector<4x128xbf16>
    %c26_1066 = arith.constant 26 : index
    %c0_1067 = arith.constant 0 : index
    %c0_1068 = arith.constant 0 : index
    %822 = vector.load %arg3[%c26_1066, %c0_1067, %c0_1068] : memref<27x8x4xbf16, #tpu.memory_space<vmem>>, vector<1x8x4xbf16>
    %823 = vector.shape_cast %822 : vector<1x8x4xbf16> to vector<8x4xbf16>
    %cst_1069 = arith.constant dense<0.000000e+00> : vector<8x128xf32>
    %824 = tpu.matmul %823, %821, %cst_1069 {dimension_numbers = #tpu.dot_dimension_numbers<[1], [0], [0], [1], [0, 0, 1, 1], [], []>} : vector<8x4xbf16>, vector<4x128xbf16>, vector<8x128xf32> -> vector<8x128xf32>
    %825 = arith.addf %819, %824 : vector<8x128xf32>
    %826 = vector.broadcast %0 : vector<8x1xf32> to vector<8x128xf32>
    %827 = arith.addf %825, %826 : vector<8x128xf32>
    %c0_1070 = arith.constant 0 : index
    %c4_1071 = arith.constant 4 : index
    %c0_1072 = arith.constant 0 : index
    %c0_1073 = arith.constant 0 : index
    %828 = vector.load %arg5[%c0_1070, %c4_1071, %c0_1072, %c0_1073] : memref<1x8x8x128xf32, #tpu.memory_space<vmem>>, vector<1x1x8x128xf32>
    %829 = vector.shape_cast %828 : vector<1x1x8x128xf32> to vector<8x128xf32>
    %830 = vector.shape_cast %827 : vector<8x128xf32> to vector<1x1x8x128xf32>
    tpu.vector_store %arg5[%c0_1070, %c4_1071, %c0_1072, %c0_1073], %830 {strides = array<i32>} : memref<1x8x8x128xf32, #tpu.memory_space<vmem>>, vector<1x1x8x128xf32>,
    %c0_1074 = arith.constant 0 : index
    %c5_1075 = arith.constant 5 : index
    %c0_1076 = arith.constant 0 : index
    %c0_1077 = arith.constant 0 : index
    %831 = vector.load %arg2[%c0_1074, %c5_1075, %c0_1076, %c0_1077] : memref<1x10x4x256xbf16, #tpu.memory_space<vmem>>, vector<1x1x4x128xbf16>
    %832 = vector.shape_cast %831 : vector<1x1x4x128xbf16> to vector<4x128xbf16>
    %c0_1078 = arith.constant 0 : index
    %c0_1079 = arith.constant 0 : index
    %c0_1080 = arith.constant 0 : index
    %833 = vector.load %arg3[%c0_1078, %c0_1079, %c0_1080] : memref<27x8x4xbf16, #tpu.memory_space<vmem>>, vector<1x8x4xbf16>
    %834 = vector.shape_cast %833 : vector<1x8x4xbf16> to vector<8x4xbf16>
    %cst_1081 = arith.constant dense<0.000000e+00> : vector<8x128xf32>
    %835 = tpu.matmul %834, %832, %cst_1081 {dimension_numbers = #tpu.dot_dimension_numbers<[1], [0], [0], [1], [0, 0, 1, 1], [], []>} : vector<8x4xbf16>, vector<4x128xbf16>, vector<8x128xf32> -> vector<8x128xf32>
    %c0_1082 = arith.constant 0 : index
    %c5_1083 = arith.constant 5 : index
    %c0_1084 = arith.constant 0 : index
    %c1_1085 = arith.constant 1 : index
    %836 = vector.load %arg2[%c0_1082, %c5_1083, %c0_1084, %c1_1085] : memref<1x10x4x256xbf16, #tpu.memory_space<vmem>>, vector<1x1x4x128xbf16>
    %837 = vector.shape_cast %836 : vector<1x1x4x128xbf16> to vector<4x128xbf16>
    %c1_1086 = arith.constant 1 : index
    %c0_1087 = arith.constant 0 : index
    %c0_1088 = arith.constant 0 : index
    %838 = vector.load %arg3[%c1_1086, %c0_1087, %c0_1088] : memref<27x8x4xbf16, #tpu.memory_space<vmem>>, vector<1x8x4xbf16>
    %839 = vector.shape_cast %838 : vector<1x8x4xbf16> to vector<8x4xbf16>
    %cst_1089 = arith.constant dense<0.000000e+00> : vector<8x128xf32>
    %840 = tpu.matmul %839, %837, %cst_1089 {dimension_numbers = #tpu.dot_dimension_numbers<[1], [0], [0], [1], [0, 0, 1, 1], [], []>} : vector<8x4xbf16>, vector<4x128xbf16>, vector<8x128xf32> -> vector<8x128xf32>
    %841 = arith.addf %835, %840 : vector<8x128xf32>
    %c0_1090 = arith.constant 0 : index
    %c5_1091 = arith.constant 5 : index
    %c0_1092 = arith.constant 0 : index
    %c2_1093 = arith.constant 2 : index
    %842 = vector.load %arg2[%c0_1090, %c5_1091, %c0_1092, %c2_1093] : memref<1x10x4x256xbf16, #tpu.memory_space<vmem>>, vector<1x1x4x128xbf16>
    %843 = vector.shape_cast %842 : vector<1x1x4x128xbf16> to vector<4x128xbf16>
    %c2_1094 = arith.constant 2 : index
    %c0_1095 = arith.constant 0 : index
    %c0_1096 = arith.constant 0 : index
    %844 = vector.load %arg3[%c2_1094, %c0_1095, %c0_1096] : memref<27x8x4xbf16, #tpu.memory_space<vmem>>, vector<1x8x4xbf16>
    %845 = vector.shape_cast %844 : vector<1x8x4xbf16> to vector<8x4xbf16>
    %cst_1097 = arith.constant dense<0.000000e+00> : vector<8x128xf32>
    %846 = tpu.matmul %845, %843, %cst_1097 {dimension_numbers = #tpu.dot_dimension_numbers<[1], [0], [0], [1], [0, 0, 1, 1], [], []>} : vector<8x4xbf16>, vector<4x128xbf16>, vector<8x128xf32> -> vector<8x128xf32>
    %847 = arith.addf %841, %846 : vector<8x128xf32>
    %c0_1098 = arith.constant 0 : index
    %c5_1099 = arith.constant 5 : index
    %c0_1100 = arith.constant 0 : index
    %c10_1101 = arith.constant 10 : index
    %848 = vector.load %arg2[%c0_1098, %c5_1099, %c0_1100, %c10_1101] : memref<1x10x4x256xbf16, #tpu.memory_space<vmem>>, vector<1x1x4x128xbf16>
    %849 = vector.shape_cast %848 : vector<1x1x4x128xbf16> to vector<4x128xbf16>
    %c3_1102 = arith.constant 3 : index
    %c0_1103 = arith.constant 0 : index
    %c0_1104 = arith.constant 0 : index
    %850 = vector.load %arg3[%c3_1102, %c0_1103, %c0_1104] : memref<27x8x4xbf16, #tpu.memory_space<vmem>>, vector<1x8x4xbf16>
    %851 = vector.shape_cast %850 : vector<1x8x4xbf16> to vector<8x4xbf16>
    %cst_1105 = arith.constant dense<0.000000e+00> : vector<8x128xf32>
    %852 = tpu.matmul %851, %849, %cst_1105 {dimension_numbers = #tpu.dot_dimension_numbers<[1], [0], [0], [1], [0, 0, 1, 1], [], []>} : vector<8x4xbf16>, vector<4x128xbf16>, vector<8x128xf32> -> vector<8x128xf32>
    %853 = arith.addf %847, %852 : vector<8x128xf32>
    %c0_1106 = arith.constant 0 : index
    %c5_1107 = arith.constant 5 : index
    %c0_1108 = arith.constant 0 : index
    %c11_1109 = arith.constant 11 : index
    %854 = vector.load %arg2[%c0_1106, %c5_1107, %c0_1108, %c11_1109] : memref<1x10x4x256xbf16, #tpu.memory_space<vmem>>, vector<1x1x4x128xbf16>
    %855 = vector.shape_cast %854 : vector<1x1x4x128xbf16> to vector<4x128xbf16>
    %c4_1110 = arith.constant 4 : index
    %c0_1111 = arith.constant 0 : index
    %c0_1112 = arith.constant 0 : index
    %856 = vector.load %arg3[%c4_1110, %c0_1111, %c0_1112] : memref<27x8x4xbf16, #tpu.memory_space<vmem>>, vector<1x8x4xbf16>
    %857 = vector.shape_cast %856 : vector<1x8x4xbf16> to vector<8x4xbf16>
    %cst_1113 = arith.constant dense<0.000000e+00> : vector<8x128xf32>
    %858 = tpu.matmul %857, %855, %cst_1113 {dimension_numbers = #tpu.dot_dimension_numbers<[1], [0], [0], [1], [0, 0, 1, 1], [], []>} : vector<8x4xbf16>, vector<4x128xbf16>, vector<8x128xf32> -> vector<8x128xf32>
    %859 = arith.addf %853, %858 : vector<8x128xf32>
    %c0_1114 = arith.constant 0 : index
    %c5_1115 = arith.constant 5 : index
    %c0_1116 = arith.constant 0 : index
    %c12_1117 = arith.constant 12 : index
    %860 = vector.load %arg2[%c0_1114, %c5_1115, %c0_1116, %c12_1117] : memref<1x10x4x256xbf16, #tpu.memory_space<vmem>>, vector<1x1x4x128xbf16>
    %861 = vector.shape_cast %860 : vector<1x1x4x128xbf16> to vector<4x128xbf16>
    %c5_1118 = arith.constant 5 : index
    %c0_1119 = arith.constant 0 : index
    %c0_1120 = arith.constant 0 : index
    %862 = vector.load %arg3[%c5_1118, %c0_1119, %c0_1120] : memref<27x8x4xbf16, #tpu.memory_space<vmem>>, vector<1x8x4xbf16>
    %863 = vector.shape_cast %862 : vector<1x8x4xbf16> to vector<8x4xbf16>
    %cst_1121 = arith.constant dense<0.000000e+00> : vector<8x128xf32>
    %864 = tpu.matmul %863, %861, %cst_1121 {dimension_numbers = #tpu.dot_dimension_numbers<[1], [0], [0], [1], [0, 0, 1, 1], [], []>} : vector<8x4xbf16>, vector<4x128xbf16>, vector<8x128xf32> -> vector<8x128xf32>
    %865 = arith.addf %859, %864 : vector<8x128xf32>
    %c0_1122 = arith.constant 0 : index
    %c5_1123 = arith.constant 5 : index
    %c0_1124 = arith.constant 0 : index
    %c20_1125 = arith.constant 20 : index
    %866 = vector.load %arg2[%c0_1122, %c5_1123, %c0_1124, %c20_1125] : memref<1x10x4x256xbf16, #tpu.memory_space<vmem>>, vector<1x1x4x128xbf16>
    %867 = vector.shape_cast %866 : vector<1x1x4x128xbf16> to vector<4x128xbf16>
    %c6_1126 = arith.constant 6 : index
    %c0_1127 = arith.constant 0 : index
    %c0_1128 = arith.constant 0 : index
    %868 = vector.load %arg3[%c6_1126, %c0_1127, %c0_1128] : memref<27x8x4xbf16, #tpu.memory_space<vmem>>, vector<1x8x4xbf16>
    %869 = vector.shape_cast %868 : vector<1x8x4xbf16> to vector<8x4xbf16>
    %cst_1129 = arith.constant dense<0.000000e+00> : vector<8x128xf32>
    %870 = tpu.matmul %869, %867, %cst_1129 {dimension_numbers = #tpu.dot_dimension_numbers<[1], [0], [0], [1], [0, 0, 1, 1], [], []>} : vector<8x4xbf16>, vector<4x128xbf16>, vector<8x128xf32> -> vector<8x128xf32>
    %871 = arith.addf %865, %870 : vector<8x128xf32>
    %c0_1130 = arith.constant 0 : index
    %c5_1131 = arith.constant 5 : index
    %c0_1132 = arith.constant 0 : index
    %c21_1133 = arith.constant 21 : index
    %872 = vector.load %arg2[%c0_1130, %c5_1131, %c0_1132, %c21_1133] : memref<1x10x4x256xbf16, #tpu.memory_space<vmem>>, vector<1x1x4x128xbf16>
    %873 = vector.shape_cast %872 : vector<1x1x4x128xbf16> to vector<4x128xbf16>
    %c7_1134 = arith.constant 7 : index
    %c0_1135 = arith.constant 0 : index
    %c0_1136 = arith.constant 0 : index
    %874 = vector.load %arg3[%c7_1134, %c0_1135, %c0_1136] : memref<27x8x4xbf16, #tpu.memory_space<vmem>>, vector<1x8x4xbf16>
    %875 = vector.shape_cast %874 : vector<1x8x4xbf16> to vector<8x4xbf16>
    %cst_1137 = arith.constant dense<0.000000e+00> : vector<8x128xf32>
    %876 = tpu.matmul %875, %873, %cst_1137 {dimension_numbers = #tpu.dot_dimension_numbers<[1], [0], [0], [1], [0, 0, 1, 1], [], []>} : vector<8x4xbf16>, vector<4x128xbf16>, vector<8x128xf32> -> vector<8x128xf32>
    %877 = arith.addf %871, %876 : vector<8x128xf32>
    %c0_1138 = arith.constant 0 : index
    %c5_1139 = arith.constant 5 : index
    %c0_1140 = arith.constant 0 : index
    %c22_1141 = arith.constant 22 : index
    %878 = vector.load %arg2[%c0_1138, %c5_1139, %c0_1140, %c22_1141] : memref<1x10x4x256xbf16, #tpu.memory_space<vmem>>, vector<1x1x4x128xbf16>
    %879 = vector.shape_cast %878 : vector<1x1x4x128xbf16> to vector<4x128xbf16>
    %c8_1142 = arith.constant 8 : index
    %c0_1143 = arith.constant 0 : index
    %c0_1144 = arith.constant 0 : index
    %880 = vector.load %arg3[%c8_1142, %c0_1143, %c0_1144] : memref<27x8x4xbf16, #tpu.memory_space<vmem>>, vector<1x8x4xbf16>
    %881 = vector.shape_cast %880 : vector<1x8x4xbf16> to vector<8x4xbf16>
    %cst_1145 = arith.constant dense<0.000000e+00> : vector<8x128xf32>
    %882 = tpu.matmul %881, %879, %cst_1145 {dimension_numbers = #tpu.dot_dimension_numbers<[1], [0], [0], [1], [0, 0, 1, 1], [], []>} : vector<8x4xbf16>, vector<4x128xbf16>, vector<8x128xf32> -> vector<8x128xf32>
    %883 = arith.addf %877, %882 : vector<8x128xf32>
    %c0_1146 = arith.constant 0 : index
    %c6_1147 = arith.constant 6 : index
    %c0_1148 = arith.constant 0 : index
    %c0_1149 = arith.constant 0 : index
    %884 = vector.load %arg2[%c0_1146, %c6_1147, %c0_1148, %c0_1149] : memref<1x10x4x256xbf16, #tpu.memory_space<vmem>>, vector<1x1x4x128xbf16>
    %885 = vector.shape_cast %884 : vector<1x1x4x128xbf16> to vector<4x128xbf16>
    %c9_1150 = arith.constant 9 : index
    %c0_1151 = arith.constant 0 : index
    %c0_1152 = arith.constant 0 : index
    %886 = vector.load %arg3[%c9_1150, %c0_1151, %c0_1152] : memref<27x8x4xbf16, #tpu.memory_space<vmem>>, vector<1x8x4xbf16>
    %887 = vector.shape_cast %886 : vector<1x8x4xbf16> to vector<8x4xbf16>
    %cst_1153 = arith.constant dense<0.000000e+00> : vector<8x128xf32>
    %888 = tpu.matmul %887, %885, %cst_1153 {dimension_numbers = #tpu.dot_dimension_numbers<[1], [0], [0], [1], [0, 0, 1, 1], [], []>} : vector<8x4xbf16>, vector<4x128xbf16>, vector<8x128xf32> -> vector<8x128xf32>
    %889 = arith.addf %883, %888 : vector<8x128xf32>
    %c0_1154 = arith.constant 0 : index
    %c6_1155 = arith.constant 6 : index
    %c0_1156 = arith.constant 0 : index
    %c1_1157 = arith.constant 1 : index
    %890 = vector.load %arg2[%c0_1154, %c6_1155, %c0_1156, %c1_1157] : memref<1x10x4x256xbf16, #tpu.memory_space<vmem>>, vector<1x1x4x128xbf16>
    %891 = vector.shape_cast %890 : vector<1x1x4x128xbf16> to vector<4x128xbf16>
    %c10_1158 = arith.constant 10 : index
    %c0_1159 = arith.constant 0 : index
    %c0_1160 = arith.constant 0 : index
    %892 = vector.load %arg3[%c10_1158, %c0_1159, %c0_1160] : memref<27x8x4xbf16, #tpu.memory_space<vmem>>, vector<1x8x4xbf16>
    %893 = vector.shape_cast %892 : vector<1x8x4xbf16> to vector<8x4xbf16>
    %cst_1161 = arith.constant dense<0.000000e+00> : vector<8x128xf32>
    %894 = tpu.matmul %893, %891, %cst_1161 {dimension_numbers = #tpu.dot_dimension_numbers<[1], [0], [0], [1], [0, 0, 1, 1], [], []>} : vector<8x4xbf16>, vector<4x128xbf16>, vector<8x128xf32> -> vector<8x128xf32>
    %895 = arith.addf %889, %894 : vector<8x128xf32>
    %c0_1162 = arith.constant 0 : index
    %c6_1163 = arith.constant 6 : index
    %c0_1164 = arith.constant 0 : index
    %c2_1165 = arith.constant 2 : index
    %896 = vector.load %arg2[%c0_1162, %c6_1163, %c0_1164, %c2_1165] : memref<1x10x4x256xbf16, #tpu.memory_space<vmem>>, vector<1x1x4x128xbf16>
    %897 = vector.shape_cast %896 : vector<1x1x4x128xbf16> to vector<4x128xbf16>
    %c11_1166 = arith.constant 11 : index
    %c0_1167 = arith.constant 0 : index
    %c0_1168 = arith.constant 0 : index
    %898 = vector.load %arg3[%c11_1166, %c0_1167, %c0_1168] : memref<27x8x4xbf16, #tpu.memory_space<vmem>>, vector<1x8x4xbf16>
    %899 = vector.shape_cast %898 : vector<1x8x4xbf16> to vector<8x4xbf16>
    %cst_1169 = arith.constant dense<0.000000e+00> : vector<8x128xf32>
    %900 = tpu.matmul %899, %897, %cst_1169 {dimension_numbers = #tpu.dot_dimension_numbers<[1], [0], [0], [1], [0, 0, 1, 1], [], []>} : vector<8x4xbf16>, vector<4x128xbf16>, vector<8x128xf32> -> vector<8x128xf32>
    %901 = arith.addf %895, %900 : vector<8x128xf32>
    %c0_1170 = arith.constant 0 : index
    %c6_1171 = arith.constant 6 : index
    %c0_1172 = arith.constant 0 : index
    %c10_1173 = arith.constant 10 : index
    %902 = vector.load %arg2[%c0_1170, %c6_1171, %c0_1172, %c10_1173] : memref<1x10x4x256xbf16, #tpu.memory_space<vmem>>, vector<1x1x4x128xbf16>
    %903 = vector.shape_cast %902 : vector<1x1x4x128xbf16> to vector<4x128xbf16>
    %c12_1174 = arith.constant 12 : index
    %c0_1175 = arith.constant 0 : index
    %c0_1176 = arith.constant 0 : index
    %904 = vector.load %arg3[%c12_1174, %c0_1175, %c0_1176] : memref<27x8x4xbf16, #tpu.memory_space<vmem>>, vector<1x8x4xbf16>
    %905 = vector.shape_cast %904 : vector<1x8x4xbf16> to vector<8x4xbf16>
    %cst_1177 = arith.constant dense<0.000000e+00> : vector<8x128xf32>
    %906 = tpu.matmul %905, %903, %cst_1177 {dimension_numbers = #tpu.dot_dimension_numbers<[1], [0], [0], [1], [0, 0, 1, 1], [], []>} : vector<8x4xbf16>, vector<4x128xbf16>, vector<8x128xf32> -> vector<8x128xf32>
    %907 = arith.addf %901, %906 : vector<8x128xf32>
    %c0_1178 = arith.constant 0 : index
    %c6_1179 = arith.constant 6 : index
    %c0_1180 = arith.constant 0 : index
    %c11_1181 = arith.constant 11 : index
    %908 = vector.load %arg2[%c0_1178, %c6_1179, %c0_1180, %c11_1181] : memref<1x10x4x256xbf16, #tpu.memory_space<vmem>>, vector<1x1x4x128xbf16>
    %909 = vector.shape_cast %908 : vector<1x1x4x128xbf16> to vector<4x128xbf16>
    %c13_1182 = arith.constant 13 : index
    %c0_1183 = arith.constant 0 : index
    %c0_1184 = arith.constant 0 : index
    %910 = vector.load %arg3[%c13_1182, %c0_1183, %c0_1184] : memref<27x8x4xbf16, #tpu.memory_space<vmem>>, vector<1x8x4xbf16>
    %911 = vector.shape_cast %910 : vector<1x8x4xbf16> to vector<8x4xbf16>
    %cst_1185 = arith.constant dense<0.000000e+00> : vector<8x128xf32>
    %912 = tpu.matmul %911, %909, %cst_1185 {dimension_numbers = #tpu.dot_dimension_numbers<[1], [0], [0], [1], [0, 0, 1, 1], [], []>} : vector<8x4xbf16>, vector<4x128xbf16>, vector<8x128xf32> -> vector<8x128xf32>
    %913 = arith.addf %907, %912 : vector<8x128xf32>
    %c0_1186 = arith.constant 0 : index
    %c6_1187 = arith.constant 6 : index
    %c0_1188 = arith.constant 0 : index
    %c12_1189 = arith.constant 12 : index
    %914 = vector.load %arg2[%c0_1186, %c6_1187, %c0_1188, %c12_1189] : memref<1x10x4x256xbf16, #tpu.memory_space<vmem>>, vector<1x1x4x128xbf16>
    %915 = vector.shape_cast %914 : vector<1x1x4x128xbf16> to vector<4x128xbf16>
    %c14_1190 = arith.constant 14 : index
    %c0_1191 = arith.constant 0 : index
    %c0_1192 = arith.constant 0 : index
    %916 = vector.load %arg3[%c14_1190, %c0_1191, %c0_1192] : memref<27x8x4xbf16, #tpu.memory_space<vmem>>, vector<1x8x4xbf16>
    %917 = vector.shape_cast %916 : vector<1x8x4xbf16> to vector<8x4xbf16>
    %cst_1193 = arith.constant dense<0.000000e+00> : vector<8x128xf32>
    %918 = tpu.matmul %917, %915, %cst_1193 {dimension_numbers = #tpu.dot_dimension_numbers<[1], [0], [0], [1], [0, 0, 1, 1], [], []>} : vector<8x4xbf16>, vector<4x128xbf16>, vector<8x128xf32> -> vector<8x128xf32>
    %919 = arith.addf %913, %918 : vector<8x128xf32>
    %c0_1194 = arith.constant 0 : index
    %c6_1195 = arith.constant 6 : index
    %c0_1196 = arith.constant 0 : index
    %c20_1197 = arith.constant 20 : index
    %920 = vector.load %arg2[%c0_1194, %c6_1195, %c0_1196, %c20_1197] : memref<1x10x4x256xbf16, #tpu.memory_space<vmem>>, vector<1x1x4x128xbf16>
    %921 = vector.shape_cast %920 : vector<1x1x4x128xbf16> to vector<4x128xbf16>
    %c15_1198 = arith.constant 15 : index
    %c0_1199 = arith.constant 0 : index
    %c0_1200 = arith.constant 0 : index
    %922 = vector.load %arg3[%c15_1198, %c0_1199, %c0_1200] : memref<27x8x4xbf16, #tpu.memory_space<vmem>>, vector<1x8x4xbf16>
    %923 = vector.shape_cast %922 : vector<1x8x4xbf16> to vector<8x4xbf16>
    %cst_1201 = arith.constant dense<0.000000e+00> : vector<8x128xf32>
    %924 = tpu.matmul %923, %921, %cst_1201 {dimension_numbers = #tpu.dot_dimension_numbers<[1], [0], [0], [1], [0, 0, 1, 1], [], []>} : vector<8x4xbf16>, vector<4x128xbf16>, vector<8x128xf32> -> vector<8x128xf32>
    %925 = arith.addf %919, %924 : vector<8x128xf32>
    %c0_1202 = arith.constant 0 : index
    %c6_1203 = arith.constant 6 : index
    %c0_1204 = arith.constant 0 : index
    %c21_1205 = arith.constant 21 : index
    %926 = vector.load %arg2[%c0_1202, %c6_1203, %c0_1204, %c21_1205] : memref<1x10x4x256xbf16, #tpu.memory_space<vmem>>, vector<1x1x4x128xbf16>
    %927 = vector.shape_cast %926 : vector<1x1x4x128xbf16> to vector<4x128xbf16>
    %c16_1206 = arith.constant 16 : index
    %c0_1207 = arith.constant 0 : index
    %c0_1208 = arith.constant 0 : index
    %928 = vector.load %arg3[%c16_1206, %c0_1207, %c0_1208] : memref<27x8x4xbf16, #tpu.memory_space<vmem>>, vector<1x8x4xbf16>
    %929 = vector.shape_cast %928 : vector<1x8x4xbf16> to vector<8x4xbf16>
    %cst_1209 = arith.constant dense<0.000000e+00> : vector<8x128xf32>
    %930 = tpu.matmul %929, %927, %cst_1209 {dimension_numbers = #tpu.dot_dimension_numbers<[1], [0], [0], [1], [0, 0, 1, 1], [], []>} : vector<8x4xbf16>, vector<4x128xbf16>, vector<8x128xf32> -> vector<8x128xf32>
    %931 = arith.addf %925, %930 : vector<8x128xf32>
    %c0_1210 = arith.constant 0 : index
    %c6_1211 = arith.constant 6 : index
    %c0_1212 = arith.constant 0 : index
    %c22_1213 = arith.constant 22 : index
    %932 = vector.load %arg2[%c0_1210, %c6_1211, %c0_1212, %c22_1213] : memref<1x10x4x256xbf16, #tpu.memory_space<vmem>>, vector<1x1x4x128xbf16>
    %933 = vector.shape_cast %932 : vector<1x1x4x128xbf16> to vector<4x128xbf16>
    %c17_1214 = arith.constant 17 : index
    %c0_1215 = arith.constant 0 : index
    %c0_1216 = arith.constant 0 : index
    %934 = vector.load %arg3[%c17_1214, %c0_1215, %c0_1216] : memref<27x8x4xbf16, #tpu.memory_space<vmem>>, vector<1x8x4xbf16>
    %935 = vector.shape_cast %934 : vector<1x8x4xbf16> to vector<8x4xbf16>
    %cst_1217 = arith.constant dense<0.000000e+00> : vector<8x128xf32>
    %936 = tpu.matmul %935, %933, %cst_1217 {dimension_numbers = #tpu.dot_dimension_numbers<[1], [0], [0], [1], [0, 0, 1, 1], [], []>} : vector<8x4xbf16>, vector<4x128xbf16>, vector<8x128xf32> -> vector<8x128xf32>
    %937 = arith.addf %931, %936 : vector<8x128xf32>
    %c0_1218 = arith.constant 0 : index
    %c7_1219 = arith.constant 7 : index
    %c0_1220 = arith.constant 0 : index
    %c0_1221 = arith.constant 0 : index
    %938 = vector.load %arg2[%c0_1218, %c7_1219, %c0_1220, %c0_1221] : memref<1x10x4x256xbf16, #tpu.memory_space<vmem>>, vector<1x1x4x128xbf16>
    %939 = vector.shape_cast %938 : vector<1x1x4x128xbf16> to vector<4x128xbf16>
    %c18_1222 = arith.constant 18 : index
    %c0_1223 = arith.constant 0 : index
    %c0_1224 = arith.constant 0 : index
    %940 = vector.load %arg3[%c18_1222, %c0_1223, %c0_1224] : memref<27x8x4xbf16, #tpu.memory_space<vmem>>, vector<1x8x4xbf16>
    %941 = vector.shape_cast %940 : vector<1x8x4xbf16> to vector<8x4xbf16>
    %cst_1225 = arith.constant dense<0.000000e+00> : vector<8x128xf32>
    %942 = tpu.matmul %941, %939, %cst_1225 {dimension_numbers = #tpu.dot_dimension_numbers<[1], [0], [0], [1], [0, 0, 1, 1], [], []>} : vector<8x4xbf16>, vector<4x128xbf16>, vector<8x128xf32> -> vector<8x128xf32>
    %943 = arith.addf %937, %942 : vector<8x128xf32>
    %c0_1226 = arith.constant 0 : index
    %c7_1227 = arith.constant 7 : index
    %c0_1228 = arith.constant 0 : index
    %c1_1229 = arith.constant 1 : index
    %944 = vector.load %arg2[%c0_1226, %c7_1227, %c0_1228, %c1_1229] : memref<1x10x4x256xbf16, #tpu.memory_space<vmem>>, vector<1x1x4x128xbf16>
    %945 = vector.shape_cast %944 : vector<1x1x4x128xbf16> to vector<4x128xbf16>
    %c19_1230 = arith.constant 19 : index
    %c0_1231 = arith.constant 0 : index
    %c0_1232 = arith.constant 0 : index
    %946 = vector.load %arg3[%c19_1230, %c0_1231, %c0_1232] : memref<27x8x4xbf16, #tpu.memory_space<vmem>>, vector<1x8x4xbf16>
    %947 = vector.shape_cast %946 : vector<1x8x4xbf16> to vector<8x4xbf16>
    %cst_1233 = arith.constant dense<0.000000e+00> : vector<8x128xf32>
    %948 = tpu.matmul %947, %945, %cst_1233 {dimension_numbers = #tpu.dot_dimension_numbers<[1], [0], [0], [1], [0, 0, 1, 1], [], []>} : vector<8x4xbf16>, vector<4x128xbf16>, vector<8x128xf32> -> vector<8x128xf32>
    %949 = arith.addf %943, %948 : vector<8x128xf32>
    %c0_1234 = arith.constant 0 : index
    %c7_1235 = arith.constant 7 : index
    %c0_1236 = arith.constant 0 : index
    %c2_1237 = arith.constant 2 : index
    %950 = vector.load %arg2[%c0_1234, %c7_1235, %c0_1236, %c2_1237] : memref<1x10x4x256xbf16, #tpu.memory_space<vmem>>, vector<1x1x4x128xbf16>
    %951 = vector.shape_cast %950 : vector<1x1x4x128xbf16> to vector<4x128xbf16>
    %c20_1238 = arith.constant 20 : index
    %c0_1239 = arith.constant 0 : index
    %c0_1240 = arith.constant 0 : index
    %952 = vector.load %arg3[%c20_1238, %c0_1239, %c0_1240] : memref<27x8x4xbf16, #tpu.memory_space<vmem>>, vector<1x8x4xbf16>
    %953 = vector.shape_cast %952 : vector<1x8x4xbf16> to vector<8x4xbf16>
    %cst_1241 = arith.constant dense<0.000000e+00> : vector<8x128xf32>
    %954 = tpu.matmul %953, %951, %cst_1241 {dimension_numbers = #tpu.dot_dimension_numbers<[1], [0], [0], [1], [0, 0, 1, 1], [], []>} : vector<8x4xbf16>, vector<4x128xbf16>, vector<8x128xf32> -> vector<8x128xf32>
    %955 = arith.addf %949, %954 : vector<8x128xf32>
    %c0_1242 = arith.constant 0 : index
    %c7_1243 = arith.constant 7 : index
    %c0_1244 = arith.constant 0 : index
    %c10_1245 = arith.constant 10 : index
    %956 = vector.load %arg2[%c0_1242, %c7_1243, %c0_1244, %c10_1245] : memref<1x10x4x256xbf16, #tpu.memory_space<vmem>>, vector<1x1x4x128xbf16>
    %957 = vector.shape_cast %956 : vector<1x1x4x128xbf16> to vector<4x128xbf16>
    %c21_1246 = arith.constant 21 : index
    %c0_1247 = arith.constant 0 : index
    %c0_1248 = arith.constant 0 : index
    %958 = vector.load %arg3[%c21_1246, %c0_1247, %c0_1248] : memref<27x8x4xbf16, #tpu.memory_space<vmem>>, vector<1x8x4xbf16>
    %959 = vector.shape_cast %958 : vector<1x8x4xbf16> to vector<8x4xbf16>
    %cst_1249 = arith.constant dense<0.000000e+00> : vector<8x128xf32>
    %960 = tpu.matmul %959, %957, %cst_1249 {dimension_numbers = #tpu.dot_dimension_numbers<[1], [0], [0], [1], [0, 0, 1, 1], [], []>} : vector<8x4xbf16>, vector<4x128xbf16>, vector<8x128xf32> -> vector<8x128xf32>
    %961 = arith.addf %955, %960 : vector<8x128xf32>
    %c0_1250 = arith.constant 0 : index
    %c7_1251 = arith.constant 7 : index
    %c0_1252 = arith.constant 0 : index
    %c11_1253 = arith.constant 11 : index
    %962 = vector.load %arg2[%c0_1250, %c7_1251, %c0_1252, %c11_1253] : memref<1x10x4x256xbf16, #tpu.memory_space<vmem>>, vector<1x1x4x128xbf16>
    %963 = vector.shape_cast %962 : vector<1x1x4x128xbf16> to vector<4x128xbf16>
    %c22_1254 = arith.constant 22 : index
    %c0_1255 = arith.constant 0 : index
    %c0_1256 = arith.constant 0 : index
    %964 = vector.load %arg3[%c22_1254, %c0_1255, %c0_1256] : memref<27x8x4xbf16, #tpu.memory_space<vmem>>, vector<1x8x4xbf16>
    %965 = vector.shape_cast %964 : vector<1x8x4xbf16> to vector<8x4xbf16>
    %cst_1257 = arith.constant dense<0.000000e+00> : vector<8x128xf32>
    %966 = tpu.matmul %965, %963, %cst_1257 {dimension_numbers = #tpu.dot_dimension_numbers<[1], [0], [0], [1], [0, 0, 1, 1], [], []>} : vector<8x4xbf16>, vector<4x128xbf16>, vector<8x128xf32> -> vector<8x128xf32>
    %967 = arith.addf %961, %966 : vector<8x128xf32>
    %c0_1258 = arith.constant 0 : index
    %c7_1259 = arith.constant 7 : index
    %c0_1260 = arith.constant 0 : index
    %c12_1261 = arith.constant 12 : index
    %968 = vector.load %arg2[%c0_1258, %c7_1259, %c0_1260, %c12_1261] : memref<1x10x4x256xbf16, #tpu.memory_space<vmem>>, vector<1x1x4x128xbf16>
    %969 = vector.shape_cast %968 : vector<1x1x4x128xbf16> to vector<4x128xbf16>
    %c23_1262 = arith.constant 23 : index
    %c0_1263 = arith.constant 0 : index
    %c0_1264 = arith.constant 0 : index
    %970 = vector.load %arg3[%c23_1262, %c0_1263, %c0_1264] : memref<27x8x4xbf16, #tpu.memory_space<vmem>>, vector<1x8x4xbf16>
    %971 = vector.shape_cast %970 : vector<1x8x4xbf16> to vector<8x4xbf16>
    %cst_1265 = arith.constant dense<0.000000e+00> : vector<8x128xf32>
    %972 = tpu.matmul %971, %969, %cst_1265 {dimension_numbers = #tpu.dot_dimension_numbers<[1], [0], [0], [1], [0, 0, 1, 1], [], []>} : vector<8x4xbf16>, vector<4x128xbf16>, vector<8x128xf32> -> vector<8x128xf32>
    %973 = arith.addf %967, %972 : vector<8x128xf32>
    %c0_1266 = arith.constant 0 : index
    %c7_1267 = arith.constant 7 : index
    %c0_1268 = arith.constant 0 : index
    %c20_1269 = arith.constant 20 : index
    %974 = vector.load %arg2[%c0_1266, %c7_1267, %c0_1268, %c20_1269] : memref<1x10x4x256xbf16, #tpu.memory_space<vmem>>, vector<1x1x4x128xbf16>
    %975 = vector.shape_cast %974 : vector<1x1x4x128xbf16> to vector<4x128xbf16>
    %c24_1270 = arith.constant 24 : index
    %c0_1271 = arith.constant 0 : index
    %c0_1272 = arith.constant 0 : index
    %976 = vector.load %arg3[%c24_1270, %c0_1271, %c0_1272] : memref<27x8x4xbf16, #tpu.memory_space<vmem>>, vector<1x8x4xbf16>
    %977 = vector.shape_cast %976 : vector<1x8x4xbf16> to vector<8x4xbf16>
    %cst_1273 = arith.constant dense<0.000000e+00> : vector<8x128xf32>
    %978 = tpu.matmul %977, %975, %cst_1273 {dimension_numbers = #tpu.dot_dimension_numbers<[1], [0], [0], [1], [0, 0, 1, 1], [], []>} : vector<8x4xbf16>, vector<4x128xbf16>, vector<8x128xf32> -> vector<8x128xf32>
    %979 = arith.addf %973, %978 : vector<8x128xf32>
    %c0_1274 = arith.constant 0 : index
    %c7_1275 = arith.constant 7 : index
    %c0_1276 = arith.constant 0 : index
    %c21_1277 = arith.constant 21 : index
    %980 = vector.load %arg2[%c0_1274, %c7_1275, %c0_1276, %c21_1277] : memref<1x10x4x256xbf16, #tpu.memory_space<vmem>>, vector<1x1x4x128xbf16>
    %981 = vector.shape_cast %980 : vector<1x1x4x128xbf16> to vector<4x128xbf16>
    %c25_1278 = arith.constant 25 : index
    %c0_1279 = arith.constant 0 : index
    %c0_1280 = arith.constant 0 : index
    %982 = vector.load %arg3[%c25_1278, %c0_1279, %c0_1280] : memref<27x8x4xbf16, #tpu.memory_space<vmem>>, vector<1x8x4xbf16>
    %983 = vector.shape_cast %982 : vector<1x8x4xbf16> to vector<8x4xbf16>
    %cst_1281 = arith.constant dense<0.000000e+00> : vector<8x128xf32>
    %984 = tpu.matmul %983, %981, %cst_1281 {dimension_numbers = #tpu.dot_dimension_numbers<[1], [0], [0], [1], [0, 0, 1, 1], [], []>} : vector<8x4xbf16>, vector<4x128xbf16>, vector<8x128xf32> -> vector<8x128xf32>
    %985 = arith.addf %979, %984 : vector<8x128xf32>
    %c0_1282 = arith.constant 0 : index
    %c7_1283 = arith.constant 7 : index
    %c0_1284 = arith.constant 0 : index
    %c22_1285 = arith.constant 22 : index
    %986 = vector.load %arg2[%c0_1282, %c7_1283, %c0_1284, %c22_1285] : memref<1x10x4x256xbf16, #tpu.memory_space<vmem>>, vector<1x1x4x128xbf16>
    %987 = vector.shape_cast %986 : vector<1x1x4x128xbf16> to vector<4x128xbf16>
    %c26_1286 = arith.constant 26 : index
    %c0_1287 = arith.constant 0 : index
    %c0_1288 = arith.constant 0 : index
    %988 = vector.load %arg3[%c26_1286, %c0_1287, %c0_1288] : memref<27x8x4xbf16, #tpu.memory_space<vmem>>, vector<1x8x4xbf16>
    %989 = vector.shape_cast %988 : vector<1x8x4xbf16> to vector<8x4xbf16>
    %cst_1289 = arith.constant dense<0.000000e+00> : vector<8x128xf32>
    %990 = tpu.matmul %989, %987, %cst_1289 {dimension_numbers = #tpu.dot_dimension_numbers<[1], [0], [0], [1], [0, 0, 1, 1], [], []>} : vector<8x4xbf16>, vector<4x128xbf16>, vector<8x128xf32> -> vector<8x128xf32>
    %991 = arith.addf %985, %990 : vector<8x128xf32>
    %992 = vector.broadcast %0 : vector<8x1xf32> to vector<8x128xf32>
    %993 = arith.addf %991, %992 : vector<8x128xf32>
    %c0_1290 = arith.constant 0 : index
    %c5_1291 = arith.constant 5 : index
    %c0_1292 = arith.constant 0 : index
    %c0_1293 = arith.constant 0 : index
    %994 = vector.load %arg5[%c0_1290, %c5_1291, %c0_1292, %c0_1293] : memref<1x8x8x128xf32, #tpu.memory_space<vmem>>, vector<1x1x8x128xf32>
    %995 = vector.shape_cast %994 : vector<1x1x8x128xf32> to vector<8x128xf32>
    %996 = vector.shape_cast %993 : vector<8x128xf32> to vector<1x1x8x128xf32>
    tpu.vector_store %arg5[%c0_1290, %c5_1291, %c0_1292, %c0_1293], %996 {strides = array<i32>} : memref<1x8x8x128xf32, #tpu.memory_space<vmem>>, vector<1x1x8x128xf32>,
    %c0_1294 = arith.constant 0 : index
    %c6_1295 = arith.constant 6 : index
    %c0_1296 = arith.constant 0 : index
    %c0_1297 = arith.constant 0 : index
    %997 = vector.load %arg2[%c0_1294, %c6_1295, %c0_1296, %c0_1297] : memref<1x10x4x256xbf16, #tpu.memory_space<vmem>>, vector<1x1x4x128xbf16>
    %998 = vector.shape_cast %997 : vector<1x1x4x128xbf16> to vector<4x128xbf16>
    %c0_1298 = arith.constant 0 : index
    %c0_1299 = arith.constant 0 : index
    %c0_1300 = arith.constant 0 : index
    %999 = vector.load %arg3[%c0_1298, %c0_1299, %c0_1300] : memref<27x8x4xbf16, #tpu.memory_space<vmem>>, vector<1x8x4xbf16>
    %1000 = vector.shape_cast %999 : vector<1x8x4xbf16> to vector<8x4xbf16>
    %cst_1301 = arith.constant dense<0.000000e+00> : vector<8x128xf32>
    %1001 = tpu.matmul %1000, %998, %cst_1301 {dimension_numbers = #tpu.dot_dimension_numbers<[1], [0], [0], [1], [0, 0, 1, 1], [], []>} : vector<8x4xbf16>, vector<4x128xbf16>, vector<8x128xf32> -> vector<8x128xf32>
    %c0_1302 = arith.constant 0 : index
    %c6_1303 = arith.constant 6 : index
    %c0_1304 = arith.constant 0 : index
    %c1_1305 = arith.constant 1 : index
    %1002 = vector.load %arg2[%c0_1302, %c6_1303, %c0_1304, %c1_1305] : memref<1x10x4x256xbf16, #tpu.memory_space<vmem>>, vector<1x1x4x128xbf16>
    %1003 = vector.shape_cast %1002 : vector<1x1x4x128xbf16> to vector<4x128xbf16>
    %c1_1306 = arith.constant 1 : index
    %c0_1307 = arith.constant 0 : index
    %c0_1308 = arith.constant 0 : index
    %1004 = vector.load %arg3[%c1_1306, %c0_1307, %c0_1308] : memref<27x8x4xbf16, #tpu.memory_space<vmem>>, vector<1x8x4xbf16>
    %1005 = vector.shape_cast %1004 : vector<1x8x4xbf16> to vector<8x4xbf16>
    %cst_1309 = arith.constant dense<0.000000e+00> : vector<8x128xf32>
    %1006 = tpu.matmul %1005, %1003, %cst_1309 {dimension_numbers = #tpu.dot_dimension_numbers<[1], [0], [0], [1], [0, 0, 1, 1], [], []>} : vector<8x4xbf16>, vector<4x128xbf16>, vector<8x128xf32> -> vector<8x128xf32>
    %1007 = arith.addf %1001, %1006 : vector<8x128xf32>
    %c0_1310 = arith.constant 0 : index
    %c6_1311 = arith.constant 6 : index
    %c0_1312 = arith.constant 0 : index
    %c2_1313 = arith.constant 2 : index
    %1008 = vector.load %arg2[%c0_1310, %c6_1311, %c0_1312, %c2_1313] : memref<1x10x4x256xbf16, #tpu.memory_space<vmem>>, vector<1x1x4x128xbf16>
    %1009 = vector.shape_cast %1008 : vector<1x1x4x128xbf16> to vector<4x128xbf16>
    %c2_1314 = arith.constant 2 : index
    %c0_1315 = arith.constant 0 : index
    %c0_1316 = arith.constant 0 : index
    %1010 = vector.load %arg3[%c2_1314, %c0_1315, %c0_1316] : memref<27x8x4xbf16, #tpu.memory_space<vmem>>, vector<1x8x4xbf16>
    %1011 = vector.shape_cast %1010 : vector<1x8x4xbf16> to vector<8x4xbf16>
    %cst_1317 = arith.constant dense<0.000000e+00> : vector<8x128xf32>
    %1012 = tpu.matmul %1011, %1009, %cst_1317 {dimension_numbers = #tpu.dot_dimension_numbers<[1], [0], [0], [1], [0, 0, 1, 1], [], []>} : vector<8x4xbf16>, vector<4x128xbf16>, vector<8x128xf32> -> vector<8x128xf32>
    %1013 = arith.addf %1007, %1012 : vector<8x128xf32>
    %c0_1318 = arith.constant 0 : index
    %c6_1319 = arith.constant 6 : index
    %c0_1320 = arith.constant 0 : index
    %c10_1321 = arith.constant 10 : index
    %1014 = vector.load %arg2[%c0_1318, %c6_1319, %c0_1320, %c10_1321] : memref<1x10x4x256xbf16, #tpu.memory_space<vmem>>, vector<1x1x4x128xbf16>
    %1015 = vector.shape_cast %1014 : vector<1x1x4x128xbf16> to vector<4x128xbf16>
    %c3_1322 = arith.constant 3 : index
    %c0_1323 = arith.constant 0 : index
    %c0_1324 = arith.constant 0 : index
    %1016 = vector.load %arg3[%c3_1322, %c0_1323, %c0_1324] : memref<27x8x4xbf16, #tpu.memory_space<vmem>>, vector<1x8x4xbf16>
    %1017 = vector.shape_cast %1016 : vector<1x8x4xbf16> to vector<8x4xbf16>
    %cst_1325 = arith.constant dense<0.000000e+00> : vector<8x128xf32>
    %1018 = tpu.matmul %1017, %1015, %cst_1325 {dimension_numbers = #tpu.dot_dimension_numbers<[1], [0], [0], [1], [0, 0, 1, 1], [], []>} : vector<8x4xbf16>, vector<4x128xbf16>, vector<8x128xf32> -> vector<8x128xf32>
    %1019 = arith.addf %1013, %1018 : vector<8x128xf32>
    %c0_1326 = arith.constant 0 : index
    %c6_1327 = arith.constant 6 : index
    %c0_1328 = arith.constant 0 : index
    %c11_1329 = arith.constant 11 : index
    %1020 = vector.load %arg2[%c0_1326, %c6_1327, %c0_1328, %c11_1329] : memref<1x10x4x256xbf16, #tpu.memory_space<vmem>>, vector<1x1x4x128xbf16>
    %1021 = vector.shape_cast %1020 : vector<1x1x4x128xbf16> to vector<4x128xbf16>
    %c4_1330 = arith.constant 4 : index
    %c0_1331 = arith.constant 0 : index
    %c0_1332 = arith.constant 0 : index
    %1022 = vector.load %arg3[%c4_1330, %c0_1331, %c0_1332] : memref<27x8x4xbf16, #tpu.memory_space<vmem>>, vector<1x8x4xbf16>
    %1023 = vector.shape_cast %1022 : vector<1x8x4xbf16> to vector<8x4xbf16>
    %cst_1333 = arith.constant dense<0.000000e+00> : vector<8x128xf32>
    %1024 = tpu.matmul %1023, %1021, %cst_1333 {dimension_numbers = #tpu.dot_dimension_numbers<[1], [0], [0], [1], [0, 0, 1, 1], [], []>} : vector<8x4xbf16>, vector<4x128xbf16>, vector<8x128xf32> -> vector<8x128xf32>
    %1025 = arith.addf %1019, %1024 : vector<8x128xf32>
    %c0_1334 = arith.constant 0 : index
    %c6_1335 = arith.constant 6 : index
    %c0_1336 = arith.constant 0 : index
    %c12_1337 = arith.constant 12 : index
    %1026 = vector.load %arg2[%c0_1334, %c6_1335, %c0_1336, %c12_1337] : memref<1x10x4x256xbf16, #tpu.memory_space<vmem>>, vector<1x1x4x128xbf16>
    %1027 = vector.shape_cast %1026 : vector<1x1x4x128xbf16> to vector<4x128xbf16>
    %c5_1338 = arith.constant 5 : index
    %c0_1339 = arith.constant 0 : index
    %c0_1340 = arith.constant 0 : index
    %1028 = vector.load %arg3[%c5_1338, %c0_1339, %c0_1340] : memref<27x8x4xbf16, #tpu.memory_space<vmem>>, vector<1x8x4xbf16>
    %1029 = vector.shape_cast %1028 : vector<1x8x4xbf16> to vector<8x4xbf16>
    %cst_1341 = arith.constant dense<0.000000e+00> : vector<8x128xf32>
    %1030 = tpu.matmul %1029, %1027, %cst_1341 {dimension_numbers = #tpu.dot_dimension_numbers<[1], [0], [0], [1], [0, 0, 1, 1], [], []>} : vector<8x4xbf16>, vector<4x128xbf16>, vector<8x128xf32> -> vector<8x128xf32>
    %1031 = arith.addf %1025, %1030 : vector<8x128xf32>
    %c0_1342 = arith.constant 0 : index
    %c6_1343 = arith.constant 6 : index
    %c0_1344 = arith.constant 0 : index
    %c20_1345 = arith.constant 20 : index
    %1032 = vector.load %arg2[%c0_1342, %c6_1343, %c0_1344, %c20_1345] : memref<1x10x4x256xbf16, #tpu.memory_space<vmem>>, vector<1x1x4x128xbf16>
    %1033 = vector.shape_cast %1032 : vector<1x1x4x128xbf16> to vector<4x128xbf16>
    %c6_1346 = arith.constant 6 : index
    %c0_1347 = arith.constant 0 : index
    %c0_1348 = arith.constant 0 : index
    %1034 = vector.load %arg3[%c6_1346, %c0_1347, %c0_1348] : memref<27x8x4xbf16, #tpu.memory_space<vmem>>, vector<1x8x4xbf16>
    %1035 = vector.shape_cast %1034 : vector<1x8x4xbf16> to vector<8x4xbf16>
    %cst_1349 = arith.constant dense<0.000000e+00> : vector<8x128xf32>
    %1036 = tpu.matmul %1035, %1033, %cst_1349 {dimension_numbers = #tpu.dot_dimension_numbers<[1], [0], [0], [1], [0, 0, 1, 1], [], []>} : vector<8x4xbf16>, vector<4x128xbf16>, vector<8x128xf32> -> vector<8x128xf32>
    %1037 = arith.addf %1031, %1036 : vector<8x128xf32>
    %c0_1350 = arith.constant 0 : index
    %c6_1351 = arith.constant 6 : index
    %c0_1352 = arith.constant 0 : index
    %c21_1353 = arith.constant 21 : index
    %1038 = vector.load %arg2[%c0_1350, %c6_1351, %c0_1352, %c21_1353] : memref<1x10x4x256xbf16, #tpu.memory_space<vmem>>, vector<1x1x4x128xbf16>
    %1039 = vector.shape_cast %1038 : vector<1x1x4x128xbf16> to vector<4x128xbf16>
    %c7_1354 = arith.constant 7 : index
    %c0_1355 = arith.constant 0 : index
    %c0_1356 = arith.constant 0 : index
    %1040 = vector.load %arg3[%c7_1354, %c0_1355, %c0_1356] : memref<27x8x4xbf16, #tpu.memory_space<vmem>>, vector<1x8x4xbf16>
    %1041 = vector.shape_cast %1040 : vector<1x8x4xbf16> to vector<8x4xbf16>
    %cst_1357 = arith.constant dense<0.000000e+00> : vector<8x128xf32>
    %1042 = tpu.matmul %1041, %1039, %cst_1357 {dimension_numbers = #tpu.dot_dimension_numbers<[1], [0], [0], [1], [0, 0, 1, 1], [], []>} : vector<8x4xbf16>, vector<4x128xbf16>, vector<8x128xf32> -> vector<8x128xf32>
    %1043 = arith.addf %1037, %1042 : vector<8x128xf32>
    %c0_1358 = arith.constant 0 : index
    %c6_1359 = arith.constant 6 : index
    %c0_1360 = arith.constant 0 : index
    %c22_1361 = arith.constant 22 : index
    %1044 = vector.load %arg2[%c0_1358, %c6_1359, %c0_1360, %c22_1361] : memref<1x10x4x256xbf16, #tpu.memory_space<vmem>>, vector<1x1x4x128xbf16>
    %1045 = vector.shape_cast %1044 : vector<1x1x4x128xbf16> to vector<4x128xbf16>
    %c8_1362 = arith.constant 8 : index
    %c0_1363 = arith.constant 0 : index
    %c0_1364 = arith.constant 0 : index
    %1046 = vector.load %arg3[%c8_1362, %c0_1363, %c0_1364] : memref<27x8x4xbf16, #tpu.memory_space<vmem>>, vector<1x8x4xbf16>
    %1047 = vector.shape_cast %1046 : vector<1x8x4xbf16> to vector<8x4xbf16>
    %cst_1365 = arith.constant dense<0.000000e+00> : vector<8x128xf32>
    %1048 = tpu.matmul %1047, %1045, %cst_1365 {dimension_numbers = #tpu.dot_dimension_numbers<[1], [0], [0], [1], [0, 0, 1, 1], [], []>} : vector<8x4xbf16>, vector<4x128xbf16>, vector<8x128xf32> -> vector<8x128xf32>
    %1049 = arith.addf %1043, %1048 : vector<8x128xf32>
    %c0_1366 = arith.constant 0 : index
    %c7_1367 = arith.constant 7 : index
    %c0_1368 = arith.constant 0 : index
    %c0_1369 = arith.constant 0 : index
    %1050 = vector.load %arg2[%c0_1366, %c7_1367, %c0_1368, %c0_1369] : memref<1x10x4x256xbf16, #tpu.memory_space<vmem>>, vector<1x1x4x128xbf16>
    %1051 = vector.shape_cast %1050 : vector<1x1x4x128xbf16> to vector<4x128xbf16>
    %c9_1370 = arith.constant 9 : index
    %c0_1371 = arith.constant 0 : index
    %c0_1372 = arith.constant 0 : index
    %1052 = vector.load %arg3[%c9_1370, %c0_1371, %c0_1372] : memref<27x8x4xbf16, #tpu.memory_space<vmem>>, vector<1x8x4xbf16>
    %1053 = vector.shape_cast %1052 : vector<1x8x4xbf16> to vector<8x4xbf16>
    %cst_1373 = arith.constant dense<0.000000e+00> : vector<8x128xf32>
    %1054 = tpu.matmul %1053, %1051, %cst_1373 {dimension_numbers = #tpu.dot_dimension_numbers<[1], [0], [0], [1], [0, 0, 1, 1], [], []>} : vector<8x4xbf16>, vector<4x128xbf16>, vector<8x128xf32> -> vector<8x128xf32>
    %1055 = arith.addf %1049, %1054 : vector<8x128xf32>
    %c0_1374 = arith.constant 0 : index
    %c7_1375 = arith.constant 7 : index
    %c0_1376 = arith.constant 0 : index
    %c1_1377 = arith.constant 1 : index
    %1056 = vector.load %arg2[%c0_1374, %c7_1375, %c0_1376, %c1_1377] : memref<1x10x4x256xbf16, #tpu.memory_space<vmem>>, vector<1x1x4x128xbf16>
    %1057 = vector.shape_cast %1056 : vector<1x1x4x128xbf16> to vector<4x128xbf16>
    %c10_1378 = arith.constant 10 : index
    %c0_1379 = arith.constant 0 : index
    %c0_1380 = arith.constant 0 : index
    %1058 = vector.load %arg3[%c10_1378, %c0_1379, %c0_1380] : memref<27x8x4xbf16, #tpu.memory_space<vmem>>, vector<1x8x4xbf16>
    %1059 = vector.shape_cast %1058 : vector<1x8x4xbf16> to vector<8x4xbf16>
    %cst_1381 = arith.constant dense<0.000000e+00> : vector<8x128xf32>
    %1060 = tpu.matmul %1059, %1057, %cst_1381 {dimension_numbers = #tpu.dot_dimension_numbers<[1], [0], [0], [1], [0, 0, 1, 1], [], []>} : vector<8x4xbf16>, vector<4x128xbf16>, vector<8x128xf32> -> vector<8x128xf32>
    %1061 = arith.addf %1055, %1060 : vector<8x128xf32>
    %c0_1382 = arith.constant 0 : index
    %c7_1383 = arith.constant 7 : index
    %c0_1384 = arith.constant 0 : index
    %c2_1385 = arith.constant 2 : index
    %1062 = vector.load %arg2[%c0_1382, %c7_1383, %c0_1384, %c2_1385] : memref<1x10x4x256xbf16, #tpu.memory_space<vmem>>, vector<1x1x4x128xbf16>
    %1063 = vector.shape_cast %1062 : vector<1x1x4x128xbf16> to vector<4x128xbf16>
    %c11_1386 = arith.constant 11 : index
    %c0_1387 = arith.constant 0 : index
    %c0_1388 = arith.constant 0 : index
    %1064 = vector.load %arg3[%c11_1386, %c0_1387, %c0_1388] : memref<27x8x4xbf16, #tpu.memory_space<vmem>>, vector<1x8x4xbf16>
    %1065 = vector.shape_cast %1064 : vector<1x8x4xbf16> to vector<8x4xbf16>
    %cst_1389 = arith.constant dense<0.000000e+00> : vector<8x128xf32>
    %1066 = tpu.matmul %1065, %1063, %cst_1389 {dimension_numbers = #tpu.dot_dimension_numbers<[1], [0], [0], [1], [0, 0, 1, 1], [], []>} : vector<8x4xbf16>, vector<4x128xbf16>, vector<8x128xf32> -> vector<8x128xf32>
    %1067 = arith.addf %1061, %1066 : vector<8x128xf32>
    %c0_1390 = arith.constant 0 : index
    %c7_1391 = arith.constant 7 : index
    %c0_1392 = arith.constant 0 : index
    %c10_1393 = arith.constant 10 : index
    %1068 = vector.load %arg2[%c0_1390, %c7_1391, %c0_1392, %c10_1393] : memref<1x10x4x256xbf16, #tpu.memory_space<vmem>>, vector<1x1x4x128xbf16>
    %1069 = vector.shape_cast %1068 : vector<1x1x4x128xbf16> to vector<4x128xbf16>
    %c12_1394 = arith.constant 12 : index
    %c0_1395 = arith.constant 0 : index
    %c0_1396 = arith.constant 0 : index
    %1070 = vector.load %arg3[%c12_1394, %c0_1395, %c0_1396] : memref<27x8x4xbf16, #tpu.memory_space<vmem>>, vector<1x8x4xbf16>
    %1071 = vector.shape_cast %1070 : vector<1x8x4xbf16> to vector<8x4xbf16>
    %cst_1397 = arith.constant dense<0.000000e+00> : vector<8x128xf32>
    %1072 = tpu.matmul %1071, %1069, %cst_1397 {dimension_numbers = #tpu.dot_dimension_numbers<[1], [0], [0], [1], [0, 0, 1, 1], [], []>} : vector<8x4xbf16>, vector<4x128xbf16>, vector<8x128xf32> -> vector<8x128xf32>
    %1073 = arith.addf %1067, %1072 : vector<8x128xf32>
    %c0_1398 = arith.constant 0 : index
    %c7_1399 = arith.constant 7 : index
    %c0_1400 = arith.constant 0 : index
    %c11_1401 = arith.constant 11 : index
    %1074 = vector.load %arg2[%c0_1398, %c7_1399, %c0_1400, %c11_1401] : memref<1x10x4x256xbf16, #tpu.memory_space<vmem>>, vector<1x1x4x128xbf16>
    %1075 = vector.shape_cast %1074 : vector<1x1x4x128xbf16> to vector<4x128xbf16>
    %c13_1402 = arith.constant 13 : index
    %c0_1403 = arith.constant 0 : index
    %c0_1404 = arith.constant 0 : index
    %1076 = vector.load %arg3[%c13_1402, %c0_1403, %c0_1404] : memref<27x8x4xbf16, #tpu.memory_space<vmem>>, vector<1x8x4xbf16>
    %1077 = vector.shape_cast %1076 : vector<1x8x4xbf16> to vector<8x4xbf16>
    %cst_1405 = arith.constant dense<0.000000e+00> : vector<8x128xf32>
    %1078 = tpu.matmul %1077, %1075, %cst_1405 {dimension_numbers = #tpu.dot_dimension_numbers<[1], [0], [0], [1], [0, 0, 1, 1], [], []>} : vector<8x4xbf16>, vector<4x128xbf16>, vector<8x128xf32> -> vector<8x128xf32>
    %1079 = arith.addf %1073, %1078 : vector<8x128xf32>
    %c0_1406 = arith.constant 0 : index
    %c7_1407 = arith.constant 7 : index
    %c0_1408 = arith.constant 0 : index
    %c12_1409 = arith.constant 12 : index
    %1080 = vector.load %arg2[%c0_1406, %c7_1407, %c0_1408, %c12_1409] : memref<1x10x4x256xbf16, #tpu.memory_space<vmem>>, vector<1x1x4x128xbf16>
    %1081 = vector.shape_cast %1080 : vector<1x1x4x128xbf16> to vector<4x128xbf16>
    %c14_1410 = arith.constant 14 : index
    %c0_1411 = arith.constant 0 : index
    %c0_1412 = arith.constant 0 : index
    %1082 = vector.load %arg3[%c14_1410, %c0_1411, %c0_1412] : memref<27x8x4xbf16, #tpu.memory_space<vmem>>, vector<1x8x4xbf16>
    %1083 = vector.shape_cast %1082 : vector<1x8x4xbf16> to vector<8x4xbf16>
    %cst_1413 = arith.constant dense<0.000000e+00> : vector<8x128xf32>
    %1084 = tpu.matmul %1083, %1081, %cst_1413 {dimension_numbers = #tpu.dot_dimension_numbers<[1], [0], [0], [1], [0, 0, 1, 1], [], []>} : vector<8x4xbf16>, vector<4x128xbf16>, vector<8x128xf32> -> vector<8x128xf32>
    %1085 = arith.addf %1079, %1084 : vector<8x128xf32>
    %c0_1414 = arith.constant 0 : index
    %c7_1415 = arith.constant 7 : index
    %c0_1416 = arith.constant 0 : index
    %c20_1417 = arith.constant 20 : index
    %1086 = vector.load %arg2[%c0_1414, %c7_1415, %c0_1416, %c20_1417] : memref<1x10x4x256xbf16, #tpu.memory_space<vmem>>, vector<1x1x4x128xbf16>
    %1087 = vector.shape_cast %1086 : vector<1x1x4x128xbf16> to vector<4x128xbf16>
    %c15_1418 = arith.constant 15 : index
    %c0_1419 = arith.constant 0 : index
    %c0_1420 = arith.constant 0 : index
    %1088 = vector.load %arg3[%c15_1418, %c0_1419, %c0_1420] : memref<27x8x4xbf16, #tpu.memory_space<vmem>>, vector<1x8x4xbf16>
    %1089 = vector.shape_cast %1088 : vector<1x8x4xbf16> to vector<8x4xbf16>
    %cst_1421 = arith.constant dense<0.000000e+00> : vector<8x128xf32>
    %1090 = tpu.matmul %1089, %1087, %cst_1421 {dimension_numbers = #tpu.dot_dimension_numbers<[1], [0], [0], [1], [0, 0, 1, 1], [], []>} : vector<8x4xbf16>, vector<4x128xbf16>, vector<8x128xf32> -> vector<8x128xf32>
    %1091 = arith.addf %1085, %1090 : vector<8x128xf32>
    %c0_1422 = arith.constant 0 : index
    %c7_1423 = arith.constant 7 : index
    %c0_1424 = arith.constant 0 : index
    %c21_1425 = arith.constant 21 : index
    %1092 = vector.load %arg2[%c0_1422, %c7_1423, %c0_1424, %c21_1425] : memref<1x10x4x256xbf16, #tpu.memory_space<vmem>>, vector<1x1x4x128xbf16>
    %1093 = vector.shape_cast %1092 : vector<1x1x4x128xbf16> to vector<4x128xbf16>
    %c16_1426 = arith.constant 16 : index
    %c0_1427 = arith.constant 0 : index
    %c0_1428 = arith.constant 0 : index
    %1094 = vector.load %arg3[%c16_1426, %c0_1427, %c0_1428] : memref<27x8x4xbf16, #tpu.memory_space<vmem>>, vector<1x8x4xbf16>
    %1095 = vector.shape_cast %1094 : vector<1x8x4xbf16> to vector<8x4xbf16>
    %cst_1429 = arith.constant dense<0.000000e+00> : vector<8x128xf32>
    %1096 = tpu.matmul %1095, %1093, %cst_1429 {dimension_numbers = #tpu.dot_dimension_numbers<[1], [0], [0], [1], [0, 0, 1, 1], [], []>} : vector<8x4xbf16>, vector<4x128xbf16>, vector<8x128xf32> -> vector<8x128xf32>
    %1097 = arith.addf %1091, %1096 : vector<8x128xf32>
    %c0_1430 = arith.constant 0 : index
    %c7_1431 = arith.constant 7 : index
    %c0_1432 = arith.constant 0 : index
    %c22_1433 = arith.constant 22 : index
    %1098 = vector.load %arg2[%c0_1430, %c7_1431, %c0_1432, %c22_1433] : memref<1x10x4x256xbf16, #tpu.memory_space<vmem>>, vector<1x1x4x128xbf16>
    %1099 = vector.shape_cast %1098 : vector<1x1x4x128xbf16> to vector<4x128xbf16>
    %c17_1434 = arith.constant 17 : index
    %c0_1435 = arith.constant 0 : index
    %c0_1436 = arith.constant 0 : index
    %1100 = vector.load %arg3[%c17_1434, %c0_1435, %c0_1436] : memref<27x8x4xbf16, #tpu.memory_space<vmem>>, vector<1x8x4xbf16>
    %1101 = vector.shape_cast %1100 : vector<1x8x4xbf16> to vector<8x4xbf16>
    %cst_1437 = arith.constant dense<0.000000e+00> : vector<8x128xf32>
    %1102 = tpu.matmul %1101, %1099, %cst_1437 {dimension_numbers = #tpu.dot_dimension_numbers<[1], [0], [0], [1], [0, 0, 1, 1], [], []>} : vector<8x4xbf16>, vector<4x128xbf16>, vector<8x128xf32> -> vector<8x128xf32>
    %1103 = arith.addf %1097, %1102 : vector<8x128xf32>
    %c0_1438 = arith.constant 0 : index
    %c8_1439 = arith.constant 8 : index
    %c0_1440 = arith.constant 0 : index
    %c0_1441 = arith.constant 0 : index
    %1104 = vector.load %arg2[%c0_1438, %c8_1439, %c0_1440, %c0_1441] : memref<1x10x4x256xbf16, #tpu.memory_space<vmem>>, vector<1x1x4x128xbf16>
    %1105 = vector.shape_cast %1104 : vector<1x1x4x128xbf16> to vector<4x128xbf16>
    %c18_1442 = arith.constant 18 : index
    %c0_1443 = arith.constant 0 : index
    %c0_1444 = arith.constant 0 : index
    %1106 = vector.load %arg3[%c18_1442, %c0_1443, %c0_1444] : memref<27x8x4xbf16, #tpu.memory_space<vmem>>, vector<1x8x4xbf16>
    %1107 = vector.shape_cast %1106 : vector<1x8x4xbf16> to vector<8x4xbf16>
    %cst_1445 = arith.constant dense<0.000000e+00> : vector<8x128xf32>
    %1108 = tpu.matmul %1107, %1105, %cst_1445 {dimension_numbers = #tpu.dot_dimension_numbers<[1], [0], [0], [1], [0, 0, 1, 1], [], []>} : vector<8x4xbf16>, vector<4x128xbf16>, vector<8x128xf32> -> vector<8x128xf32>
    %1109 = arith.addf %1103, %1108 : vector<8x128xf32>
    %c0_1446 = arith.constant 0 : index
    %c8_1447 = arith.constant 8 : index
    %c0_1448 = arith.constant 0 : index
    %c1_1449 = arith.constant 1 : index
    %1110 = vector.load %arg2[%c0_1446, %c8_1447, %c0_1448, %c1_1449] : memref<1x10x4x256xbf16, #tpu.memory_space<vmem>>, vector<1x1x4x128xbf16>
    %1111 = vector.shape_cast %1110 : vector<1x1x4x128xbf16> to vector<4x128xbf16>
    %c19_1450 = arith.constant 19 : index
    %c0_1451 = arith.constant 0 : index
    %c0_1452 = arith.constant 0 : index
    %1112 = vector.load %arg3[%c19_1450, %c0_1451, %c0_1452] : memref<27x8x4xbf16, #tpu.memory_space<vmem>>, vector<1x8x4xbf16>
    %1113 = vector.shape_cast %1112 : vector<1x8x4xbf16> to vector<8x4xbf16>
    %cst_1453 = arith.constant dense<0.000000e+00> : vector<8x128xf32>
    %1114 = tpu.matmul %1113, %1111, %cst_1453 {dimension_numbers = #tpu.dot_dimension_numbers<[1], [0], [0], [1], [0, 0, 1, 1], [], []>} : vector<8x4xbf16>, vector<4x128xbf16>, vector<8x128xf32> -> vector<8x128xf32>
    %1115 = arith.addf %1109, %1114 : vector<8x128xf32>
    %c0_1454 = arith.constant 0 : index
    %c8_1455 = arith.constant 8 : index
    %c0_1456 = arith.constant 0 : index
    %c2_1457 = arith.constant 2 : index
    %1116 = vector.load %arg2[%c0_1454, %c8_1455, %c0_1456, %c2_1457] : memref<1x10x4x256xbf16, #tpu.memory_space<vmem>>, vector<1x1x4x128xbf16>
    %1117 = vector.shape_cast %1116 : vector<1x1x4x128xbf16> to vector<4x128xbf16>
    %c20_1458 = arith.constant 20 : index
    %c0_1459 = arith.constant 0 : index
    %c0_1460 = arith.constant 0 : index
    %1118 = vector.load %arg3[%c20_1458, %c0_1459, %c0_1460] : memref<27x8x4xbf16, #tpu.memory_space<vmem>>, vector<1x8x4xbf16>
    %1119 = vector.shape_cast %1118 : vector<1x8x4xbf16> to vector<8x4xbf16>
    %cst_1461 = arith.constant dense<0.000000e+00> : vector<8x128xf32>
    %1120 = tpu.matmul %1119, %1117, %cst_1461 {dimension_numbers = #tpu.dot_dimension_numbers<[1], [0], [0], [1], [0, 0, 1, 1], [], []>} : vector<8x4xbf16>, vector<4x128xbf16>, vector<8x128xf32> -> vector<8x128xf32>
    %1121 = arith.addf %1115, %1120 : vector<8x128xf32>
    %c0_1462 = arith.constant 0 : index
    %c8_1463 = arith.constant 8 : index
    %c0_1464 = arith.constant 0 : index
    %c10_1465 = arith.constant 10 : index
    %1122 = vector.load %arg2[%c0_1462, %c8_1463, %c0_1464, %c10_1465] : memref<1x10x4x256xbf16, #tpu.memory_space<vmem>>, vector<1x1x4x128xbf16>
    %1123 = vector.shape_cast %1122 : vector<1x1x4x128xbf16> to vector<4x128xbf16>
    %c21_1466 = arith.constant 21 : index
    %c0_1467 = arith.constant 0 : index
    %c0_1468 = arith.constant 0 : index
    %1124 = vector.load %arg3[%c21_1466, %c0_1467, %c0_1468] : memref<27x8x4xbf16, #tpu.memory_space<vmem>>, vector<1x8x4xbf16>
    %1125 = vector.shape_cast %1124 : vector<1x8x4xbf16> to vector<8x4xbf16>
    %cst_1469 = arith.constant dense<0.000000e+00> : vector<8x128xf32>
    %1126 = tpu.matmul %1125, %1123, %cst_1469 {dimension_numbers = #tpu.dot_dimension_numbers<[1], [0], [0], [1], [0, 0, 1, 1], [], []>} : vector<8x4xbf16>, vector<4x128xbf16>, vector<8x128xf32> -> vector<8x128xf32>
    %1127 = arith.addf %1121, %1126 : vector<8x128xf32>
    %c0_1470 = arith.constant 0 : index
    %c8_1471 = arith.constant 8 : index
    %c0_1472 = arith.constant 0 : index
    %c11_1473 = arith.constant 11 : index
    %1128 = vector.load %arg2[%c0_1470, %c8_1471, %c0_1472, %c11_1473] : memref<1x10x4x256xbf16, #tpu.memory_space<vmem>>, vector<1x1x4x128xbf16>
    %1129 = vector.shape_cast %1128 : vector<1x1x4x128xbf16> to vector<4x128xbf16>
    %c22_1474 = arith.constant 22 : index
    %c0_1475 = arith.constant 0 : index
    %c0_1476 = arith.constant 0 : index
    %1130 = vector.load %arg3[%c22_1474, %c0_1475, %c0_1476] : memref<27x8x4xbf16, #tpu.memory_space<vmem>>, vector<1x8x4xbf16>
    %1131 = vector.shape_cast %1130 : vector<1x8x4xbf16> to vector<8x4xbf16>
    %cst_1477 = arith.constant dense<0.000000e+00> : vector<8x128xf32>
    %1132 = tpu.matmul %1131, %1129, %cst_1477 {dimension_numbers = #tpu.dot_dimension_numbers<[1], [0], [0], [1], [0, 0, 1, 1], [], []>} : vector<8x4xbf16>, vector<4x128xbf16>, vector<8x128xf32> -> vector<8x128xf32>
    %1133 = arith.addf %1127, %1132 : vector<8x128xf32>
    %c0_1478 = arith.constant 0 : index
    %c8_1479 = arith.constant 8 : index
    %c0_1480 = arith.constant 0 : index
    %c12_1481 = arith.constant 12 : index
    %1134 = vector.load %arg2[%c0_1478, %c8_1479, %c0_1480, %c12_1481] : memref<1x10x4x256xbf16, #tpu.memory_space<vmem>>, vector<1x1x4x128xbf16>
    %1135 = vector.shape_cast %1134 : vector<1x1x4x128xbf16> to vector<4x128xbf16>
    %c23_1482 = arith.constant 23 : index
    %c0_1483 = arith.constant 0 : index
    %c0_1484 = arith.constant 0 : index
    %1136 = vector.load %arg3[%c23_1482, %c0_1483, %c0_1484] : memref<27x8x4xbf16, #tpu.memory_space<vmem>>, vector<1x8x4xbf16>
    %1137 = vector.shape_cast %1136 : vector<1x8x4xbf16> to vector<8x4xbf16>
    %cst_1485 = arith.constant dense<0.000000e+00> : vector<8x128xf32>
    %1138 = tpu.matmul %1137, %1135, %cst_1485 {dimension_numbers = #tpu.dot_dimension_numbers<[1], [0], [0], [1], [0, 0, 1, 1], [], []>} : vector<8x4xbf16>, vector<4x128xbf16>, vector<8x128xf32> -> vector<8x128xf32>
    %1139 = arith.addf %1133, %1138 : vector<8x128xf32>
    %c0_1486 = arith.constant 0 : index
    %c8_1487 = arith.constant 8 : index
    %c0_1488 = arith.constant 0 : index
    %c20_1489 = arith.constant 20 : index
    %1140 = vector.load %arg2[%c0_1486, %c8_1487, %c0_1488, %c20_1489] : memref<1x10x4x256xbf16, #tpu.memory_space<vmem>>, vector<1x1x4x128xbf16>
    %1141 = vector.shape_cast %1140 : vector<1x1x4x128xbf16> to vector<4x128xbf16>
    %c24_1490 = arith.constant 24 : index
    %c0_1491 = arith.constant 0 : index
    %c0_1492 = arith.constant 0 : index
    %1142 = vector.load %arg3[%c24_1490, %c0_1491, %c0_1492] : memref<27x8x4xbf16, #tpu.memory_space<vmem>>, vector<1x8x4xbf16>
    %1143 = vector.shape_cast %1142 : vector<1x8x4xbf16> to vector<8x4xbf16>
    %cst_1493 = arith.constant dense<0.000000e+00> : vector<8x128xf32>
    %1144 = tpu.matmul %1143, %1141, %cst_1493 {dimension_numbers = #tpu.dot_dimension_numbers<[1], [0], [0], [1], [0, 0, 1, 1], [], []>} : vector<8x4xbf16>, vector<4x128xbf16>, vector<8x128xf32> -> vector<8x128xf32>
    %1145 = arith.addf %1139, %1144 : vector<8x128xf32>
    %c0_1494 = arith.constant 0 : index
    %c8_1495 = arith.constant 8 : index
    %c0_1496 = arith.constant 0 : index
    %c21_1497 = arith.constant 21 : index
    %1146 = vector.load %arg2[%c0_1494, %c8_1495, %c0_1496, %c21_1497] : memref<1x10x4x256xbf16, #tpu.memory_space<vmem>>, vector<1x1x4x128xbf16>
    %1147 = vector.shape_cast %1146 : vector<1x1x4x128xbf16> to vector<4x128xbf16>
    %c25_1498 = arith.constant 25 : index
    %c0_1499 = arith.constant 0 : index
    %c0_1500 = arith.constant 0 : index
    %1148 = vector.load %arg3[%c25_1498, %c0_1499, %c0_1500] : memref<27x8x4xbf16, #tpu.memory_space<vmem>>, vector<1x8x4xbf16>
    %1149 = vector.shape_cast %1148 : vector<1x8x4xbf16> to vector<8x4xbf16>
    %cst_1501 = arith.constant dense<0.000000e+00> : vector<8x128xf32>
    %1150 = tpu.matmul %1149, %1147, %cst_1501 {dimension_numbers = #tpu.dot_dimension_numbers<[1], [0], [0], [1], [0, 0, 1, 1], [], []>} : vector<8x4xbf16>, vector<4x128xbf16>, vector<8x128xf32> -> vector<8x128xf32>
    %1151 = arith.addf %1145, %1150 : vector<8x128xf32>
    %c0_1502 = arith.constant 0 : index
    %c8_1503 = arith.constant 8 : index
    %c0_1504 = arith.constant 0 : index
    %c22_1505 = arith.constant 22 : index
    %1152 = vector.load %arg2[%c0_1502, %c8_1503, %c0_1504, %c22_1505] : memref<1x10x4x256xbf16, #tpu.memory_space<vmem>>, vector<1x1x4x128xbf16>
    %1153 = vector.shape_cast %1152 : vector<1x1x4x128xbf16> to vector<4x128xbf16>
    %c26_1506 = arith.constant 26 : index
    %c0_1507 = arith.constant 0 : index
    %c0_1508 = arith.constant 0 : index
    %1154 = vector.load %arg3[%c26_1506, %c0_1507, %c0_1508] : memref<27x8x4xbf16, #tpu.memory_space<vmem>>, vector<1x8x4xbf16>
    %1155 = vector.shape_cast %1154 : vector<1x8x4xbf16> to vector<8x4xbf16>
    %cst_1509 = arith.constant dense<0.000000e+00> : vector<8x128xf32>
    %1156 = tpu.matmul %1155, %1153, %cst_1509 {dimension_numbers = #tpu.dot_dimension_numbers<[1], [0], [0], [1], [0, 0, 1, 1], [], []>} : vector<8x4xbf16>, vector<4x128xbf16>, vector<8x128xf32> -> vector<8x128xf32>
    %1157 = arith.addf %1151, %1156 : vector<8x128xf32>
    %1158 = vector.broadcast %0 : vector<8x1xf32> to vector<8x128xf32>
    %1159 = arith.addf %1157, %1158 : vector<8x128xf32>
    %c0_1510 = arith.constant 0 : index
    %c6_1511 = arith.constant 6 : index
    %c0_1512 = arith.constant 0 : index
    %c0_1513 = arith.constant 0 : index
    %1160 = vector.load %arg5[%c0_1510, %c6_1511, %c0_1512, %c0_1513] : memref<1x8x8x128xf32, #tpu.memory_space<vmem>>, vector<1x1x8x128xf32>
    %1161 = vector.shape_cast %1160 : vector<1x1x8x128xf32> to vector<8x128xf32>
    %1162 = vector.shape_cast %1159 : vector<8x128xf32> to vector<1x1x8x128xf32>
    tpu.vector_store %arg5[%c0_1510, %c6_1511, %c0_1512, %c0_1513], %1162 {strides = array<i32>} : memref<1x8x8x128xf32, #tpu.memory_space<vmem>>, vector<1x1x8x128xf32>,
    %c0_1514 = arith.constant 0 : index
    %c7_1515 = arith.constant 7 : index
    %c0_1516 = arith.constant 0 : index
    %c0_1517 = arith.constant 0 : index
    %1163 = vector.load %arg2[%c0_1514, %c7_1515, %c0_1516, %c0_1517] : memref<1x10x4x256xbf16, #tpu.memory_space<vmem>>, vector<1x1x4x128xbf16>
    %1164 = vector.shape_cast %1163 : vector<1x1x4x128xbf16> to vector<4x128xbf16>
    %c0_1518 = arith.constant 0 : index
    %c0_1519 = arith.constant 0 : index
    %c0_1520 = arith.constant 0 : index
    %1165 = vector.load %arg3[%c0_1518, %c0_1519, %c0_1520] : memref<27x8x4xbf16, #tpu.memory_space<vmem>>, vector<1x8x4xbf16>
    %1166 = vector.shape_cast %1165 : vector<1x8x4xbf16> to vector<8x4xbf16>
    %cst_1521 = arith.constant dense<0.000000e+00> : vector<8x128xf32>
    %1167 = tpu.matmul %1166, %1164, %cst_1521 {dimension_numbers = #tpu.dot_dimension_numbers<[1], [0], [0], [1], [0, 0, 1, 1], [], []>} : vector<8x4xbf16>, vector<4x128xbf16>, vector<8x128xf32> -> vector<8x128xf32>
    %c0_1522 = arith.constant 0 : index
    %c7_1523 = arith.constant 7 : index
    %c0_1524 = arith.constant 0 : index
    %c1_1525 = arith.constant 1 : index
    %1168 = vector.load %arg2[%c0_1522, %c7_1523, %c0_1524, %c1_1525] : memref<1x10x4x256xbf16, #tpu.memory_space<vmem>>, vector<1x1x4x128xbf16>
    %1169 = vector.shape_cast %1168 : vector<1x1x4x128xbf16> to vector<4x128xbf16>
    %c1_1526 = arith.constant 1 : index
    %c0_1527 = arith.constant 0 : index
    %c0_1528 = arith.constant 0 : index
    %1170 = vector.load %arg3[%c1_1526, %c0_1527, %c0_1528] : memref<27x8x4xbf16, #tpu.memory_space<vmem>>, vector<1x8x4xbf16>
    %1171 = vector.shape_cast %1170 : vector<1x8x4xbf16> to vector<8x4xbf16>
    %cst_1529 = arith.constant dense<0.000000e+00> : vector<8x128xf32>
    %1172 = tpu.matmul %1171, %1169, %cst_1529 {dimension_numbers = #tpu.dot_dimension_numbers<[1], [0], [0], [1], [0, 0, 1, 1], [], []>} : vector<8x4xbf16>, vector<4x128xbf16>, vector<8x128xf32> -> vector<8x128xf32>
    %1173 = arith.addf %1167, %1172 : vector<8x128xf32>
    %c0_1530 = arith.constant 0 : index
    %c7_1531 = arith.constant 7 : index
    %c0_1532 = arith.constant 0 : index
    %c2_1533 = arith.constant 2 : index
    %1174 = vector.load %arg2[%c0_1530, %c7_1531, %c0_1532, %c2_1533] : memref<1x10x4x256xbf16, #tpu.memory_space<vmem>>, vector<1x1x4x128xbf16>
    %1175 = vector.shape_cast %1174 : vector<1x1x4x128xbf16> to vector<4x128xbf16>
    %c2_1534 = arith.constant 2 : index
    %c0_1535 = arith.constant 0 : index
    %c0_1536 = arith.constant 0 : index
    %1176 = vector.load %arg3[%c2_1534, %c0_1535, %c0_1536] : memref<27x8x4xbf16, #tpu.memory_space<vmem>>, vector<1x8x4xbf16>
    %1177 = vector.shape_cast %1176 : vector<1x8x4xbf16> to vector<8x4xbf16>
    %cst_1537 = arith.constant dense<0.000000e+00> : vector<8x128xf32>
    %1178 = tpu.matmul %1177, %1175, %cst_1537 {dimension_numbers = #tpu.dot_dimension_numbers<[1], [0], [0], [1], [0, 0, 1, 1], [], []>} : vector<8x4xbf16>, vector<4x128xbf16>, vector<8x128xf32> -> vector<8x128xf32>
    %1179 = arith.addf %1173, %1178 : vector<8x128xf32>
    %c0_1538 = arith.constant 0 : index
    %c7_1539 = arith.constant 7 : index
    %c0_1540 = arith.constant 0 : index
    %c10_1541 = arith.constant 10 : index
    %1180 = vector.load %arg2[%c0_1538, %c7_1539, %c0_1540, %c10_1541] : memref<1x10x4x256xbf16, #tpu.memory_space<vmem>>, vector<1x1x4x128xbf16>
    %1181 = vector.shape_cast %1180 : vector<1x1x4x128xbf16> to vector<4x128xbf16>
    %c3_1542 = arith.constant 3 : index
    %c0_1543 = arith.constant 0 : index
    %c0_1544 = arith.constant 0 : index
    %1182 = vector.load %arg3[%c3_1542, %c0_1543, %c0_1544] : memref<27x8x4xbf16, #tpu.memory_space<vmem>>, vector<1x8x4xbf16>
    %1183 = vector.shape_cast %1182 : vector<1x8x4xbf16> to vector<8x4xbf16>
    %cst_1545 = arith.constant dense<0.000000e+00> : vector<8x128xf32>
    %1184 = tpu.matmul %1183, %1181, %cst_1545 {dimension_numbers = #tpu.dot_dimension_numbers<[1], [0], [0], [1], [0, 0, 1, 1], [], []>} : vector<8x4xbf16>, vector<4x128xbf16>, vector<8x128xf32> -> vector<8x128xf32>
    %1185 = arith.addf %1179, %1184 : vector<8x128xf32>
    %c0_1546 = arith.constant 0 : index
    %c7_1547 = arith.constant 7 : index
    %c0_1548 = arith.constant 0 : index
    %c11_1549 = arith.constant 11 : index
    %1186 = vector.load %arg2[%c0_1546, %c7_1547, %c0_1548, %c11_1549] : memref<1x10x4x256xbf16, #tpu.memory_space<vmem>>, vector<1x1x4x128xbf16>
    %1187 = vector.shape_cast %1186 : vector<1x1x4x128xbf16> to vector<4x128xbf16>
    %c4_1550 = arith.constant 4 : index
    %c0_1551 = arith.constant 0 : index
    %c0_1552 = arith.constant 0 : index
    %1188 = vector.load %arg3[%c4_1550, %c0_1551, %c0_1552] : memref<27x8x4xbf16, #tpu.memory_space<vmem>>, vector<1x8x4xbf16>
    %1189 = vector.shape_cast %1188 : vector<1x8x4xbf16> to vector<8x4xbf16>
    %cst_1553 = arith.constant dense<0.000000e+00> : vector<8x128xf32>
    %1190 = tpu.matmul %1189, %1187, %cst_1553 {dimension_numbers = #tpu.dot_dimension_numbers<[1], [0], [0], [1], [0, 0, 1, 1], [], []>} : vector<8x4xbf16>, vector<4x128xbf16>, vector<8x128xf32> -> vector<8x128xf32>
    %1191 = arith.addf %1185, %1190 : vector<8x128xf32>
    %c0_1554 = arith.constant 0 : index
    %c7_1555 = arith.constant 7 : index
    %c0_1556 = arith.constant 0 : index
    %c12_1557 = arith.constant 12 : index
    %1192 = vector.load %arg2[%c0_1554, %c7_1555, %c0_1556, %c12_1557] : memref<1x10x4x256xbf16, #tpu.memory_space<vmem>>, vector<1x1x4x128xbf16>
    %1193 = vector.shape_cast %1192 : vector<1x1x4x128xbf16> to vector<4x128xbf16>
    %c5_1558 = arith.constant 5 : index
    %c0_1559 = arith.constant 0 : index
    %c0_1560 = arith.constant 0 : index
    %1194 = vector.load %arg3[%c5_1558, %c0_1559, %c0_1560] : memref<27x8x4xbf16, #tpu.memory_space<vmem>>, vector<1x8x4xbf16>
    %1195 = vector.shape_cast %1194 : vector<1x8x4xbf16> to vector<8x4xbf16>
    %cst_1561 = arith.constant dense<0.000000e+00> : vector<8x128xf32>
    %1196 = tpu.matmul %1195, %1193, %cst_1561 {dimension_numbers = #tpu.dot_dimension_numbers<[1], [0], [0], [1], [0, 0, 1, 1], [], []>} : vector<8x4xbf16>, vector<4x128xbf16>, vector<8x128xf32> -> vector<8x128xf32>
    %1197 = arith.addf %1191, %1196 : vector<8x128xf32>
    %c0_1562 = arith.constant 0 : index
    %c7_1563 = arith.constant 7 : index
    %c0_1564 = arith.constant 0 : index
    %c20_1565 = arith.constant 20 : index
    %1198 = vector.load %arg2[%c0_1562, %c7_1563, %c0_1564, %c20_1565] : memref<1x10x4x256xbf16, #tpu.memory_space<vmem>>, vector<1x1x4x128xbf16>
    %1199 = vector.shape_cast %1198 : vector<1x1x4x128xbf16> to vector<4x128xbf16>
    %c6_1566 = arith.constant 6 : index
    %c0_1567 = arith.constant 0 : index
    %c0_1568 = arith.constant 0 : index
    %1200 = vector.load %arg3[%c6_1566, %c0_1567, %c0_1568] : memref<27x8x4xbf16, #tpu.memory_space<vmem>>, vector<1x8x4xbf16>
    %1201 = vector.shape_cast %1200 : vector<1x8x4xbf16> to vector<8x4xbf16>
    %cst_1569 = arith.constant dense<0.000000e+00> : vector<8x128xf32>
    %1202 = tpu.matmul %1201, %1199, %cst_1569 {dimension_numbers = #tpu.dot_dimension_numbers<[1], [0], [0], [1], [0, 0, 1, 1], [], []>} : vector<8x4xbf16>, vector<4x128xbf16>, vector<8x128xf32> -> vector<8x128xf32>
    %1203 = arith.addf %1197, %1202 : vector<8x128xf32>
    %c0_1570 = arith.constant 0 : index
    %c7_1571 = arith.constant 7 : index
    %c0_1572 = arith.constant 0 : index
    %c21_1573 = arith.constant 21 : index
    %1204 = vector.load %arg2[%c0_1570, %c7_1571, %c0_1572, %c21_1573] : memref<1x10x4x256xbf16, #tpu.memory_space<vmem>>, vector<1x1x4x128xbf16>
    %1205 = vector.shape_cast %1204 : vector<1x1x4x128xbf16> to vector<4x128xbf16>
    %c7_1574 = arith.constant 7 : index
    %c0_1575 = arith.constant 0 : index
    %c0_1576 = arith.constant 0 : index
    %1206 = vector.load %arg3[%c7_1574, %c0_1575, %c0_1576] : memref<27x8x4xbf16, #tpu.memory_space<vmem>>, vector<1x8x4xbf16>
    %1207 = vector.shape_cast %1206 : vector<1x8x4xbf16> to vector<8x4xbf16>
    %cst_1577 = arith.constant dense<0.000000e+00> : vector<8x128xf32>
    %1208 = tpu.matmul %1207, %1205, %cst_1577 {dimension_numbers = #tpu.dot_dimension_numbers<[1], [0], [0], [1], [0, 0, 1, 1], [], []>} : vector<8x4xbf16>, vector<4x128xbf16>, vector<8x128xf32> -> vector<8x128xf32>
    %1209 = arith.addf %1203, %1208 : vector<8x128xf32>
    %c0_1578 = arith.constant 0 : index
    %c7_1579 = arith.constant 7 : index
    %c0_1580 = arith.constant 0 : index
    %c22_1581 = arith.constant 22 : index
    %1210 = vector.load %arg2[%c0_1578, %c7_1579, %c0_1580, %c22_1581] : memref<1x10x4x256xbf16, #tpu.memory_space<vmem>>, vector<1x1x4x128xbf16>
    %1211 = vector.shape_cast %1210 : vector<1x1x4x128xbf16> to vector<4x128xbf16>
    %c8_1582 = arith.constant 8 : index
    %c0_1583 = arith.constant 0 : index
    %c0_1584 = arith.constant 0 : index
    %1212 = vector.load %arg3[%c8_1582, %c0_1583, %c0_1584] : memref<27x8x4xbf16, #tpu.memory_space<vmem>>, vector<1x8x4xbf16>
    %1213 = vector.shape_cast %1212 : vector<1x8x4xbf16> to vector<8x4xbf16>
    %cst_1585 = arith.constant dense<0.000000e+00> : vector<8x128xf32>
    %1214 = tpu.matmul %1213, %1211, %cst_1585 {dimension_numbers = #tpu.dot_dimension_numbers<[1], [0], [0], [1], [0, 0, 1, 1], [], []>} : vector<8x4xbf16>, vector<4x128xbf16>, vector<8x128xf32> -> vector<8x128xf32>
    %1215 = arith.addf %1209, %1214 : vector<8x128xf32>
    %c0_1586 = arith.constant 0 : index
    %c8_1587 = arith.constant 8 : index
    %c0_1588 = arith.constant 0 : index
    %c0_1589 = arith.constant 0 : index
    %1216 = vector.load %arg2[%c0_1586, %c8_1587, %c0_1588, %c0_1589] : memref<1x10x4x256xbf16, #tpu.memory_space<vmem>>, vector<1x1x4x128xbf16>
    %1217 = vector.shape_cast %1216 : vector<1x1x4x128xbf16> to vector<4x128xbf16>
    %c9_1590 = arith.constant 9 : index
    %c0_1591 = arith.constant 0 : index
    %c0_1592 = arith.constant 0 : index
    %1218 = vector.load %arg3[%c9_1590, %c0_1591, %c0_1592] : memref<27x8x4xbf16, #tpu.memory_space<vmem>>, vector<1x8x4xbf16>
    %1219 = vector.shape_cast %1218 : vector<1x8x4xbf16> to vector<8x4xbf16>
    %cst_1593 = arith.constant dense<0.000000e+00> : vector<8x128xf32>
    %1220 = tpu.matmul %1219, %1217, %cst_1593 {dimension_numbers = #tpu.dot_dimension_numbers<[1], [0], [0], [1], [0, 0, 1, 1], [], []>} : vector<8x4xbf16>, vector<4x128xbf16>, vector<8x128xf32> -> vector<8x128xf32>
    %1221 = arith.addf %1215, %1220 : vector<8x128xf32>
    %c0_1594 = arith.constant 0 : index
    %c8_1595 = arith.constant 8 : index
    %c0_1596 = arith.constant 0 : index
    %c1_1597 = arith.constant 1 : index
    %1222 = vector.load %arg2[%c0_1594, %c8_1595, %c0_1596, %c1_1597] : memref<1x10x4x256xbf16, #tpu.memory_space<vmem>>, vector<1x1x4x128xbf16>
    %1223 = vector.shape_cast %1222 : vector<1x1x4x128xbf16> to vector<4x128xbf16>
    %c10_1598 = arith.constant 10 : index
    %c0_1599 = arith.constant 0 : index
    %c0_1600 = arith.constant 0 : index
    %1224 = vector.load %arg3[%c10_1598, %c0_1599, %c0_1600] : memref<27x8x4xbf16, #tpu.memory_space<vmem>>, vector<1x8x4xbf16>
    %1225 = vector.shape_cast %1224 : vector<1x8x4xbf16> to vector<8x4xbf16>
    %cst_1601 = arith.constant dense<0.000000e+00> : vector<8x128xf32>
    %1226 = tpu.matmul %1225, %1223, %cst_1601 {dimension_numbers = #tpu.dot_dimension_numbers<[1], [0], [0], [1], [0, 0, 1, 1], [], []>} : vector<8x4xbf16>, vector<4x128xbf16>, vector<8x128xf32> -> vector<8x128xf32>
    %1227 = arith.addf %1221, %1226 : vector<8x128xf32>
    %c0_1602 = arith.constant 0 : index
    %c8_1603 = arith.constant 8 : index
    %c0_1604 = arith.constant 0 : index
    %c2_1605 = arith.constant 2 : index
    %1228 = vector.load %arg2[%c0_1602, %c8_1603, %c0_1604, %c2_1605] : memref<1x10x4x256xbf16, #tpu.memory_space<vmem>>, vector<1x1x4x128xbf16>
    %1229 = vector.shape_cast %1228 : vector<1x1x4x128xbf16> to vector<4x128xbf16>
    %c11_1606 = arith.constant 11 : index
    %c0_1607 = arith.constant 0 : index
    %c0_1608 = arith.constant 0 : index
    %1230 = vector.load %arg3[%c11_1606, %c0_1607, %c0_1608] : memref<27x8x4xbf16, #tpu.memory_space<vmem>>, vector<1x8x4xbf16>
    %1231 = vector.shape_cast %1230 : vector<1x8x4xbf16> to vector<8x4xbf16>
    %cst_1609 = arith.constant dense<0.000000e+00> : vector<8x128xf32>
    %1232 = tpu.matmul %1231, %1229, %cst_1609 {dimension_numbers = #tpu.dot_dimension_numbers<[1], [0], [0], [1], [0, 0, 1, 1], [], []>} : vector<8x4xbf16>, vector<4x128xbf16>, vector<8x128xf32> -> vector<8x128xf32>
    %1233 = arith.addf %1227, %1232 : vector<8x128xf32>
    %c0_1610 = arith.constant 0 : index
    %c8_1611 = arith.constant 8 : index
    %c0_1612 = arith.constant 0 : index
    %c10_1613 = arith.constant 10 : index
    %1234 = vector.load %arg2[%c0_1610, %c8_1611, %c0_1612, %c10_1613] : memref<1x10x4x256xbf16, #tpu.memory_space<vmem>>, vector<1x1x4x128xbf16>
    %1235 = vector.shape_cast %1234 : vector<1x1x4x128xbf16> to vector<4x128xbf16>
    %c12_1614 = arith.constant 12 : index
    %c0_1615 = arith.constant 0 : index
    %c0_1616 = arith.constant 0 : index
    %1236 = vector.load %arg3[%c12_1614, %c0_1615, %c0_1616] : memref<27x8x4xbf16, #tpu.memory_space<vmem>>, vector<1x8x4xbf16>
    %1237 = vector.shape_cast %1236 : vector<1x8x4xbf16> to vector<8x4xbf16>
    %cst_1617 = arith.constant dense<0.000000e+00> : vector<8x128xf32>
    %1238 = tpu.matmul %1237, %1235, %cst_1617 {dimension_numbers = #tpu.dot_dimension_numbers<[1], [0], [0], [1], [0, 0, 1, 1], [], []>} : vector<8x4xbf16>, vector<4x128xbf16>, vector<8x128xf32> -> vector<8x128xf32>
    %1239 = arith.addf %1233, %1238 : vector<8x128xf32>
    %c0_1618 = arith.constant 0 : index
    %c8_1619 = arith.constant 8 : index
    %c0_1620 = arith.constant 0 : index
    %c11_1621 = arith.constant 11 : index
    %1240 = vector.load %arg2[%c0_1618, %c8_1619, %c0_1620, %c11_1621] : memref<1x10x4x256xbf16, #tpu.memory_space<vmem>>, vector<1x1x4x128xbf16>
    %1241 = vector.shape_cast %1240 : vector<1x1x4x128xbf16> to vector<4x128xbf16>
    %c13_1622 = arith.constant 13 : index
    %c0_1623 = arith.constant 0 : index
    %c0_1624 = arith.constant 0 : index
    %1242 = vector.load %arg3[%c13_1622, %c0_1623, %c0_1624] : memref<27x8x4xbf16, #tpu.memory_space<vmem>>, vector<1x8x4xbf16>
    %1243 = vector.shape_cast %1242 : vector<1x8x4xbf16> to vector<8x4xbf16>
    %cst_1625 = arith.constant dense<0.000000e+00> : vector<8x128xf32>
    %1244 = tpu.matmul %1243, %1241, %cst_1625 {dimension_numbers = #tpu.dot_dimension_numbers<[1], [0], [0], [1], [0, 0, 1, 1], [], []>} : vector<8x4xbf16>, vector<4x128xbf16>, vector<8x128xf32> -> vector<8x128xf32>
    %1245 = arith.addf %1239, %1244 : vector<8x128xf32>
    %c0_1626 = arith.constant 0 : index
    %c8_1627 = arith.constant 8 : index
    %c0_1628 = arith.constant 0 : index
    %c12_1629 = arith.constant 12 : index
    %1246 = vector.load %arg2[%c0_1626, %c8_1627, %c0_1628, %c12_1629] : memref<1x10x4x256xbf16, #tpu.memory_space<vmem>>, vector<1x1x4x128xbf16>
    %1247 = vector.shape_cast %1246 : vector<1x1x4x128xbf16> to vector<4x128xbf16>
    %c14_1630 = arith.constant 14 : index
    %c0_1631 = arith.constant 0 : index
    %c0_1632 = arith.constant 0 : index
    %1248 = vector.load %arg3[%c14_1630, %c0_1631, %c0_1632] : memref<27x8x4xbf16, #tpu.memory_space<vmem>>, vector<1x8x4xbf16>
    %1249 = vector.shape_cast %1248 : vector<1x8x4xbf16> to vector<8x4xbf16>
    %cst_1633 = arith.constant dense<0.000000e+00> : vector<8x128xf32>
    %1250 = tpu.matmul %1249, %1247, %cst_1633 {dimension_numbers = #tpu.dot_dimension_numbers<[1], [0], [0], [1], [0, 0, 1, 1], [], []>} : vector<8x4xbf16>, vector<4x128xbf16>, vector<8x128xf32> -> vector<8x128xf32>
    %1251 = arith.addf %1245, %1250 : vector<8x128xf32>
    %c0_1634 = arith.constant 0 : index
    %c8_1635 = arith.constant 8 : index
    %c0_1636 = arith.constant 0 : index
    %c20_1637 = arith.constant 20 : index
    %1252 = vector.load %arg2[%c0_1634, %c8_1635, %c0_1636, %c20_1637] : memref<1x10x4x256xbf16, #tpu.memory_space<vmem>>, vector<1x1x4x128xbf16>
    %1253 = vector.shape_cast %1252 : vector<1x1x4x128xbf16> to vector<4x128xbf16>
    %c15_1638 = arith.constant 15 : index
    %c0_1639 = arith.constant 0 : index
    %c0_1640 = arith.constant 0 : index
    %1254 = vector.load %arg3[%c15_1638, %c0_1639, %c0_1640] : memref<27x8x4xbf16, #tpu.memory_space<vmem>>, vector<1x8x4xbf16>
    %1255 = vector.shape_cast %1254 : vector<1x8x4xbf16> to vector<8x4xbf16>
    %cst_1641 = arith.constant dense<0.000000e+00> : vector<8x128xf32>
    %1256 = tpu.matmul %1255, %1253, %cst_1641 {dimension_numbers = #tpu.dot_dimension_numbers<[1], [0], [0], [1], [0, 0, 1, 1], [], []>} : vector<8x4xbf16>, vector<4x128xbf16>, vector<8x128xf32> -> vector<8x128xf32>
    %1257 = arith.addf %1251, %1256 : vector<8x128xf32>
    %c0_1642 = arith.constant 0 : index
    %c8_1643 = arith.constant 8 : index
    %c0_1644 = arith.constant 0 : index
    %c21_1645 = arith.constant 21 : index
    %1258 = vector.load %arg2[%c0_1642, %c8_1643, %c0_1644, %c21_1645] : memref<1x10x4x256xbf16, #tpu.memory_space<vmem>>, vector<1x1x4x128xbf16>
    %1259 = vector.shape_cast %1258 : vector<1x1x4x128xbf16> to vector<4x128xbf16>
    %c16_1646 = arith.constant 16 : index
    %c0_1647 = arith.constant 0 : index
    %c0_1648 = arith.constant 0 : index
    %1260 = vector.load %arg3[%c16_1646, %c0_1647, %c0_1648] : memref<27x8x4xbf16, #tpu.memory_space<vmem>>, vector<1x8x4xbf16>
    %1261 = vector.shape_cast %1260 : vector<1x8x4xbf16> to vector<8x4xbf16>
    %cst_1649 = arith.constant dense<0.000000e+00> : vector<8x128xf32>
    %1262 = tpu.matmul %1261, %1259, %cst_1649 {dimension_numbers = #tpu.dot_dimension_numbers<[1], [0], [0], [1], [0, 0, 1, 1], [], []>} : vector<8x4xbf16>, vector<4x128xbf16>, vector<8x128xf32> -> vector<8x128xf32>
    %1263 = arith.addf %1257, %1262 : vector<8x128xf32>
    %c0_1650 = arith.constant 0 : index
    %c8_1651 = arith.constant 8 : index
    %c0_1652 = arith.constant 0 : index
    %c22_1653 = arith.constant 22 : index
    %1264 = vector.load %arg2[%c0_1650, %c8_1651, %c0_1652, %c22_1653] : memref<1x10x4x256xbf16, #tpu.memory_space<vmem>>, vector<1x1x4x128xbf16>
    %1265 = vector.shape_cast %1264 : vector<1x1x4x128xbf16> to vector<4x128xbf16>
    %c17_1654 = arith.constant 17 : index
    %c0_1655 = arith.constant 0 : index
    %c0_1656 = arith.constant 0 : index
    %1266 = vector.load %arg3[%c17_1654, %c0_1655, %c0_1656] : memref<27x8x4xbf16, #tpu.memory_space<vmem>>, vector<1x8x4xbf16>
    %1267 = vector.shape_cast %1266 : vector<1x8x4xbf16> to vector<8x4xbf16>
    %cst_1657 = arith.constant dense<0.000000e+00> : vector<8x128xf32>
    %1268 = tpu.matmul %1267, %1265, %cst_1657 {dimension_numbers = #tpu.dot_dimension_numbers<[1], [0], [0], [1], [0, 0, 1, 1], [], []>} : vector<8x4xbf16>, vector<4x128xbf16>, vector<8x128xf32> -> vector<8x128xf32>
    %1269 = arith.addf %1263, %1268 : vector<8x128xf32>
    %c0_1658 = arith.constant 0 : index
    %c9_1659 = arith.constant 9 : index
    %c0_1660 = arith.constant 0 : index
    %c0_1661 = arith.constant 0 : index
    %1270 = vector.load %arg2[%c0_1658, %c9_1659, %c0_1660, %c0_1661] : memref<1x10x4x256xbf16, #tpu.memory_space<vmem>>, vector<1x1x4x128xbf16>
    %1271 = vector.shape_cast %1270 : vector<1x1x4x128xbf16> to vector<4x128xbf16>
    %c18_1662 = arith.constant 18 : index
    %c0_1663 = arith.constant 0 : index
    %c0_1664 = arith.constant 0 : index
    %1272 = vector.load %arg3[%c18_1662, %c0_1663, %c0_1664] : memref<27x8x4xbf16, #tpu.memory_space<vmem>>, vector<1x8x4xbf16>
    %1273 = vector.shape_cast %1272 : vector<1x8x4xbf16> to vector<8x4xbf16>
    %cst_1665 = arith.constant dense<0.000000e+00> : vector<8x128xf32>
    %1274 = tpu.matmul %1273, %1271, %cst_1665 {dimension_numbers = #tpu.dot_dimension_numbers<[1], [0], [0], [1], [0, 0, 1, 1], [], []>} : vector<8x4xbf16>, vector<4x128xbf16>, vector<8x128xf32> -> vector<8x128xf32>
    %1275 = arith.addf %1269, %1274 : vector<8x128xf32>
    %c0_1666 = arith.constant 0 : index
    %c9_1667 = arith.constant 9 : index
    %c0_1668 = arith.constant 0 : index
    %c1_1669 = arith.constant 1 : index
    %1276 = vector.load %arg2[%c0_1666, %c9_1667, %c0_1668, %c1_1669] : memref<1x10x4x256xbf16, #tpu.memory_space<vmem>>, vector<1x1x4x128xbf16>
    %1277 = vector.shape_cast %1276 : vector<1x1x4x128xbf16> to vector<4x128xbf16>
    %c19_1670 = arith.constant 19 : index
    %c0_1671 = arith.constant 0 : index
    %c0_1672 = arith.constant 0 : index
    %1278 = vector.load %arg3[%c19_1670, %c0_1671, %c0_1672] : memref<27x8x4xbf16, #tpu.memory_space<vmem>>, vector<1x8x4xbf16>
    %1279 = vector.shape_cast %1278 : vector<1x8x4xbf16> to vector<8x4xbf16>
    %cst_1673 = arith.constant dense<0.000000e+00> : vector<8x128xf32>
    %1280 = tpu.matmul %1279, %1277, %cst_1673 {dimension_numbers = #tpu.dot_dimension_numbers<[1], [0], [0], [1], [0, 0, 1, 1], [], []>} : vector<8x4xbf16>, vector<4x128xbf16>, vector<8x128xf32> -> vector<8x128xf32>
    %1281 = arith.addf %1275, %1280 : vector<8x128xf32>
    %c0_1674 = arith.constant 0 : index
    %c9_1675 = arith.constant 9 : index
    %c0_1676 = arith.constant 0 : index
    %c2_1677 = arith.constant 2 : index
    %1282 = vector.load %arg2[%c0_1674, %c9_1675, %c0_1676, %c2_1677] : memref<1x10x4x256xbf16, #tpu.memory_space<vmem>>, vector<1x1x4x128xbf16>
    %1283 = vector.shape_cast %1282 : vector<1x1x4x128xbf16> to vector<4x128xbf16>
    %c20_1678 = arith.constant 20 : index
    %c0_1679 = arith.constant 0 : index
    %c0_1680 = arith.constant 0 : index
    %1284 = vector.load %arg3[%c20_1678, %c0_1679, %c0_1680] : memref<27x8x4xbf16, #tpu.memory_space<vmem>>, vector<1x8x4xbf16>
    %1285 = vector.shape_cast %1284 : vector<1x8x4xbf16> to vector<8x4xbf16>
    %cst_1681 = arith.constant dense<0.000000e+00> : vector<8x128xf32>
    %1286 = tpu.matmul %1285, %1283, %cst_1681 {dimension_numbers = #tpu.dot_dimension_numbers<[1], [0], [0], [1], [0, 0, 1, 1], [], []>} : vector<8x4xbf16>, vector<4x128xbf16>, vector<8x128xf32> -> vector<8x128xf32>
    %1287 = arith.addf %1281, %1286 : vector<8x128xf32>
    %c0_1682 = arith.constant 0 : index
    %c9_1683 = arith.constant 9 : index
    %c0_1684 = arith.constant 0 : index
    %c10_1685 = arith.constant 10 : index
    %1288 = vector.load %arg2[%c0_1682, %c9_1683, %c0_1684, %c10_1685] : memref<1x10x4x256xbf16, #tpu.memory_space<vmem>>, vector<1x1x4x128xbf16>
    %1289 = vector.shape_cast %1288 : vector<1x1x4x128xbf16> to vector<4x128xbf16>
    %c21_1686 = arith.constant 21 : index
    %c0_1687 = arith.constant 0 : index
    %c0_1688 = arith.constant 0 : index
    %1290 = vector.load %arg3[%c21_1686, %c0_1687, %c0_1688] : memref<27x8x4xbf16, #tpu.memory_space<vmem>>, vector<1x8x4xbf16>
    %1291 = vector.shape_cast %1290 : vector<1x8x4xbf16> to vector<8x4xbf16>
    %cst_1689 = arith.constant dense<0.000000e+00> : vector<8x128xf32>
    %1292 = tpu.matmul %1291, %1289, %cst_1689 {dimension_numbers = #tpu.dot_dimension_numbers<[1], [0], [0], [1], [0, 0, 1, 1], [], []>} : vector<8x4xbf16>, vector<4x128xbf16>, vector<8x128xf32> -> vector<8x128xf32>
    %1293 = arith.addf %1287, %1292 : vector<8x128xf32>
    %c0_1690 = arith.constant 0 : index
    %c9_1691 = arith.constant 9 : index
    %c0_1692 = arith.constant 0 : index
    %c11_1693 = arith.constant 11 : index
    %1294 = vector.load %arg2[%c0_1690, %c9_1691, %c0_1692, %c11_1693] : memref<1x10x4x256xbf16, #tpu.memory_space<vmem>>, vector<1x1x4x128xbf16>
    %1295 = vector.shape_cast %1294 : vector<1x1x4x128xbf16> to vector<4x128xbf16>
    %c22_1694 = arith.constant 22 : index
    %c0_1695 = arith.constant 0 : index
    %c0_1696 = arith.constant 0 : index
    %1296 = vector.load %arg3[%c22_1694, %c0_1695, %c0_1696] : memref<27x8x4xbf16, #tpu.memory_space<vmem>>, vector<1x8x4xbf16>
    %1297 = vector.shape_cast %1296 : vector<1x8x4xbf16> to vector<8x4xbf16>
    %cst_1697 = arith.constant dense<0.000000e+00> : vector<8x128xf32>
    %1298 = tpu.matmul %1297, %1295, %cst_1697 {dimension_numbers = #tpu.dot_dimension_numbers<[1], [0], [0], [1], [0, 0, 1, 1], [], []>} : vector<8x4xbf16>, vector<4x128xbf16>, vector<8x128xf32> -> vector<8x128xf32>
    %1299 = arith.addf %1293, %1298 : vector<8x128xf32>
    %c0_1698 = arith.constant 0 : index
    %c9_1699 = arith.constant 9 : index
    %c0_1700 = arith.constant 0 : index
    %c12_1701 = arith.constant 12 : index
    %1300 = vector.load %arg2[%c0_1698, %c9_1699, %c0_1700, %c12_1701] : memref<1x10x4x256xbf16, #tpu.memory_space<vmem>>, vector<1x1x4x128xbf16>
    %1301 = vector.shape_cast %1300 : vector<1x1x4x128xbf16> to vector<4x128xbf16>
    %c23_1702 = arith.constant 23 : index
    %c0_1703 = arith.constant 0 : index
    %c0_1704 = arith.constant 0 : index
    %1302 = vector.load %arg3[%c23_1702, %c0_1703, %c0_1704] : memref<27x8x4xbf16, #tpu.memory_space<vmem>>, vector<1x8x4xbf16>
    %1303 = vector.shape_cast %1302 : vector<1x8x4xbf16> to vector<8x4xbf16>
    %cst_1705 = arith.constant dense<0.000000e+00> : vector<8x128xf32>
    %1304 = tpu.matmul %1303, %1301, %cst_1705 {dimension_numbers = #tpu.dot_dimension_numbers<[1], [0], [0], [1], [0, 0, 1, 1], [], []>} : vector<8x4xbf16>, vector<4x128xbf16>, vector<8x128xf32> -> vector<8x128xf32>
    %1305 = arith.addf %1299, %1304 : vector<8x128xf32>
    %c0_1706 = arith.constant 0 : index
    %c9_1707 = arith.constant 9 : index
    %c0_1708 = arith.constant 0 : index
    %c20_1709 = arith.constant 20 : index
    %1306 = vector.load %arg2[%c0_1706, %c9_1707, %c0_1708, %c20_1709] : memref<1x10x4x256xbf16, #tpu.memory_space<vmem>>, vector<1x1x4x128xbf16>
    %1307 = vector.shape_cast %1306 : vector<1x1x4x128xbf16> to vector<4x128xbf16>
    %c24_1710 = arith.constant 24 : index
    %c0_1711 = arith.constant 0 : index
    %c0_1712 = arith.constant 0 : index
    %1308 = vector.load %arg3[%c24_1710, %c0_1711, %c0_1712] : memref<27x8x4xbf16, #tpu.memory_space<vmem>>, vector<1x8x4xbf16>
    %1309 = vector.shape_cast %1308 : vector<1x8x4xbf16> to vector<8x4xbf16>
    %cst_1713 = arith.constant dense<0.000000e+00> : vector<8x128xf32>
    %1310 = tpu.matmul %1309, %1307, %cst_1713 {dimension_numbers = #tpu.dot_dimension_numbers<[1], [0], [0], [1], [0, 0, 1, 1], [], []>} : vector<8x4xbf16>, vector<4x128xbf16>, vector<8x128xf32> -> vector<8x128xf32>
    %1311 = arith.addf %1305, %1310 : vector<8x128xf32>
    %c0_1714 = arith.constant 0 : index
    %c9_1715 = arith.constant 9 : index
    %c0_1716 = arith.constant 0 : index
    %c21_1717 = arith.constant 21 : index
    %1312 = vector.load %arg2[%c0_1714, %c9_1715, %c0_1716, %c21_1717] : memref<1x10x4x256xbf16, #tpu.memory_space<vmem>>, vector<1x1x4x128xbf16>
    %1313 = vector.shape_cast %1312 : vector<1x1x4x128xbf16> to vector<4x128xbf16>
    %c25_1718 = arith.constant 25 : index
    %c0_1719 = arith.constant 0 : index
    %c0_1720 = arith.constant 0 : index
    %1314 = vector.load %arg3[%c25_1718, %c0_1719, %c0_1720] : memref<27x8x4xbf16, #tpu.memory_space<vmem>>, vector<1x8x4xbf16>
    %1315 = vector.shape_cast %1314 : vector<1x8x4xbf16> to vector<8x4xbf16>
    %cst_1721 = arith.constant dense<0.000000e+00> : vector<8x128xf32>
    %1316 = tpu.matmul %1315, %1313, %cst_1721 {dimension_numbers = #tpu.dot_dimension_numbers<[1], [0], [0], [1], [0, 0, 1, 1], [], []>} : vector<8x4xbf16>, vector<4x128xbf16>, vector<8x128xf32> -> vector<8x128xf32>
    %1317 = arith.addf %1311, %1316 : vector<8x128xf32>
    %c0_1722 = arith.constant 0 : index
    %c9_1723 = arith.constant 9 : index
    %c0_1724 = arith.constant 0 : index
    %c22_1725 = arith.constant 22 : index
    %1318 = vector.load %arg2[%c0_1722, %c9_1723, %c0_1724, %c22_1725] : memref<1x10x4x256xbf16, #tpu.memory_space<vmem>>, vector<1x1x4x128xbf16>
    %1319 = vector.shape_cast %1318 : vector<1x1x4x128xbf16> to vector<4x128xbf16>
    %c26_1726 = arith.constant 26 : index
    %c0_1727 = arith.constant 0 : index
    %c0_1728 = arith.constant 0 : index
    %1320 = vector.load %arg3[%c26_1726, %c0_1727, %c0_1728] : memref<27x8x4xbf16, #tpu.memory_space<vmem>>, vector<1x8x4xbf16>
    %1321 = vector.shape_cast %1320 : vector<1x8x4xbf16> to vector<8x4xbf16>
    %cst_1729 = arith.constant dense<0.000000e+00> : vector<8x128xf32>
    %1322 = tpu.matmul %1321, %1319, %cst_1729 {dimension_numbers = #tpu.dot_dimension_numbers<[1], [0], [0], [1], [0, 0, 1, 1], [], []>} : vector<8x4xbf16>, vector<4x128xbf16>, vector<8x128xf32> -> vector<8x128xf32>
    %1323 = arith.addf %1317, %1322 : vector<8x128xf32>
    %1324 = vector.broadcast %0 : vector<8x1xf32> to vector<8x128xf32>
    %1325 = arith.addf %1323, %1324 : vector<8x128xf32>
    %c0_1730 = arith.constant 0 : index
    %c7_1731 = arith.constant 7 : index
    %c0_1732 = arith.constant 0 : index
    %c0_1733 = arith.constant 0 : index
    %1326 = vector.load %arg5[%c0_1730, %c7_1731, %c0_1732, %c0_1733] : memref<1x8x8x128xf32, #tpu.memory_space<vmem>>, vector<1x1x8x128xf32>
    %1327 = vector.shape_cast %1326 : vector<1x1x8x128xf32> to vector<8x128xf32>
    %1328 = vector.shape_cast %1325 : vector<8x128xf32> to vector<1x1x8x128xf32>
    tpu.vector_store %arg5[%c0_1730, %c7_1731, %c0_1732, %c0_1733], %1328 {strides = array<i32>} : memref<1x8x8x128xf32, #tpu.memory_space<vmem>>, vector<1x1x8x128xf32>,
    return
  }
  func.func @transform_0(%arg0: i32, %arg1: i32) -> (i32, i32, i32, i32) {
    %c1_i32 = arith.constant 1 : i32
    %0 = arith.muli %arg0, %c1_i32 : i32
    %1 = arith.addi %0, %arg1 : i32
    %c0_i32 = arith.constant 0 : i32
    %c0_i32_0 = arith.constant 0 : i32
    %c0_i32_1 = arith.constant 0 : i32
    %c0_i32_2 = arith.constant 0 : i32
    return %1, %c0_i32, %c0_i32_0, %c0_i32_1 : i32, i32, i32, i32
  }
  func.func @transform_1(%arg0: i32, %arg1: i32) -> (i32, i32, i32) {
    %c0_i32 = arith.constant 0 : i32
    %c0_i32_0 = arith.constant 0 : i32
    %c0_i32_1 = arith.constant 0 : i32
    %c0_i32_2 = arith.constant 0 : i32
    return %c0_i32, %c0_i32_0, %c0_i32_1 : i32, i32, i32
  }
  func.func @transform_2(%arg0: i32, %arg1: i32) -> (i32, i32) {
    %c0_i32 = arith.constant 0 : i32
    %c0_i32_0 = arith.constant 0 : i32
    %c0_i32_1 = arith.constant 0 : i32
    return %c0_i32, %c0_i32_0 : i32, i32
  }
  func.func @transform_3(%arg0: i32, %arg1: i32) -> (i32, i32, i32, i32) {
    %c0_i32 = arith.constant 0 : i32
    %c0_i32_0 = arith.constant 0 : i32
    %c0_i32_1 = arith.constant 0 : i32
    return %arg0, %arg1, %c0_i32, %c0_i32_0 : i32, i32, i32, i32
  }
}

</mosaic_0001>

<bundles_post_ra>
// kernel: tpu_custom_call.1
= control target key start
LH: loop header
LB: loop body
LE: loop exit
PB: predicated region body
PF: predicated region fallthrough
CT: control target
= control target key end

     0   :  { %8 = vsyncpa [#allocation3], 0  ;;  %s20211_s0 = inlined_call_operand.vmem [shape: bf16[2,10,4,256], index: 0, kind: input, shape index: {}]   ;;  %s20212_s1 = inlined_call_operand.vmem [shape: bf16[27,8,4], index: 1, kind: input, shape index: {}]   ;;  %s20213_s2 = inlined_call_operand.vmem [shape: f32[8,1], index: 2, kind: input, shape index: {}]   ;;  %s20214_s3 = inlined_call_operand.hbm [shape: f32[2,8,8,128], index: 3, kind: output, shape index: {}]  }
   0x1   :  { %10 = vsyncpa [#allocation3 + $0x1], 0  ;;  %s16364_s12 = smov 0   ;;  %s16366_s13 = smov 0  }
   0x2   :  { %s16368_s14 = smov 0   ;;  %s16370_s15 = smov 0  }
   0x3   :  { %s16372_s16 = smov 0   ;;  %s16374_s17 = smov 0  }
   0x4 LB: > { %s13611_s18 = sadd.s32 4294967295, %s16328_s17   ;;  %s13612_s19 = sadd.s32 4294967294, %s16328_s17   ;;  %s16328_s17 = sphi %s16374_s17, %s16_s17   ;;  %s16324_s16 = sphi %s16372_s16, %s20221_s16   ;;  %s16320_s15 = sphi %s16370_s15, %s20220_s15   ;;  %s16316_s14 = sphi %s16368_s14, %s20219_s14   ;;  %s16312_s13 = sphi %s16366_s13, %s20218_s13   ;;  %s16308_s12 = sphi %s16364_s12, %s20217_s12  }
   0x5   : > { %s28_s20 = sadd.s32 1, %s16324_s16  ;;  %s107_s21 = sadd.s32 1, %s16316_s14 }
   0x6   : > { %p30_p0 = scmp.ge.s32.totalorder %s28_s20, 2  ;;  %p117_p1 = scmp.ne.s32.totalorder %s16316_s14, %s16312_s13 }
   0x7   : > { %p118_p2 = scmp.eq.s32.totalorder %s13611_s18, 1  ;;  %p123_p3 = scmp.ne.s32.totalorder %s16312_s13, %s16308_s12 }
   0x8   : > { %s20223_s20 = smov (%p30_p0, %s28_s20), 0  ;;  %p124_p5 = scmp.eq.s32.totalorder %s13612_s19, 1 }
   0x9   : > { %p16404_p4 = por %p118_p2, %p117_p1  ;;  %s102_s23 = ssub.s32 %s16324_s16, %s20223_s20 }
   0xa   : > { %p13615_p6 = scmp.ge.s32.totalorder %s16328_s17, 1  ;;  %p105_p7 = scmp.eq.s32.totalorder %s102_s23, 0 }
   0xb   : > { %p16411_p8 = por %p124_p5, %p123_p3  ;;  %p158_p9 = scmp.lt.s32.totalorder %s16328_s17, 3 }
   0xc   : > { %s16417_s25 = scalar_select %p105_p7, %s16316_s14, %s107_s21  }
   0xd   : > { %p159_p10 = pnand %p13615_p6, %p158_p9 }
   0xe   : > { %p184_p11 = scmp.lt.s32.totalorder (!%p159_p10), %s16320_s15, 1  ;;  %s16332_s4 = smov (!%p159_p10), 126  }
   0xf   : > { %162 = sbr.rel (%p159_p10) target bundleno = 1219 (0x4c3), region = 32  ;;  %s16333_s5 = smov (!%p159_p10), 127  }
  0x10   : > { %s16334_s8 = smov (!%p159_p10), 118   ;;  %s16335_s9 = smov (!%p159_p10), 117  }
  0x11   : > { %s16336_s10 = smov (!%p159_p10), 116   ;;  %s16337_s11 = smov (!%p159_p10), 108  }
  0x12   : > { %s16338_s18 = smov (!%p159_p10), 107   ;;  %s16339_s19 = smov (!%p159_p10), 106  }
  0x14   : > { %v16330_v0 = vmov 0.0   ;;  %s185_s26 = scalar_select %p184_p11, %s16320_s15, 1  ;;  %vm16331_vm0 = vmmov 0   ;;  %vm217_vm1 = vcmask 1041408   ;;  %v194_v5 = vld [vmem:[%s20212_s1] sm:$0xf] }
  0x15   : > { %14892 = vmatprep.subr.bf16.mxu1 %v16330_v0  ;;  %14886 = vmatprep.subr.bf16.mxu0 %v16330_v0  ;;  %vm213_vm2 = vcmask 31744   ;;  %vm211_vm3 = vcmask 1039360   ;;  %vm323_vm4 = vcmask 1031168   ;;  %vm388_vm5 = vcmask 965632   ;;  %v13618_v17 = vld [vmem:[%s20212_s1 + $0x4] sm:$0xf] }
  0x16   : > { %14894 = vmatprep.mubr.msk.bf16.mxu1 %vm16331_vm0, %v16330_v0  ;;  %14888 = vmatprep.mubr.msk.bf16.mxu0 %vm16331_vm0, %v16330_v0  ;;  %s16182_s27 = smul.u32 40, %s185_s26  ;;  %vm453_vm6 = vcmask 957440   ;;  %v13625_v23 = vld [vmem:[%s20212_s1 + $0xc] sm:$0xf]  ;;  %vm518_vm7 = vcmask 949248   ;;  %vm583_vm8 = vcmask 883712  }
  0x17   : > { %v13622_v27 = vld [vmem:[%s20212_s1 + $0x8] sm:$0xf]  ;;  %v13631_v33 = vld [vmem:[%s20212_s1 + $0x14] sm:$0xf]  ;;  %vm648_vm9 = vcmask 875520   ;;  %vm713_vm10 = vcmask 867328  }
  0x18   : > { %s16430_s30 = scalar_lea.vmem %s20211_s0, %s16182_s27  ;;  %v13628_v37 = vld [vmem:[%s20212_s1 + $0x10] sm:$0xf]  ;;  %v13637_v44 = vld [vmem:[%s20212_s1 + $0x1c] sm:$0xf]  ;;  %v13634_v49 = vld [vmem:[%s20212_s1 + $0x18] sm:$0xf] }
  0x19   : > { %v13623_v1 = vld.sshfl [vmem:[%s16430_s30] sm:$0x33 pattern:$0x76325410]  ;;  %v13643_v42 = vld [vmem:[%s16430_s30 + $0x4] sm:$0x3] }
  0x1a   : > { %v193_v2 = vld [vmem:[%s16430_s30] sm:$0x3]  ;;  %319 = vrot.lane.b32.xlu1 %v13623_v1, %s16332_s4  ;;  %v318_v3 = vcombine.high %v13623_v1, %v13623_v1  ;;  %207 = vrot.lane.b32.xlu0 %v13623_v1, %s16333_s5  ;;  %v16457_v6 = vld.sshfl [vmem:[%s16430_s30 + $0x4] sm:$0x33 pattern:$0x76325410] }
  0x1b   : > { %v265_v4 = vsel %vm217_vm1, %v193_v2, 0  ;;  %v16463_v7 = vcombine.high %v16457_v6, %v16457_v6  ;;  %v16494_v8 = vld.sshfl [vmem:[%s16430_s30 + $0x8] sm:$0x33 pattern:$0x76325410]  ;;  %v770_v47 = vsel %vm217_vm1, %v13643_v42, 0 }
  0x1c   : > { %14893 = vmatpush3.bf16.msra.mxu1 %v265_v4  ;;  %v16500_v9 = vcombine.high %v16494_v8, %v16494_v8  ;;  %v13644_v53 = vld [vmem:[%s20212_s1 + $0x24] sm:$0xf]  ;;  %v13640_v59 = vld [vmem:[%s20212_s1 + $0x20] sm:$0xf]  ;;  %s16341_s26 = smov [#allocation2]  }
  0x1d   : > { %14904 = vmatprep.subr.bf16.mxu1 %v16330_v0  ;;  %v16683_v63 = vld.sshfl [vmem:[%s16430_s30 + $0xc] sm:$0x33 pattern:$0x76325410] }
  0x1e   : > { %321 = vrot.lane.b32.xlu1 %v318_v3, %s16332_s4  ;;  %209 = vrot.lane.b32.xlu0 %v318_v3, %s16333_s5 }
  0x1f   : > { %14895 = vmatmul.mubr.msk.bf16.vlgmr.msra.gmra.mxu1 %vm213_vm2, %v194_v5  ;;  %v16694_v5 = vcombine.high %v16683_v63, %v16683_v63 }
  0x20   : > { %14906 = vmatprep.mubr.msk.bf16.mxu1 %vm16331_vm0, %v16330_v0 }
  0x22   : > { %384 = vrot.lane.b32.xlu0 %v13623_v1, %s16334_s8  ;;  %386 = vrot.lane.b32.xlu1 %v318_v3, %s16334_s8 }
  0x26   : > { %449 = vrot.lane.b32.xlu0 %v13623_v1, %s16335_s9  ;;  %451 = vrot.lane.b32.xlu1 %v318_v3, %s16335_s9 }
  0x2a   : > { %514 = vrot.lane.b32.xlu0 %v13623_v1, %s16336_s10  ;;  %516 = vrot.lane.b32.xlu1 %v318_v3, %s16336_s10 }
  0x2e   : > { %579 = vrot.lane.b32.xlu0 %v13623_v1, %s16337_s11  ;;  %581 = vrot.lane.b32.xlu1 %v318_v3, %s16337_s11 }
  0x32   : > { %644 = vrot.lane.b32.xlu0 %v13623_v1, %s16338_s18  ;;  %646 = vrot.lane.b32.xlu1 %v318_v3, %s16338_s18 }
  0x36   : > { %709 = vrot.lane.b32.xlu0 %v13623_v1, %s16339_s19  ;;  %711 = vrot.lane.b32.xlu1 %v318_v3, %s16339_s19  ;;  %v13651_v1 = vld [vmem:[%s20212_s1 + $0x2c] sm:$0xf] }
  0x3a   : > { %825 = vrot.lane.b32.xlu0 %v16457_v6, %s16333_s5  ;;  %827 = vrot.lane.b32.xlu1 %v16463_v7, %s16333_s5 }
  0x3e   : > { %889 = vrot.lane.b32.xlu0 %v16457_v6, %s16332_s4  ;;  %891 = vrot.lane.b32.xlu1 %v16463_v7, %s16332_s4 }
  0x42   : > { %953 = vrot.lane.b32.xlu0 %v16457_v6, %s16334_s8  ;;  %955 = vrot.lane.b32.xlu1 %v16463_v7, %s16334_s8 }
  0x46   : > { %1017 = vrot.lane.b32.xlu0 %v16457_v6, %s16335_s9  ;;  %1019 = vrot.lane.b32.xlu1 %v16463_v7, %s16335_s9 }
  0x4a   : > { %1081 = vrot.lane.b32.xlu0 %v16457_v6, %s16336_s10  ;;  %1083 = vrot.lane.b32.xlu1 %v16463_v7, %s16336_s10 }
  0x4e   : > { %1145 = vrot.lane.b32.xlu0 %v16457_v6, %s16337_s11  ;;  %1147 = vrot.lane.b32.xlu1 %v16463_v7, %s16337_s11 }
  0x52   : > { %1209 = vrot.lane.b32.xlu0 %v16457_v6, %s16338_s18  ;;  %1211 = vrot.lane.b32.xlu1 %v16463_v7, %s16338_s18 }
  0x56   : > { %1273 = vrot.lane.b32.xlu0 %v16457_v6, %s16339_s19  ;;  %1275 = vrot.lane.b32.xlu1 %v16463_v7, %s16339_s19 }
  0x5a   : > { %1388 = vrot.lane.b32.xlu0 %v16494_v8, %s16333_s5  ;;  %1390 = vrot.lane.b32.xlu1 %v16500_v9, %s16333_s5 }
  0x5e   : > { %1452 = vrot.lane.b32.xlu0 %v16494_v8, %s16332_s4  ;;  %1454 = vrot.lane.b32.xlu1 %v16500_v9, %s16332_s4 }
  0x62   : > { %1516 = vrot.lane.b32.xlu0 %v16494_v8, %s16334_s8  ;;  %1518 = vrot.lane.b32.xlu1 %v16500_v9, %s16334_s8 }
  0x66   : > { %1580 = vrot.lane.b32.xlu0 %v16494_v8, %s16335_s9  ;;  %1582 = vrot.lane.b32.xlu1 %v16500_v9, %s16335_s9 }
  0x6a   : > { %1644 = vrot.lane.b32.xlu0 %v16494_v8, %s16336_s10  ;;  %1646 = vrot.lane.b32.xlu1 %v16500_v9, %s16336_s10 }
  0x6e   : > { %1708 = vrot.lane.b32.xlu0 %v16494_v8, %s16337_s11  ;;  %1710 = vrot.lane.b32.xlu1 %v16500_v9, %s16337_s11 }
  0x72   : > { %1772 = vrot.lane.b32.xlu0 %v16494_v8, %s16338_s18  ;;  %1774 = vrot.lane.b32.xlu1 %v16500_v9, %s16338_s18 }
  0x76   : > { %1836 = vrot.lane.b32.xlu0 %v16494_v8, %s16339_s19  ;;  %1838 = vrot.lane.b32.xlu1 %v16500_v9, %s16339_s19 }
  0x7a   : > { %1908 = vrot.lane.b32.xlu0 %v16457_v6, %s16333_s5  ;;  %1910 = vrot.lane.b32.xlu1 %v16463_v7, %s16333_s5 }
  0x7e   : > { %2016 = vrot.lane.b32.xlu0 %v16457_v6, %s16332_s4  ;;  %2018 = vrot.lane.b32.xlu1 %v16463_v7, %s16332_s4 }
  0x82   : > { %2079 = vrot.lane.b32.xlu0 %v16457_v6, %s16334_s8  ;;  %2081 = vrot.lane.b32.xlu1 %v16463_v7, %s16334_s8 }
  0x86   : > { %2142 = vrot.lane.b32.xlu0 %v16457_v6, %s16335_s9  ;;  %2144 = vrot.lane.b32.xlu1 %v16463_v7, %s16335_s9 }
  0x8a   : > { %2205 = vrot.lane.b32.xlu0 %v16457_v6, %s16336_s10  ;;  %2207 = vrot.lane.b32.xlu1 %v16463_v7, %s16336_s10 }
  0x8c   : > { %v320_v10 = vpop.permute.xlu1 %319  ;;  %v208_v11 = vpop.permute.xlu0 %207 }
  0x8e   : > { %2268 = vrot.lane.b32.xlu0 %v16457_v6, %s16337_s11  ;;  %2270 = vrot.lane.b32.xlu1 %v16463_v7, %s16337_s11 }
  0x90   : > { %v322_v12 = vpop.permute.xlu1 %321  ;;  %v210_v13 = vpop.permute.xlu0 %209 }
  0x91   : > { %v212_v14 = vsel %vm211_vm3, %v208_v11, %v210_v13  ;;  %v324_v16 = vsel %vm323_vm4, %v320_v10, %v322_v12  ;;  %v13647_v10 = vld [vmem:[%s20212_s1 + $0x28] sm:$0xf] }
  0x92   : > { %2331 = vrot.lane.b32.xlu0 %v16457_v6, %s16338_s18  ;;  %v219_v15 = vsel %vm217_vm1, %v212_v14, 0  ;;  %2333 = vrot.lane.b32.xlu1 %v16463_v7, %s16338_s18  ;;  %v329_v21 = vsel %vm217_vm1, %v324_v16, 0  ;;  %v13659_v14 = vld [vmem:[%s20212_s1 + $0x34] sm:$0xf] }
  0x93   : > { %14887 = vmatpush3.bf16.msra.mxu0 %v219_v15 }
  0x94   : > { %v387_v18 = vpop.permute.xlu1 %386  ;;  %v385_v19 = vpop.permute.xlu0 %384  ;;  %14898 = vmatprep.subr.bf16.mxu0 %v16330_v0 }
  0x95   : > { %v389_v20 = vsel %vm388_vm5, %v385_v19, %v387_v18 }
  0x96   : > { %v394_v22 = vsel %vm217_vm1, %v389_v20, 0  ;;  %2394 = vrot.lane.b32.xlu0 %v16457_v6, %s16339_s19  ;;  %14889 = vmatmul.mubr.msk.bf16.vlgmr.msra.gmra.mxu0 %vm213_vm2, %v13618_v17  ;;  %v13655_v20 = vld [vmem:[%s20212_s1 + $0x30] sm:$0xf] }
  0x97   : > { %14899 = vmatpush3.bf16.msra.mxu0 %v329_v21  ;;  %14905 = vmatpush3.bf16.msra.mxu1 %v394_v22 }
  0x98   : > { %v452_v24 = vpop.permute.xlu1 %451  ;;  %v450_v25 = vpop.permute.xlu0 %449  ;;  %14900 = vmatprep.mubr.msk.bf16.mxu0 %vm16331_vm0, %v16330_v0  ;;  %14910 = vmatprep.subr.bf16.mxu0 %v16330_v0 }
  0x99   : > { %v454_v26 = vsel %vm453_vm6, %v450_v25, %v452_v24  ;;  %14916 = vmatprep.subr.bf16.mxu1 %v16330_v0  ;;  %2396 = vrot.lane.b32.xlu1 %v16463_v7, %s16339_s19  ;;  %v13667_v24 = vld [vmem:[%s20212_s1 + $0x3c] sm:$0xf] }
  0x9a   : > { %2506 = vrot.lane.b32.xlu0 %v16494_v8, %s16333_s5  ;;  %14907 = vmatmul.mubr.msk.bf16.vlgmr.msra.gmra.mxu1 %vm213_vm2, %v13625_v23  ;;  %v459_v28 = vsel %vm217_vm1, %v454_v26, 0 }
  0x9b   : > { %14918 = vmatprep.mubr.msk.bf16.mxu1 %vm16331_vm0, %v16330_v0 }
  0x9c   : > { %v517_v29 = vpop.permute.xlu1 %516  ;;  %v515_v30 = vpop.permute.xlu0 %514 }
  0x9d   : > { %v519_v31 = vsel %vm518_vm7, %v515_v30, %v517_v29  ;;  %2508 = vrot.lane.b32.xlu1 %v16500_v9, %s16333_s5  ;;  %v13663_v30 = vld [vmem:[%s20212_s1 + $0x38] sm:$0xf] }
  0x9e   : > { %v524_v32 = vsel %vm217_vm1, %v519_v31, 0  ;;  %2569 = vrot.lane.b32.xlu0 %v16494_v8, %s16332_s4  ;;  %14901 = vmatmul.mubr.msk.bf16.vlgmr.msra.gmra.mxu0 %vm213_vm2, %v13622_v27 }
  0x9f   : > { %14911 = vmatpush3.bf16.msra.mxu0 %v459_v28  ;;  %14917 = vmatpush3.bf16.msra.mxu1 %v524_v32 }
  0xa0   : > { %v582_v34 = vpop.permute.xlu1 %581  ;;  %v580_v35 = vpop.permute.xlu0 %579  ;;  %14912 = vmatprep.mubr.msk.bf16.mxu0 %vm16331_vm0, %v16330_v0  ;;  %14922 = vmatprep.subr.bf16.mxu0 %v16330_v0 }
  0xa1   : > { %v584_v36 = vsel %vm583_vm8, %v580_v35, %v582_v34  ;;  %14928 = vmatprep.subr.bf16.mxu1 %v16330_v0  ;;  %2571 = vrot.lane.b32.xlu1 %v16500_v9, %s16332_s4  ;;  %v13675_v35 = vld [vmem:[%s20212_s1 + $0x44] sm:$0xf] }
  0xa2   : > { %2632 = vrot.lane.b32.xlu0 %v16494_v8, %s16334_s8  ;;  %14919 = vmatmul.mubr.msk.bf16.vlgmr.msra.gmra.mxu1 %vm213_vm2, %v13631_v33  ;;  %v589_v38 = vsel %vm217_vm1, %v584_v36, 0 }
  0xa3   : > { %14930 = vmatprep.mubr.msk.bf16.mxu1 %vm16331_vm0, %v16330_v0 }
  0xa4   : > { %v647_v39 = vpop.permute.xlu1 %646  ;;  %v645_v40 = vpop.permute.xlu0 %644 }
  0xa5   : > { %v649_v41 = vsel %vm648_vm9, %v645_v40, %v647_v39  ;;  %2634 = vrot.lane.b32.xlu1 %v16500_v9, %s16334_s8  ;;  %v13678_v39 = vld [vmem:[%s16430_s30 + $0x8] sm:$0x3]  ;;  %v13671_v40 = vld [vmem:[%s20212_s1 + $0x40] sm:$0xf] }
  0xa6   : > { %v654_v43 = vsel %vm217_vm1, %v649_v41, 0  ;;  %2695 = vrot.lane.b32.xlu0 %v16494_v8, %s16335_s9  ;;  %14913 = vmatmul.mubr.msk.bf16.vlgmr.msra.gmra.mxu0 %vm213_vm2, %v13628_v37  ;;  %v1333_v41 = vsel %vm217_vm1, %v13678_v39, 0 }
  0xa7   : > { %14923 = vmatpush3.bf16.msra.mxu0 %v589_v38  ;;  %14929 = vmatpush3.bf16.msra.mxu1 %v654_v43 }
  0xa8   : > { %v712_v45 = vpop.permute.xlu1 %711  ;;  %v710_v46 = vpop.permute.xlu0 %709  ;;  %14924 = vmatprep.mubr.msk.bf16.mxu0 %vm16331_vm0, %v16330_v0  ;;  %14934 = vmatprep.subr.bf16.mxu0 %v16330_v0 }
  0xa9   : > { %v714_v48 = vsel %vm713_vm10, %v710_v46, %v712_v45  ;;  %14940 = vmatprep.subr.bf16.mxu1 %v16330_v0  ;;  %2697 = vrot.lane.b32.xlu1 %v16500_v9, %s16335_s9  ;;  %v13682_v45 = vld [vmem:[%s20212_s1 + $0x4c] sm:$0xf] }
  0xaa   : > { %2758 = vrot.lane.b32.xlu0 %v16494_v8, %s16336_s10  ;;  %14931 = vmatmul.mubr.msk.bf16.vlgmr.msra.gmra.mxu1 %vm213_vm2, %v13637_v44  ;;  %v719_v50 = vsel %vm217_vm1, %v714_v48, 0 }
  0xab   : > { %14941 = vmatpush3.bf16.msra.mxu1 %v770_v47  ;;  %14942 = vmatprep.mubr.msk.bf16.mxu1 %vm16331_vm0, %v16330_v0 }
  0xac   : > { %v828_v51 = vpop.permute.xlu1 %827  ;;  %v826_v52 = vpop.permute.xlu0 %825  ;;  %14952 = vmatprep.subr.bf16.mxu1 %v16330_v0 }
  0xad   : > { %2760 = vrot.lane.b32.xlu1 %v16500_v9, %s16336_s10  ;;  %v829_v56 = vsel %vm211_vm3, %v826_v52, %v828_v51 }
  0xae   : > { %2821 = vrot.lane.b32.xlu0 %v16494_v8, %s16337_s11  ;;  %14925 = vmatmul.mubr.msk.bf16.vlgmr.msra.gmra.mxu0 %vm213_vm2, %v13634_v49  ;;  %v834_v60 = vsel %vm217_vm1, %v829_v56, 0 }
  0xaf   : > { %14935 = vmatpush3.bf16.msra.mxu0 %v719_v50  ;;  %14936 = vmatprep.mubr.msk.bf16.mxu0 %vm16331_vm0, %v16330_v0  ;;  %v13679_v50 = vld [vmem:[%s20212_s1 + $0x48] sm:$0xf] }
  0xb0   : > { %v892_v54 = vpop.permute.xlu1 %891  ;;  %14946 = vmatprep.subr.bf16.mxu0 %v16330_v0  ;;  %v890_v55 = vpop.permute.xlu0 %889 }
  0xb1   : > { %v893_v57 = vsel %vm323_vm4, %v890_v55, %v892_v54  ;;  %2823 = vrot.lane.b32.xlu1 %v16500_v9, %s16337_s11  ;;  %v13690_v55 = vld [vmem:[%s20212_s1 + $0x54] sm:$0xf] }
  0xb2   : > { %2884 = vrot.lane.b32.xlu0 %v16494_v8, %s16338_s18  ;;  %14943 = vmatmul.mubr.msk.bf16.vlgmr.msra.gmra.mxu1 %vm213_vm2, %v13644_v53  ;;  %v898_v58 = vsel %vm217_vm1, %v893_v57, 0 }
  0xb3   : > { %14953 = vmatpush3.bf16.msra.mxu1 %v898_v58  ;;  %14954 = vmatprep.mubr.msk.bf16.mxu1 %vm16331_vm0, %v16330_v0 }
  0xb4   : > { %v956_v61 = vpop.permute.xlu1 %955  ;;  %v954_v62 = vpop.permute.xlu0 %953  ;;  %14964 = vmatprep.subr.bf16.mxu1 %v16330_v0 }
  0xb5   : > { %2886 = vrot.lane.b32.xlu1 %v16500_v9, %s16338_s18  ;;  %v957_v4 = vsel %vm388_vm5, %v954_v62, %v956_v61  ;;  %v13686_v62 = vld [vmem:[%s20212_s1 + $0x50] sm:$0xf] }
  0xb6   : > { %2947 = vrot.lane.b32.xlu0 %v16494_v8, %s16339_s19  ;;  %14937 = vmatmul.mubr.msk.bf16.vlgmr.msra.gmra.mxu0 %vm213_vm2, %v13640_v59  ;;  %v962_v11 = vsel %vm217_vm1, %v957_v4, 0 }
  0xb7   : > { %14947 = vmatpush3.bf16.msra.mxu0 %v834_v60  ;;  %14948 = vmatprep.mubr.msk.bf16.mxu0 %vm16331_vm0, %v16330_v0 }
  0xb8   : > { %v1020_v2 = vpop.permute.xlu1 %1019  ;;  %14958 = vmatprep.subr.bf16.mxu0 %v16330_v0  ;;  %v1018_v3 = vpop.permute.xlu0 %1017 }
  0xb9   : > { %v1021_v6 = vsel %vm453_vm6, %v1018_v3, %v1020_v2  ;;  %2949 = vrot.lane.b32.xlu1 %v16500_v9, %s16339_s19 }
  0xba   : > { %3060 = vrot.lane.b32.xlu0 %v16683_v63, %s16333_s5  ;;  %14955 = vmatmul.mubr.msk.bf16.vlgmr.msra.gmra.mxu1 %vm213_vm2, %v13651_v1  ;;  %v1026_v7 = vsel %vm217_vm1, %v1021_v6, 0 }
  0xbb   : > { %14965 = vmatpush3.bf16.msra.mxu1 %v1026_v7  ;;  %14966 = vmatprep.mubr.msk.bf16.mxu1 %vm16331_vm0, %v16330_v0 }
  0xbc   : > { %v1084_v12 = vpop.permute.xlu1 %1083  ;;  %v1082_v13 = vpop.permute.xlu0 %1081  ;;  %14976 = vmatprep.subr.bf16.mxu1 %v16330_v0 }
  0xbd   : > { %3062 = vrot.lane.b32.xlu1 %v16694_v5, %s16333_s5  ;;  %v1085_v17 = vsel %vm518_vm7, %v1082_v13, %v1084_v12 }
  0xbe   : > { %3123 = vrot.lane.b32.xlu0 %v16683_v63, %s16332_s4  ;;  %14949 = vmatmul.mubr.msk.bf16.vlgmr.msra.gmra.mxu0 %vm213_vm2, %v13647_v10  ;;  %v1090_v21 = vsel %vm217_vm1, %v1085_v17, 0  ;;  %v13698_v10 = vld [vmem:[%s20212_s1 + $0x5c] sm:$0xf] }
  0xbf   : > { %14959 = vmatpush3.bf16.msra.mxu0 %v962_v11  ;;  %14960 = vmatprep.mubr.msk.bf16.mxu0 %vm16331_vm0, %v16330_v0 }
  0xc0   : > { %v1148_v15 = vpop.permute.xlu1 %1147  ;;  %14970 = vmatprep.subr.bf16.mxu0 %v16330_v0  ;;  %v1146_v16 = vpop.permute.xlu0 %1145 }
  0xc1   : > { %v1149_v18 = vsel %vm583_vm8, %v1146_v16, %v1148_v15  ;;  %3125 = vrot.lane.b32.xlu1 %v16694_v5, %s16332_s4  ;;  %v13694_v15 = vld [vmem:[%s20212_s1 + $0x58] sm:$0xf] }
  0xc2   : > { %3186 = vrot.lane.b32.xlu0 %v16683_v63, %s16334_s8  ;;  %14967 = vmatmul.mubr.msk.bf16.vlgmr.msra.gmra.mxu1 %vm213_vm2, %v13659_v14  ;;  %v1154_v19 = vsel %vm217_vm1, %v1149_v18, 0 }
  0xc3   : > { %14977 = vmatpush3.bf16.msra.mxu1 %v1154_v19  ;;  %14978 = vmatprep.mubr.msk.bf16.mxu1 %vm16331_vm0, %v16330_v0 }
  0xc4   : > { %v1212_v22 = vpop.permute.xlu1 %1211  ;;  %v1210_v23 = vpop.permute.xlu0 %1209  ;;  %14988 = vmatprep.subr.bf16.mxu1 %v16330_v0 }
  0xc5   : > { %3188 = vrot.lane.b32.xlu1 %v16694_v5, %s16334_s8  ;;  %v1213_v27 = vsel %vm648_vm9, %v1210_v23, %v1212_v22 }
  0xc6   : > { %3249 = vrot.lane.b32.xlu0 %v16683_v63, %s16335_s9  ;;  %14961 = vmatmul.mubr.msk.bf16.vlgmr.msra.gmra.mxu0 %vm213_vm2, %v13655_v20  ;;  %v1218_v31 = vsel %vm217_vm1, %v1213_v27, 0  ;;  %v13706_v20 = vld [vmem:[%s20212_s1 + $0x64] sm:$0xf] }
  0xc7   : > { %14971 = vmatpush3.bf16.msra.mxu0 %v1090_v21  ;;  %14972 = vmatprep.mubr.msk.bf16.mxu0 %vm16331_vm0, %v16330_v0 }
  0xc8   : > { %v1276_v25 = vpop.permute.xlu1 %1275  ;;  %14982 = vmatprep.subr.bf16.mxu0 %v16330_v0  ;;  %v1274_v26 = vpop.permute.xlu0 %1273 }
  0xc9   : > { %v1277_v28 = vsel %vm713_vm10, %v1274_v26, %v1276_v25  ;;  %3251 = vrot.lane.b32.xlu1 %v16694_v5, %s16335_s9  ;;  %v13702_v25 = vld [vmem:[%s20212_s1 + $0x60] sm:$0xf] }
  0xca   : > { %3312 = vrot.lane.b32.xlu0 %v16683_v63, %s16336_s10  ;;  %14979 = vmatmul.mubr.msk.bf16.vlgmr.msra.gmra.mxu1 %vm213_vm2, %v13667_v24  ;;  %v1282_v29 = vsel %vm217_vm1, %v1277_v28, 0 }
  0xcb   : > { %14989 = vmatpush3.bf16.msra.mxu1 %v1282_v29  ;;  %14990 = vmatprep.mubr.msk.bf16.mxu1 %vm16331_vm0, %v16330_v0 }
  0xcc   : > { %v1391_v32 = vpop.permute.xlu1 %1390  ;;  %v1389_v33 = vpop.permute.xlu0 %1388  ;;  %15000 = vmatprep.subr.bf16.mxu1 %v16330_v0 }
  0xcd   : > { %v1392_v34 = vsel %vm211_vm3, %v1389_v33, %v1391_v32  ;;  %3314 = vrot.lane.b32.xlu1 %v16694_v5, %s16336_s10 }
  0xce   : > { %3375 = vrot.lane.b32.xlu0 %v16683_v63, %s16337_s11  ;;  %14973 = vmatmul.mubr.msk.bf16.vlgmr.msra.gmra.mxu0 %vm213_vm2, %v13663_v30  ;;  %v1397_v36 = vsel %vm217_vm1, %v1392_v34, 0  ;;  %v13715_v30 = vld [vmem:[%s20212_s1 + $0x4] sm:$0xf] }
  0xcf   : > { %14983 = vmatpush3.bf16.msra.mxu0 %v1218_v31  ;;  %14984 = vmatprep.mubr.msk.bf16.mxu0 %vm16331_vm0, %v16330_v0  ;;  %v13713_v34 = vld [vmem:[%s16430_s30 + $0x4] sm:$0x3] }
  0xd0   : > { %14994 = vmatprep.subr.bf16.mxu0 %v16330_v0  ;;  %v1455_v37 = vpop.permute.xlu1 %1454  ;;  %v1453_v38 = vpop.permute.xlu0 %1452 }
  0xd1   : > { %3377 = vrot.lane.b32.xlu1 %v16694_v5, %s16337_s11  ;;  %v1456_v49 = vsel %vm323_vm4, %v1453_v38, %v1455_v37  ;;  %v13720_v38 = vld [vmem:[%s20212_s1 + $0x8] sm:$0xf] }
  0xd2   : > { %3438 = vrot.lane.b32.xlu0 %v16683_v63, %s16338_s18  ;;  %14991 = vmatmul.mubr.msk.bf16.vlgmr.msra.gmra.mxu1 %vm213_vm2, %v13675_v35  ;;  %v1461_v51 = vsel %vm217_vm1, %v1456_v49, 0  ;;  %v1963_v35 = vsel %vm217_vm1, %v13713_v34, 0 }
  0xd3   : > { %15001 = vmatpush3.bf16.msra.mxu1 %v1397_v36  ;;  %15002 = vmatprep.mubr.msk.bf16.mxu1 %vm16331_vm0, %v16330_v0 }
  0xd4   : > { %v1519_v42 = vpop.permute.xlu1 %1518  ;;  %v1517_v43 = vpop.permute.xlu0 %1516  ;;  %15012 = vmatprep.subr.bf16.mxu1 %v16330_v0 }
  0xd5   : > { %v1520_v44 = vsel %vm388_vm5, %v1517_v43, %v1519_v42  ;;  %3440 = vrot.lane.b32.xlu1 %v16694_v5, %s16338_s18  ;;  %v1896_v43 = vld [vmem:[%s20212_s1] sm:$0xf] }
  0xd6   : > { %3501 = vrot.lane.b32.xlu0 %v16683_v63, %s16339_s19  ;;  %14985 = vmatmul.mubr.msk.bf16.vlgmr.msra.gmra.mxu0 %vm213_vm2, %v13671_v40  ;;  %v1525_v46 = vsel %vm217_vm1, %v1520_v44, 0 }
  0xd7   : > { %14995 = vmatpush3.bf16.msra.mxu0 %v1333_v41  ;;  %14996 = vmatprep.mubr.msk.bf16.mxu0 %vm16331_vm0, %v16330_v0 }
  0xd8   : > { %15006 = vmatprep.subr.bf16.mxu0 %v16330_v0  ;;  %v1583_v47 = vpop.permute.xlu1 %1582  ;;  %v1581_v48 = vpop.permute.xlu0 %1580 }
  0xd9   : > { %3503 = vrot.lane.b32.xlu1 %v16694_v5, %s16339_s19  ;;  %v1584_v60 = vsel %vm453_vm6, %v1581_v48, %v1583_v47  ;;  %v13728_v48 = vld [vmem:[%s20212_s1 + $0x10] sm:$0xf] }
  0xda   : > { %3569 = vrot.lane.b32.xlu0 %v16494_v8, %s16333_s5  ;;  %15003 = vmatmul.mubr.msk.bf16.vlgmr.msra.gmra.mxu1 %vm213_vm2, %v13682_v45  ;;  %v1589_v2 = vsel %vm217_vm1, %v1584_v60, 0 }
  0xdb   : > { %15013 = vmatpush3.bf16.msra.mxu1 %v1525_v46  ;;  %15014 = vmatprep.mubr.msk.bf16.mxu1 %vm16331_vm0, %v16330_v0 }
  0xdc   : > { %v1647_v52 = vpop.permute.xlu1 %1646  ;;  %v1645_v53 = vpop.permute.xlu0 %1644  ;;  %15024 = vmatprep.subr.bf16.mxu1 %v16330_v0 }
  0xdd   : > { %v1648_v54 = vsel %vm518_vm7, %v1645_v53, %v1647_v52  ;;  %3571 = vrot.lane.b32.xlu1 %v16500_v9, %s16333_s5  ;;  %v13724_v52 = vld [vmem:[%s20212_s1 + $0xc] sm:$0xf] }
  0xde   : > { %3677 = vrot.lane.b32.xlu0 %v16494_v8, %s16332_s4  ;;  %14997 = vmatmul.mubr.msk.bf16.vlgmr.msra.gmra.mxu0 %vm213_vm2, %v13679_v50  ;;  %v1653_v57 = vsel %vm217_vm1, %v1648_v54, 0 }
  0xdf   : > { %15007 = vmatpush3.bf16.msra.mxu0 %v1461_v51  ;;  %15008 = vmatprep.mubr.msk.bf16.mxu0 %vm16331_vm0, %v16330_v0  ;;  %v16825_v56 = vpop.f32.mrf.mxu1 }
  0xe0   : > { %15018 = vmatprep.subr.bf16.mxu0 %v16330_v0  ;;  %v1711_v58 = vpop.permute.xlu1 %1710  ;;  %v1709_v59 = vpop.permute.xlu0 %1708 }
  0xe1   : > { %3679 = vrot.lane.b32.xlu1 %v16500_v9, %s16332_s4  ;;  %v14896_v61 = vpop.f32.mrf.mxu1  ;;  %v1712_v14 = vsel %vm583_vm8, %v1709_v59, %v1711_v58  ;;  %v13736_v58 = vld [vmem:[%s20212_s1 + $0x18] sm:$0xf] }
  0xe2   : > { %3740 = vrot.lane.b32.xlu0 %v16494_v8, %s16334_s8  ;;  %15015 = vmatmul.mubr.msk.bf16.vlgmr.msra.gmra.mxu1 %vm213_vm2, %v13690_v55  ;;  %v1717_v16 = vsel %vm217_vm1, %v1712_v14, 0 }
  0xe3   : > { %15025 = vmatpush3.bf16.msra.mxu1 %v1653_v57  ;;  %15026 = vmatprep.mubr.msk.bf16.mxu1 %vm16331_vm0, %v16330_v0  ;;  %v304_v1 = vpop.f32.mrf.mxu1 }
  0xe4   : > { %v1775_v3 = vpop.permute.xlu1 %1774  ;;  %v1773_v4 = vpop.permute.xlu0 %1772  ;;  %15036 = vmatprep.subr.bf16.mxu1 %v16330_v0  ;;  %v13732_v1 = vld [vmem:[%s20212_s1 + $0x14] sm:$0xf] }
  0xe5   : > { %v1776_v6 = vsel %vm648_vm9, %v1773_v4, %v1775_v3  ;;  %3742 = vrot.lane.b32.xlu1 %v16500_v9, %s16334_s8  ;;  %v14897_v7 = vpop.f32.mrf.mxu1 }
  0xe6   : > { %3803 = vrot.lane.b32.xlu0 %v16494_v8, %s16335_s9  ;;  %15009 = vmatmul.mubr.msk.bf16.vlgmr.msra.gmra.mxu0 %vm213_vm2, %v13686_v62  ;;  %v1781_v11 = vsel %vm217_vm1, %v1776_v6, 0  ;;  %v17005_v7 = vld.sshfl [vmem:[%s16430_s30 + $0x10] sm:$0x33 pattern:$0x76325410] }
  0xe7   : > { %15019 = vmatpush3.bf16.msra.mxu0 %v1589_v2  ;;  %15020 = vmatprep.mubr.msk.bf16.mxu0 %vm16331_vm0, %v16330_v0  ;;  %v17016_v14 = vcombine.high %v17005_v7, %v17005_v7 }
  0xe8   : > { %15030 = vmatprep.subr.bf16.mxu0 %v16330_v0  ;;  %v1839_v12 = vpop.permute.xlu1 %1838  ;;  %v1837_v13 = vpop.permute.xlu0 %1836 }
  0xe9   : > { %3805 = vrot.lane.b32.xlu1 %v16500_v9, %s16335_s9  ;;  %v1840_v24 = vsel %vm713_vm10, %v1837_v13, %v1839_v12 }
  0xea   : > { %3866 = vrot.lane.b32.xlu0 %v16494_v8, %s16336_s10  ;;  %15027 = vmatmul.mubr.msk.bf16.vlgmr.msra.gmra.mxu1 %vm213_vm2, %v13698_v10  ;;  %v1845_v26 = vsel %vm217_vm1, %v1840_v24, 0  ;;  %v13744_v10 = vld [vmem:[%s20212_s1 + $0x20] sm:$0xf] }
  0xeb   : > { %15037 = vmatpush3.bf16.msra.mxu1 %v1781_v11  ;;  %15038 = vmatprep.mubr.msk.bf16.mxu1 %vm16331_vm0, %v16330_v0 }
  0xec   : > { %v1911_v17 = vpop.permute.xlu1 %1910  ;;  %v1909_v18 = vpop.permute.xlu0 %1908  ;;  %15048 = vmatprep.subr.bf16.mxu1 %v16330_v0 }
  0xed   : > { %v1912_v19 = vsel %vm211_vm3, %v1909_v18, %v1911_v17  ;;  %3868 = vrot.lane.b32.xlu1 %v16500_v9, %s16336_s10 }
  0xee   : > { %3929 = vrot.lane.b32.xlu0 %v16494_v8, %s16337_s11  ;;  %15021 = vmatmul.mubr.msk.bf16.vlgmr.msra.gmra.mxu0 %vm213_vm2, %v13694_v15  ;;  %v1917_v21 = vsel %vm217_vm1, %v1912_v19, 0  ;;  %v13747_v15 = vld [vmem:[%s16430_s30 + $0x8] sm:$0x3] }
  0xef   : > { %15031 = vmatpush3.bf16.msra.mxu0 %v1717_v16  ;;  %15032 = vmatprep.mubr.msk.bf16.mxu0 %vm16331_vm0, %v16330_v0  ;;  %v13740_v16 = vld [vmem:[%s20212_s1 + $0x1c] sm:$0xf]  ;;  %v2452_v18 = vsel %vm217_vm1, %v13747_v15, 0 }
  0xf0   : > { %15042 = vmatprep.subr.bf16.mxu0 %v16330_v0  ;;  %v2017_v22 = vpop.permute.xlu0 %2016  ;;  %v2019_v23 = vpop.permute.xlu1 %2018 }
  0xf1   : > { %3931 = vrot.lane.b32.xlu1 %v16500_v9, %s16337_s11  ;;  %v2020_v29 = vsel %vm323_vm4, %v2017_v22, %v2019_v23 }
  0xf2   : > { %3992 = vrot.lane.b32.xlu0 %v16494_v8, %s16338_s18  ;;  %15039 = vmatmul.mubr.msk.bf16.vlgmr.msra.gmra.mxu1 %vm213_vm2, %v13706_v20  ;;  %v2025_v31 = vsel %vm217_vm1, %v2020_v29, 0 }
  0xf3   : > { %15049 = vmatpush3.bf16.msra.mxu1 %v1917_v21  ;;  %15050 = vmatprep.mubr.msk.bf16.mxu1 %vm16331_vm0, %v16330_v0  ;;  %v13751_v21 = vld [vmem:[%s20212_s1 + $0x28] sm:$0xf] }
  0xf4   : > { %v2080_v27 = vpop.permute.xlu0 %2079  ;;  %15060 = vmatprep.subr.bf16.mxu1 %v16330_v0  ;;  %v2082_v28 = vpop.permute.xlu1 %2081 }
  0xf5   : > { %3994 = vrot.lane.b32.xlu1 %v16500_v9, %s16338_s18  ;;  %v2083_v42 = vsel %vm388_vm5, %v2080_v27, %v2082_v28 }
  0xf6   : > { %4055 = vrot.lane.b32.xlu0 %v16494_v8, %s16339_s19  ;;  %15033 = vmatmul.mubr.msk.bf16.vlgmr.msra.gmra.mxu0 %vm213_vm2, %v13702_v25  ;;  %v13710_v8 = vld [vmem:[%s20212_s1 + $0x68] sm:$0xf]  ;;  %v2088_v44 = vsel %vm217_vm1, %v2083_v42, 0 }
  0xf7   : > { %15043 = vmatpush3.bf16.msra.mxu0 %v1845_v26  ;;  %15044 = vmatprep.mubr.msk.bf16.mxu0 %vm16331_vm0, %v16330_v0  ;;  %v13748_v26 = vld [vmem:[%s20212_s1 + $0x24] sm:$0xf] }
  0xf8   : > { %15054 = vmatprep.subr.bf16.mxu0 %v16330_v0  ;;  %v2143_v32 = vpop.permute.xlu0 %2142  ;;  %v2145_v33 = vpop.permute.xlu1 %2144 }
  0xf9   : > { %4057 = vrot.lane.b32.xlu1 %v16500_v9, %s16339_s19  ;;  %v2146_v9 = vsel %vm453_vm6, %v2143_v32, %v2145_v33 }
  0xfa   : > { %4167 = vrot.lane.b32.xlu0 %v16683_v63, %s16333_s5  ;;  %15051 = vmatmul.mubr.msk.bf16.vlgmr.msra.gmra.mxu1 %vm213_vm2, %v13715_v30  ;;  %v2151_v39 = vsel %vm217_vm1, %v2146_v9, 0 }
  0xfb   : > { %15061 = vmatpush3.bf16.msra.mxu1 %v2025_v31  ;;  %15062 = vmatprep.mubr.msk.bf16.mxu1 %vm16331_vm0, %v16330_v0  ;;  %v13759_v31 = vld [vmem:[%s20212_s1 + $0x30] sm:$0xf] }
  0xfc   : > { %v2206_v36 = vpop.permute.xlu0 %2205  ;;  %15072 = vmatprep.subr.bf16.mxu1 %v16330_v0  ;;  %v2208_v37 = vpop.permute.xlu1 %2207 }
  0xfd   : > { %4169 = vrot.lane.b32.xlu1 %v16694_v5, %s16333_s5  ;;  %v2209_v51 = vsel %vm518_vm7, %v2206_v36, %v2208_v37 }
  0xfe   : > { %4230 = vrot.lane.b32.xlu0 %v16683_v63, %s16332_s4  ;;  %15045 = vmatmul.mubr.msk.bf16.vlgmr.msra.gmra.mxu0 %vm213_vm2, %v13710_v8  ;;  %v2214_v54 = vsel %vm217_vm1, %v2209_v51, 0 }
  0xff   : > { %15055 = vmatpush3.bf16.msra.mxu0 %v1963_v35  ;;  %15056 = vmatprep.mubr.msk.bf16.mxu0 %vm16331_vm0, %v16330_v0  ;;  %v13755_v35 = vld [vmem:[%s20212_s1 + $0x2c] sm:$0xf] }
 0x100   : > { %15066 = vmatprep.subr.bf16.mxu0 %v16330_v0  ;;  %v2269_v40 = vpop.permute.xlu0 %2268  ;;  %v2271_v41 = vpop.permute.xlu1 %2270 }
 0x101   : > { %4232 = vrot.lane.b32.xlu1 %v16694_v5, %s16332_s4  ;;  %v2272_v46 = vsel %vm583_vm8, %v2269_v40, %v2271_v41 }
 0x102   : > { %4293 = vrot.lane.b32.xlu0 %v16683_v63, %s16334_s8  ;;  %15063 = vmatmul.mubr.msk.bf16.vlgmr.msra.gmra.mxu1 %vm213_vm2, %v13720_v38  ;;  %v2277_v49 = vsel %vm217_vm1, %v2272_v46, 0 }
 0x103   : > { %15073 = vmatpush3.bf16.msra.mxu1 %v2151_v39  ;;  %15074 = vmatprep.mubr.msk.bf16.mxu1 %vm16331_vm0, %v16330_v0  ;;  %v13767_v39 = vld [vmem:[%s20212_s1 + $0x38] sm:$0xf] }
 0x104   : > { %v2332_v45 = vpop.permute.xlu0 %2331  ;;  %15084 = vmatprep.subr.bf16.mxu1 %v16330_v0  ;;  %v2334_v47 = vpop.permute.xlu1 %2333 }
 0x105   : > { %4295 = vrot.lane.b32.xlu1 %v16694_v5, %s16334_s8  ;;  %v2335_v62 = vsel %vm648_vm9, %v2332_v45, %v2334_v47 }
 0x106   : > { %4356 = vrot.lane.b32.xlu0 %v16683_v63, %s16335_s9  ;;  %15057 = vmatmul.mubr.msk.bf16.vlgmr.msra.gmra.mxu0 %vm213_vm2, %v1896_v43  ;;  %v2340_v3 = vsel %vm217_vm1, %v2335_v62, 0 }
 0x107   : > { %15067 = vmatpush3.bf16.msra.mxu0 %v2088_v44  ;;  %15068 = vmatprep.mubr.msk.bf16.mxu0 %vm16331_vm0, %v16330_v0  ;;  %v13763_v44 = vld [vmem:[%s20212_s1 + $0x34] sm:$0xf] }
 0x108   : > { %15078 = vmatprep.subr.bf16.mxu0 %v16330_v0  ;;  %v2395_v50 = vpop.permute.xlu0 %2394 }
 0x109   : > { %4358 = vrot.lane.b32.xlu1 %v16694_v5, %s16335_s9 }
 0x10a   : > { %4419 = vrot.lane.b32.xlu0 %v16683_v63, %s16336_s10  ;;  %15075 = vmatmul.mubr.msk.bf16.vlgmr.msra.gmra.mxu1 %vm213_vm2, %v13728_v48  ;;  %v13782_v48 = vld [vmem:[%s16430_s30 + $0xc] sm:$0x3] }
 0x10b   : > { %15085 = vmatpush3.bf16.msra.mxu1 %v2277_v49  ;;  %15086 = vmatprep.mubr.msk.bf16.mxu1 %vm16331_vm0, %v16330_v0  ;;  %v2397_v53 = vpop.permute.xlu1 %2396  ;;  %v13775_v49 = vld [vmem:[%s20212_s1 + $0x40] sm:$0xf]  ;;  %v3006_v51 = vsel %vm217_vm1, %v13782_v48, 0 }
 0x10c   : > { %v2507_v55 = vpop.permute.xlu0 %2506  ;;  %15096 = vmatprep.subr.bf16.mxu1 %v16330_v0  ;;  %v2398_v57 = vsel %vm713_vm10, %v2395_v50, %v2397_v53 }
 0x10d   : > { %4421 = vrot.lane.b32.xlu1 %v16694_v5, %s16336_s10  ;;  %v2403_v60 = vsel %vm217_vm1, %v2398_v57, 0 }
 0x10e   : > { %4482 = vrot.lane.b32.xlu0 %v16683_v63, %s16337_s11  ;;  %15069 = vmatmul.mubr.msk.bf16.vlgmr.msra.gmra.mxu0 %vm213_vm2, %v13724_v52 }
 0x10f   : > { %15079 = vmatpush3.bf16.msra.mxu0 %v2214_v54  ;;  %15080 = vmatprep.mubr.msk.bf16.mxu0 %vm16331_vm0, %v16330_v0  ;;  %v2509_v59 = vpop.permute.xlu1 %2508  ;;  %v13771_v54 = vld [vmem:[%s20212_s1 + $0x3c] sm:$0xf] }
 0x110   : > { %15090 = vmatprep.subr.bf16.mxu0 %v16330_v0  ;;  %v2570_v61 = vpop.permute.xlu0 %2569  ;;  %v2510_v6 = vsel %vm211_vm3, %v2507_v55, %v2509_v59 }
 0x111   : > { %4484 = vrot.lane.b32.xlu1 %v16694_v5, %s16337_s11  ;;  %v2515_v12 = vsel %vm217_vm1, %v2510_v6, 0 }
 0x112   : > { %4545 = vrot.lane.b32.xlu0 %v16683_v63, %s16338_s18  ;;  %15087 = vmatmul.mubr.msk.bf16.vlgmr.msra.gmra.mxu1 %vm213_vm2, %v13736_v58 }
 0x113   : > { %15097 = vmatpush3.bf16.msra.mxu1 %v2403_v60  ;;  %15098 = vmatprep.mubr.msk.bf16.mxu1 %vm16331_vm0, %v16330_v0  ;;  %v2572_v2 = vpop.permute.xlu1 %2571  ;;  %v13783_v60 = vld [vmem:[%s20212_s1 + $0x48] sm:$0xf] }
 0x114   : > { %v2633_v4 = vpop.permute.xlu0 %2632  ;;  %15108 = vmatprep.subr.bf16.mxu1 %v16330_v0  ;;  %v2573_v25 = vsel %vm323_vm4, %v2570_v61, %v2572_v2 }
 0x115   : > { %4547 = vrot.lane.b32.xlu1 %v16694_v5, %s16338_s18  ;;  %v2578_v28 = vsel %vm217_vm1, %v2573_v25, 0 }
 0x116   : > { %4608 = vrot.lane.b32.xlu0 %v16683_v63, %s16339_s19  ;;  %15081 = vmatmul.mubr.msk.bf16.vlgmr.msra.gmra.mxu0 %vm213_vm2, %v13732_v1 }
 0x117   : > { %15091 = vmatpush3.bf16.msra.mxu0 %v2340_v3  ;;  %15092 = vmatprep.mubr.msk.bf16.mxu0 %vm16331_vm0, %v16330_v0  ;;  %v2635_v11 = vpop.permute.xlu1 %2634  ;;  %v13779_v3 = vld [vmem:[%s20212_s1 + $0x44] sm:$0xf] }
 0x118   : > { %15102 = vmatprep.subr.bf16.mxu0 %v16330_v0  ;;  %v2696_v13 = vpop.permute.xlu0 %2695  ;;  %v2636_v20 = vsel %vm388_vm5, %v2633_v4, %v2635_v11 }
 0x119   : > { %4610 = vrot.lane.b32.xlu1 %v16694_v5, %s16339_s19  ;;  %v2641_v23 = vsel %vm217_vm1, %v2636_v20, 0 }
 0x11a   : > { %4721 = vrot.lane.b32.xlu0 %v17005_v7, %s16333_s5  ;;  %15099 = vmatmul.mubr.msk.bf16.vlgmr.msra.gmra.mxu1 %vm213_vm2, %v13744_v10 }
 0x11b   : > { %15109 = vmatpush3.bf16.msra.mxu1 %v2515_v12  ;;  %15110 = vmatprep.mubr.msk.bf16.mxu1 %vm16331_vm0, %v16330_v0  ;;  %v2698_v17 = vpop.permute.xlu1 %2697  ;;  %v13790_v12 = vld [vmem:[%s20212_s1 + $0x50] sm:$0xf] }
 0x11c   : > { %v2759_v19 = vpop.permute.xlu0 %2758  ;;  %15120 = vmatprep.subr.bf16.mxu1 %v16330_v0  ;;  %v2699_v8 = vsel %vm453_vm6, %v2696_v13, %v2698_v17 }
 0x11d   : > { %4723 = vrot.lane.b32.xlu1 %v17016_v14, %s16333_s5  ;;  %v2704_v37 = vsel %vm217_vm1, %v2699_v8, 0 }
 0x11e   : > { %4784 = vrot.lane.b32.xlu0 %v17005_v7, %s16332_s4  ;;  %15093 = vmatmul.mubr.msk.bf16.vlgmr.msra.gmra.mxu0 %vm213_vm2, %v13740_v16 }
 0x11f   : > { %15103 = vmatpush3.bf16.msra.mxu0 %v2452_v18  ;;  %15104 = vmatprep.mubr.msk.bf16.mxu0 %vm16331_vm0, %v16330_v0  ;;  %v2761_v22 = vpop.permute.xlu1 %2760  ;;  %v13786_v18 = vld [vmem:[%s20212_s1 + $0x4c] sm:$0xf] }
 0x120   : > { %15114 = vmatprep.subr.bf16.mxu0 %v16330_v0  ;;  %v2822_v24 = vpop.permute.xlu0 %2821  ;;  %v2762_v30 = vsel %vm518_vm7, %v2759_v19, %v2761_v22 }
 0x121   : > { %4786 = vrot.lane.b32.xlu1 %v17016_v14, %s16332_s4  ;;  %v2767_v33 = vsel %vm217_vm1, %v2762_v30, 0 }
 0x122   : > { %4847 = vrot.lane.b32.xlu0 %v17005_v7, %s16334_s8  ;;  %15111 = vmatmul.mubr.msk.bf16.vlgmr.msra.gmra.mxu1 %vm213_vm2, %v13751_v21 }
 0x123   : > { %15121 = vmatpush3.bf16.msra.mxu1 %v2641_v23  ;;  %15122 = vmatprep.mubr.msk.bf16.mxu1 %vm16331_vm0, %v16330_v0  ;;  %v2824_v27 = vpop.permute.xlu1 %2823  ;;  %v13798_v23 = vld [vmem:[%s20212_s1 + $0x58] sm:$0xf] }
 0x124   : > { %v2885_v29 = vpop.permute.xlu0 %2884  ;;  %15132 = vmatprep.subr.bf16.mxu1 %v16330_v0  ;;  %v2825_v43 = vsel %vm583_vm8, %v2822_v24, %v2824_v27 }
 0x125   : > { %4849 = vrot.lane.b32.xlu1 %v17016_v14, %s16334_s8  ;;  %v2830_v46 = vsel %vm217_vm1, %v2825_v43, 0 }
 0x126   : > { %4910 = vrot.lane.b32.xlu0 %v17005_v7, %s16335_s9  ;;  %15105 = vmatmul.mubr.msk.bf16.vlgmr.msra.gmra.mxu0 %vm213_vm2, %v13748_v26 }
 0x127   : > { %15115 = vmatpush3.bf16.msra.mxu0 %v2578_v28  ;;  %15116 = vmatprep.mubr.msk.bf16.mxu0 %vm16331_vm0, %v16330_v0  ;;  %v2887_v32 = vpop.permute.xlu1 %2886  ;;  %v13794_v28 = vld [vmem:[%s20212_s1 + $0x54] sm:$0xf] }
 0x128   : > { %15126 = vmatprep.subr.bf16.mxu0 %v16330_v0  ;;  %v2948_v34 = vpop.permute.xlu0 %2947  ;;  %v2888_v38 = vsel %vm648_vm9, %v2885_v29, %v2887_v32 }
 0x129   : > { %4912 = vrot.lane.b32.xlu1 %v17016_v14, %s16335_s9  ;;  %v2893_v41 = vsel %vm217_vm1, %v2888_v38, 0 }
 0x12a   : > { %4973 = vrot.lane.b32.xlu0 %v17005_v7, %s16336_s10  ;;  %15123 = vmatmul.mubr.msk.bf16.vlgmr.msra.gmra.mxu1 %vm213_vm2, %v13759_v31 }
 0x12b   : > { %15133 = vmatpush3.bf16.msra.mxu1 %v2767_v33  ;;  %15134 = vmatprep.mubr.msk.bf16.mxu1 %vm16331_vm0, %v16330_v0  ;;  %v2950_v36 = vpop.permute.xlu1 %2949 }
 0x12c   : > { %v3061_v9 = vpop.permute.xlu0 %3060  ;;  %15144 = vmatprep.subr.bf16.mxu1 %v16330_v0  ;;  %v2951_v53 = vsel %vm713_vm10, %v2948_v34, %v2950_v36  ;;  %v13806_v34 = vld [vmem:[%s20212_s1 + $0x60] sm:$0xf] }
 0x12d   : > { %4975 = vrot.lane.b32.xlu1 %v17016_v14, %s16336_s10  ;;  %v2956_v57 = vsel %vm217_vm1, %v2951_v53, 0 }
 0x12e   : > { %5036 = vrot.lane.b32.xlu0 %v17005_v7, %s16337_s11  ;;  %15117 = vmatmul.mubr.msk.bf16.vlgmr.msra.gmra.mxu0 %vm213_vm2, %v13755_v35 }
 0x12f   : > { %15127 = vmatpush3.bf16.msra.mxu0 %v2704_v37  ;;  %15128 = vmatprep.mubr.msk.bf16.mxu0 %vm16331_vm0, %v16330_v0  ;;  %v3063_v40 = vpop.permute.xlu1 %3062 }
 0x130   : > { %15138 = vmatprep.subr.bf16.mxu0 %v16330_v0  ;;  %v3124_v42 = vpop.permute.xlu0 %3123  ;;  %v3064_v2 = vsel %vm211_vm3, %v3061_v9, %v3063_v40 }
 0x131   : > { %5038 = vrot.lane.b32.xlu1 %v17016_v14, %s16337_s11  ;;  %v3069_v6 = vsel %vm217_vm1, %v3064_v2, 0 }
 0x132   : > { %5099 = vrot.lane.b32.xlu0 %v17005_v7, %s16338_s18  ;;  %15135 = vmatmul.mubr.msk.bf16.vlgmr.msra.gmra.mxu1 %vm213_vm2, %v13767_v39  ;;  %v13802_v39 = vld [vmem:[%s20212_s1 + $0x5c] sm:$0xf] }
 0x133   : > { %15145 = vmatpush3.bf16.msra.mxu1 %v2893_v41  ;;  %15146 = vmatprep.mubr.msk.bf16.mxu1 %vm16331_vm0, %v16330_v0  ;;  %v3126_v45 = vpop.permute.xlu1 %3125 }
 0x134   : > { %v3187_v47 = vpop.permute.xlu0 %3186  ;;  %15156 = vmatprep.subr.bf16.mxu1 %v16330_v0  ;;  %v3127_v59 = vsel %vm323_vm4, %v3124_v42, %v3126_v45  ;;  %v13818_v45 = vld [vmem:[%s16430_s30 + $0x8] sm:$0x3] }
 0x135   : > { %5101 = vrot.lane.b32.xlu1 %v17016_v14, %s16338_s18  ;;  %v3132_v62 = vsel %vm217_vm1, %v3127_v59, 0  ;;  %v13810_v59 = vld [vmem:[%s20212_s1 + $0x64] sm:$0xf] }
 0x136   : > { %5162 = vrot.lane.b32.xlu0 %v17005_v7, %s16339_s19  ;;  %15129 = vmatmul.mubr.msk.bf16.vlgmr.msra.gmra.mxu0 %vm213_vm2, %v13763_v44 }
 0x137   : > { %15139 = vmatpush3.bf16.msra.mxu0 %v2830_v46  ;;  %15140 = vmatprep.mubr.msk.bf16.mxu0 %vm16331_vm0, %v16330_v0  ;;  %v3189_v50 = vpop.permute.xlu1 %3188 }
 0x138   : > { %15150 = vmatprep.subr.bf16.mxu0 %v16330_v0  ;;  %v3250_v52 = vpop.permute.xlu0 %3249  ;;  %v3190_v17 = vsel %vm388_vm5, %v3187_v47, %v3189_v50 }
 0x139   : > { %5164 = vrot.lane.b32.xlu1 %v17016_v14, %s16339_s19  ;;  %v3195_v20 = vsel %vm217_vm1, %v3190_v17, 0 }
 0x13a   : > { %5230 = vrot.lane.b32.xlu0 %v16683_v63, %s16333_s5  ;;  %15147 = vmatmul.mubr.msk.bf16.vlgmr.msra.gmra.mxu1 %vm213_vm2, %v13775_v49  ;;  %v13814_v49 = vld [vmem:[%s20212_s1 + $0x68] sm:$0xf] }
 0x13b   : > { %15157 = vmatpush3.bf16.msra.mxu1 %v3006_v51  ;;  %15158 = vmatprep.mubr.msk.bf16.mxu1 %vm16331_vm0, %v16330_v0  ;;  %v3252_v55 = vpop.permute.xlu1 %3251 }
 0x13c   : > { %v3313_v58 = vpop.permute.xlu0 %3312  ;;  %15168 = vmatprep.subr.bf16.mxu1 %v16330_v0  ;;  %v3253_v11 = vsel %vm453_vm6, %v3250_v52, %v3252_v55  ;;  %v3624_v52 = vsel %vm217_vm1, %v13818_v45, 0 }
 0x13d   : > { %5232 = vrot.lane.b32.xlu1 %v16694_v5, %s16333_s5  ;;  %v3258_v15 = vsel %vm217_vm1, %v3253_v11, 0  ;;  %v3557_v11 = vld [vmem:[%s20212_s1] sm:$0xf] }
 0x13e   : > { %5338 = vrot.lane.b32.xlu0 %v16683_v63, %s16332_s4  ;;  %15141 = vmatmul.mubr.msk.bf16.vlgmr.msra.gmra.mxu0 %vm213_vm2, %v13771_v54 }
 0x13f   : > { %15151 = vmatpush3.bf16.msra.mxu0 %v2956_v57  ;;  %15152 = vmatprep.mubr.msk.bf16.mxu0 %vm16331_vm0, %v16330_v0  ;;  %v3315_v61 = vpop.permute.xlu1 %3314 }
 0x140   : > { %15162 = vmatprep.subr.bf16.mxu0 %v16330_v0  ;;  %v3376_v1 = vpop.permute.xlu0 %3375  ;;  %v3316_v27 = vsel %vm518_vm7, %v3313_v58, %v3315_v61 }
 0x141   : > { %5340 = vrot.lane.b32.xlu1 %v16694_v5, %s16332_s4  ;;  %v3321_v30 = vsel %vm217_vm1, %v3316_v27, 0 }
 0x142   : > { %5401 = vrot.lane.b32.xlu0 %v16683_v63, %s16334_s8  ;;  %15159 = vmatmul.mubr.msk.bf16.vlgmr.msra.gmra.mxu1 %vm213_vm2, %v13783_v60 }
 0x143   : > { %15169 = vmatpush3.bf16.msra.mxu1 %v3132_v62  ;;  %15170 = vmatprep.mubr.msk.bf16.mxu1 %vm16331_vm0, %v16330_v0  ;;  %v3378_v4 = vpop.permute.xlu1 %3377 }
 0x144   : > { %v3439_v10 = vpop.permute.xlu0 %3438  ;;  %15180 = vmatprep.subr.bf16.mxu1 %v16330_v0  ;;  %v3379_v22 = vsel %vm583_vm8, %v3376_v1, %v3378_v4 }
 0x145   : > { %5403 = vrot.lane.b32.xlu1 %v16694_v5, %s16334_s8  ;;  %v3384_v25 = vsel %vm217_vm1, %v3379_v22, 0  ;;  %v13820_v22 = vld [vmem:[%s20212_s1 + $0x4] sm:$0xf] }
 0x146   : > { %5464 = vrot.lane.b32.xlu0 %v16683_v63, %s16335_s9  ;;  %15153 = vmatmul.mubr.msk.bf16.vlgmr.msra.gmra.mxu0 %vm213_vm2, %v13779_v3 }
 0x147   : > { %15163 = vmatpush3.bf16.msra.mxu0 %v3069_v6  ;;  %15164 = vmatprep.mubr.msk.bf16.mxu0 %vm16331_vm0, %v16330_v0  ;;  %v3441_v13 = vpop.permute.xlu1 %3440 }
 0x148   : > { %15174 = vmatprep.subr.bf16.mxu0 %v16330_v0  ;;  %v3502_v16 = vpop.permute.xlu0 %3501 }
 0x149   : > { %5466 = vrot.lane.b32.xlu1 %v16694_v5, %s16335_s9 }
 0x14a   : > { %5527 = vrot.lane.b32.xlu0 %v16683_v63, %s16336_s10  ;;  %15171 = vmatmul.mubr.msk.bf16.vlgmr.msra.gmra.mxu1 %vm213_vm2, %v13790_v12 }
 0x14b   : > { %15181 = vmatpush3.bf16.msra.mxu1 %v3258_v15  ;;  %15182 = vmatprep.mubr.msk.bf16.mxu1 %vm16331_vm0, %v16330_v0  ;;  %v3504_v19 = vpop.permute.xlu1 %3503 }
 0x14c   : > { %v17186_v21 = vpop.permute.xlu0 %3569  ;;  %15192 = vmatprep.subr.bf16.mxu1 %v16330_v0  ;;  %v3505_v32 = vsel %vm713_vm10, %v3502_v16, %v3504_v19 }
 0x14d   : > { %5529 = vrot.lane.b32.xlu1 %v16694_v5, %s16336_s10  ;;  %v3510_v36 = vsel %vm217_vm1, %v3505_v32, 0  ;;  %v13829_v32 = vld [vmem:[%s20212_s1 + $0xc] sm:$0xf] }
 0x14e   : > { %5590 = vrot.lane.b32.xlu0 %v16683_v63, %s16337_s11  ;;  %15165 = vmatmul.mubr.msk.bf16.vlgmr.msra.gmra.mxu0 %vm213_vm2, %v13786_v18 }
 0x14f   : > { %15175 = vmatpush3.bf16.msra.mxu0 %v3195_v20  ;;  %15176 = vmatprep.mubr.msk.bf16.mxu0 %vm16331_vm0, %v16330_v0  ;;  %v3572_v24 = vpop.permute.xlu1 %3571 }
 0x150   : > { %15186 = vmatprep.subr.bf16.mxu0 %v16330_v0  ;;  %v17202_v26 = vpop.permute.xlu0 %3677  ;;  %v3573_v53 = vsel %vm211_vm3, %v17186_v21, %v3572_v24 }
 0x151   : > { %5592 = vrot.lane.b32.xlu1 %v16694_v5, %s16337_s11  ;;  %v3578_v61 = vsel %vm217_vm1, %v3573_v53, 0 }
 0x152   : > { %5653 = vrot.lane.b32.xlu0 %v16683_v63, %s16338_s18  ;;  %15183 = vmatmul.mubr.msk.bf16.vlgmr.msra.gmra.mxu1 %vm213_vm2, %v13798_v23 }
 0x153   : > { %15193 = vmatpush3.bf16.msra.mxu1 %v3384_v25  ;;  %15194 = vmatprep.mubr.msk.bf16.mxu1 %vm16331_vm0, %v16330_v0  ;;  %v17215_v29 = vpop.permute.xlu1 %3679 }
 0x154   : > { %v17218_v31 = vpop.permute.xlu0 %3740  ;;  %15204 = vmatprep.subr.bf16.mxu1 %v16330_v0  ;;  %v3681_v17 = vsel %vm323_vm4, %v17202_v26, %v17215_v29 }
 0x155   : > { %5655 = vrot.lane.b32.xlu1 %v16694_v5, %s16338_s18  ;;  %v3686_v24 = vsel %vm217_vm1, %v3681_v17, 0 }
 0x156   : > { %v255_v33 = vpop.f32.mrf.mxu0  ;;  %5716 = vrot.lane.b32.xlu0 %v16683_v63, %s16339_s19  ;;  %15177 = vmatmul.mubr.msk.bf16.vlgmr.msra.gmra.mxu0 %vm213_vm2, %v13794_v28  ;;  %v3442_v63 = vsel %vm648_vm9, %v3439_v10, %v3441_v13 }
 0x157   : > { %15187 = vmatpush3.bf16.msra.mxu0 %v3321_v30  ;;  %15188 = vmatprep.mubr.msk.bf16.mxu0 %vm16331_vm0, %v16330_v0  ;;  %v3743_v8 = vpop.permute.xlu1 %3742  ;;  %v3447_v41 = vsel %vm217_vm1, %v3442_v63, 0  ;;  %v302_v43 = vadd.f32 %v16825_v56, %v255_v33 }
 0x158   : > { %v14890_v35 = vpop.f32.mrf.mxu0  ;;  %15198 = vmatprep.subr.bf16.mxu0 %v16330_v0  ;;  %v17234_v37 = vpop.permute.xlu0 %3803  ;;  %v3744_v2 = vsel %vm388_vm5, %v17218_v31, %v3743_v8 }
 0x159   : > { %5718 = vrot.lane.b32.xlu1 %v16694_v5, %s16339_s19  ;;  %v3749_v16 = vsel %vm217_vm1, %v3744_v2, 0 }
 0x15a   : > { %v258_v9 = vpop.f32.mrf.mxu0  ;;  %5828 = vrot.lane.b32.xlu0 %v17005_v7, %s16333_s5  ;;  %v430_v38 = vpop.f32.mrf.mxu1  ;;  %15195 = vmatmul.mubr.msk.bf16.vlgmr.msra.gmra.mxu1 %vm213_vm2, %v13806_v34 }
 0x15b   : > { %15205 = vmatpush3.bf16.msra.mxu1 %v3510_v36  ;;  %15206 = vmatprep.mubr.msk.bf16.mxu1 %vm16331_vm0, %v16330_v0  ;;  %v17247_v40 = vpop.permute.xlu1 %3805 }
 0x15c   : > { %v14891_v5 = vpop.f32.mrf.mxu0  ;;  %v14908_v42 = vpop.f32.mrf.mxu1  ;;  %15216 = vmatprep.subr.bf16.mxu1 %v16330_v0  ;;  %v3807_v36 = vsel %vm453_vm6, %v17234_v37, %v17247_v40 }
 0x15d   : > { %v17252_v44 = vpop.permute.xlu0 %3866  ;;  %5830 = vrot.lane.b32.xlu1 %v17016_v14, %s16333_s5  ;;  %v3812_v40 = vsel %vm217_vm1, %v3807_v36, 0 }
 0x15e   : > { %v365_v46 = vpop.f32.mrf.mxu0  ;;  %5891 = vrot.lane.b32.xlu0 %v17005_v7, %s16332_s4  ;;  %15189 = vmatmul.mubr.msk.bf16.vlgmr.msra.gmra.mxu0 %vm213_vm2, %v13802_v39  ;;  %v433_v47 = vpop.f32.mrf.mxu1 }
 0x15f   : > { %v371_v48 = vadd.f32 %v365_v46, %v302_v43  ;;  %15199 = vmatpush3.bf16.msra.mxu0 %v3447_v41  ;;  %15200 = vmatprep.mubr.msk.bf16.mxu0 %vm16331_vm0, %v16330_v0  ;;  %v3869_v56 = vpop.permute.xlu1 %3868  ;;  %v13825_v41 = vld [vmem:[%s20212_s1 + $0x8] sm:$0xf] }
 0x160   : > { %v14902_v50 = vpop.f32.mrf.mxu0  ;;  %v14909_v51 = vpop.f32.mrf.mxu1  ;;  %15210 = vmatprep.subr.bf16.mxu0 %v16330_v0  ;;  %v3870_v27 = vsel %vm518_vm7, %v17252_v44, %v3869_v56 }
 0x161   : > { %v436_v54 = vadd.f32 %v430_v38, %v371_v48  ;;  %v17269_v55 = vpop.permute.xlu0 %3929  ;;  %5893 = vrot.lane.b32.xlu1 %v17016_v14, %s16332_s4  ;;  %v3875_v35 = vsel %vm217_vm1, %v3870_v27, 0  ;;  %v17367_v48 = vld.sshfl [vmem:[%s16430_s30 + $0x14] sm:$0x33 pattern:$0x76325410] }
 0x162   : > { %v368_v57 = vpop.f32.mrf.mxu0  ;;  %5954 = vrot.lane.b32.xlu0 %v17005_v7, %s16334_s8  ;;  %v560_v58 = vpop.f32.mrf.mxu1  ;;  %15207 = vmatmul.mubr.msk.bf16.vlgmr.msra.gmra.mxu1 %vm213_vm2, %v13814_v49  ;;  %v13837_v49 = vld [vmem:[%s20212_s1 + $0x14] sm:$0xf] }
 0x163   : > { %15217 = vmatpush3.bf16.msra.mxu1 %v3624_v52  ;;  %15218 = vmatprep.mubr.msk.bf16.mxu1 %vm16331_vm0, %v16330_v0  ;;  %v17281_v60 = vpop.permute.xlu1 %3931 }
 0x164   : > { %v14903_v62 = vpop.f32.mrf.mxu0  ;;  %v14920_v1 = vpop.f32.mrf.mxu1  ;;  %15228 = vmatprep.subr.bf16.mxu1 %v16330_v0  ;;  %v3933_v53 = vsel %vm583_vm8, %v17269_v55, %v17281_v60  ;;  %v13833_v55 = vld [vmem:[%s20212_s1 + $0x10] sm:$0xf] }
 0x165   : > { %v17287_v3 = vpop.permute.xlu0 %3992  ;;  %5956 = vrot.lane.b32.xlu1 %v17016_v14, %s16334_s8  ;;  %v3938_v62 = vsel %vm217_vm1, %v3933_v53, 0 }
 0x166   : > { %v495_v4 = vpop.f32.mrf.mxu0  ;;  %6017 = vrot.lane.b32.xlu0 %v17005_v7, %s16335_s9  ;;  %15201 = vmatmul.mubr.msk.bf16.vlgmr.msra.gmra.mxu0 %vm213_vm2, %v13810_v59  ;;  %v563_v6 = vpop.f32.mrf.mxu1 }
 0x167   : > { %v501_v10 = vadd.f32 %v495_v4, %v436_v54  ;;  %15211 = vmatpush3.bf16.msra.mxu0 %v3578_v61  ;;  %15212 = vmatprep.mubr.msk.bf16.mxu0 %vm16331_vm0, %v16330_v0  ;;  %v3995_v12 = vpop.permute.xlu1 %3994  ;;  %v17383_v54 = vcombine.high %v17367_v48, %v17367_v48  ;;  %v13852_v4 = vld [vmem:[%s16430_s30 + $0xc] sm:$0x3] }
 0x168   : > { %v14914_v13 = vpop.f32.mrf.mxu0  ;;  %v14921_v15 = vpop.f32.mrf.mxu1  ;;  %15222 = vmatprep.subr.bf16.mxu0 %v16330_v0  ;;  %v3996_v43 = vsel %vm648_vm9, %v17287_v3, %v3995_v12  ;;  %v13845_v12 = vld [vmem:[%s20212_s1 + $0x1c] sm:$0xf]  ;;  %v4113_v17 = vsel %vm217_vm1, %v13852_v4, 0 }
 0x169   : > { %v566_v18 = vadd.f32 %v560_v58, %v501_v10  ;;  %v17304_v19 = vpop.permute.xlu0 %4055  ;;  %6019 = vrot.lane.b32.xlu1 %v17016_v14, %s16335_s9  ;;  %v4001_v52 = vsel %vm217_vm1, %v3996_v43, 0 }
 0x16a   : > { %v498_v20 = vpop.f32.mrf.mxu0  ;;  %6080 = vrot.lane.b32.xlu0 %v17005_v7, %s16336_s10  ;;  %v690_v21 = vpop.f32.mrf.mxu1  ;;  %15219 = vmatmul.mubr.msk.bf16.vlgmr.msra.gmra.mxu1 %vm213_vm2, %v3557_v11 }
 0x16b   : > { %15229 = vmatpush3.bf16.msra.mxu1 %v3749_v16  ;;  %15230 = vmatprep.mubr.msk.bf16.mxu1 %vm16331_vm0, %v16330_v0  ;;  %v17316_v23 = vpop.permute.xlu1 %4057 }
 0x16c   : > { %v14915_v25 = vpop.f32.mrf.mxu0  ;;  %v14932_v26 = vpop.f32.mrf.mxu1  ;;  %15240 = vmatprep.subr.bf16.mxu1 %v16330_v0 }
 0x16d   : > { %v17322_v28 = vpop.permute.xlu0 %4167  ;;  %6082 = vrot.lane.b32.xlu1 %v17016_v14, %s16336_s10  ;;  %v13841_v25 = vld [vmem:[%s20212_s1 + $0x18] sm:$0xf] }
 0x16e   : > { %v625_v29 = vpop.f32.mrf.mxu0  ;;  %6143 = vrot.lane.b32.xlu0 %v17005_v7, %s16337_s11  ;;  %15213 = vmatmul.mubr.msk.bf16.vlgmr.msra.gmra.mxu0 %vm213_vm2, %v13820_v22  ;;  %v693_v30 = vpop.f32.mrf.mxu1 }
 0x16f   : > { %v631_v31 = vadd.f32 %v625_v29, %v566_v18  ;;  %15223 = vmatpush3.bf16.msra.mxu0 %v3686_v24  ;;  %15224 = vmatprep.mubr.msk.bf16.mxu0 %vm16331_vm0, %v16330_v0  ;;  %v17334_v33 = vpop.permute.xlu1 %4169  ;;  %v4059_v18 = vsel %vm713_vm10, %v17304_v19, %v17316_v23 }
 0x170   : > { %v14926_v34 = vpop.f32.mrf.mxu0  ;;  %v14933_v8 = vpop.f32.mrf.mxu1  ;;  %15234 = vmatprep.subr.bf16.mxu0 %v16330_v0  ;;  %v4064_v23 = vsel %vm217_vm1, %v4059_v18, 0 }
 0x171   : > { %v696_v63 = vadd.f32 %v690_v21, %v631_v31  ;;  %v17341_v9 = vpop.permute.xlu0 %4230  ;;  %6145 = vrot.lane.b32.xlu1 %v17016_v14, %s16337_s11  ;;  %v13853_v8 = vld [vmem:[%s20212_s1 + $0x24] sm:$0xf] }
 0x172   : > { %v628_v38 = vpop.f32.mrf.mxu0  ;;  %6206 = vrot.lane.b32.xlu0 %v17005_v7, %s16338_s18  ;;  %v806_v39 = vpop.f32.mrf.mxu1  ;;  %15231 = vmatmul.mubr.msk.bf16.vlgmr.msra.gmra.mxu1 %vm213_vm2, %v13829_v32 }
 0x173   : > { %15241 = vmatpush3.bf16.msra.mxu1 %v3875_v35  ;;  %15242 = vmatprep.mubr.msk.bf16.mxu1 %vm16331_vm0, %v16330_v0  ;;  %v17353_v37 = vpop.permute.xlu1 %4232  ;;  %v4171_v38 = vsel %vm211_vm3, %v17322_v28, %v17334_v33 }
 0x174   : > { %v14927_v5 = vpop.f32.mrf.mxu0  ;;  %v14944_v42 = vpop.f32.mrf.mxu1  ;;  %15252 = vmatprep.subr.bf16.mxu1 %v16330_v0  ;;  %v4234_v29 = vsel %vm323_vm4, %v17341_v9, %v17353_v37  ;;  %v4176_v33 = vsel %vm217_vm1, %v4171_v38, 0 }
 0x175   : > { %v17359_v44 = vpop.permute.xlu0 %4293  ;;  %6208 = vrot.lane.b32.xlu1 %v17016_v14, %s16338_s18  ;;  %v4239_v9 = vsel %vm217_vm1, %v4234_v29, 0  ;;  %v13849_v5 = vld [vmem:[%s20212_s1 + $0x20] sm:$0xf] }
 0x176   : > { %v755_v45 = vpop.f32.mrf.mxu0  ;;  %6269 = vrot.lane.b32.xlu0 %v17005_v7, %s16339_s19  ;;  %15225 = vmatmul.mubr.msk.bf16.vlgmr.msra.gmra.mxu0 %vm213_vm2, %v13825_v41  ;;  %v809_v46 = vpop.f32.mrf.mxu1 }
 0x177   : > { %v761_v47 = vadd.f32 %v755_v45, %v696_v63  ;;  %15235 = vmatpush3.bf16.msra.mxu0 %v3812_v40  ;;  %15236 = vmatprep.mubr.msk.bf16.mxu0 %vm16331_vm0, %v16330_v0  ;;  %v17374_v56 = vpop.permute.xlu1 %4295 }
 0x178   : > { %v14938_v50 = vpop.f32.mrf.mxu0  ;;  %v14945_v51 = vpop.f32.mrf.mxu1  ;;  %15246 = vmatprep.subr.bf16.mxu0 %v16330_v0 }
 0x179   : > { %v812_v57 = vadd.f32 %v806_v39, %v761_v47  ;;  %v17385_v58 = vpop.permute.xlu0 %4356  ;;  %6271 = vrot.lane.b32.xlu1 %v17016_v14, %s16339_s19  ;;  %v13860_v51 = vld [vmem:[%s20212_s1 + $0x2c] sm:$0xf] }
 0x17a   : > { %v758_v59 = vpop.f32.mrf.mxu0  ;;  %6382 = vrot.lane.b32.xlu0 %v17367_v48, %s16333_s5  ;;  %v934_v61 = vpop.f32.mrf.mxu1  ;;  %15243 = vmatmul.mubr.msk.bf16.vlgmr.msra.gmra.mxu1 %vm213_vm2, %v13837_v49 }
 0x17b   : > { %15253 = vmatpush3.bf16.msra.mxu1 %v4001_v52  ;;  %15254 = vmatprep.mubr.msk.bf16.mxu1 %vm16331_vm0, %v16330_v0  ;;  %v17397_v60 = vpop.permute.xlu1 %4358  ;;  %v4297_v59 = vsel %vm388_vm5, %v17359_v44, %v17374_v56 }
 0x17c   : > { %v14939_v1 = vpop.f32.mrf.mxu0  ;;  %v14956_v2 = vpop.f32.mrf.mxu1  ;;  %15264 = vmatprep.subr.bf16.mxu1 %v16330_v0  ;;  %v4360_v45 = vsel %vm453_vm6, %v17385_v58, %v17397_v60  ;;  %v4302_v56 = vsel %vm217_vm1, %v4297_v59, 0 }
 0x17d   : > { %v17401_v3 = vpop.permute.xlu0 %4419  ;;  %6384 = vrot.lane.b32.xlu1 %v17383_v54, %s16333_s5  ;;  %v4365_v58 = vsel %vm217_vm1, %v4360_v45, 0  ;;  %v13856_v1 = vld [vmem:[%s20212_s1 + $0x28] sm:$0xf] }
 0x17e   : > { %v870_v6 = vpop.f32.mrf.mxu0  ;;  %6445 = vrot.lane.b32.xlu0 %v17367_v48, %s16332_s4  ;;  %15237 = vmatmul.mubr.msk.bf16.vlgmr.msra.gmra.mxu0 %vm213_vm2, %v13833_v55  ;;  %v937_v10 = vpop.f32.mrf.mxu1 }
 0x17f   : > { %v876_v11 = vadd.f32 %v870_v6, %v812_v57  ;;  %15247 = vmatpush3.bf16.msra.mxu0 %v3938_v62  ;;  %15248 = vmatprep.mubr.msk.bf16.mxu0 %vm16331_vm0, %v16330_v0  ;;  %v17414_v13 = vpop.permute.xlu1 %4421 }
 0x180   : > { %v14950_v15 = vpop.f32.mrf.mxu0  ;;  %v14957_v16 = vpop.f32.mrf.mxu1  ;;  %15258 = vmatprep.subr.bf16.mxu0 %v16330_v0 }
 0x181   : > { %v940_v20 = vadd.f32 %v934_v61, %v876_v11  ;;  %v17421_v21 = vpop.permute.xlu0 %4482  ;;  %6447 = vrot.lane.b32.xlu1 %v17383_v54, %s16332_s4  ;;  %v13868_v16 = vld [vmem:[%s20212_s1 + $0x34] sm:$0xf] }
 0x182   : > { %v873_v22 = vpop.f32.mrf.mxu0  ;;  %6508 = vrot.lane.b32.xlu0 %v17367_v48, %s16334_s8  ;;  %v1062_v24 = vpop.f32.mrf.mxu1  ;;  %15255 = vmatmul.mubr.msk.bf16.vlgmr.msra.gmra.mxu1 %vm213_vm2, %v13845_v12 }
 0x183   : > { %15265 = vmatpush3.bf16.msra.mxu1 %v4113_v17  ;;  %15266 = vmatprep.mubr.msk.bf16.mxu1 %vm16331_vm0, %v16330_v0  ;;  %v17433_v19 = vpop.permute.xlu1 %4484  ;;  %v4423_v22 = vsel %vm518_vm7, %v17401_v3, %v17414_v13 }
 0x184   : > { %v14951_v26 = vpop.f32.mrf.mxu0  ;;  %v14968_v27 = vpop.f32.mrf.mxu1  ;;  %15276 = vmatprep.subr.bf16.mxu1 %v16330_v0  ;;  %v4486_v6 = vsel %vm583_vm8, %v17421_v21, %v17433_v19  ;;  %v4428_v13 = vsel %vm217_vm1, %v4423_v22, 0  ;;  %v13891_v22 = vld [vmem:[%s20212_s1 + $0x4c] sm:$0xf] }
 0x185   : > { %v17440_v30 = vpop.permute.xlu0 %4545  ;;  %6510 = vrot.lane.b32.xlu1 %v17383_v54, %s16334_s8  ;;  %v4491_v21 = vsel %vm217_vm1, %v4486_v6, 0  ;;  %v17543_v26 = vld.sshfl [vmem:[%s16430_s30 + $0x10] sm:$0x33 pattern:$0x76325410] }
 0x186   : > { %v998_v31 = vpop.f32.mrf.mxu0  ;;  %6571 = vrot.lane.b32.xlu0 %v17367_v48, %s16335_s9  ;;  %15249 = vmatmul.mubr.msk.bf16.vlgmr.msra.gmra.mxu0 %vm213_vm2, %v13841_v25  ;;  %v1065_v32 = vpop.f32.mrf.mxu1  ;;  %v13864_v27 = vld [vmem:[%s20212_s1 + $0x30] sm:$0xf] }
 0x187   : > { %v1004_v34 = vadd.f32 %v998_v31, %v940_v20  ;;  %15259 = vmatpush3.bf16.msra.mxu0 %v4064_v23  ;;  %15260 = vmatprep.mubr.msk.bf16.mxu0 %vm16331_vm0, %v16330_v0  ;;  %v17452_v35 = vpop.permute.xlu1 %4547 }
 0x188   : > { %v14962_v36 = vpop.f32.mrf.mxu0  ;;  %v14969_v63 = vpop.f32.mrf.mxu1  ;;  %15270 = vmatprep.subr.bf16.mxu0 %v16330_v0 }
 0x189   : > { %v1068_v39 = vadd.f32 %v1062_v24, %v1004_v34  ;;  %v17459_v41 = vpop.permute.xlu0 %4608  ;;  %6573 = vrot.lane.b32.xlu1 %v17383_v54, %s16335_s9 }
 0x18a   : > { %v1001_v37 = vpop.f32.mrf.mxu0  ;;  %6634 = vrot.lane.b32.xlu0 %v17367_v48, %s16336_s10  ;;  %v1190_v40 = vpop.f32.mrf.mxu1  ;;  %15267 = vmatmul.mubr.msk.bf16.vlgmr.msra.gmra.mxu1 %vm213_vm2, %v13853_v8 }
 0x18b   : > { %15277 = vmatpush3.bf16.msra.mxu1 %v4239_v9  ;;  %15278 = vmatprep.mubr.msk.bf16.mxu1 %vm16331_vm0, %v16330_v0  ;;  %v17471_v28 = vpop.permute.xlu1 %4610  ;;  %v13876_v9 = vld [vmem:[%s20212_s1 + $0x3c] sm:$0xf]  ;;  %v4549_v37 = vsel %vm648_vm9, %v17440_v30, %v17452_v35 }
 0x18c   : > { %v14963_v42 = vpop.f32.mrf.mxu0  ;;  %v14980_v43 = vpop.f32.mrf.mxu1  ;;  %15288 = vmatprep.subr.bf16.mxu1 %v16330_v0  ;;  %v4612_v32 = vsel %vm713_vm10, %v17459_v41, %v17471_v28  ;;  %v4554_v35 = vsel %vm217_vm1, %v4549_v37, 0  ;;  %v13899_v37 = vld [vmem:[%s20212_s1 + $0x54] sm:$0xf] }
 0x18d   : > { %v17478_v46 = vpop.permute.xlu0 %4721  ;;  %6636 = vrot.lane.b32.xlu1 %v17383_v54, %s16336_s10  ;;  %v4617_v41 = vsel %vm217_vm1, %v4612_v32, 0  ;;  %v13872_v42 = vld [vmem:[%s20212_s1 + $0x38] sm:$0xf]  ;;  %v13888_v32 = vld [vmem:[%s20212_s1 + $0x48] sm:$0xf] }
 0x18e   : > { %v1126_v47 = vpop.f32.mrf.mxu0  ;;  %6697 = vrot.lane.b32.xlu0 %v17367_v48, %s16337_s11  ;;  %15261 = vmatmul.mubr.msk.bf16.vlgmr.msra.gmra.mxu0 %vm213_vm2, %v13849_v5  ;;  %v1193_v49 = vpop.f32.mrf.mxu1 }
 0x18f   : > { %v1132_v50 = vadd.f32 %v1126_v47, %v1068_v39  ;;  %15271 = vmatpush3.bf16.msra.mxu0 %v4176_v33  ;;  %15272 = vmatprep.mubr.msk.bf16.mxu0 %vm16331_vm0, %v16330_v0  ;;  %v17490_v52 = vpop.permute.xlu1 %4723 }
 0x190   : > { %v14974_v53 = vpop.f32.mrf.mxu0  ;;  %v14981_v57 = vpop.f32.mrf.mxu1  ;;  %15282 = vmatprep.subr.bf16.mxu0 %v16330_v0  ;;  %v4725_v47 = vsel %vm211_vm3, %v17478_v46, %v17490_v52 }
 0x191   : > { %v1196_v61 = vadd.f32 %v1190_v40, %v1132_v50  ;;  %v17497_v55 = vpop.permute.xlu0 %4784  ;;  %6699 = vrot.lane.b32.xlu1 %v17383_v54, %s16337_s11  ;;  %v13884_v57 = vld [vmem:[%s20212_s1 + $0x44] sm:$0xf]  ;;  %v4730_v59 = vsel %vm217_vm1, %v4725_v47, 0 }
 0x192   : > { %v1129_v60 = vpop.f32.mrf.mxu0  ;;  %6760 = vrot.lane.b32.xlu0 %v17367_v48, %s16338_s18  ;;  %v1318_v62 = vpop.f32.mrf.mxu1  ;;  %15279 = vmatmul.mubr.msk.bf16.vlgmr.msra.gmra.mxu1 %vm213_vm2, %v13860_v51 }
 0x193   : > { %15289 = vmatpush3.bf16.msra.mxu1 %v4365_v58  ;;  %15290 = vmatprep.mubr.msk.bf16.mxu1 %vm16331_vm0, %v16330_v0  ;;  %v17509_v44 = vpop.permute.xlu1 %4786  ;;  %v13887_v60 = vld [vmem:[%s16430_s30 + $0x10] sm:$0x3] }
 0x194   : > { %v14975_v2 = vpop.f32.mrf.mxu0  ;;  %v14992_v4 = vpop.f32.mrf.mxu1  ;;  %15300 = vmatprep.subr.bf16.mxu1 %v16330_v0 }
 0x195   : > { %v17516_v10 = vpop.permute.xlu0 %4847  ;;  %6762 = vrot.lane.b32.xlu1 %v17383_v54, %s16338_s18  ;;  %v13880_v2 = vld [vmem:[%s20212_s1 + $0x40] sm:$0xf] }
 0x196   : > { %v1254_v11 = vpop.f32.mrf.mxu0  ;;  %6823 = vrot.lane.b32.xlu0 %v17367_v48, %s16339_s19  ;;  %15273 = vmatmul.mubr.msk.bf16.vlgmr.msra.gmra.mxu0 %vm213_vm2, %v13856_v1  ;;  %v1321_v12 = vpop.f32.mrf.mxu1 }
 0x197   : > { %v1260_v15 = vadd.f32 %v1254_v11, %v1196_v61  ;;  %15283 = vmatpush3.bf16.msra.mxu0 %v4302_v56  ;;  %15284 = vmatprep.mubr.msk.bf16.mxu0 %vm16331_vm0, %v16330_v0  ;;  %v17528_v17 = vpop.permute.xlu1 %4849  ;;  %v4667_v12 = vsel %vm217_vm1, %v13887_v60, 0 }
 0x198   : > { %v14986_v18 = vpop.f32.mrf.mxu0  ;;  %v14993_v20 = vpop.f32.mrf.mxu1  ;;  %15294 = vmatprep.subr.bf16.mxu0 %v16330_v0 }
 0x199   : > { %v1324_v24 = vadd.f32 %v1318_v62, %v1260_v15  ;;  %v17535_v25 = vpop.permute.xlu0 %4910  ;;  %6825 = vrot.lane.b32.xlu1 %v17383_v54, %s16339_s19  ;;  %v4851_v15 = vsel %vm388_vm5, %v17516_v10, %v17528_v17 }
 0x19a   : > { %v1257_v19 = vpop.f32.mrf.mxu0  ;;  %6891 = vrot.lane.b32.xlu0 %v17005_v7, %s16333_s5  ;;  %v1433_v23 = vpop.f32.mrf.mxu1  ;;  %15291 = vmatmul.mubr.msk.bf16.vlgmr.msra.gmra.mxu1 %vm213_vm2, %v13868_v16  ;;  %v17556_v7 = vcombine.high %v17543_v26, %v17543_v26 }
 0x19b   : > { %15301 = vmatpush3.bf16.msra.mxu1 %v4491_v21  ;;  %15302 = vmatprep.mubr.msk.bf16.mxu1 %vm16331_vm0, %v16330_v0  ;;  %v17550_v3 = vpop.permute.xlu1 %4912  ;;  %v4856_v19 = vsel %vm217_vm1, %v4851_v15, 0 }
 0x19c   : > { %v14987_v29 = vpop.f32.mrf.mxu0  ;;  %v15004_v31 = vpop.f32.mrf.mxu1  ;;  %15312 = vmatprep.subr.bf16.mxu1 %v16330_v0 }
 0x19d   : > { %v17561_v34 = vpop.permute.xlu0 %4973  ;;  %6893 = vrot.lane.b32.xlu1 %v17016_v14, %s16333_s5 }
 0x19e   : > { %v1369_v8 = vpop.f32.mrf.mxu0  ;;  %6999 = vrot.lane.b32.xlu0 %v17543_v26, %s16332_s4  ;;  %15285 = vmatmul.mubr.msk.bf16.vlgmr.msra.gmra.mxu0 %vm213_vm2, %v13864_v27  ;;  %v1436_v36 = vpop.f32.mrf.mxu1 }
 0x19f   : > { %v1375_v63 = vadd.f32 %v1369_v8, %v1324_v24  ;;  %15295 = vmatpush3.bf16.msra.mxu0 %v4428_v13  ;;  %15296 = vmatprep.mubr.msk.bf16.mxu0 %vm16331_vm0, %v16330_v0  ;;  %v17573_v38 = vpop.permute.xlu1 %4975 }
 0x1a0   : > { %v14998_v39 = vpop.f32.mrf.mxu0  ;;  %v15005_v14 = vpop.f32.mrf.mxu1  ;;  %15306 = vmatprep.subr.bf16.mxu0 %v16330_v0 }
 0x1a1   : > { %v1439_v40 = vadd.f32 %v1433_v23, %v1375_v63  ;;  %v17580_v5 = vpop.permute.xlu0 %5036  ;;  %7001 = vrot.lane.b32.xlu1 %v17556_v7, %s16332_s4  ;;  %v4788_v23 = vsel %vm323_vm4, %v17497_v55, %v17509_v44  ;;  %v4977_v63 = vsel %vm518_vm7, %v17561_v34, %v17573_v38 }
 0x1a2   : > { %v1372_v28 = vpop.f32.mrf.mxu0  ;;  %7062 = vrot.lane.b32.xlu0 %v17543_v26, %s16334_s8  ;;  %v1561_v33 = vpop.f32.mrf.mxu1  ;;  %15303 = vmatmul.mubr.msk.bf16.vlgmr.msra.gmra.mxu1 %vm213_vm2, %v13876_v9  ;;  %v4793_v44 = vsel %vm217_vm1, %v4788_v23, 0 }
 0x1a3   : > { %15313 = vmatpush3.bf16.msra.mxu1 %v4617_v41  ;;  %15314 = vmatprep.mubr.msk.bf16.mxu1 %vm16331_vm0, %v16330_v0  ;;  %v17592_v30 = vpop.permute.xlu1 %5038  ;;  %v4982_v28 = vsel %vm217_vm1, %v4977_v63, 0 }
 0x1a4   : > { %v14999_v43 = vpop.f32.mrf.mxu0  ;;  %v15016_v45 = vpop.f32.mrf.mxu1  ;;  %15324 = vmatprep.subr.bf16.mxu1 %v16330_v0  ;;  %v5040_v60 = vsel %vm583_vm8, %v17580_v5, %v17592_v30 }
 0x1a5   : > { %v17599_v49 = vpop.permute.xlu0 %5099  ;;  %7064 = vrot.lane.b32.xlu1 %v17556_v7, %s16334_s8  ;;  %v13895_v45 = vld [vmem:[%s20212_s1 + $0x50] sm:$0xf]  ;;  %v5045_v30 = vsel %vm217_vm1, %v5040_v60, 0 }
 0x1a6   : > { %v1497_v50 = vpop.f32.mrf.mxu0  ;;  %7125 = vrot.lane.b32.xlu0 %v17543_v26, %s16335_s9  ;;  %15297 = vmatmul.mubr.msk.bf16.vlgmr.msra.gmra.mxu0 %vm213_vm2, %v13872_v42  ;;  %v1564_v51 = vpop.f32.mrf.mxu1  ;;  %v17833_v60 = vld.sshfl [vmem:[%s16430_s30 + $0x18] sm:$0x33 pattern:$0x76325410] }
 0x1a7   : > { %v1503_v53 = vadd.f32 %v1497_v50, %v1439_v40  ;;  %15307 = vmatpush3.bf16.msra.mxu0 %v4554_v35  ;;  %15308 = vmatprep.mubr.msk.bf16.mxu0 %vm16331_vm0, %v16330_v0  ;;  %v17611_v46 = vpop.permute.xlu1 %5101 }
 0x1a8   : > { %v15010_v52 = vpop.f32.mrf.mxu0  ;;  %v15017_v58 = vpop.f32.mrf.mxu1  ;;  %15318 = vmatprep.subr.bf16.mxu0 %v16330_v0  ;;  %v5103_v50 = vsel %vm648_vm9, %v17599_v49, %v17611_v46 }
 0x1a9   : > { %v1567_v61 = vadd.f32 %v1561_v33, %v1503_v53  ;;  %v17616_v62 = vpop.permute.xlu0 %5162  ;;  %7127 = vrot.lane.b32.xlu1 %v17556_v7, %s16335_s9  ;;  %v13907_v58 = vld [vmem:[%s20212_s1 + $0x5c] sm:$0xf] }
 0x1aa   : > { %v1500_v1 = vpop.f32.mrf.mxu0  ;;  %7188 = vrot.lane.b32.xlu0 %v17543_v26, %s16336_s10  ;;  %v1689_v56 = vpop.f32.mrf.mxu1  ;;  %15315 = vmatmul.mubr.msk.bf16.vlgmr.msra.gmra.mxu1 %vm213_vm2, %v13884_v57 }
 0x1ab   : > { %15325 = vmatpush3.bf16.msra.mxu1 %v4730_v59  ;;  %15326 = vmatprep.mubr.msk.bf16.mxu1 %vm16331_vm0, %v16330_v0  ;;  %v17628_v4 = vpop.permute.xlu1 %5164 }
 0x1ac   : > { %v15011_v6 = vpop.f32.mrf.mxu0  ;;  %v15028_v11 = vpop.f32.mrf.mxu1  ;;  %15336 = vmatprep.subr.bf16.mxu1 %v16330_v0  ;;  %v5166_v23 = vsel %vm713_vm10, %v17616_v62, %v17628_v4 }
 0x1ad   : > { %v17635_v16 = vpop.permute.xlu0 %5230  ;;  %7190 = vrot.lane.b32.xlu1 %v17556_v7, %s16336_s10  ;;  %v13903_v6 = vld [vmem:[%s20212_s1 + $0x58] sm:$0xf]  ;;  %v5171_v4 = vsel %vm217_vm1, %v5166_v23, 0 }
 0x1ae   : > { %v1625_v18 = vpop.f32.mrf.mxu0  ;;  %7251 = vrot.lane.b32.xlu0 %v17543_v26, %s16337_s11  ;;  %15309 = vmatmul.mubr.msk.bf16.vlgmr.msra.gmra.mxu0 %vm213_vm2, %v13880_v2  ;;  %v1692_v20 = vpop.f32.mrf.mxu1 }
 0x1af   : > { %v1631_v21 = vadd.f32 %v1625_v18, %v1567_v61  ;;  %15319 = vmatpush3.bf16.msra.mxu0 %v4667_v12  ;;  %15320 = vmatprep.mubr.msk.bf16.mxu0 %vm16331_vm0, %v16330_v0  ;;  %v17647_v10 = vpop.permute.xlu1 %5232  ;;  %v5108_v61 = vsel %vm217_vm1, %v5103_v50, 0 }
 0x1b0   : > { %v15022_v17 = vpop.f32.mrf.mxu0  ;;  %v15029_v24 = vpop.f32.mrf.mxu1  ;;  %15330 = vmatprep.subr.bf16.mxu0 %v16330_v0  ;;  %v5234_v15 = vsel %vm211_vm3, %v17635_v16, %v17647_v10 }
 0x1b1   : > { %v1695_v27 = vadd.f32 %v1689_v56, %v1631_v21  ;;  %v17654_v13 = vpop.permute.xlu0 %5338  ;;  %7253 = vrot.lane.b32.xlu1 %v17556_v7, %s16337_s11  ;;  %v13915_v17 = vld [vmem:[%s20212_s1 + $0x64] sm:$0xf] }
 0x1b2   : > { %v1628_v29 = vpop.f32.mrf.mxu0  ;;  %7314 = vrot.lane.b32.xlu0 %v17543_v26, %s16338_s18  ;;  %v1817_v31 = vpop.f32.mrf.mxu1  ;;  %15327 = vmatmul.mubr.msk.bf16.vlgmr.msra.gmra.mxu1 %vm213_vm2, %v13891_v22 }
 0x1b3   : > { %15337 = vmatpush3.bf16.msra.mxu1 %v4856_v19  ;;  %15338 = vmatprep.mubr.msk.bf16.mxu1 %vm16331_vm0, %v16330_v0  ;;  %v17666_v55 = vpop.permute.xlu1 %5340  ;;  %v5239_v19 = vsel %vm217_vm1, %v5234_v15, 0 }
 0x1b4   : > { %v15023_v8 = vpop.f32.mrf.mxu0  ;;  %v15040_v36 = vpop.f32.mrf.mxu1  ;;  %15348 = vmatprep.subr.bf16.mxu1 %v16330_v0  ;;  %v5342_v63 = vsel %vm323_vm4, %v17654_v13, %v17666_v55 }
 0x1b5   : > { %v17673_v9 = vpop.permute.xlu0 %5401  ;;  %7316 = vrot.lane.b32.xlu1 %v17556_v7, %s16338_s18 }
 0x1b6   : > { %v1753_v39 = vpop.f32.mrf.mxu0  ;;  %7377 = vrot.lane.b32.xlu0 %v17543_v26, %s16339_s19  ;;  %15321 = vmatmul.mubr.msk.bf16.vlgmr.msra.gmra.mxu0 %vm213_vm2, %v13888_v32  ;;  %v1820_v14 = vpop.f32.mrf.mxu1  ;;  %v4914_v26 = vsel %vm453_vm6, %v17535_v25, %v17550_v3 }
 0x1b7   : > { %v1759_v41 = vadd.f32 %v1753_v39, %v1695_v27  ;;  %15331 = vmatpush3.bf16.msra.mxu0 %v4793_v44  ;;  %15332 = vmatprep.mubr.msk.bf16.mxu0 %vm16331_vm0, %v16330_v0  ;;  %v17685_v34 = vpop.permute.xlu1 %5403  ;;  %v4919_v3 = vsel %vm217_vm1, %v4914_v26, 0  ;;  %v13911_v44 = vld [vmem:[%s20212_s1 + $0x60] sm:$0xf] }
 0x1b8   : > { %v15034_v38 = vpop.f32.mrf.mxu0  ;;  %v15041_v40 = vpop.f32.mrf.mxu1  ;;  %15342 = vmatprep.subr.bf16.mxu0 %v16330_v0 }
 0x1b9   : > { %v1823_v33 = vadd.f32 %v1817_v31, %v1759_v41  ;;  %v17692_v42 = vpop.permute.xlu0 %5464  ;;  %7379 = vrot.lane.b32.xlu1 %v17556_v7, %s16339_s19  ;;  %v13925_v38 = vld [vmem:[%s20212_s1 + $0x4] sm:$0xf] }
 0x1ba   : > { %v1756_v35 = vpop.f32.mrf.mxu0  ;;  %7489 = vrot.lane.b32.xlu0 %v17367_v48, %s16333_s5  ;;  %v1953_v43 = vpop.f32.mrf.mxu1  ;;  %15339 = vmatmul.mubr.msk.bf16.vlgmr.msra.gmra.mxu1 %vm213_vm2, %v13899_v37 }
 0x1bb   : > { %15349 = vmatpush3.bf16.msra.mxu1 %v4982_v28  ;;  %15350 = vmatprep.mubr.msk.bf16.mxu1 %vm16331_vm0, %v16330_v0  ;;  %v17704_v25 = vpop.permute.xlu1 %5466  ;;  %v5347_v28 = vsel %vm217_vm1, %v5342_v63, 0 }
 0x1bc   : > { %v15035_v7 = vpop.f32.mrf.mxu0  ;;  %v15052_v47 = vpop.f32.mrf.mxu1  ;;  %15360 = vmatprep.subr.bf16.mxu1 %v16330_v0 }
 0x1bd   : > { %v17711_v51 = vpop.permute.xlu0 %5527  ;;  %7491 = vrot.lane.b32.xlu1 %v17383_v54, %s16333_s5 }
 0x1be   : > { %v1881_v53 = vpop.f32.mrf.mxu0  ;;  %7552 = vrot.lane.b32.xlu0 %v17367_v48, %s16332_s4  ;;  %15333 = vmatmul.mubr.msk.bf16.vlgmr.msra.gmra.mxu0 %vm213_vm2, %v13895_v45  ;;  %v1956_v57 = vpop.f32.mrf.mxu1 }
 0x1bf   : > { %v17718_v52 = vadd.f32 %v1881_v53, %v1823_v33  ;;  %15343 = vmatpush3.bf16.msra.mxu0 %v4919_v3  ;;  %15344 = vmatprep.mubr.msk.bf16.mxu0 %vm16331_vm0, %v16330_v0  ;;  %v17725_v49 = vpop.permute.xlu1 %5529  ;;  %v13923_v33 = vld [vmem:[%s16430_s30 + $0xc] sm:$0x3]  ;;  %v13919_v3 = vld [vmem:[%s20212_s1 + $0x68] sm:$0xf]  ;;  %v5468_v57 = vsel %vm453_vm6, %v17692_v42, %v17704_v25 }
 0x1c0   : > { %v15046_v46 = vpop.f32.mrf.mxu0  ;;  %v15053_v59 = vpop.f32.mrf.mxu1  ;;  %15354 = vmatprep.subr.bf16.mxu0 %v16330_v0  ;;  %v5285_v53 = vsel %vm217_vm1, %v13923_v33, 0  ;;  %v13930_v42 = vld [vmem:[%s20212_s1 + $0x8] sm:$0xf]  ;;  %v13946_v33 = vld [vmem:[%s20212_s1 + $0x18] sm:$0xf] }
 0x1c1   : > { %v17732_v1 = vpop.permute.xlu0 %5590  ;;  %7554 = vrot.lane.b32.xlu1 %v17383_v54, %s16332_s4 }
 0x1c2   : > { %v1884_v56 = vpop.f32.mrf.mxu0  ;;  %7615 = vrot.lane.b32.xlu0 %v17367_v48, %s16334_s8  ;;  %v2061_v2 = vpop.f32.mrf.mxu1  ;;  %15351 = vmatmul.mubr.msk.bf16.vlgmr.msra.gmra.mxu1 %vm213_vm2, %v13907_v58 }
 0x1c3   : > { %15361 = vmatpush3.bf16.msra.mxu1 %v5108_v61  ;;  %15362 = vmatprep.mubr.msk.bf16.mxu1 %vm16331_vm0, %v16330_v0  ;;  %v17744_v5 = vpop.permute.xlu1 %5592 }
 0x1c4   : > { %v15047_v11 = vpop.f32.mrf.mxu0  ;;  %v15064_v12 = vpop.f32.mrf.mxu1  ;;  %15372 = vmatprep.subr.bf16.mxu1 %v16330_v0 }
 0x1c5   : > { %v17751_v18 = vpop.permute.xlu0 %5653  ;;  %7617 = vrot.lane.b32.xlu1 %v17383_v54, %s16334_s8 }
 0x1c6   : > { %v1999_v20 = vpop.f32.mrf.mxu0  ;;  %7678 = vrot.lane.b32.xlu0 %v17367_v48, %s16335_s9  ;;  %15345 = vmatmul.mubr.msk.bf16.vlgmr.msra.gmra.mxu0 %vm213_vm2, %v13903_v6  ;;  %v2064_v21 = vpop.f32.mrf.mxu1  ;;  %v5405_v6 = vsel %vm388_vm5, %v17673_v9, %v17685_v34  ;;  %v5218_v9 = vld [vmem:[%s20212_s1] sm:$0xf] }
 0x1c7   : > { %v2000_v22 = vadd.f32 %v1999_v20, %v1953_v43  ;;  %15355 = vmatpush3.bf16.msra.mxu0 %v5045_v30  ;;  %15356 = vmatprep.mubr.msk.bf16.mxu0 %vm16331_vm0, %v16330_v0  ;;  %v17763_v16 = vpop.permute.xlu1 %5655  ;;  %v17849_v30 = vcombine.high %v17833_v60, %v17833_v60  ;;  %v5410_v21 = vsel %vm217_vm1, %v5405_v6, 0 }
 0x1c8   : > { %v15058_v10 = vpop.f32.mrf.mxu0  ;;  %v15065_v24 = vpop.f32.mrf.mxu1  ;;  %15366 = vmatprep.subr.bf16.mxu0 %v16330_v0 }
 0x1c9   : > { %v2067_v27 = vadd.f32 %v2061_v2, %v2000_v22  ;;  %v17770_v29 = vpop.permute.xlu0 %5716  ;;  %7680 = vrot.lane.b32.xlu1 %v17383_v54, %s16335_s9 }
 0x1ca   : > { %v2002_v31 = vpop.f32.mrf.mxu0  ;;  %7741 = vrot.lane.b32.xlu0 %v17367_v48, %s16336_s10  ;;  %v2187_v32 = vpop.f32.mrf.mxu1  ;;  %15363 = vmatmul.mubr.msk.bf16.vlgmr.msra.gmra.mxu1 %vm213_vm2, %v13915_v17  ;;  %v5594_v17 = vsel %vm583_vm8, %v17732_v1, %v17744_v5 }
 0x1cb   : > { %15373 = vmatpush3.bf16.msra.mxu1 %v5239_v19  ;;  %15374 = vmatprep.mubr.msk.bf16.mxu1 %vm16331_vm0, %v16330_v0  ;;  %v17782_v62 = vpop.permute.xlu1 %5718 }
 0x1cc   : > { %v15059_v8 = vpop.f32.mrf.mxu0  ;;  %v15076_v36 = vpop.f32.mrf.mxu1  ;;  %15384 = vmatprep.subr.bf16.mxu1 %v16330_v0 }
 0x1cd   : > { %v17789_v39 = vpop.permute.xlu0 %5828  ;;  %7743 = vrot.lane.b32.xlu1 %v17383_v54, %s16336_s10 }
 0x1ce   : > { %v2124_v14 = vpop.f32.mrf.mxu0  ;;  %7804 = vrot.lane.b32.xlu0 %v17367_v48, %s16337_s11  ;;  %15357 = vmatmul.mubr.msk.bf16.vlgmr.msra.gmra.mxu0 %vm213_vm2, %v13911_v44  ;;  %v2190_v41 = vpop.f32.mrf.mxu1  ;;  %v5531_v44 = vsel %vm518_vm7, %v17711_v51, %v17725_v49 }
 0x1cf   : > { %v2130_v37 = vadd.f32 %v2124_v14, %v2067_v27  ;;  %15367 = vmatpush3.bf16.msra.mxu0 %v5171_v4  ;;  %15368 = vmatprep.mubr.msk.bf16.mxu0 %vm16331_vm0, %v16330_v0  ;;  %v17801_v13 = vpop.permute.xlu1 %5830  ;;  %v13938_v27 = vld [vmem:[%s20212_s1 + $0x10] sm:$0xf]  ;;  %v13934_v14 = vld [vmem:[%s20212_s1 + $0xc] sm:$0xf]  ;;  %v5536_v49 = vsel %vm217_vm1, %v5531_v44, 0 }
 0x1d0   : > { %v15070_v55 = vpop.f32.mrf.mxu0  ;;  %v15077_v40 = vpop.f32.mrf.mxu1  ;;  %15378 = vmatprep.subr.bf16.mxu0 %v16330_v0 }
 0x1d1   : > { %v2193_v26 = vadd.f32 %v2187_v32, %v2130_v37  ;;  %v17806_v35 = vpop.permute.xlu0 %5891  ;;  %7806 = vrot.lane.b32.xlu1 %v17383_v54, %s16337_s11  ;;  %v5599_v32 = vsel %vm217_vm1, %v5594_v17, 0 }
 0x1d2   : > { %v2127_v43 = vpop.f32.mrf.mxu0  ;;  %7867 = vrot.lane.b32.xlu0 %v17367_v48, %s16338_s18  ;;  %v2313_v45 = vpop.f32.mrf.mxu1  ;;  %15375 = vmatmul.mubr.msk.bf16.vlgmr.msra.gmra.mxu1 %vm213_vm2, %v13925_v38  ;;  %v5720_v38 = vsel %vm713_vm10, %v17770_v29, %v17782_v62 }
 0x1d3   : > { %15385 = vmatpush3.bf16.msra.mxu1 %v5347_v28  ;;  %15386 = vmatprep.mubr.msk.bf16.mxu1 %vm16331_vm0, %v16330_v0  ;;  %v17818_v7 = vpop.permute.xlu1 %5893 }
 0x1d4   : > { %v15071_v47 = vpop.f32.mrf.mxu0  ;;  %v15088_v50 = vpop.f32.mrf.mxu1  ;;  %15396 = vmatprep.subr.bf16.mxu1 %v16330_v0 }
 0x1d5   : > { %v17825_v58 = vpop.permute.xlu0 %5954  ;;  %7869 = vrot.lane.b32.xlu1 %v17383_v54, %s16338_s18 }
 0x1d6   : > { %v2250_v46 = vpop.f32.mrf.mxu0  ;;  %7930 = vrot.lane.b32.xlu0 %v17367_v48, %s16339_s19  ;;  %15369 = vmatmul.mubr.msk.bf16.vlgmr.msra.gmra.mxu0 %vm213_vm2, %v13919_v3  ;;  %v2316_v59 = vpop.f32.mrf.mxu1  ;;  %v5473_v48 = vsel %vm217_vm1, %v5468_v57, 0  ;;  %v5657_v3 = vsel %vm648_vm9, %v17751_v18, %v17763_v16 }
 0x1d7   : > { %v2256_v61 = vadd.f32 %v2250_v46, %v2193_v26  ;;  %15379 = vmatpush3.bf16.msra.mxu0 %v5285_v53  ;;  %15380 = vmatprep.mubr.msk.bf16.mxu0 %vm16331_vm0, %v16330_v0  ;;  %v17840_v25 = vpop.permute.xlu1 %5956  ;;  %v13942_v46 = vld [vmem:[%s20212_s1 + $0x14] sm:$0xf]  ;;  %v5662_v16 = vsel %vm217_vm1, %v5657_v3, 0 }
 0x1d8   : > { %v15082_v56 = vpop.f32.mrf.mxu0  ;;  %v15089_v2 = vpop.f32.mrf.mxu1  ;;  %15390 = vmatprep.subr.bf16.mxu0 %v16330_v0 }
 0x1d9   : > { %v2319_v11 = vadd.f32 %v2313_v45, %v2256_v61  ;;  %v17851_v12 = vpop.permute.xlu0 %6017  ;;  %7932 = vrot.lane.b32.xlu1 %v17383_v54, %s16339_s19  ;;  %v5725_v45 = vsel %vm217_vm1, %v5720_v38, 0 }
 0x1da   : > { %v2253_v15 = vpop.f32.mrf.mxu0  ;;  %8043 = vrot.lane.b32.xlu0 %v17833_v60, %s16333_s5  ;;  %v2439_v20 = vpop.f32.mrf.mxu1  ;;  %15387 = vmatmul.mubr.msk.bf16.vlgmr.msra.gmra.mxu1 %vm213_vm2, %v13930_v42  ;;  %v5832_v42 = vsel %vm211_vm3, %v17789_v39, %v17801_v13 }
 0x1db   : > { %15397 = vmatpush3.bf16.msra.mxu1 %v5473_v48  ;;  %15398 = vmatprep.mubr.msk.bf16.mxu1 %vm16331_vm0, %v16330_v0  ;;  %v17863_v34 = vpop.permute.xlu1 %6019 }
 0x1dc   : > { %v15083_v54 = vpop.f32.mrf.mxu0  ;;  %v15100_v22 = vpop.f32.mrf.mxu1  ;;  %15408 = vmatprep.subr.bf16.mxu1 %v16330_v0 }
 0x1dd   : > { %v17870_v10 = vpop.permute.xlu0 %6080  ;;  %8045 = vrot.lane.b32.xlu1 %v17849_v30, %s16333_s5 }
 0x1de   : > { %v2376_v24 = vpop.f32.mrf.mxu0  ;;  %8106 = vrot.lane.b32.xlu0 %v17833_v60, %s16332_s4  ;;  %15381 = vmatmul.mubr.msk.bf16.vlgmr.msra.gmra.mxu0 %vm213_vm2, %v5218_v9  ;;  %v2442_v19 = vpop.f32.mrf.mxu1 }
 0x1df   : > { %v2382_v23 = vadd.f32 %v2376_v24, %v2319_v11  ;;  %15391 = vmatpush3.bf16.msra.mxu0 %v5410_v21  ;;  %15392 = vmatprep.mubr.msk.bf16.mxu0 %vm16331_vm0, %v16330_v0  ;;  %v17882_v1 = vpop.permute.xlu1 %6082  ;;  %v13954_v11 = vld [vmem:[%s20212_s1 + $0x20] sm:$0xf]  ;;  %v13957_v21 = vld [vmem:[%s16430_s30 + $0x10] sm:$0x3]  ;;  %v13950_v24 = vld [vmem:[%s20212_s1 + $0x1c] sm:$0xf] }
 0x1e0   : > { %v15094_v5 = vpop.f32.mrf.mxu0  ;;  %v15101_v31 = vpop.f32.mrf.mxu1  ;;  %15402 = vmatprep.subr.bf16.mxu0 %v16330_v0  ;;  %v6084_v3 = vsel %vm518_vm7, %v17870_v10, %v17882_v1 }
 0x1e1   : > { %v2445_v4 = vadd.f32 %v2439_v20, %v2382_v23  ;;  %v17889_v8 = vpop.permute.xlu0 %6143  ;;  %8108 = vrot.lane.b32.xlu1 %v17849_v30, %s16332_s4  ;;  %v5837_v20 = vsel %vm217_vm1, %v5832_v42, 0  ;;  %v5774_v5 = vsel %vm217_vm1, %v13957_v21, 0  ;;  %v5958_v31 = vsel %vm388_vm5, %v17825_v58, %v17840_v25  ;;  %v13961_v58 = vld [vmem:[%s20212_s1 + $0x28] sm:$0xf] }
 0x1e2   : > { %v2379_v36 = vpop.f32.mrf.mxu0  ;;  %8169 = vrot.lane.b32.xlu0 %v17833_v60, %s16334_s8  ;;  %v2551_v63 = vpop.f32.mrf.mxu1  ;;  %15399 = vmatmul.mubr.msk.bf16.vlgmr.msra.gmra.mxu1 %vm213_vm2, %v13938_v27  ;;  %v6021_v42 = vsel %vm453_vm6, %v17851_v12, %v17863_v34 }
 0x1e3   : > { %15409 = vmatpush3.bf16.msra.mxu1 %v5599_v32  ;;  %15410 = vmatprep.mubr.msk.bf16.mxu1 %vm16331_vm0, %v16330_v0  ;;  %v17901_v51 = vpop.permute.xlu1 %6145  ;;  %v6026_v34 = vsel %vm217_vm1, %v6021_v42, 0 }
 0x1e4   : > { %v15095_v41 = vpop.f32.mrf.mxu0  ;;  %v15112_v37 = vpop.f32.mrf.mxu1  ;;  %15420 = vmatprep.subr.bf16.mxu1 %v16330_v0 }
 0x1e5   : > { %v17908_v55 = vpop.permute.xlu0 %6206  ;;  %8171 = vrot.lane.b32.xlu1 %v17849_v30, %s16334_s8  ;;  %v5963_v41 = vsel %vm217_vm1, %v5958_v31, 0  ;;  %v5895_v37 = vsel %vm323_vm4, %v17806_v35, %v17818_v7  ;;  %v13958_v35 = vld [vmem:[%s20212_s1 + $0x24] sm:$0xf]  ;;  %v6147_v31 = vsel %vm583_vm8, %v17889_v8, %v17901_v51 }
 0x1e6   : > { %v2488_v40 = vpop.f32.mrf.mxu0  ;;  %8232 = vrot.lane.b32.xlu0 %v17833_v60, %s16335_s9  ;;  %15393 = vmatmul.mubr.msk.bf16.vlgmr.msra.gmra.mxu0 %vm213_vm2, %v13934_v14  ;;  %v2554_v28 = vpop.f32.mrf.mxu1  ;;  %v6152_v51 = vsel %vm217_vm1, %v6147_v31, 0 }
 0x1e7   : > { %v2494_v26 = vadd.f32 %v2488_v40, %v2445_v4  ;;  %15403 = vmatpush3.bf16.msra.mxu0 %v5536_v49  ;;  %15404 = vmatprep.mubr.msk.bf16.mxu0 %vm16331_vm0, %v16330_v0  ;;  %v17920_v29 = vpop.permute.xlu1 %6208 }
 0x1e8   : > { %v15106_v62 = vpop.f32.mrf.mxu0  ;;  %v15113_v43 = vpop.f32.mrf.mxu1  ;;  %15414 = vmatprep.subr.bf16.mxu0 %v16330_v0 }
 0x1e9   : > { %v2557_v47 = vadd.f32 %v2551_v63, %v2494_v26  ;;  %v17927_v50 = vpop.permute.xlu0 %6269  ;;  %8234 = vrot.lane.b32.xlu1 %v17849_v30, %s16335_s9  ;;  %v17990_v63 = vld.sshfl [vmem:[%s16430_s30 + $0x14] sm:$0x33 pattern:$0x76325410]  ;;  %v5900_v62 = vsel %vm217_vm1, %v5895_v37, 0 }
 0x1ea   : > { %v2491_v53 = vpop.f32.mrf.mxu0  ;;  %8295 = vrot.lane.b32.xlu0 %v17833_v60, %s16336_s10  ;;  %v2677_v57 = vpop.f32.mrf.mxu1  ;;  %15411 = vmatmul.mubr.msk.bf16.vlgmr.msra.gmra.mxu1 %vm213_vm2, %v13946_v33  ;;  %v18006_v38 = vcombine.high %v17990_v63, %v17990_v63 }
 0x1eb   : > { %15421 = vmatpush3.bf16.msra.mxu1 %v5725_v45  ;;  %15422 = vmatprep.mubr.msk.bf16.mxu1 %vm16331_vm0, %v16330_v0  ;;  %v17939_v18 = vpop.permute.xlu1 %6271 }
 0x1ec   : > { %v15107_v59 = vpop.f32.mrf.mxu0  ;;  %v15124_v61 = vpop.f32.mrf.mxu1  ;;  %15432 = vmatprep.subr.bf16.mxu1 %v16330_v0 }
 0x1ed   : > { %v17946_v56 = vpop.permute.xlu0 %6382  ;;  %8297 = vrot.lane.b32.xlu1 %v17849_v30, %s16336_s10  ;;  %v6089_v61 = vsel %vm217_vm1, %v6084_v3, 0 }
 0x1ee   : > { %v2614_v2 = vpop.f32.mrf.mxu0  ;;  %8358 = vrot.lane.b32.xlu0 %v17833_v60, %s16337_s11  ;;  %15405 = vmatmul.mubr.msk.bf16.vlgmr.msra.gmra.mxu0 %vm213_vm2, %v13942_v46  ;;  %v2680_v48 = vpop.f32.mrf.mxu1 }
 0x1ef   : > { %v2620_v6 = vadd.f32 %v2614_v2, %v2557_v47  ;;  %15415 = vmatpush3.bf16.msra.mxu0 %v5662_v16  ;;  %15416 = vmatprep.mubr.msk.bf16.mxu0 %vm16331_vm0, %v16330_v0  ;;  %v17958_v39 = vpop.permute.xlu1 %6384  ;;  %v13969_v16 = vld [vmem:[%s20212_s1 + $0x30] sm:$0xf] }
 0x1f0   : > { %v15118_v13 = vpop.f32.mrf.mxu0  ;;  %v15125_v15 = vpop.f32.mrf.mxu1  ;;  %15426 = vmatprep.subr.bf16.mxu0 %v16330_v0 }
 0x1f1   : > { %v2683_v9 = vadd.f32 %v2677_v57, %v2620_v6  ;;  %v17963_v54 = vpop.permute.xlu0 %6445  ;;  %8360 = vrot.lane.b32.xlu1 %v17849_v30, %s16337_s11  ;;  %v13965_v13 = vld [vmem:[%s20212_s1 + $0x2c] sm:$0xf] }
 0x1f2   : > { %v2617_v22 = vpop.f32.mrf.mxu0  ;;  %8421 = vrot.lane.b32.xlu0 %v17833_v60, %s16338_s18  ;;  %v2803_v17 = vpop.f32.mrf.mxu1  ;;  %15423 = vmatmul.mubr.msk.bf16.vlgmr.msra.gmra.mxu1 %vm213_vm2, %v13954_v11 }
 0x1f3   : > { %15433 = vmatpush3.bf16.msra.mxu1 %v5837_v20  ;;  %15434 = vmatprep.mubr.msk.bf16.mxu1 %vm16331_vm0, %v16330_v0  ;;  %v17975_v19 = vpop.permute.xlu1 %6447 }
 0x1f4   : > { %v15119_v23 = vpop.f32.mrf.mxu0  ;;  %v15136_v27 = vpop.f32.mrf.mxu1  ;;  %15444 = vmatprep.subr.bf16.mxu1 %v16330_v0 }
 0x1f5   : > { %v17982_v32 = vpop.permute.xlu0 %6508  ;;  %8423 = vrot.lane.b32.xlu1 %v17849_v30, %s16338_s18  ;;  %v13977_v23 = vld [vmem:[%s20212_s1 + $0x38] sm:$0xf] }
 0x1f6   : > { %v2740_v44 = vpop.f32.mrf.mxu0  ;;  %8484 = vrot.lane.b32.xlu0 %v17833_v60, %s16339_s19  ;;  %15417 = vmatmul.mubr.msk.bf16.vlgmr.msra.gmra.mxu0 %vm213_vm2, %v13950_v24  ;;  %v2806_v4 = vpop.f32.mrf.mxu1 }
 0x1f7   : > { %v2746_v36 = vadd.f32 %v2740_v44, %v2683_v9  ;;  %15427 = vmatpush3.bf16.msra.mxu0 %v5774_v5  ;;  %15428 = vmatprep.mubr.msk.bf16.mxu0 %vm16331_vm0, %v16330_v0  ;;  %v17997_v25 = vpop.permute.xlu1 %6510  ;;  %v6210_v9 = vsel %vm648_vm9, %v17908_v55, %v17920_v29 }
 0x1f8   : > { %v15130_v14 = vpop.f32.mrf.mxu0  ;;  %v15137_v49 = vpop.f32.mrf.mxu1  ;;  %15438 = vmatprep.subr.bf16.mxu0 %v16330_v0  ;;  %v6215_v5 = vsel %vm217_vm1, %v6210_v9, 0 }
 0x1f9   : > { %v2809_v40 = vadd.f32 %v2803_v17, %v2746_v36  ;;  %v18008_v28 = vpop.permute.xlu0 %6571  ;;  %8486 = vrot.lane.b32.xlu1 %v17849_v30, %s16339_s19  ;;  %v13973_v14 = vld [vmem:[%s20212_s1 + $0x34] sm:$0xf] }
 0x1fa   : > { %v2743_v26 = vpop.f32.mrf.mxu0  ;;  %8552 = vrot.lane.b32.xlu0 %v17990_v63, %s16333_s5  ;;  %v2929_v33 = vpop.f32.mrf.mxu1  ;;  %15435 = vmatmul.mubr.msk.bf16.vlgmr.msra.gmra.mxu1 %vm213_vm2, %v13961_v58 }
 0x1fb   : > { %15445 = vmatpush3.bf16.msra.mxu1 %v5963_v41  ;;  %15446 = vmatprep.mubr.msk.bf16.mxu1 %vm16331_vm0, %v16330_v0  ;;  %v18020_v7 = vpop.permute.xlu1 %6573 }
 0x1fc   : > { %v15131_v43 = vpop.f32.mrf.mxu0  ;;  %v15148_v45 = vpop.f32.mrf.mxu1  ;;  %15456 = vmatprep.subr.bf16.mxu1 %v16330_v0  ;;  %v6575_v31 = vsel %vm453_vm6, %v18008_v28, %v18020_v7 }
 0x1fd   : > { %v18027_v47 = vpop.permute.xlu0 %6634  ;;  %8554 = vrot.lane.b32.xlu1 %v18006_v38, %s16333_s5 }
 0x1fe   : > { %v2866_v53 = vpop.f32.mrf.mxu0  ;;  %8660 = vrot.lane.b32.xlu0 %v17990_v63, %s16332_s4  ;;  %15429 = vmatmul.mubr.msk.bf16.vlgmr.msra.gmra.mxu0 %vm213_vm2, %v13958_v35  ;;  %v2932_v57 = vpop.f32.mrf.mxu1 }
 0x1ff   : > { %v2872_v46 = vadd.f32 %v2866_v53, %v2809_v40  ;;  %15439 = vmatpush3.bf16.msra.mxu0 %v5900_v62  ;;  %15440 = vmatprep.mubr.msk.bf16.mxu0 %vm16331_vm0, %v16330_v0  ;;  %v18039_v10 = vpop.permute.xlu1 %6636  ;;  %v13992_v40 = vld [vmem:[%s16430_s30 + $0x14] sm:$0x3]  ;;  %v13985_v62 = vld [vmem:[%s20212_s1 + $0x40] sm:$0xf]  ;;  %v6273_v57 = vsel %vm713_vm10, %v17927_v50, %v17939_v18 }
 0x200   : > { %v15142_v1 = vpop.f32.mrf.mxu0  ;;  %v15149_v59 = vpop.f32.mrf.mxu1  ;;  %15450 = vmatprep.subr.bf16.mxu0 %v16330_v0  ;;  %v6328_v53 = vsel %vm217_vm1, %v13992_v40, 0  ;;  %v6278_v18 = vsel %vm217_vm1, %v6273_v57, 0  ;;  %v6512_v40 = vsel %vm388_vm5, %v17982_v32, %v17997_v25 }
 0x201   : > { %v2935_v2 = vadd.f32 %v2929_v33, %v2872_v46  ;;  %v18046_v48 = vpop.permute.xlu0 %6697  ;;  %8662 = vrot.lane.b32.xlu1 %v18006_v38, %s16332_s4  ;;  %v6517_v25 = vsel %vm217_vm1, %v6512_v40, 0  ;;  %v14028_v40 = vld [vmem:[%s16430_s30 + $0x10] sm:$0x3] }
 0x202   : > { %v2869_v6 = vpop.f32.mrf.mxu0  ;;  %8723 = vrot.lane.b32.xlu0 %v17990_v63, %s16334_s8  ;;  %v3042_v11 = vpop.f32.mrf.mxu1  ;;  %15447 = vmatmul.mubr.msk.bf16.vlgmr.msra.gmra.mxu1 %vm213_vm2, %v13969_v16 }
 0x203   : > { %15457 = vmatpush3.bf16.msra.mxu1 %v6089_v61  ;;  %15458 = vmatprep.mubr.msk.bf16.mxu1 %vm16331_vm0, %v16330_v0  ;;  %v18058_v12 = vpop.permute.xlu1 %6699  ;;  %v13981_v61 = vld [vmem:[%s20212_s1 + $0x3c] sm:$0xf]  ;;  %v6449_v6 = vsel %vm323_vm4, %v17963_v54, %v17975_v19 }
 0x204   : > { %v15143_v15 = vpop.f32.mrf.mxu0  ;;  %v15160_v20 = vpop.f32.mrf.mxu1  ;;  %15468 = vmatprep.subr.bf16.mxu1 %v16330_v0  ;;  %v6701_v57 = vsel %vm583_vm8, %v18046_v48, %v18058_v12 }
 0x205   : > { %v18065_v21 = vpop.permute.xlu0 %6760  ;;  %8725 = vrot.lane.b32.xlu1 %v18006_v38, %s16334_s8  ;;  %v13993_v20 = vld [vmem:[%s20212_s1 + $0x48] sm:$0xf] }
 0x206   : > { %v2992_v22 = vpop.f32.mrf.mxu0  ;;  %8786 = vrot.lane.b32.xlu0 %v17990_v63, %s16335_s9  ;;  %15441 = vmatmul.mubr.msk.bf16.vlgmr.msra.gmra.mxu0 %vm213_vm2, %v13965_v13  ;;  %v3045_v17 = vpop.f32.mrf.mxu1 }
 0x207   : > { %v2998_v24 = vadd.f32 %v2992_v22, %v2935_v2  ;;  %15451 = vmatpush3.bf16.msra.mxu0 %v6026_v34  ;;  %15452 = vmatprep.mubr.msk.bf16.mxu0 %vm16331_vm0, %v16330_v0  ;;  %v18077_v55 = vpop.permute.xlu1 %6762  ;;  %v6454_v22 = vsel %vm217_vm1, %v6449_v6, 0 }
 0x208   : > { %v15154_v29 = vpop.f32.mrf.mxu0  ;;  %v15161_v27 = vpop.f32.mrf.mxu1  ;;  %15462 = vmatprep.subr.bf16.mxu0 %v16330_v0 }
 0x209   : > { %v3048_v44 = vadd.f32 %v3042_v11, %v2998_v24  ;;  %v18084_v4 = vpop.permute.xlu0 %6823  ;;  %8788 = vrot.lane.b32.xlu1 %v18006_v38, %s16335_s9  ;;  %v13989_v27 = vld [vmem:[%s20212_s1 + $0x44] sm:$0xf] }
 0x20a   : > { %v2995_v36 = vpop.f32.mrf.mxu0  ;;  %8849 = vrot.lane.b32.xlu0 %v17990_v63, %s16336_s10  ;;  %v3168_v58 = vpop.f32.mrf.mxu1  ;;  %15459 = vmatmul.mubr.msk.bf16.vlgmr.msra.gmra.mxu1 %vm213_vm2, %v13977_v23 }
 0x20b   : > { %15469 = vmatpush3.bf16.msra.mxu1 %v6215_v5  ;;  %15470 = vmatprep.mubr.msk.bf16.mxu1 %vm16331_vm0, %v16330_v0  ;;  %v18096_v8 = vpop.permute.xlu1 %6825 }
 0x20c   : > { %v15155_v49 = vpop.f32.mrf.mxu0  ;;  %v15172_v41 = vpop.f32.mrf.mxu1  ;;  %15480 = vmatprep.subr.bf16.mxu1 %v16330_v0 }
 0x20d   : > { %v18100_v37 = vpop.permute.xlu0 %6891  ;;  %8851 = vrot.lane.b32.xlu1 %v18006_v38, %s16336_s10  ;;  %v6580_v41 = vsel %vm217_vm1, %v6575_v31, 0  ;;  %v6764_v31 = vsel %vm648_vm9, %v18065_v21, %v18077_v55 }
 0x20e   : > { %v3105_v26 = vpop.f32.mrf.mxu0  ;;  %8912 = vrot.lane.b32.xlu0 %v17990_v63, %s16337_s11  ;;  %15453 = vmatmul.mubr.msk.bf16.vlgmr.msra.gmra.mxu0 %vm213_vm2, %v13973_v14  ;;  %v3171_v33 = vpop.f32.mrf.mxu1  ;;  %v6769_v55 = vsel %vm217_vm1, %v6764_v31, 0 }
 0x20f   : > { %v3111_v35 = vadd.f32 %v3105_v26, %v3048_v44  ;;  %15463 = vmatpush3.bf16.msra.mxu0 %v6152_v51  ;;  %15464 = vmatprep.mubr.msk.bf16.mxu0 %vm16331_vm0, %v16330_v0  ;;  %v18113_v43 = vpop.permute.xlu1 %6893  ;;  %v14000_v51 = vld [vmem:[%s20212_s1 + $0x50] sm:$0xf] }
 0x210   : > { %v15166_v45 = vpop.f32.mrf.mxu0  ;;  %v15173_v3 = vpop.f32.mrf.mxu1  ;;  %15474 = vmatprep.subr.bf16.mxu0 %v16330_v0 }
 0x211   : > { %v3174_v46 = vadd.f32 %v3168_v58, %v3111_v35  ;;  %v18120_v16 = vpop.permute.xlu0 %6999  ;;  %8914 = vrot.lane.b32.xlu1 %v18006_v38, %s16337_s11  ;;  %v13996_v45 = vld [vmem:[%s20212_s1 + $0x4c] sm:$0xf] }
 0x212   : > { %v3108_v1 = vpop.f32.mrf.mxu0  ;;  %8975 = vrot.lane.b32.xlu0 %v17990_v63, %s16338_s18  ;;  %v3294_v59 = vpop.f32.mrf.mxu1  ;;  %15471 = vmatmul.mubr.msk.bf16.vlgmr.msra.gmra.mxu1 %vm213_vm2, %v13985_v62 }
 0x213   : > { %15481 = vmatpush3.bf16.msra.mxu1 %v6328_v53  ;;  %15482 = vmatprep.mubr.msk.bf16.mxu1 %vm16331_vm0, %v16330_v0  ;;  %v18132_v50 = vpop.permute.xlu1 %7001 }
 0x214   : > { %v15167_v42 = vpop.f32.mrf.mxu0  ;;  %v15184_v2 = vpop.f32.mrf.mxu1  ;;  %15492 = vmatprep.subr.bf16.mxu1 %v16330_v0 }
 0x215   : > { %v18139_v11 = vpop.permute.xlu0 %7062  ;;  %8977 = vrot.lane.b32.xlu1 %v18006_v38, %s16338_s18  ;;  %v6706_v2 = vsel %vm217_vm1, %v6701_v57, 0 }
 0x216   : > { %v3231_v13 = vpop.f32.mrf.mxu0  ;;  %9038 = vrot.lane.b32.xlu0 %v17990_v63, %s16339_s19  ;;  %15465 = vmatmul.mubr.msk.bf16.vlgmr.msra.gmra.mxu0 %vm213_vm2, %v13981_v61  ;;  %v3297_v34 = vpop.f32.mrf.mxu1  ;;  %v6386_v63 = vsel %vm211_vm3, %v17946_v56, %v17958_v39 }
 0x217   : > { %v3237_v15 = vadd.f32 %v3231_v13, %v3174_v46  ;;  %15475 = vmatpush3.bf16.msra.mxu0 %v6278_v18  ;;  %15476 = vmatprep.mubr.msk.bf16.mxu0 %vm16331_vm0, %v16330_v0  ;;  %v18151_v54 = vpop.permute.xlu1 %7064  ;;  %v6391_v39 = vsel %vm217_vm1, %v6386_v63, 0  ;;  %v14008_v18 = vld [vmem:[%s20212_s1 + $0x58] sm:$0xf]  ;;  %v6638_v13 = vsel %vm518_vm7, %v18027_v47, %v18039_v10  ;;  %v6827_v63 = vsel %vm713_vm10, %v18084_v4, %v18096_v8 }
 0x218   : > { %v15178_v19 = vpop.f32.mrf.mxu0  ;;  %v15185_v9 = vpop.f32.mrf.mxu1  ;;  %15486 = vmatprep.subr.bf16.mxu0 %v16330_v0  ;;  %v6643_v10 = vsel %vm217_vm1, %v6638_v13, 0 }
 0x219   : > { %v3300_v17 = vadd.f32 %v3294_v59, %v3237_v15  ;;  %v18158_v24 = vpop.permute.xlu0 %7125  ;;  %9040 = vrot.lane.b32.xlu1 %v18006_v38, %s16339_s19  ;;  %v14004_v19 = vld [vmem:[%s20212_s1 + $0x54] sm:$0xf] }
 0x21a   : > { %v3234_v23 = vpop.f32.mrf.mxu0  ;;  %9150 = vrot.lane.b32.xlu0 %v17833_v60, %s16333_s5  ;;  %v3420_v29 = vpop.f32.mrf.mxu1  ;;  %15483 = vmatmul.mubr.msk.bf16.vlgmr.msra.gmra.mxu1 %vm213_vm2, %v13993_v20 }
 0x21b   : > { %15493 = vmatpush3.bf16.msra.mxu1 %v6454_v22  ;;  %15494 = vmatprep.mubr.msk.bf16.mxu1 %vm16331_vm0, %v16330_v0  ;;  %v18170_v56 = vpop.permute.xlu1 %7127 }
 0x21c   : > { %v15179_v38 = vpop.f32.mrf.mxu0  ;;  %v15196_v5 = vpop.f32.mrf.mxu1  ;;  %15504 = vmatprep.subr.bf16.mxu1 %v16330_v0 }
 0x21d   : > { %v18177_v44 = vpop.permute.xlu0 %7188  ;;  %9152 = vrot.lane.b32.xlu1 %v17849_v30, %s16333_s5  ;;  %v6832_v5 = vsel %vm217_vm1, %v6827_v63, 0 }
 0x21e   : > { %v3357_v36 = vpop.f32.mrf.mxu0  ;;  %9213 = vrot.lane.b32.xlu0 %v17833_v60, %s16332_s4  ;;  %15477 = vmatmul.mubr.msk.bf16.vlgmr.msra.gmra.mxu0 %vm213_vm2, %v13989_v27  ;;  %v3423_v58 = vpop.f32.mrf.mxu1 }
 0x21f   : > { %v3363_v14 = vadd.f32 %v3357_v36, %v3300_v17  ;;  %15487 = vmatpush3.bf16.msra.mxu0 %v6391_v39  ;;  %15488 = vmatprep.mubr.msk.bf16.mxu0 %vm16331_vm0, %v16330_v0  ;;  %v18189_v28 = vpop.permute.xlu1 %7190  ;;  %v14016_v39 = vld [vmem:[%s20212_s1 + $0x60] sm:$0xf] }
 0x220   : > { %v15190_v7 = vpop.f32.mrf.mxu0  ;;  %v15197_v49 = vpop.f32.mrf.mxu1  ;;  %15498 = vmatprep.subr.bf16.mxu0 %v16330_v0 }
 0x221   : > { %v3426_v26 = vadd.f32 %v3420_v29, %v3363_v14  ;;  %v18196_v33 = vpop.permute.xlu0 %7251  ;;  %9215 = vrot.lane.b32.xlu1 %v17849_v30, %s16332_s4 }
 0x222   : > { %v3360_v35 = vpop.f32.mrf.mxu0  ;;  %9276 = vrot.lane.b32.xlu0 %v17833_v60, %s16334_s8  ;;  %v3546_v62 = vpop.f32.mrf.mxu1  ;;  %15495 = vmatmul.mubr.msk.bf16.vlgmr.msra.gmra.mxu1 %vm213_vm2, %v14000_v51  ;;  %v14012_v51 = vld [vmem:[%s20212_s1 + $0x5c] sm:$0xf] }
 0x223   : > { %15505 = vmatpush3.bf16.msra.mxu1 %v6580_v41  ;;  %15506 = vmatprep.mubr.msk.bf16.mxu1 %vm16331_vm0, %v16330_v0  ;;  %v18208_v32 = vpop.permute.xlu1 %7253 }
 0x224   : > { %v15191_v3 = vpop.f32.mrf.mxu0  ;;  %v15208_v53 = vpop.f32.mrf.mxu1  ;;  %15516 = vmatprep.subr.bf16.mxu1 %v16330_v0 }
 0x225   : > { %v18215_v46 = vpop.permute.xlu0 %7314  ;;  %9278 = vrot.lane.b32.xlu1 %v17849_v30, %s16334_s8 }
 0x226   : > { %v3483_v1 = vpop.f32.mrf.mxu0  ;;  %9339 = vrot.lane.b32.xlu0 %v17833_v60, %s16335_s9  ;;  %15489 = vmatmul.mubr.msk.bf16.vlgmr.msra.gmra.mxu0 %vm213_vm2, %v13996_v45  ;;  %v3549_v59 = vpop.f32.mrf.mxu1  ;;  %v18299_v45 = vld.sshfl [vmem:[%s16430_s30 + $0x1c] sm:$0x33 pattern:$0x76325410] }
 0x227   : > { %v3489_v61 = vadd.f32 %v3483_v1, %v3426_v26  ;;  %15499 = vmatpush3.bf16.msra.mxu0 %v6517_v25  ;;  %15500 = vmatprep.mubr.msk.bf16.mxu0 %vm16331_vm0, %v16330_v0  ;;  %v18227_v48 = vpop.permute.xlu1 %7316  ;;  %v14024_v25 = vld [vmem:[%s20212_s1 + $0x68] sm:$0xf]  ;;  %v18312_v1 = vcombine.high %v18299_v45, %v18299_v45  ;;  %v6895_v59 = vsel %vm211_vm3, %v18100_v37, %v18113_v43 }
 0x228   : > { %v15202_v12 = vpop.f32.mrf.mxu0  ;;  %v15209_v42 = vpop.f32.mrf.mxu1  ;;  %15510 = vmatprep.subr.bf16.mxu0 %v16330_v0  ;;  %v6900_v43 = vsel %vm217_vm1, %v6895_v59, 0  ;;  %v14035_v59 = vld [vmem:[%s20212_s1 + $0x8] sm:$0xf] }
 0x229   : > { %v18231_v6 = vadd.f32 %v3546_v62, %v3489_v61  ;;  %v18236_v34 = vpop.permute.xlu0 %7377  ;;  %9341 = vrot.lane.b32.xlu1 %v17849_v30, %s16335_s9 }
 0x22a   : > { %v3486_v15 = vpop.f32.mrf.mxu0  ;;  %9402 = vrot.lane.b32.xlu0 %v17833_v60, %s16336_s10  ;;  %v3660_v20 = vpop.f32.mrf.mxu1  ;;  %15507 = vmatmul.mubr.msk.bf16.vlgmr.msra.gmra.mxu1 %vm213_vm2, %v14008_v18 }
 0x22b   : > { %15517 = vmatpush3.bf16.msra.mxu1 %v6706_v2  ;;  %15518 = vmatprep.mubr.msk.bf16.mxu1 %vm16331_vm0, %v16330_v0  ;;  %v18248_v47 = vpop.permute.xlu1 %7379  ;;  %v14020_v2 = vld [vmem:[%s20212_s1 + $0x64] sm:$0xf]  ;;  %v7066_v15 = vsel %vm388_vm5, %v18139_v11, %v18151_v54 }
 0x22c   : > { %v15203_v9 = vpop.f32.mrf.mxu0  ;;  %v15220_v22 = vpop.f32.mrf.mxu1  ;;  %15528 = vmatprep.subr.bf16.mxu1 %v16330_v0 }
 0x22d   : > { %v18255_v17 = vpop.permute.xlu0 %7489  ;;  %9404 = vrot.lane.b32.xlu1 %v17849_v30, %s16336_s10  ;;  %v6879_v22 = vld [vmem:[%s20212_s1] sm:$0xf] }
 0x22e   : > { %v3614_v23 = vpop.f32.mrf.mxu0  ;;  %9465 = vrot.lane.b32.xlu0 %v17833_v60, %s16337_s11  ;;  %15501 = vmatmul.mubr.msk.bf16.vlgmr.msra.gmra.mxu0 %vm213_vm2, %v14004_v19  ;;  %v3663_v29 = vpop.f32.mrf.mxu1 }
 0x22f   : > { %v3661_v27 = vadd.f32 %v3660_v20, %v3614_v23  ;;  %15511 = vmatpush3.bf16.msra.mxu0 %v6643_v10  ;;  %15512 = vmatprep.mubr.msk.bf16.mxu0 %vm16331_vm0, %v16330_v0  ;;  %v18267_v4 = vpop.permute.xlu1 %7491  ;;  %v7071_v23 = vsel %vm217_vm1, %v7066_v15, 0  ;;  %v7003_v29 = vsel %vm323_vm4, %v18120_v16, %v18132_v50  ;;  %v14047_v15 = vld [vmem:[%s20212_s1 + $0x14] sm:$0xf] }
 0x230   : > { %v15214_v8 = vpop.f32.mrf.mxu0  ;;  %v15221_v38 = vpop.f32.mrf.mxu1  ;;  %15522 = vmatprep.subr.bf16.mxu0 %v16330_v0  ;;  %v7008_v50 = vsel %vm217_vm1, %v7003_v29, 0  ;;  %v14043_v29 = vld [vmem:[%s20212_s1 + $0x10] sm:$0xf] }
 0x231   : > { %v18274_v36 = vpop.permute.xlu0 %7552  ;;  %9467 = vrot.lane.b32.xlu1 %v17849_v30, %s16337_s11 }
 0x232   : > { %v3617_v58 = vpop.f32.mrf.mxu0  ;;  %9528 = vrot.lane.b32.xlu0 %v17833_v60, %s16338_s18  ;;  %v3785_v14 = vpop.f32.mrf.mxu1  ;;  %15519 = vmatmul.mubr.msk.bf16.vlgmr.msra.gmra.mxu1 %vm213_vm2, %v14016_v39 }
 0x233   : > { %15529 = vmatpush3.bf16.msra.mxu1 %v6832_v5  ;;  %15530 = vmatprep.mubr.msk.bf16.mxu1 %vm16331_vm0, %v16330_v0  ;;  %v18286_v21 = vpop.permute.xlu1 %7554  ;;  %v14030_v5 = vld [vmem:[%s20212_s1 + $0x4] sm:$0xf] }
 0x234   : > { %v15215_v7 = vpop.f32.mrf.mxu0  ;;  %v15232_v49 = vpop.f32.mrf.mxu1  ;;  %15540 = vmatprep.subr.bf16.mxu1 %v16330_v0 }
 0x235   : > { %v18290_v41 = vpop.permute.xlu0 %7615  ;;  %9530 = vrot.lane.b32.xlu1 %v17849_v30, %s16338_s18 }
 0x236   : > { %v3722_v26 = vpop.f32.mrf.mxu0  ;;  %9591 = vrot.lane.b32.xlu0 %v17833_v60, %s16339_s19  ;;  %15513 = vmatmul.mubr.msk.bf16.vlgmr.msra.gmra.mxu0 %vm213_vm2, %v14012_v51  ;;  %v3788_v35 = vpop.f32.mrf.mxu1  ;;  %v6946_v60 = vsel %vm217_vm1, %v14028_v40, 0  ;;  %v14039_v40 = vld [vmem:[%s20212_s1 + $0xc] sm:$0xf] }
 0x237   : > { %v3728_v62 = vadd.f32 %v3722_v26, %v3661_v27  ;;  %15523 = vmatpush3.bf16.msra.mxu0 %v6769_v55  ;;  %15524 = vmatprep.mubr.msk.bf16.mxu0 %vm16331_vm0, %v16330_v0  ;;  %v18306_v3 = vpop.permute.xlu1 %7617 }
 0x238   : > { %v15226_v53 = vpop.f32.mrf.mxu0  ;;  %v15233_v57 = vpop.f32.mrf.mxu1  ;;  %15534 = vmatprep.subr.bf16.mxu0 %v16330_v0 }
 0x239   : > { %v3791_v61 = vadd.f32 %v3785_v14, %v3728_v62  ;;  %v18317_v18 = vpop.permute.xlu0 %7678  ;;  %9593 = vrot.lane.b32.xlu1 %v17849_v30, %s16339_s19  ;;  %v7192_v14 = vsel %vm518_vm7, %v18177_v44, %v18189_v28  ;;  %v7129_v62 = vsel %vm453_vm6, %v18158_v24, %v18170_v56 }
 0x23a   : > { %v3725_v12 = vpop.f32.mrf.mxu0  ;;  %9704 = vrot.lane.b32.xlu0 %v18299_v45, %s16333_s5  ;;  %v3911_v42 = vpop.f32.mrf.mxu1  ;;  %15531 = vmatmul.mubr.msk.bf16.vlgmr.msra.gmra.mxu1 %vm213_vm2, %v14024_v25  ;;  %v7197_v35 = vsel %vm217_vm1, %v7192_v14, 0  ;;  %v7134_v56 = vsel %vm217_vm1, %v7129_v62, 0  ;;  %v18456_v14 = vld.sshfl [vmem:[%s16430_s30 + $0x18] sm:$0x33 pattern:$0x76325410] }
 0x23b   : > { %15541 = vmatpush3.bf16.msra.mxu1 %v6946_v60  ;;  %15542 = vmatprep.mubr.msk.bf16.mxu1 %vm16331_vm0, %v16330_v0  ;;  %v18329_v37 = vpop.permute.xlu1 %7680 }
 0x23c   : > { %v15227_v30 = vpop.f32.mrf.mxu0  ;;  %v15244_v13 = vpop.f32.mrf.mxu1  ;;  %15552 = vmatprep.subr.bf16.mxu1 %v16330_v0 }
 0x23d   : > { %v18336_v20 = vpop.permute.xlu0 %7741  ;;  %9706 = vrot.lane.b32.xlu1 %v18312_v1, %s16333_s5 }
 0x23e   : > { %v3848_v19 = vpop.f32.mrf.mxu0  ;;  %9767 = vrot.lane.b32.xlu0 %v18299_v45, %s16332_s4  ;;  %15525 = vmatmul.mubr.msk.bf16.vlgmr.msra.gmra.mxu0 %vm213_vm2, %v14020_v2  ;;  %v3914_v10 = vpop.f32.mrf.mxu1 }
 0x23f   : > { %v3854_v9 = vadd.f32 %v3848_v19, %v3791_v61  ;;  %15535 = vmatpush3.bf16.msra.mxu0 %v6900_v43  ;;  %15536 = vmatprep.mubr.msk.bf16.mxu0 %vm16331_vm0, %v16330_v0  ;;  %v18348_v11 = vpop.permute.xlu1 %7743 }
 0x240   : > { %v15238_v54 = vpop.f32.mrf.mxu0  ;;  %v15245_v63 = vpop.f32.mrf.mxu1  ;;  %15546 = vmatprep.subr.bf16.mxu0 %v16330_v0 }
 0x241   : > { %v3917_v27 = vadd.f32 %v3911_v42, %v3854_v9  ;;  %v18355_v39 = vpop.permute.xlu0 %7804  ;;  %9769 = vrot.lane.b32.xlu1 %v18312_v1, %s16332_s4  ;;  %v7318_v42 = vsel %vm648_vm9, %v18215_v46, %v18227_v48  ;;  %v7255_v9 = vsel %vm583_vm8, %v18196_v33, %v18208_v32 }
 0x242   : > { %v3851_v8 = vpop.f32.mrf.mxu0  ;;  %9830 = vrot.lane.b32.xlu0 %v18299_v45, %s16334_s8  ;;  %v4037_v38 = vpop.f32.mrf.mxu1  ;;  %15543 = vmatmul.mubr.msk.bf16.vlgmr.msra.gmra.mxu1 %vm213_vm2, %v6879_v22  ;;  %v7323_v10 = vsel %vm217_vm1, %v7318_v42, 0  ;;  %v7260_v32 = vsel %vm217_vm1, %v7255_v9, 0 }
 0x243   : > { %15553 = vmatpush3.bf16.msra.mxu1 %v7071_v23  ;;  %15554 = vmatprep.mubr.msk.bf16.mxu1 %vm16331_vm0, %v16330_v0  ;;  %v18367_v16 = vpop.permute.xlu1 %7806 }
 0x244   : > { %v15239_v31 = vpop.f32.mrf.mxu0  ;;  %v15256_v58 = vpop.f32.mrf.mxu1  ;;  %15564 = vmatprep.subr.bf16.mxu1 %v16330_v0 }
 0x245   : > { %v18374_v51 = vpop.permute.xlu0 %7867  ;;  %9832 = vrot.lane.b32.xlu1 %v18312_v1, %s16334_s8 }
 0x246   : > { %v3974_v55 = vpop.f32.mrf.mxu0  ;;  %9893 = vrot.lane.b32.xlu0 %v18299_v45, %s16335_s9  ;;  %15537 = vmatmul.mubr.msk.bf16.vlgmr.msra.gmra.mxu0 %vm213_vm2, %v14030_v5  ;;  %v4040_v7 = vpop.f32.mrf.mxu1  ;;  %v14062_v5 = vld [vmem:[%s16430_s30 + $0x14] sm:$0x3] }
 0x247   : > { %v3980_v49 = vadd.f32 %v3974_v55, %v3917_v27  ;;  %15547 = vmatpush3.bf16.msra.mxu0 %v7008_v50  ;;  %15548 = vmatprep.mubr.msk.bf16.mxu0 %vm16331_vm0, %v16330_v0  ;;  %v18386_v44 = vpop.permute.xlu1 %7869  ;;  %v14055_v55 = vld [vmem:[%s20212_s1 + $0x1c] sm:$0xf] }
 0x248   : > { %v15250_v28 = vpop.f32.mrf.mxu0  ;;  %v15257_v26 = vpop.f32.mrf.mxu1  ;;  %15558 = vmatprep.subr.bf16.mxu0 %v16330_v0 }
 0x249   : > { %v4043_v25 = vadd.f32 %v4037_v38, %v3980_v49  ;;  %v18393_v53 = vpop.permute.xlu0 %7930  ;;  %9895 = vrot.lane.b32.xlu1 %v18312_v1, %s16335_s9  ;;  %v7435_v28 = vsel %vm217_vm1, %v14062_v5, 0  ;;  %v18469_v26 = vcombine.high %v18456_v14, %v18456_v14 }
 0x24a   : > { %v3977_v57 = vpop.f32.mrf.mxu0  ;;  %9956 = vrot.lane.b32.xlu0 %v18299_v45, %s16336_s10  ;;  %v4149_v60 = vpop.f32.mrf.mxu1  ;;  %15555 = vmatmul.mubr.msk.bf16.vlgmr.msra.gmra.mxu1 %vm213_vm2, %v14039_v40 }
 0x24b   : > { %15565 = vmatpush3.bf16.msra.mxu1 %v7197_v35  ;;  %15566 = vmatprep.mubr.msk.bf16.mxu1 %vm16331_vm0, %v16330_v0  ;;  %v18405_v24 = vpop.permute.xlu1 %7932  ;;  %v7381_v35 = vsel %vm713_vm10, %v18236_v34, %v18248_v47 }
 0x24c   : > { %v15251_v61 = vpop.f32.mrf.mxu0  ;;  %v15268_v12 = vpop.f32.mrf.mxu1  ;;  %15576 = vmatprep.subr.bf16.mxu1 %v16330_v0  ;;  %v7386_v47 = vsel %vm217_vm1, %v7381_v35, 0 }
 0x24d   : > { %v18412_v2 = vpop.permute.xlu0 %8043  ;;  %9958 = vrot.lane.b32.xlu1 %v18312_v1, %s16336_s10  ;;  %v7556_v12 = vsel %vm323_vm4, %v18274_v36, %v18286_v21 }
 0x24e   : > { %v4100_v43 = vpop.f32.mrf.mxu0  ;;  %10019 = vrot.lane.b32.xlu0 %v18299_v45, %s16337_s11  ;;  %15549 = vmatmul.mubr.msk.bf16.vlgmr.msra.gmra.mxu0 %vm213_vm2, %v14035_v59  ;;  %v4152_v30 = vpop.f32.mrf.mxu1  ;;  %v14051_v59 = vld [vmem:[%s20212_s1 + $0x18] sm:$0xf] }
 0x24f   : > { %v4106_v13 = vadd.f32 %v4100_v43, %v4043_v25  ;;  %15559 = vmatpush3.bf16.msra.mxu0 %v7134_v56  ;;  %15560 = vmatprep.mubr.msk.bf16.mxu0 %vm16331_vm0, %v16330_v0  ;;  %v18424_v46 = vpop.permute.xlu1 %8045 }
 0x250   : > { %v15262_v48 = vpop.f32.mrf.mxu0  ;;  %v15269_v19 = vpop.f32.mrf.mxu1  ;;  %15570 = vmatprep.subr.bf16.mxu0 %v16330_v0 }
 0x251   : > { %v4155_v22 = vadd.f32 %v4149_v60, %v4106_v13  ;;  %v18431_v54 = vpop.permute.xlu0 %8106  ;;  %10021 = vrot.lane.b32.xlu1 %v18312_v1, %s16337_s11  ;;  %v7561_v19 = vsel %vm217_vm1, %v7556_v12, 0 }
 0x252   : > { %v4103_v63 = vpop.f32.mrf.mxu0  ;;  %10082 = vrot.lane.b32.xlu0 %v18299_v45, %s16338_s18  ;;  %v4275_v23 = vpop.f32.mrf.mxu1  ;;  %15567 = vmatmul.mubr.msk.bf16.vlgmr.msra.gmra.mxu1 %vm213_vm2, %v14047_v15  ;;  %v14063_v15 = vld [vmem:[%s20212_s1 + $0x24] sm:$0xf] }
 0x253   : > { %15577 = vmatpush3.bf16.msra.mxu1 %v7323_v10  ;;  %15578 = vmatprep.mubr.msk.bf16.mxu1 %vm16331_vm0, %v16330_v0  ;;  %v18443_v33 = vpop.permute.xlu1 %8108  ;;  %v7493_v10 = vsel %vm211_vm3, %v18255_v17, %v18267_v4 }
 0x254   : > { %v15263_v27 = vpop.f32.mrf.mxu0  ;;  %v15280_v8 = vpop.f32.mrf.mxu1  ;;  %15588 = vmatprep.subr.bf16.mxu1 %v16330_v0  ;;  %v7498_v4 = vsel %vm217_vm1, %v7493_v10, 0 }
 0x255   : > { %v18447_v38 = vpop.permute.xlu0 %8169  ;;  %10084 = vrot.lane.b32.xlu1 %v18312_v1, %s16338_s18  ;;  %v7682_v8 = vsel %vm453_vm6, %v18317_v18, %v18329_v37 }
 0x256   : > { %v4212_v50 = vpop.f32.mrf.mxu0  ;;  %10145 = vrot.lane.b32.xlu0 %v18299_v45, %s16339_s19  ;;  %15561 = vmatmul.mubr.msk.bf16.vlgmr.msra.gmra.mxu0 %vm213_vm2, %v14043_v29  ;;  %v4278_v31 = vpop.f32.mrf.mxu1  ;;  %v14059_v29 = vld [vmem:[%s20212_s1 + $0x20] sm:$0xf] }
 0x257   : > { %v4218_v58 = vadd.f32 %v4212_v50, %v4155_v22  ;;  %15571 = vmatpush3.bf16.msra.mxu0 %v7260_v32  ;;  %15572 = vmatprep.mubr.msk.bf16.mxu0 %vm16331_vm0, %v16330_v0  ;;  %v18463_v7 = vpop.permute.xlu1 %8171 }
 0x258   : > { %v15274_v49 = vpop.f32.mrf.mxu0  ;;  %v15281_v40 = vpop.f32.mrf.mxu1  ;;  %15582 = vmatprep.subr.bf16.mxu0 %v16330_v0 }
 0x259   : > { %v4281_v62 = vadd.f32 %v4275_v23, %v4218_v58  ;;  %v18474_v25 = vpop.permute.xlu0 %8232  ;;  %10147 = vrot.lane.b32.xlu1 %v18312_v1, %s16339_s19  ;;  %v7687_v40 = vsel %vm217_vm1, %v7682_v8, 0 }
 0x25a   : > { %v4215_v57 = vpop.f32.mrf.mxu0  ;;  %10213 = vrot.lane.b32.xlu0 %v18456_v14, %s16333_s5  ;;  %v4401_v60 = vpop.f32.mrf.mxu1  ;;  %15579 = vmatmul.mubr.msk.bf16.vlgmr.msra.gmra.mxu1 %vm213_vm2, %v14055_v55  ;;  %v14070_v55 = vld [vmem:[%s20212_s1 + $0x2c] sm:$0xf] }
 0x25b   : > { %15589 = vmatpush3.bf16.msra.mxu1 %v7435_v28  ;;  %15590 = vmatprep.mubr.msk.bf16.mxu1 %vm16331_vm0, %v16330_v0  ;;  %v18486_v34 = vpop.permute.xlu1 %8234  ;;  %v7619_v28 = vsel %vm388_vm5, %v18290_v41, %v18306_v3 }
 0x25c   : > { %v15275_v56 = vpop.f32.mrf.mxu0  ;;  %v15292_v61 = vpop.f32.mrf.mxu1  ;;  %15600 = vmatprep.subr.bf16.mxu1 %v16330_v0  ;;  %v7624_v3 = vsel %vm217_vm1, %v7619_v28, 0 }
 0x25d   : > { %v18493_v42 = vpop.permute.xlu0 %8295  ;;  %10215 = vrot.lane.b32.xlu1 %v18469_v26, %s16333_s5  ;;  %v7808_v61 = vsel %vm583_vm8, %v18355_v39, %v18367_v16 }
 0x25e   : > { %v4338_v43 = vpop.f32.mrf.mxu0  ;;  %10321 = vrot.lane.b32.xlu0 %v18456_v14, %s16332_s4  ;;  %15573 = vmatmul.mubr.msk.bf16.vlgmr.msra.gmra.mxu0 %vm213_vm2, %v14051_v59  ;;  %v4404_v30 = vpop.f32.mrf.mxu1  ;;  %v14066_v59 = vld [vmem:[%s20212_s1 + $0x28] sm:$0xf] }
 0x25f   : > { %v4344_v13 = vadd.f32 %v4338_v43, %v4281_v62  ;;  %15583 = vmatpush3.bf16.msra.mxu0 %v7386_v47  ;;  %15584 = vmatprep.mubr.msk.bf16.mxu0 %vm16331_vm0, %v16330_v0  ;;  %v18505_v36 = vpop.permute.xlu1 %8297 }
 0x260   : > { %v15286_v21 = vpop.f32.mrf.mxu0  ;;  %v15293_v48 = vpop.f32.mrf.mxu1  ;;  %15594 = vmatprep.subr.bf16.mxu0 %v16330_v0 }
 0x261   : > { %v4407_v9 = vadd.f32 %v4401_v60, %v4344_v13  ;;  %v18512_v22 = vpop.permute.xlu0 %8358  ;;  %10323 = vrot.lane.b32.xlu1 %v18469_v26, %s16332_s4  ;;  %v7813_v48 = vsel %vm217_vm1, %v7808_v61, 0 }
 0x262   : > { %v4341_v63 = vpop.f32.mrf.mxu0  ;;  %10384 = vrot.lane.b32.xlu0 %v18456_v14, %s16334_s8  ;;  %v4527_v23 = vpop.f32.mrf.mxu1  ;;  %15591 = vmatmul.mubr.msk.bf16.vlgmr.msra.gmra.mxu1 %vm213_vm2, %v14063_v15  ;;  %v14078_v15 = vld [vmem:[%s20212_s1 + $0x34] sm:$0xf] }
 0x263   : > { %15601 = vmatpush3.bf16.msra.mxu1 %v7561_v19  ;;  %15602 = vmatprep.mubr.msk.bf16.mxu1 %vm16331_vm0, %v16330_v0  ;;  %v18524_v17 = vpop.permute.xlu1 %8360  ;;  %v7745_v19 = vsel %vm518_vm7, %v18336_v20, %v18348_v11 }
 0x264   : > { %v15287_v32 = vpop.f32.mrf.mxu0  ;;  %v15304_v27 = vpop.f32.mrf.mxu1  ;;  %15612 = vmatprep.subr.bf16.mxu1 %v16330_v0  ;;  %v7750_v11 = vsel %vm217_vm1, %v7745_v19, 0 }
 0x265   : > { %v18531_v5 = vpop.permute.xlu0 %8421  ;;  %10386 = vrot.lane.b32.xlu1 %v18469_v26, %s16334_s8  ;;  %v7934_v27 = vsel %vm713_vm10, %v18393_v53, %v18405_v24 }
 0x266   : > { %v4464_v50 = vpop.f32.mrf.mxu0  ;;  %10447 = vrot.lane.b32.xlu0 %v18456_v14, %s16335_s9  ;;  %15585 = vmatmul.mubr.msk.bf16.vlgmr.msra.gmra.mxu0 %vm213_vm2, %v14059_v29  ;;  %v4530_v31 = vpop.f32.mrf.mxu1  ;;  %v14074_v29 = vld [vmem:[%s20212_s1 + $0x30] sm:$0xf] }
 0x267   : > { %v4470_v58 = vadd.f32 %v4464_v50, %v4407_v9  ;;  %15595 = vmatpush3.bf16.msra.mxu0 %v7498_v4  ;;  %15596 = vmatprep.mubr.msk.bf16.mxu0 %vm16331_vm0, %v16330_v0  ;;  %v18543_v18 = vpop.permute.xlu1 %8423 }
 0x268   : > { %v15298_v37 = vpop.f32.mrf.mxu0  ;;  %v15305_v49 = vpop.f32.mrf.mxu1  ;;  %15606 = vmatprep.subr.bf16.mxu0 %v16330_v0 }
 0x269   : > { %v4533_v35 = vadd.f32 %v4527_v23, %v4470_v58  ;;  %v18550_v62 = vpop.permute.xlu0 %8484  ;;  %10449 = vrot.lane.b32.xlu1 %v18469_v26, %s16335_s9  ;;  %v7939_v49 = vsel %vm217_vm1, %v7934_v27, 0 }
 0x26a   : > { %v4467_v57 = vpop.f32.mrf.mxu0  ;;  %10510 = vrot.lane.b32.xlu0 %v18456_v14, %s16336_s10  ;;  %v4653_v60 = vpop.f32.mrf.mxu1  ;;  %15603 = vmatmul.mubr.msk.bf16.vlgmr.msra.gmra.mxu1 %vm213_vm2, %v14070_v55  ;;  %v14086_v55 = vld [vmem:[%s20212_s1 + $0x3c] sm:$0xf] }
 0x26b   : > { %15613 = vmatpush3.bf16.msra.mxu1 %v7687_v40  ;;  %15614 = vmatprep.mubr.msk.bf16.mxu1 %vm16331_vm0, %v16330_v0  ;;  %v18562_v41 = vpop.permute.xlu1 %8486 }
 0x26c   : > { %v15299_v47 = vpop.f32.mrf.mxu0  ;;  %v15316_v56 = vpop.f32.mrf.mxu1  ;;  %15624 = vmatprep.subr.bf16.mxu1 %v16330_v0 }
 0x26d   : > { %v18569_v12 = vpop.permute.xlu0 %8552  ;;  %10512 = vrot.lane.b32.xlu1 %v18469_v26, %s16336_s10 }
 0x26e   : > { %v4590_v43 = vpop.f32.mrf.mxu0  ;;  %10573 = vrot.lane.b32.xlu0 %v18456_v14, %s16337_s11  ;;  %15597 = vmatmul.mubr.msk.bf16.vlgmr.msra.gmra.mxu0 %vm213_vm2, %v14066_v59  ;;  %v4656_v30 = vpop.f32.mrf.mxu1 }
 0x26f   : > { %v4596_v13 = vadd.f32 %v4590_v43, %v4533_v35  ;;  %15607 = vmatpush3.bf16.msra.mxu0 %v7624_v3  ;;  %15608 = vmatprep.mubr.msk.bf16.mxu0 %vm16331_vm0, %v16330_v0  ;;  %v18581_v39 = vpop.permute.xlu1 %8554  ;;  %v8047_v3 = vsel %vm211_vm3, %v18412_v2, %v18424_v46  ;;  %v14094_v30 = vld [vmem:[%s20212_s1 + $0x44] sm:$0xf] }
 0x270   : > { %v15310_v16 = vpop.f32.mrf.mxu0  ;;  %v15317_v21 = vpop.f32.mrf.mxu1  ;;  %15618 = vmatprep.subr.bf16.mxu0 %v16330_v0 }
 0x271   : > { %v4659_v10 = vadd.f32 %v4653_v60, %v4596_v13  ;;  %v18588_v9 = vpop.permute.xlu0 %8660  ;;  %10575 = vrot.lane.b32.xlu1 %v18469_v26, %s16337_s11  ;;  %v14082_v60 = vld [vmem:[%s20212_s1 + $0x38] sm:$0xf] }
 0x272   : > { %v4593_v63 = vpop.f32.mrf.mxu0  ;;  %10636 = vrot.lane.b32.xlu0 %v18456_v14, %s16338_s18  ;;  %v4766_v23 = vpop.f32.mrf.mxu1  ;;  %15615 = vmatmul.mubr.msk.bf16.vlgmr.msra.gmra.mxu1 %vm213_vm2, %v14078_v15  ;;  %v8052_v15 = vsel %vm217_vm1, %v8047_v3, 0  ;;  %v14097_v21 = vld [vmem:[%s16430_s30 + $0x18] sm:$0x3] }
 0x273   : > { %15625 = vmatpush3.bf16.msra.mxu1 %v7813_v48  ;;  %15626 = vmatprep.mubr.msk.bf16.mxu1 %vm16331_vm0, %v16330_v0  ;;  %v18600_v20 = vpop.permute.xlu1 %8662  ;;  %v14090_v63 = vld [vmem:[%s20212_s1 + $0x40] sm:$0xf] }
 0x274   : > { %v15311_v4 = vpop.f32.mrf.mxu0  ;;  %v15328_v32 = vpop.f32.mrf.mxu1  ;;  %15636 = vmatprep.subr.bf16.mxu1 %v16330_v0 }
 0x275   : > { %v18607_v8 = vpop.permute.xlu0 %8723  ;;  %10638 = vrot.lane.b32.xlu1 %v18469_v26, %s16338_s18  ;;  %v7989_v4 = vsel %vm217_vm1, %v14097_v21, 0  ;;  %v8173_v32 = vsel %vm388_vm5, %v18447_v38, %v18463_v7 }
 0x276   : > { %v4703_v50 = vpop.f32.mrf.mxu0  ;;  %10699 = vrot.lane.b32.xlu0 %v18456_v14, %s16339_s19  ;;  %15609 = vmatmul.mubr.msk.bf16.vlgmr.msra.gmra.mxu0 %vm213_vm2, %v14074_v29  ;;  %v4769_v31 = vpop.f32.mrf.mxu1  ;;  %v7871_v14 = vsel %vm648_vm9, %v18374_v51, %v18386_v44 }
 0x277   : > { %v4709_v58 = vadd.f32 %v4703_v50, %v4659_v10  ;;  %15619 = vmatpush3.bf16.msra.mxu0 %v7750_v11  ;;  %15620 = vmatprep.mubr.msk.bf16.mxu0 %vm16331_vm0, %v16330_v0  ;;  %v18619_v53 = vpop.permute.xlu1 %8725  ;;  %v7876_v44 = vsel %vm217_vm1, %v7871_v14, 0 }
 0x278   : > { %v15322_v24 = vpop.f32.mrf.mxu0  ;;  %v15329_v37 = vpop.f32.mrf.mxu1  ;;  %15630 = vmatprep.subr.bf16.mxu0 %v16330_v0 }
 0x279   : > { %v4772_v40 = vadd.f32 %v4766_v23, %v4709_v58  ;;  %v18626_v28 = vpop.permute.xlu0 %8786  ;;  %10701 = vrot.lane.b32.xlu1 %v18469_v26, %s16339_s19  ;;  %v8178_v37 = vsel %vm217_vm1, %v8173_v32, 0 }
 0x27a   : > { %v4706_v35 = vpop.f32.mrf.mxu0  ;;  %10811 = vrot.lane.b32.xlu0 %v18299_v45, %s16333_s5  ;;  %v4892_v57 = vpop.f32.mrf.mxu1  ;;  %15627 = vmatmul.mubr.msk.bf16.vlgmr.msra.gmra.mxu1 %vm213_vm2, %v14086_v55  ;;  %v14101_v55 = vld [vmem:[%s20212_s1 + $0x4c] sm:$0xf] }
 0x27b   : > { %15637 = vmatpush3.bf16.msra.mxu1 %v7939_v49  ;;  %15638 = vmatprep.mubr.msk.bf16.mxu1 %vm16331_vm0, %v16330_v0  ;;  %v18638_v51 = vpop.permute.xlu1 %8788  ;;  %v8110_v49 = vsel %vm323_vm4, %v18431_v54, %v18443_v33 }
 0x27c   : > { %v15323_v26 = vpop.f32.mrf.mxu0  ;;  %v15340_v59 = vpop.f32.mrf.mxu1  ;;  %15648 = vmatprep.subr.bf16.mxu1 %v16330_v0  ;;  %v8115_v33 = vsel %vm217_vm1, %v8110_v49, 0 }
 0x27d   : > { %v18645_v47 = vpop.permute.xlu0 %8849  ;;  %10813 = vrot.lane.b32.xlu1 %v18312_v1, %s16333_s5  ;;  %v8299_v59 = vsel %vm518_vm7, %v18493_v42, %v18505_v36 }
 0x27e   : > { %v4829_v56 = vpop.f32.mrf.mxu0  ;;  %10874 = vrot.lane.b32.xlu0 %v18299_v45, %s16332_s4  ;;  %15621 = vmatmul.mubr.msk.bf16.vlgmr.msra.gmra.mxu0 %vm213_vm2, %v14082_v60  ;;  %v4895_v61 = vpop.f32.mrf.mxu1  ;;  %v14098_v60 = vld [vmem:[%s20212_s1 + $0x48] sm:$0xf] }
 0x27f   : > { %v4835_v43 = vadd.f32 %v4829_v56, %v4772_v40  ;;  %15631 = vmatpush3.bf16.msra.mxu0 %v7876_v44  ;;  %15632 = vmatprep.mubr.msk.bf16.mxu0 %vm16331_vm0, %v16330_v0  ;;  %v18657_v2 = vpop.permute.xlu1 %8851 }
 0x280   : > { %v15334_v46 = vpop.f32.mrf.mxu0  ;;  %v15341_v13 = vpop.f32.mrf.mxu1  ;;  %15642 = vmatprep.subr.bf16.mxu0 %v16330_v0 }
 0x281   : > { %v4898_v16 = vadd.f32 %v4892_v57, %v4835_v43  ;;  %v18662_v48 = vpop.permute.xlu0 %8912  ;;  %10876 = vrot.lane.b32.xlu1 %v18312_v1, %s16332_s4  ;;  %v8304_v13 = vsel %vm217_vm1, %v8299_v59, 0 }
 0x282   : > { %v4832_v19 = vpop.f32.mrf.mxu0  ;;  %10937 = vrot.lane.b32.xlu0 %v18299_v45, %s16334_s8  ;;  %v5018_v10 = vpop.f32.mrf.mxu1  ;;  %15639 = vmatmul.mubr.msk.bf16.vlgmr.msra.gmra.mxu1 %vm213_vm2, %v14094_v30  ;;  %v14109_v30 = vld [vmem:[%s20212_s1 + $0x54] sm:$0xf] }
 0x283   : > { %15649 = vmatpush3.bf16.msra.mxu1 %v8052_v15  ;;  %15650 = vmatprep.mubr.msk.bf16.mxu1 %vm16331_vm0, %v16330_v0  ;;  %v18674_v23 = vpop.permute.xlu1 %8914  ;;  %v8236_v15 = vsel %vm453_vm6, %v18474_v25, %v18486_v34 }
 0x284   : > { %v15335_v29 = vpop.f32.mrf.mxu0  ;;  %v15352_v11 = vpop.f32.mrf.mxu1  ;;  %15660 = vmatprep.subr.bf16.mxu1 %v16330_v0  ;;  %v8241_v34 = vsel %vm217_vm1, %v8236_v15, 0 }
 0x285   : > { %v18681_v27 = vpop.permute.xlu0 %8975  ;;  %10939 = vrot.lane.b32.xlu1 %v18312_v1, %s16334_s8 }
 0x286   : > { %v4955_v50 = vpop.f32.mrf.mxu0  ;;  %11000 = vrot.lane.b32.xlu0 %v18299_v45, %s16335_s9  ;;  %15633 = vmatmul.mubr.msk.bf16.vlgmr.msra.gmra.mxu0 %vm213_vm2, %v14090_v63  ;;  %v5021_v31 = vpop.f32.mrf.mxu1  ;;  %v14105_v63 = vld [vmem:[%s20212_s1 + $0x50] sm:$0xf] }
 0x287   : > { %v4961_v58 = vadd.f32 %v4955_v50, %v4898_v16  ;;  %15643 = vmatpush3.bf16.msra.mxu0 %v7989_v4  ;;  %15644 = vmatprep.mubr.msk.bf16.mxu0 %vm16331_vm0, %v16330_v0  ;;  %v18693_v38 = vpop.permute.xlu1 %8977  ;;  %v8425_v4 = vsel %vm648_vm9, %v18531_v5, %v18543_v18  ;;  %v14117_v5 = vld [vmem:[%s20212_s1 + $0x5c] sm:$0xf] }
 0x288   : > { %v15346_v7 = vpop.f32.mrf.mxu0  ;;  %v15353_v24 = vpop.f32.mrf.mxu1  ;;  %15654 = vmatprep.subr.bf16.mxu0 %v16330_v0 }
 0x289   : > { %v5024_v14 = vadd.f32 %v5018_v10, %v4961_v58  ;;  %v18700_v40 = vpop.permute.xlu0 %9038  ;;  %11002 = vrot.lane.b32.xlu1 %v18312_v1, %s16335_s9 }
 0x28a   : > { %v4958_v35 = vpop.f32.mrf.mxu0  ;;  %11063 = vrot.lane.b32.xlu0 %v18299_v45, %s16336_s10  ;;  %v5144_v57 = vpop.f32.mrf.mxu1  ;;  %15651 = vmatmul.mubr.msk.bf16.vlgmr.msra.gmra.mxu1 %vm213_vm2, %v14101_v55  ;;  %v18767_v55 = vld.sshfl [vmem:[%s16430_s30 + $0x20] sm:$0x33 pattern:$0x76325410] }
 0x28b   : > { %15661 = vmatpush3.bf16.msra.mxu1 %v8178_v37  ;;  %15662 = vmatprep.mubr.msk.bf16.mxu1 %vm16331_vm0, %v16330_v0  ;;  %v18712_v54 = vpop.permute.xlu1 %9040  ;;  %v8362_v37 = vsel %vm583_vm8, %v18512_v22, %v18524_v17  ;;  %v18783_v49 = vcombine.high %v18767_v55, %v18767_v55  ;;  %v16340_v35 = vmov 0   ;;  %v14113_v22 = vld [vmem:[%s20212_s1 + $0x58] sm:$0xf] }
 0x28c   : > { %v15347_v44 = vpop.f32.mrf.mxu0  ;;  %v15364_v26 = vpop.f32.mrf.mxu1  ;;  %15672 = vmatprep.subr.bf16.mxu1 %v16330_v0  ;;  %16251 = vset.pattern.permute.xlu0 %v16340_v35  ;;  %v14133_v35 = vld [vmem:[%s16430_s30 + $0x14] sm:$0x3] }
 0x28d   : > { %v18719_v3 = vpop.permute.xlu0 %9150  ;;  %11065 = vrot.lane.b32.xlu1 %v18312_v1, %s16336_s10  ;;  %v8556_v26 = vsel %vm211_vm3, %v18569_v12, %v18581_v39 }
 0x28e   : > { %v5081_v56 = vpop.f32.mrf.mxu0  ;;  %11126 = vrot.lane.b32.xlu0 %v18299_v45, %s16337_s11  ;;  %15645 = vmatmul.mubr.msk.bf16.vlgmr.msra.gmra.mxu0 %vm213_vm2, %v14098_v60  ;;  %v5147_v61 = vpop.f32.mrf.mxu1 }
 0x28f   : > { %v5087_v43 = vadd.f32 %v5081_v56, %v5024_v14  ;;  %15655 = vmatpush3.bf16.msra.mxu0 %v8115_v33  ;;  %15656 = vmatprep.mubr.msk.bf16.mxu0 %vm16331_vm0, %v16330_v0  ;;  %v18731_v42 = vpop.permute.xlu1 %9152 }
 0x290   : > { %v15358_v36 = vpop.f32.mrf.mxu0  ;;  %v15365_v46 = vpop.f32.mrf.mxu1  ;;  %15666 = vmatprep.subr.bf16.mxu0 %v16330_v0 }
 0x291   : > { %v5150_v16 = vadd.f32 %v5144_v57, %v5087_v43  ;;  %v18738_v21 = vpop.permute.xlu0 %9213  ;;  %11128 = vrot.lane.b32.xlu1 %v18312_v1, %s16337_s11  ;;  %v8561_v46 = vsel %vm217_vm1, %v8556_v26, 0 }
 0x292   : > { %v5084_v19 = vpop.f32.mrf.mxu0  ;;  %11189 = vrot.lane.b32.xlu0 %v18299_v45, %s16338_s18  ;;  %v5275_v10 = vpop.f32.mrf.mxu1  ;;  %15663 = vmatmul.mubr.msk.bf16.vlgmr.msra.gmra.mxu1 %vm213_vm2, %v14109_v30  ;;  %v14125_v30 = vld [vmem:[%s20212_s1 + $0x64] sm:$0xf] }
 0x293   : > { %15673 = vmatpush3.bf16.msra.mxu1 %v8304_v13  ;;  %15674 = vmatprep.mubr.msk.bf16.mxu1 %vm16331_vm0, %v16330_v0  ;;  %v18750_v25 = vpop.permute.xlu1 %9215  ;;  %v8488_v13 = vsel %vm713_vm10, %v18550_v62, %v18562_v41 }
 0x294   : > { %v15359_v29 = vpop.f32.mrf.mxu0  ;;  %v15376_v11 = vpop.f32.mrf.mxu1  ;;  %15684 = vmatprep.subr.bf16.mxu1 %v16330_v0  ;;  %v8493_v41 = vsel %vm217_vm1, %v8488_v13, 0 }
 0x295   : > { %v18757_v32 = vpop.permute.xlu0 %9276  ;;  %11191 = vrot.lane.b32.xlu1 %v18312_v1, %s16338_s18  ;;  %v8664_v11 = vsel %vm323_vm4, %v18588_v9, %v18600_v20 }
 0x296   : > { %v5207_v50 = vpop.f32.mrf.mxu0  ;;  %11252 = vrot.lane.b32.xlu0 %v18299_v45, %s16339_s19  ;;  %15657 = vmatmul.mubr.msk.bf16.vlgmr.msra.gmra.mxu0 %vm213_vm2, %v14105_v63  ;;  %v5278_v31 = vpop.f32.mrf.mxu1  ;;  %v8430_v45 = vsel %vm217_vm1, %v8425_v4, 0  ;;  %v14121_v63 = vld [vmem:[%s20212_s1 + $0x60] sm:$0xf] }
 0x297   : > { %v18764_v58 = vadd.f32 %v5207_v50, %v5150_v16  ;;  %15667 = vmatpush3.bf16.msra.mxu0 %v8241_v34  ;;  %15668 = vmatprep.mubr.msk.bf16.mxu0 %vm16331_vm0, %v16330_v0  ;;  %v18774_v18 = vpop.permute.xlu1 %9278 }
 0x298   : > { %v15370_v7 = vpop.f32.mrf.mxu0  ;;  %v15377_v24 = vpop.f32.mrf.mxu1  ;;  %15678 = vmatprep.subr.bf16.mxu0 %v16330_v0 }
 0x299   : > { %v18785_v14 = vpop.permute.xlu0 %9339  ;;  %11254 = vrot.lane.b32.xlu1 %v18312_v1, %s16339_s19  ;;  %v8367_v1 = vsel %vm217_vm1, %v8362_v37, 0  ;;  %v14135_v7 = vld [vmem:[%s20212_s1 + $0x4] sm:$0xf] }
 0x29a   : > { %v5210_v57 = vpop.f32.mrf.mxu0  ;;  %11365 = vrot.lane.b32.xlu0 %v18767_v55, %s16333_s5  ;;  %v5383_v60 = vpop.f32.mrf.mxu1  ;;  %15675 = vmatmul.mubr.msk.bf16.vlgmr.msra.gmra.mxu1 %vm213_vm2, %v14117_v5 }
 0x29b   : > { %15685 = vmatpush3.bf16.msra.mxu1 %v8430_v45  ;;  %15686 = vmatprep.mubr.msk.bf16.mxu1 %vm16331_vm0, %v16330_v0  ;;  %v18797_v17 = vpop.permute.xlu1 %9341  ;;  %v8669_v45 = vsel %vm217_vm1, %v8664_v11, 0 }
 0x29c   : > { %v15371_v33 = vpop.f32.mrf.mxu0  ;;  %v15388_v44 = vpop.f32.mrf.mxu1  ;;  %15696 = vmatprep.subr.bf16.mxu1 %v16330_v0 }
 0x29d   : > { %v18804_v59 = vpop.permute.xlu0 %9402  ;;  %11367 = vrot.lane.b32.xlu1 %v18783_v49, %s16333_s5 }
 0x29e   : > { %v5321_v56 = vpop.f32.mrf.mxu0  ;;  %11428 = vrot.lane.b32.xlu0 %v18767_v55, %s16332_s4  ;;  %15669 = vmatmul.mubr.msk.bf16.vlgmr.msra.gmra.mxu0 %vm213_vm2, %v14113_v22  ;;  %v5386_v61 = vpop.f32.mrf.mxu1 }
 0x29f   : > { %v5322_v43 = vadd.f32 %v5321_v56, %v5275_v10  ;;  %15679 = vmatpush3.bf16.msra.mxu0 %v8367_v1  ;;  %15680 = vmatprep.mubr.msk.bf16.mxu0 %vm16331_vm0, %v16330_v0  ;;  %v18816_v12 = vpop.permute.xlu1 %9404  ;;  %v14129_v1 = vld [vmem:[%s20212_s1 + $0x68] sm:$0xf]  ;;  %v8607_v56 = vsel %vm217_vm1, %v14133_v35, 0  ;;  %v8790_v61 = vsel %vm453_vm6, %v18626_v28, %v18638_v51 }
 0x2a0   : > { %v15382_v39 = vpop.f32.mrf.mxu0  ;;  %v15389_v36 = vpop.f32.mrf.mxu1  ;;  %15690 = vmatprep.subr.bf16.mxu0 %v16330_v0 }
 0x2a1   : > { %v5389_v15 = vadd.f32 %v5383_v60, %v5322_v43  ;;  %v18823_v16 = vpop.permute.xlu0 %9465  ;;  %11430 = vrot.lane.b32.xlu1 %v18783_v49, %s16332_s4 }
 0x2a2   : > { %v5324_v19 = vpop.f32.mrf.mxu0  ;;  %11491 = vrot.lane.b32.xlu0 %v18767_v55, %s16334_s8  ;;  %v5509_v10 = vpop.f32.mrf.mxu1  ;;  %15687 = vmatmul.mubr.msk.bf16.vlgmr.msra.gmra.mxu1 %vm213_vm2, %v14125_v30 }
 0x2a3   : > { %15697 = vmatpush3.bf16.msra.mxu1 %v8561_v46  ;;  %15698 = vmatprep.mubr.msk.bf16.mxu1 %vm16331_vm0, %v16330_v0  ;;  %v18835_v62 = vpop.permute.xlu1 %9467  ;;  %v14140_v46 = vld [vmem:[%s20212_s1 + $0x8] sm:$0xf]  ;;  %v8727_v19 = vsel %vm388_vm5, %v18607_v8, %v18619_v53 }
 0x2a4   : > { %v15383_v34 = vpop.f32.mrf.mxu0  ;;  %v15400_v29 = vpop.f32.mrf.mxu1  ;;  %15708 = vmatprep.subr.bf16.mxu1 %v16330_v0  ;;  %v8732_v53 = vsel %vm217_vm1, %v8727_v19, 0 }
 0x2a5   : > { %v18842_v4 = vpop.permute.xlu0 %9528  ;;  %11493 = vrot.lane.b32.xlu1 %v18783_v49, %s16334_s8  ;;  %v8540_v29 = vld [vmem:[%s20212_s1] sm:$0xf] }
 0x2a6   : > { %v5446_v50 = vpop.f32.mrf.mxu0  ;;  %11554 = vrot.lane.b32.xlu0 %v18767_v55, %s16335_s9  ;;  %15681 = vmatmul.mubr.msk.bf16.vlgmr.msra.gmra.mxu0 %vm213_vm2, %v14121_v63  ;;  %v5512_v31 = vpop.f32.mrf.mxu1 }
 0x2a7   : > { %v5452_v5 = vadd.f32 %v5446_v50, %v5389_v15  ;;  %15691 = vmatpush3.bf16.msra.mxu0 %v8493_v41  ;;  %15692 = vmatprep.mubr.msk.bf16.mxu0 %vm16331_vm0, %v16330_v0  ;;  %v18854_v9 = vpop.permute.xlu1 %9530  ;;  %v8795_v15 = vsel %vm217_vm1, %v8790_v61, 0  ;;  %v8916_v31 = vsel %vm583_vm8, %v18662_v48, %v18674_v23  ;;  %v14148_v48 = vld [vmem:[%s20212_s1 + $0x10] sm:$0xf] }
 0x2a8   : > { %v15394_v20 = vpop.f32.mrf.mxu0  ;;  %v15401_v24 = vpop.f32.mrf.mxu1  ;;  %15702 = vmatprep.subr.bf16.mxu0 %v16330_v0 }
 0x2a9   : > { %v5515_v37 = vadd.f32 %v5509_v10, %v5452_v5  ;;  %v18859_v57 = vpop.permute.xlu0 %9591  ;;  %11556 = vrot.lane.b32.xlu1 %v18783_v49, %s16335_s9 }
 0x2aa   : > { %v5449_v60 = vpop.f32.mrf.mxu0  ;;  %11617 = vrot.lane.b32.xlu0 %v18767_v55, %s16336_s10  ;;  %v5635_v22 = vpop.f32.mrf.mxu1  ;;  %15699 = vmatmul.mubr.msk.bf16.vlgmr.msra.gmra.mxu1 %vm213_vm2, %v14135_v7 }
 0x2ab   : > { %15709 = vmatpush3.bf16.msra.mxu1 %v8669_v45  ;;  %15710 = vmatprep.mubr.msk.bf16.mxu1 %vm16331_vm0, %v16330_v0  ;;  %v18871_v33 = vpop.permute.xlu1 %9593  ;;  %v18924_v45 = vld.sshfl [vmem:[%s16430_s30 + $0x1c] sm:$0x33 pattern:$0x76325410]  ;;  %v8921_v60 = vsel %vm217_vm1, %v8916_v31, 0 }
 0x2ac   : > { %v15395_v44 = vpop.f32.mrf.mxu0  ;;  %v15412_v26 = vpop.f32.mrf.mxu1  ;;  %15720 = vmatprep.subr.bf16.mxu1 %v16330_v0 }
 0x2ad   : > { %v18878_v43 = vpop.permute.xlu0 %9704  ;;  %11619 = vrot.lane.b32.xlu1 %v18783_v49, %s16336_s10 }
 0x2ae   : > { %v5572_v30 = vpop.f32.mrf.mxu0  ;;  %11680 = vrot.lane.b32.xlu0 %v18767_v55, %s16337_s11  ;;  %15693 = vmatmul.mubr.msk.bf16.vlgmr.msra.gmra.mxu0 %vm213_vm2, %v14129_v1  ;;  %v5638_v39 = vpop.f32.mrf.mxu1  ;;  %v18940_v1 = vcombine.high %v18924_v45, %v18924_v45 }
 0x2af   : > { %v5578_v36 = vadd.f32 %v5572_v30, %v5515_v37  ;;  %15703 = vmatpush3.bf16.msra.mxu0 %v8607_v56  ;;  %15704 = vmatprep.mubr.msk.bf16.mxu0 %vm16331_vm0, %v16330_v0  ;;  %v18890_v28 = vpop.permute.xlu1 %9706 }
 0x2b0   : > { %v15406_v51 = vpop.f32.mrf.mxu0  ;;  %v15413_v13 = vpop.f32.mrf.mxu1  ;;  %15714 = vmatprep.subr.bf16.mxu0 %v16330_v0 }
 0x2b1   : > { %v5641_v10 = vadd.f32 %v5635_v22, %v5578_v36  ;;  %v18897_v63 = vpop.permute.xlu0 %9767  ;;  %11682 = vrot.lane.b32.xlu1 %v18783_v49, %s16337_s11  ;;  %v8853_v22 = vsel %vm518_vm7, %v18645_v47, %v18657_v2  ;;  %v14144_v47 = vld [vmem:[%s20212_s1 + $0xc] sm:$0xf] }
 0x2b2   : > { %v5575_v41 = vpop.f32.mrf.mxu0  ;;  %11743 = vrot.lane.b32.xlu0 %v18767_v55, %s16338_s18  ;;  %v5761_v34 = vpop.f32.mrf.mxu1  ;;  %15711 = vmatmul.mubr.msk.bf16.vlgmr.msra.gmra.mxu1 %vm213_vm2, %v14140_v46  ;;  %v8858_v30 = vsel %vm217_vm1, %v8853_v22, 0  ;;  %v9042_v46 = vsel %vm713_vm10, %v18700_v40, %v18712_v54 }
 0x2b3   : > { %15721 = vmatpush3.bf16.msra.mxu1 %v8795_v15  ;;  %15722 = vmatprep.mubr.msk.bf16.mxu1 %vm16331_vm0, %v16330_v0  ;;  %v18909_v8 = vpop.permute.xlu1 %9769 }
 0x2b4   : > { %v15407_v11 = vpop.f32.mrf.mxu0  ;;  %v15424_v50 = vpop.f32.mrf.mxu1  ;;  %15732 = vmatprep.subr.bf16.mxu1 %v16330_v0 }
 0x2b5   : > { %v18916_v5 = vpop.permute.xlu0 %9830  ;;  %11745 = vrot.lane.b32.xlu1 %v18783_v49, %s16338_s18 }
 0x2b6   : > { %v5698_v7 = vpop.f32.mrf.mxu0  ;;  %11806 = vrot.lane.b32.xlu0 %v18767_v55, %s16339_s19  ;;  %15705 = vmatmul.mubr.msk.bf16.vlgmr.msra.gmra.mxu0 %vm213_vm2, %v8540_v29  ;;  %v5764_v20 = vpop.f32.mrf.mxu1  ;;  %v8979_v29 = vsel %vm648_vm9, %v18681_v27, %v18693_v38 }
 0x2b7   : > { %v5704_v24 = vadd.f32 %v5698_v7, %v5641_v10  ;;  %15715 = vmatpush3.bf16.msra.mxu0 %v8732_v53  ;;  %15716 = vmatprep.mubr.msk.bf16.mxu0 %vm16331_vm0, %v16330_v0  ;;  %v18931_v23 = vpop.permute.xlu1 %9832  ;;  %v14156_v10 = vld [vmem:[%s20212_s1 + $0x18] sm:$0xf]  ;;  %v14152_v7 = vld [vmem:[%s20212_s1 + $0x14] sm:$0xf]  ;;  %v8984_v38 = vsel %vm217_vm1, %v8979_v29, 0 }
 0x2b8   : > { %v15418_v37 = vpop.f32.mrf.mxu0  ;;  %v15425_v35 = vpop.f32.mrf.mxu1  ;;  %15726 = vmatprep.subr.bf16.mxu0 %v16330_v0 }
 0x2b9   : > { %v5767_v44 = vadd.f32 %v5761_v34, %v5704_v24  ;;  %v18942_v26 = vpop.permute.xlu0 %9893  ;;  %11808 = vrot.lane.b32.xlu1 %v18783_v49, %s16339_s19  ;;  %v9047_v34 = vsel %vm217_vm1, %v9042_v46, 0 }
 0x2ba   : > { %v5701_v56 = vpop.f32.mrf.mxu0  ;;  %11874 = vrot.lane.b32.xlu0 %v18924_v45, %s16333_s5  ;;  %v5873_v61 = vpop.f32.mrf.mxu1  ;;  %15723 = vmatmul.mubr.msk.bf16.vlgmr.msra.gmra.mxu1 %vm213_vm2, %v14148_v48  ;;  %v9154_v48 = vsel %vm211_vm3, %v18719_v3, %v18731_v42 }
 0x2bb   : > { %15733 = vmatpush3.bf16.msra.mxu1 %v8921_v60  ;;  %15734 = vmatprep.mubr.msk.bf16.mxu1 %vm16331_vm0, %v16330_v0  ;;  %v18954_v2 = vpop.permute.xlu1 %9895 }
 0x2bc   : > { %v15419_v39 = vpop.f32.mrf.mxu0  ;;  %v15436_v36 = vpop.f32.mrf.mxu1  ;;  %15744 = vmatprep.subr.bf16.mxu1 %v16330_v0 }
 0x2bd   : > { %v18961_v51 = vpop.permute.xlu0 %9956  ;;  %11876 = vrot.lane.b32.xlu1 %v18940_v1, %s16333_s5 }
 0x2be   : > { %v5810_v13 = vpop.f32.mrf.mxu0  ;;  %11982 = vrot.lane.b32.xlu0 %v18924_v45, %s16332_s4  ;;  %15717 = vmatmul.mubr.msk.bf16.vlgmr.msra.gmra.mxu0 %vm213_vm2, %v14144_v47  ;;  %v5876_v15 = vpop.f32.mrf.mxu1 }
 0x2bf   : > { %v5816_v19 = vadd.f32 %v5810_v13, %v5767_v44  ;;  %15727 = vmatpush3.bf16.msra.mxu0 %v8858_v30  ;;  %15728 = vmatprep.mubr.msk.bf16.mxu0 %vm16331_vm0, %v16330_v0  ;;  %v18973_v40 = vpop.permute.xlu1 %9958  ;;  %v14164_v44 = vld [vmem:[%s20212_s1 + $0x20] sm:$0xf]  ;;  %v14167_v30 = vld [vmem:[%s16430_s30 + $0x18] sm:$0x3]  ;;  %v14160_v13 = vld [vmem:[%s20212_s1 + $0x1c] sm:$0xf] }
 0x2c0   : > { %v15430_v54 = vpop.f32.mrf.mxu0  ;;  %v15437_v41 = vpop.f32.mrf.mxu1  ;;  %15738 = vmatprep.subr.bf16.mxu0 %v16330_v0 }
 0x2c1   : > { %v5879_v53 = vadd.f32 %v5873_v61, %v5816_v19  ;;  %v18980_v11 = vpop.permute.xlu0 %10019  ;;  %11984 = vrot.lane.b32.xlu1 %v18940_v1, %s16332_s4  ;;  %v9159_v61 = vsel %vm217_vm1, %v9154_v48, 0  ;;  %v9096_v54 = vsel %vm217_vm1, %v14167_v30, 0  ;;  %v9280_v41 = vsel %vm388_vm5, %v18757_v32, %v18774_v18 }
 0x2c2   : > { %v5813_v50 = vpop.f32.mrf.mxu0  ;;  %12045 = vrot.lane.b32.xlu0 %v18924_v45, %s16334_s8  ;;  %v5999_v31 = vpop.f32.mrf.mxu1  ;;  %15735 = vmatmul.mubr.msk.bf16.vlgmr.msra.gmra.mxu1 %vm213_vm2, %v14156_v10 }
 0x2c3   : > { %15745 = vmatpush3.bf16.msra.mxu1 %v9047_v34  ;;  %15746 = vmatprep.mubr.msk.bf16.mxu1 %vm16331_vm0, %v16330_v0  ;;  %v18992_v27 = vpop.permute.xlu1 %10021 }
 0x2c4   : > { %v15431_v20 = vpop.f32.mrf.mxu0  ;;  %v15448_v24 = vpop.f32.mrf.mxu1  ;;  %15756 = vmatprep.subr.bf16.mxu1 %v16330_v0 }
 0x2c5   : > { %v18999_v37 = vpop.permute.xlu0 %10082  ;;  %12047 = vrot.lane.b32.xlu1 %v18940_v1, %s16334_s8  ;;  %v9217_v20 = vsel %vm323_vm4, %v18738_v21, %v18750_v25 }
 0x2c6   : > { %v5936_v35 = vpop.f32.mrf.mxu0  ;;  %12108 = vrot.lane.b32.xlu0 %v18924_v45, %s16335_s9  ;;  %15729 = vmatmul.mubr.msk.bf16.vlgmr.msra.gmra.mxu0 %vm213_vm2, %v14152_v7  ;;  %v6002_v60 = vpop.f32.mrf.mxu1  ;;  %v9222_v25 = vsel %vm217_vm1, %v9217_v20, 0 }
 0x2c7   : > { %v5942_v22 = vadd.f32 %v5936_v35, %v5879_v53  ;;  %15739 = vmatpush3.bf16.msra.mxu0 %v8984_v38  ;;  %15740 = vmatprep.mubr.msk.bf16.mxu0 %vm16331_vm0, %v16330_v0  ;;  %v19011_v3 = vpop.permute.xlu1 %10084  ;;  %v9285_v38 = vsel %vm217_vm1, %v9280_v41, 0 }
 0x2c8   : > { %v15442_v42 = vpop.f32.mrf.mxu0  ;;  %v15449_v56 = vpop.f32.mrf.mxu1  ;;  %15750 = vmatprep.subr.bf16.mxu0 %v16330_v0 }
 0x2c9   : > { %v6005_v47 = vadd.f32 %v5999_v31, %v5942_v22  ;;  %v19016_v39 = vpop.permute.xlu0 %10145  ;;  %12110 = vrot.lane.b32.xlu1 %v18940_v1, %s16335_s9  ;;  %v14171_v31 = vld [vmem:[%s20212_s1 + $0x28] sm:$0xf]  ;;  %v14168_v22 = vld [vmem:[%s20212_s1 + $0x24] sm:$0xf]  ;;  %v9406_v56 = vsel %vm518_vm7, %v18804_v59, %v18816_v12 }
 0x2ca   : > { %v5939_v36 = vpop.f32.mrf.mxu0  ;;  %12171 = vrot.lane.b32.xlu0 %v18924_v45, %s16336_s10  ;;  %v6125_v46 = vpop.f32.mrf.mxu1  ;;  %15747 = vmatmul.mubr.msk.bf16.vlgmr.msra.gmra.mxu1 %vm213_vm2, %v14164_v44 }
 0x2cb   : > { %15757 = vmatpush3.bf16.msra.mxu1 %v9159_v61  ;;  %15758 = vmatprep.mubr.msk.bf16.mxu1 %vm16331_vm0, %v16330_v0  ;;  %v19028_v15 = vpop.permute.xlu1 %10147 }
 0x2cc   : > { %v15443_v19 = vpop.f32.mrf.mxu0  ;;  %v15460_v10 = vpop.f32.mrf.mxu1  ;;  %15768 = vmatprep.subr.bf16.mxu1 %v16330_v0 }
 0x2cd   : > { %v19035_v34 = vpop.permute.xlu0 %10213  ;;  %12173 = vrot.lane.b32.xlu1 %v18940_v1, %s16336_s10  ;;  %v9411_v19 = vsel %vm217_vm1, %v9406_v56, 0 }
 0x2ce   : > { %v6062_v29 = vpop.f32.mrf.mxu0  ;;  %12234 = vrot.lane.b32.xlu0 %v18924_v45, %s16337_s11  ;;  %15741 = vmatmul.mubr.msk.bf16.vlgmr.msra.gmra.mxu0 %vm213_vm2, %v14160_v13  ;;  %v6128_v53 = vpop.f32.mrf.mxu1 }
 0x2cf   : > { %v6068_v50 = vadd.f32 %v6062_v29, %v6005_v47  ;;  %15751 = vmatpush3.bf16.msra.mxu0 %v9096_v54  ;;  %15752 = vmatprep.mubr.msk.bf16.mxu0 %vm16331_vm0, %v16330_v0  ;;  %v19047_v32 = vpop.permute.xlu1 %10215  ;;  %v14175_v53 = vld [vmem:[%s20212_s1 + $0x2c] sm:$0xf] }
 0x2d0   : > { %v15454_v18 = vpop.f32.mrf.mxu0  ;;  %v15461_v7 = vpop.f32.mrf.mxu1  ;;  %15762 = vmatprep.subr.bf16.mxu0 %v16330_v0 }
 0x2d1   : > { %v6131_v24 = vadd.f32 %v6125_v46, %v6068_v50  ;;  %v19054_v48 = vpop.permute.xlu0 %10321  ;;  %12236 = vrot.lane.b32.xlu1 %v18940_v1, %s16337_s11  ;;  %v14179_v46 = vld [vmem:[%s20212_s1 + $0x30] sm:$0xf] }
 0x2d2   : > { %v6065_v35 = vpop.f32.mrf.mxu0  ;;  %12297 = vrot.lane.b32.xlu0 %v18924_v45, %s16338_s18  ;;  %v6251_v60 = vpop.f32.mrf.mxu1  ;;  %15759 = vmatmul.mubr.msk.bf16.vlgmr.msra.gmra.mxu1 %vm213_vm2, %v14171_v31  ;;  %v9532_v31 = vsel %vm648_vm9, %v18842_v4, %v18854_v9 }
 0x2d3   : > { %15769 = vmatpush3.bf16.msra.mxu1 %v9285_v38  ;;  %15770 = vmatprep.mubr.msk.bf16.mxu1 %vm16331_vm0, %v16330_v0  ;;  %v19066_v21 = vpop.permute.xlu1 %10323  ;;  %v9537_v35 = vsel %vm217_vm1, %v9532_v31, 0 }
 0x2d4   : > { %v15455_v44 = vpop.f32.mrf.mxu0  ;;  %v15472_v42 = vpop.f32.mrf.mxu1  ;;  %15780 = vmatprep.subr.bf16.mxu1 %v16330_v0 }
 0x2d5   : > { %v19073_v61 = vpop.permute.xlu0 %10384  ;;  %12299 = vrot.lane.b32.xlu1 %v18940_v1, %s16338_s18 }
 0x2d6   : > { %v6188_v47 = vpop.f32.mrf.mxu0  ;;  %15753 = vmatmul.mubr.msk.bf16.vlgmr.msra.gmra.mxu0 %vm213_vm2, %v14168_v22  ;;  %12360 = vrot.lane.b32.xlu0 %v18924_v45, %s16339_s19  ;;  %v6254_v30 = vpop.f32.mrf.mxu1  ;;  %v9343_v45 = vsel %vm453_vm6, %v18785_v14, %v18797_v17 }
 0x2d7   : > { %v6194_v36 = vadd.f32 %v6188_v47, %v6131_v24  ;;  %15763 = vmatpush3.bf16.msra.mxu0 %v9222_v25  ;;  %15764 = vmatprep.mubr.msk.bf16.mxu0 %vm16331_vm0, %v16330_v0  ;;  %v19085_v59 = vpop.permute.xlu1 %10386  ;;  %v9348_v17 = vsel %vm217_vm1, %v9343_v45, 0  ;;  %v14187_v24 = vld [vmem:[%s20212_s1 + $0x38] sm:$0xf]  ;;  %v14195_v45 = vld [vmem:[%s20212_s1 + $0x40] sm:$0xf] }
 0x2d8   : > { %v15466_v12 = vpop.f32.mrf.mxu0  ;;  %v15473_v13 = vpop.f32.mrf.mxu1  ;;  %15774 = vmatprep.subr.bf16.mxu0 %v16330_v0 }
 0x2d9   : > { %v6257_v10 = vadd.f32 %v6251_v60, %v6194_v36  ;;  %v19092_v54 = vpop.permute.xlu0 %10447  ;;  %12362 = vrot.lane.b32.xlu1 %v18940_v1, %s16339_s19  ;;  %v9469_v60 = vsel %vm583_vm8, %v18823_v16, %v18835_v62  ;;  %v14183_v16 = vld [vmem:[%s20212_s1 + $0x34] sm:$0xf] }
 0x2da   : > { %v6191_v41 = vpop.f32.mrf.mxu0  ;;  %12472 = vrot.lane.b32.xlu0 %v18767_v55, %s16333_s5  ;;  %v6364_v29 = vpop.f32.mrf.mxu1  ;;  %15771 = vmatmul.mubr.msk.bf16.vlgmr.msra.gmra.mxu1 %vm213_vm2, %v14179_v46  ;;  %v9474_v62 = vsel %vm217_vm1, %v9469_v60, 0  ;;  %v14202_v46 = vld [vmem:[%s16430_s30 + $0x1c] sm:$0x3] }
 0x2db   : > { %15781 = vmatpush3.bf16.msra.mxu1 %v9411_v19  ;;  %15782 = vmatprep.mubr.msk.bf16.mxu1 %vm16331_vm0, %v16330_v0  ;;  %v19104_v14 = vpop.permute.xlu1 %10449 }
 0x2dc   : > { %v15467_v1 = vpop.f32.mrf.mxu0  ;;  %v15484_v50 = vpop.f32.mrf.mxu1  ;;  %15792 = vmatprep.subr.bf16.mxu1 %v16330_v0 }
 0x2dd   : > { %v19111_v18 = vpop.permute.xlu0 %10510  ;;  %12474 = vrot.lane.b32.xlu1 %v18783_v49, %s16333_s5 }
 0x2de   : > { %v6314_v7 = vpop.f32.mrf.mxu0  ;;  %12535 = vrot.lane.b32.xlu0 %v18767_v55, %s16332_s4  ;;  %15765 = vmatmul.mubr.msk.bf16.vlgmr.msra.gmra.mxu0 %vm213_vm2, %v14175_v53  ;;  %v6367_v38 = vpop.f32.mrf.mxu1  ;;  %v9650_v53 = vsel %vm217_vm1, %v14202_v46, 0 }
 0x2df   : > { %v6320_v20 = vadd.f32 %v6314_v7, %v6257_v10  ;;  %15775 = vmatpush3.bf16.msra.mxu0 %v9348_v17  ;;  %15776 = vmatprep.mubr.msk.bf16.mxu0 %vm16331_vm0, %v16330_v0  ;;  %v19130_v44 = vpop.permute.xlu1 %10512  ;;  %v9595_v17 = vsel %vm713_vm10, %v18859_v57, %v18871_v33  ;;  %v14191_v38 = vld [vmem:[%s20212_s1 + $0x3c] sm:$0xf] }
 0x2e0   : > { %v15478_v4 = vpop.f32.mrf.mxu0  ;;  %v15485_v9 = vpop.f32.mrf.mxu1  ;;  %15786 = vmatprep.subr.bf16.mxu0 %v16330_v0  ;;  %v9600_v57 = vsel %vm217_vm1, %v9595_v17, 0 }
 0x2e1   : > { %v6370_v22 = vadd.f32 %v6364_v29, %v6320_v20  ;;  %v19128_v25 = vpop.permute.xlu0 %10573  ;;  %12537 = vrot.lane.b32.xlu1 %v18783_v49, %s16332_s4 }
 0x2e2   : > { %v6317_v42 = vpop.f32.mrf.mxu0  ;;  %12598 = vrot.lane.b32.xlu0 %v18767_v55, %s16334_s8  ;;  %v6490_v56 = vpop.f32.mrf.mxu1  ;;  %15783 = vmatmul.mubr.msk.bf16.vlgmr.msra.gmra.mxu1 %vm213_vm2, %v14187_v24  ;;  %v9771_v24 = vsel %vm323_vm4, %v18897_v63, %v18909_v8  ;;  %v14203_v63 = vld [vmem:[%s20212_s1 + $0x48] sm:$0xf] }
 0x2e3   : > { %15793 = vmatpush3.bf16.msra.mxu1 %v9537_v35  ;;  %15794 = vmatprep.mubr.msk.bf16.mxu1 %vm16331_vm0, %v16330_v0  ;;  %v19157_v10 = vpop.permute.xlu1 %10575 }
 0x2e4   : > { %v15479_v47 = vpop.f32.mrf.mxu0  ;;  %v15496_v30 = vpop.f32.mrf.mxu1  ;;  %15804 = vmatprep.subr.bf16.mxu1 %v16330_v0 }
 0x2e5   : > { %v19144_v36 = vpop.permute.xlu0 %10636  ;;  %12600 = vrot.lane.b32.xlu1 %v18783_v49, %s16334_s8 }
 0x2e6   : > { %v6427_v12 = vpop.f32.mrf.mxu0  ;;  %12661 = vrot.lane.b32.xlu0 %v18767_v55, %s16335_s9  ;;  %15777 = vmatmul.mubr.msk.bf16.vlgmr.msra.gmra.mxu0 %vm213_vm2, %v14183_v16  ;;  %v6493_v13 = vpop.f32.mrf.mxu1  ;;  %v9708_v16 = vsel %vm211_vm3, %v18878_v43, %v18890_v28 }
 0x2e7   : > { %v6433_v19 = vadd.f32 %v6427_v12, %v6370_v22  ;;  %15787 = vmatpush3.bf16.msra.mxu0 %v9474_v62  ;;  %15788 = vmatprep.mubr.msk.bf16.mxu0 %vm16331_vm0, %v16330_v0  ;;  %v19183_v9 = vpop.permute.xlu1 %10638  ;;  %v14199_v13 = vld [vmem:[%s20212_s1 + $0x44] sm:$0xf]  ;;  %v9713_v43 = vsel %vm217_vm1, %v9708_v16, 0 }
 0x2e8   : > { %v15490_v41 = vpop.f32.mrf.mxu0  ;;  %v15497_v29 = vpop.f32.mrf.mxu1  ;;  %15798 = vmatprep.subr.bf16.mxu0 %v16330_v0 }
 0x2e9   : > { %v6496_v1 = vadd.f32 %v6490_v56, %v6433_v19  ;;  %v19164_v50 = vpop.permute.xlu0 %10699  ;;  %12663 = vrot.lane.b32.xlu1 %v18783_v49, %s16335_s9  ;;  %v9776_v56 = vsel %vm217_vm1, %v9771_v24, 0 }
 0x2ea   : > { %v6430_v31 = vpop.f32.mrf.mxu0  ;;  %12724 = vrot.lane.b32.xlu0 %v18767_v55, %s16336_s10  ;;  %v6616_v7 = vpop.f32.mrf.mxu1  ;;  %15795 = vmatmul.mubr.msk.bf16.vlgmr.msra.gmra.mxu1 %vm213_vm2, %v14195_v45  ;;  %v9897_v45 = vsel %vm453_vm6, %v18942_v26, %v18954_v2  ;;  %v14210_v26 = vld [vmem:[%s20212_s1 + $0x50] sm:$0xf] }
 0x2eb   : > { %15805 = vmatpush3.bf16.msra.mxu1 %v9650_v53  ;;  %15806 = vmatprep.mubr.msk.bf16.mxu1 %vm16331_vm0, %v16330_v0  ;;  %v19202_v30 = vpop.permute.xlu1 %10701 }
 0x2ec   : > { %v15491_v33 = vpop.f32.mrf.mxu0  ;;  %v15508_v20 = vpop.f32.mrf.mxu1  ;;  %15816 = vmatprep.subr.bf16.mxu1 %v16330_v0 }
 0x2ed   : > { %v19181_v4 = vpop.permute.xlu0 %10811  ;;  %12726 = vrot.lane.b32.xlu1 %v18783_v49, %s16336_s10 }
 0x2ee   : > { %v6553_v35 = vpop.f32.mrf.mxu0  ;;  %12787 = vrot.lane.b32.xlu0 %v18767_v55, %s16337_s11  ;;  %15789 = vmatmul.mubr.msk.bf16.vlgmr.msra.gmra.mxu0 %vm213_vm2, %v14191_v38  ;;  %v6619_v60 = vpop.f32.mrf.mxu1  ;;  %v9834_v38 = vsel %vm388_vm5, %v18916_v5, %v18931_v23  ;;  %v14206_v5 = vld [vmem:[%s20212_s1 + $0x4c] sm:$0xf] }
 0x2ef   : > { %v6559_v22 = vadd.f32 %v6553_v35, %v6496_v1  ;;  %15799 = vmatpush3.bf16.msra.mxu0 %v9600_v57  ;;  %15800 = vmatprep.mubr.msk.bf16.mxu0 %vm16331_vm0, %v16330_v0  ;;  %v19227_v1 = vld.sshfl [vmem:[%s16430_s30 + $0x24] sm:$0x33 pattern:$0x76325410]  ;;  %v19234_v2 = vpop.permute.xlu1 %10813  ;;  %v9839_v23 = vsel %vm217_vm1, %v9834_v38, 0 }
 0x2f0   : > { %v15502_v8 = vpop.f32.mrf.mxu0  ;;  %v15509_v42 = vpop.f32.mrf.mxu1  ;;  %15810 = vmatprep.subr.bf16.mxu0 %v16330_v0  ;;  %v19243_v57 = vcombine.high %v19227_v1, %v19227_v1  ;;  %v14226_v38 = vld [vmem:[%s20212_s1 + $0x60] sm:$0xf] }
 0x2f1   : > { %v6622_v62 = vadd.f32 %v6616_v7, %v6559_v22  ;;  %v19200_v47 = vpop.permute.xlu0 %10874  ;;  %12789 = vrot.lane.b32.xlu1 %v18783_v49, %s16337_s11 }
 0x2f2   : > { %v6556_v46 = vpop.f32.mrf.mxu0  ;;  %12850 = vrot.lane.b32.xlu0 %v18767_v55, %s16338_s18  ;;  %v6742_v12 = vpop.f32.mrf.mxu1  ;;  %15807 = vmatmul.mubr.msk.bf16.vlgmr.msra.gmra.mxu1 %vm213_vm2, %v14203_v63 }
 0x2f3   : > { %15817 = vmatpush3.bf16.msra.mxu1 %v9776_v56  ;;  %15818 = vmatprep.mubr.msk.bf16.mxu1 %vm16331_vm0, %v16330_v0  ;;  %v19264_v8 = vpop.permute.xlu1 %10876 }
 0x2f4   : > { %v15503_v28 = vpop.f32.mrf.mxu0  ;;  %v15520_v19 = vpop.f32.mrf.mxu1  ;;  %15828 = vmatprep.subr.bf16.mxu1 %v16330_v0 }
 0x2f5   : > { %v19219_v41 = vpop.permute.xlu0 %10937  ;;  %12852 = vrot.lane.b32.xlu1 %v18783_v49, %s16338_s18 }
 0x2f6   : > { %v6679_v29 = vpop.f32.mrf.mxu0  ;;  %12913 = vrot.lane.b32.xlu0 %v18767_v55, %s16339_s19  ;;  %15801 = vmatmul.mubr.msk.bf16.vlgmr.msra.gmra.mxu0 %vm213_vm2, %v14199_v13  ;;  %v6745_v53 = vpop.f32.mrf.mxu1  ;;  %v9902_v55 = vsel %vm217_vm1, %v9897_v45, 0  ;;  %v9960_v13 = vsel %vm518_vm7, %v18961_v51, %v18973_v40  ;;  %v14214_v45 = vld [vmem:[%s20212_s1 + $0x54] sm:$0xf] }
 0x2f7   : > { %v6685_v17 = vadd.f32 %v6679_v29, %v6622_v62  ;;  %15811 = vmatpush3.bf16.msra.mxu0 %v9713_v43  ;;  %15812 = vmatprep.mubr.msk.bf16.mxu0 %vm16331_vm0, %v16330_v0  ;;  %v19295_v51 = vpop.permute.xlu1 %10939  ;;  %v9965_v40 = vsel %vm217_vm1, %v9960_v13, 0 }
 0x2f8   : > { %v15514_v31 = vpop.f32.mrf.mxu0  ;;  %v15521_v7 = vpop.f32.mrf.mxu1  ;;  %15822 = vmatprep.subr.bf16.mxu0 %v16330_v0 }
 0x2f9   : > { %v6748_v33 = vadd.f32 %v6742_v12, %v6685_v17  ;;  %v19245_v20 = vpop.permute.xlu0 %11000  ;;  %12915 = vrot.lane.b32.xlu1 %v18783_v49, %s16339_s19  ;;  %v10023_v49 = vsel %vm583_vm8, %v18980_v11, %v18992_v27  ;;  %v14218_v11 = vld [vmem:[%s20212_s1 + $0x58] sm:$0xf]  ;;  %v10149_v17 = vsel %vm713_vm10, %v19016_v39, %v19028_v15 }
 0x2fa   : > { %v6682_v24 = vpop.f32.mrf.mxu0  ;;  %13026 = vrot.lane.b32.xlu0 %v19227_v1, %s16333_s5  ;;  %v6868_v35 = vpop.f32.mrf.mxu1  ;;  %15819 = vmatmul.mubr.msk.bf16.vlgmr.msra.gmra.mxu1 %vm213_vm2, %v14210_v26  ;;  %v10028_v46 = vsel %vm217_vm1, %v10023_v49, 0 }
 0x2fb   : > { %15829 = vmatpush3.bf16.msra.mxu1 %v9902_v55  ;;  %15830 = vmatprep.mubr.msk.bf16.mxu1 %vm16331_vm0, %v16330_v0  ;;  %v10086_v24 = vsel %vm648_vm9, %v18999_v37, %v19011_v3 }
 0x2fc   : > { %v15515_v60 = vpop.f32.mrf.mxu0  ;;  %v15532_v22 = vpop.f32.mrf.mxu1  ;;  %15840 = vmatprep.subr.bf16.mxu1 %v16330_v0  ;;  %v10091_v37 = vsel %vm217_vm1, %v10086_v24, 0 }
 0x2fd   : > { %v19262_v63 = vpop.permute.xlu0 %11063  ;;  %13028 = vrot.lane.b32.xlu1 %v19243_v57, %s16333_s5  ;;  %v14222_v22 = vld [vmem:[%s20212_s1 + $0x5c] sm:$0xf] }
 0x2fe   : > { %v6805_v42 = vpop.f32.mrf.mxu0  ;;  %15813 = vmatmul.mubr.msk.bf16.vlgmr.msra.gmra.mxu0 %vm213_vm2, %v14206_v5  ;;  %13089 = vrot.lane.b32.xlu0 %v19227_v1, %s16332_s4  ;;  %v6871_v56 = vpop.f32.mrf.mxu1 }
 0x2ff   : > { %v6811_v16 = vadd.f32 %v6805_v42, %v6748_v33  ;;  %15823 = vmatpush3.bf16.msra.mxu0 %v9839_v23  ;;  %15824 = vmatprep.mubr.msk.bf16.mxu0 %vm16331_vm0, %v16330_v0  ;;  %v10154_v33 = vsel %vm217_vm1, %v10149_v17, 0  ;;  %v19321_v5 = vpop.permute.xlu1 %11002  ;;  %v14238_v56 = vld [vmem:[%s16430_s30 + $0x18] sm:$0x3] }
 0x300   : > { %v15526_v27 = vpop.f32.mrf.mxu0  ;;  %v15533_v62 = vpop.f32.mrf.mxu1  ;;  %15834 = vmatprep.subr.bf16.mxu0 %v16330_v0 }
 0x301   : > { %v19278_v12 = vadd.f32 %v6868_v35, %v6811_v16  ;;  %v19283_v43 = vpop.permute.xlu0 %11126  ;;  %13091 = vrot.lane.b32.xlu1 %v19243_v57, %s16332_s4  ;;  %v14234_v62 = vld [vmem:[%s20212_s1 + $0x68] sm:$0xf] }
 0x302   : > { %v6808_v28 = vpop.f32.mrf.mxu0  ;;  %13152 = vrot.lane.b32.xlu0 %v19227_v1, %s16334_s8  ;;  %v6982_v19 = vpop.f32.mrf.mxu1  ;;  %15831 = vmatmul.mubr.msk.bf16.vlgmr.msra.gmra.mxu1 %vm213_vm2, %v14218_v11 }
 0x303   : > { %15841 = vmatpush3.bf16.msra.mxu1 %v10028_v46  ;;  %15842 = vmatprep.mubr.msk.bf16.mxu1 %vm16331_vm0, %v16330_v0  ;;  %v19348_v46 = vpop.permute.xlu1 %11065 }
 0x304   : > { %v15527_v29 = vpop.f32.mrf.mxu0  ;;  %v15544_v53 = vpop.f32.mrf.mxu1  ;;  %15852 = vmatprep.subr.bf16.mxu1 %v16330_v0 }
 0x305   : > { %v19302_v26 = vpop.permute.xlu0 %11189  ;;  %13154 = vrot.lane.b32.xlu1 %v19243_v57, %s16334_s8 }
 0x306   : > { %v6936_v31 = vpop.f32.mrf.mxu0  ;;  %15825 = vmatmul.mubr.msk.bf16.vlgmr.msra.gmra.mxu0 %vm213_vm2, %v14214_v45  ;;  %13215 = vrot.lane.b32.xlu0 %v19227_v1, %s16335_s9  ;;  %v6985_v7 = vpop.f32.mrf.mxu1  ;;  %v10217_v45 = vsel %vm211_vm3, %v19035_v34, %v19047_v32 }
 0x307   : > { %v6983_v55 = vadd.f32 %v6982_v19, %v6936_v31  ;;  %15835 = vmatpush3.bf16.msra.mxu0 %v9965_v40  ;;  %15836 = vmatprep.mubr.msk.bf16.mxu0 %vm16331_vm0, %v16330_v0  ;;  %v10268_v19 = vsel %vm217_vm1, %v14238_v56, 0  ;;  %v14230_v31 = vld [vmem:[%s20212_s1 + $0x64] sm:$0xf]  ;;  %v10222_v34 = vsel %vm217_vm1, %v10217_v45, 0  ;;  %v14249_v45 = vld [vmem:[%s20212_s1 + $0xc] sm:$0xf] }
 0x308   : > { %v15538_v39 = vpop.f32.mrf.mxu0  ;;  %v15545_v15 = vpop.f32.mrf.mxu1  ;;  %15846 = vmatprep.subr.bf16.mxu0 %v16330_v0 }
 0x309   : > { %v19319_v35 = vpop.permute.xlu0 %11252  ;;  %13217 = vrot.lane.b32.xlu1 %v19243_v57, %s16335_s9  ;;  %v19374_v39 = vpop.permute.xlu1 %11128  ;;  %s16256_s9 = sshll.u32 %s16341_s26, 4  ;;  %s16257_s9 = int_to_ptr.vmem [resolvable:$false] %s16256_s9 }
 0x30a   : > { %v6939_v23 = vpop.f32.mrf.mxu0  ;;  %13278 = vrot.lane.b32.xlu0 %v19227_v1, %s16336_s10  ;;  %v7107_v60 = vpop.f32.mrf.mxu1  ;;  %15843 = vmatmul.mubr.msk.bf16.vlgmr.msra.gmra.mxu1 %vm213_vm2, %v14226_v38 }
 0x30b   : > { %15853 = vmatpush3.bf16.msra.mxu1 %v10154_v33  ;;  %15854 = vmatprep.mubr.msk.bf16.mxu1 %vm16331_vm0, %v16330_v0 }
 0x30c   : > { %v15539_v3 = vpop.f32.mrf.mxu0  ;;  %v15556_v49 = vpop.f32.mrf.mxu1  ;;  %15864 = vmatprep.subr.bf16.mxu1 %v16330_v0 }
 0x30d   : > { %v19335_v42 = vpop.permute.xlu0 %11365  ;;  %13280 = vrot.lane.b32.xlu1 %v19243_v57, %s16336_s10 }
 0x30e   : > { %v7044_v16 = vpop.f32.mrf.mxu0  ;;  %15837 = vmatmul.mubr.msk.bf16.vlgmr.msra.gmra.mxu0 %vm213_vm2, %v14222_v22  ;;  %13341 = vrot.lane.b32.xlu0 %v19227_v1, %s16337_s11  ;;  %v7110_v11 = vpop.f32.mrf.mxu1 }
 0x30f   : > { %v7050_v27 = vadd.f32 %v7044_v16, %v6983_v55  ;;  %15847 = vmatpush3.bf16.msra.mxu0 %v10091_v37  ;;  %15848 = vmatprep.mubr.msk.bf16.mxu0 %vm16331_vm0, %v16330_v0  ;;  %v10388_v55 = vsel %vm388_vm5, %v19073_v61, %v19085_v59  ;;  %v192_v61 = vld [vmem:[%s20213_s2] sm:$0xff] }
 0x310   : > { %v15550_v13 = vpop.f32.mrf.mxu0  ;;  %v15557_v28 = vpop.f32.mrf.mxu1  ;;  %15858 = vmatprep.subr.bf16.mxu0 %v16330_v0  ;;  %v10201_v59 = vld [vmem:[%s20212_s1] sm:$0xf]  ;;  %v10393_v22 = vsel %vm217_vm1, %v10388_v55, 0  ;;  %v14240_v16 = vld [vmem:[%s20212_s1 + $0x4] sm:$0xf] }
 0x311   : > { %v7113_v40 = vadd.f32 %v7107_v60, %v7050_v27  ;;  %v19355_v29 = vpop.permute.xlu0 %11428  ;;  %13343 = vrot.lane.b32.xlu1 %v19243_v57, %s16337_s11  ;;  %v14245_v55 = vld [vmem:[%s20212_s1 + $0x8] sm:$0xf]  ;;  %s180_s11 = sand.u32 1, %s16312_s13  }
 0x312   : > { %v7047_v53 = vpop.f32.mrf.mxu0  ;;  %13404 = vrot.lane.b32.xlu0 %v19227_v1, %s16338_s18  ;;  %v7233_v17 = vpop.f32.mrf.mxu1  ;;  %15855 = vmatmul.mubr.msk.bf16.vlgmr.msra.gmra.mxu1 %vm213_vm2, %v14234_v62  ;;  %s13616_s29 = sshll.u32 %s180_s11, 6 }
 0x313   : > { %15865 = vmatpush3.bf16.msra.mxu1 %v10268_v19  ;;  %15866 = vmatprep.mubr.msk.bf16.mxu1 %vm16331_vm0, %v16330_v0 }
 0x314   : > { %v15551_v32 = vpop.f32.mrf.mxu0  ;;  %v15568_v7 = vpop.f32.mrf.mxu1  ;;  %15876 = vmatprep.subr.bf16.mxu1 %v16330_v0 }
 0x315   : > { %v19372_v38 = vpop.permute.xlu0 %11491  ;;  %13406 = vrot.lane.b32.xlu1 %v19243_v57, %s16338_s18  ;;  %s14453_s18 = sshll.u32 %s16320_s15, 10  ;;  %s20166_s15 = scalar_lea.sflag [#allocation3], %s180_s11 }
 0x316   : > { %v7170_v15 = vpop.f32.mrf.mxu0  ;;  %15849 = vmatmul.mubr.msk.bf16.vlgmr.msra.gmra.mxu0 %vm213_vm2, %v14230_v31  ;;  %13467 = vrot.lane.b32.xlu0 %v19227_v1, %s16339_s19  ;;  %v7236_v33 = vpop.f32.mrf.mxu1  ;;  %v10325_v1 = vsel %vm323_vm4, %v19054_v48, %v19066_v21  ;;  %s20158_s23 = scalar_lea.hbm %s20214_s3, %s14453_s18 }
 0x317   : > { %v7176_v24 = vadd.f32 %v7170_v15, %v7113_v40  ;;  %15859 = vmatpush3.bf16.msra.mxu0 %v10222_v34  ;;  %15860 = vmatprep.mubr.msk.bf16.mxu0 %vm16331_vm0, %v16330_v0  ;;  %v19404_v48 = vpop.permute.xlu1 %11191  ;;  %v10330_v21 = vsel %vm217_vm1, %v10325_v1, 0  ;;  %v10640_v33 = vsel %vm648_vm9, %v19144_v36, %v19183_v9  ;;  %v10577_v9 = vsel %vm583_vm8, %v19128_v25, %v19157_v10 }
 0x318   : > { %v15562_v23 = vpop.f32.mrf.mxu0  ;;  %v15569_v60 = vpop.f32.mrf.mxu1  ;;  %15870 = vmatprep.subr.bf16.mxu0 %v16330_v0  ;;  %v10645_v36 = vsel %vm217_vm1, %v10640_v33, 0  ;;  %v14261_v33 = vld [vmem:[%s20212_s1 + $0x18] sm:$0xf] }
 0x319   : > { %v7239_v37 = vadd.f32 %v7233_v17, %v7176_v24  ;;  %v19394_v3 = vpop.permute.xlu0 %11554  ;;  %13469 = vrot.lane.b32.xlu1 %v19243_v57, %s16339_s19  ;;  %v10514_v57 = vsel %vm518_vm7, %v19111_v18, %v19130_v44  ;;  %v10451_v18 = vsel %vm453_vm6, %v19092_v54, %v19104_v14  ;;  %s19907_s19 = scalar_lea.vmem [#allocation2], %s13616_s29 }
 0x31a   : > { %v7173_v49 = vpop.f32.mrf.mxu0  ;;  %1890 = vperm.xlu0 %16251, %v192_v61   ;;  %v7359_v56 = vpop.f32.mrf.mxu1  ;;  %15867 = vmatmul.mubr.msk.bf16.vlgmr.msra.gmra.mxu1 %vm213_vm2, %v10201_v59  ;;  %v10519_v17 = vsel %vm217_vm1, %v10514_v57, 0  ;;  %v10456_v15 = vsel %vm217_vm1, %v10451_v18, 0  ;;  %v10582_v57 = vsel %vm217_vm1, %v10577_v9, 0  ;;  %s13538_s5 = sshll.u32 %s19907_s19, 4  ;;  %s20160_s5 = int_to_ptr.vmem [resolvable:$true] %s13538_s5 }
 0x31b   : > { %15877 = vmatpush3.bf16.msra.mxu1 %v10393_v22  ;;  %15878 = vmatprep.mubr.msk.bf16.mxu1 %vm16331_vm0, %v16330_v0  ;;  %v19426_v34 = vpop.permute.xlu1 %11254  ;;  %v14257_v22 = vld [vmem:[%s20212_s1 + $0x14] sm:$0xf]  ;;  %s16252_s8 = scalar_lea.vmem %s20160_s5, 1024  ;;  %p16259_p1 = scmp.lt.s32.totalorder %s20160_s5, %s16257_s9 }
 0x31c   : > { %v15563_v11 = vpop.f32.mrf.mxu0  ;;  %v15580_v27 = vpop.f32.mrf.mxu1  ;;  %15888 = vmatprep.subr.bf16.mxu1 %v16330_v0  ;;  %p16253_p12 = scmp.ne.s32.totalorder %s20160_s5, %s16252_s8 }
 0x31d   : > { %v19411_v62 = vpop.permute.xlu0 %11617  ;;  %v14253_v11 = vld [vmem:[%s20212_s1 + $0x10] sm:$0xf] }
 0x31e   : > { %v7296_v13 = vpop.f32.mrf.mxu0  ;;  %15861 = vmatmul.mubr.msk.bf16.vlgmr.msra.gmra.mxu0 %vm213_vm2, %v14240_v16  ;;  %v7362_v28 = vpop.f32.mrf.mxu1  ;;  %p16254_p13 = pnand %p16253_p12, %p16404_p4 }
 0x31f   : > { %v7302_v19 = vadd.f32 %v7296_v13, %v7239_v37  ;;  %15871 = vmatpush3.bf16.msra.mxu0 %v10330_v21  ;;  %15872 = vmatprep.mubr.msk.bf16.mxu0 %vm16331_vm0, %v16330_v0  ;;  %v19441_v61 = vpop.permute.xlu1 %11367  ;;  %v14272_v28 = vld [vmem:[%s16430_s30 + $0x1c] sm:$0x3] }
 0x320   : > { %v15574_v40 = vpop.f32.mrf.mxu0  ;;  %v15581_v53 = vpop.f32.mrf.mxu1  ;;  %15882 = vmatprep.subr.bf16.mxu0 %v16330_v0  ;;  %p16255_p0 = pneg %p16254_p13 }
 0x321   : > { %v7365_v44 = vadd.f32 %v7359_v56, %v7302_v19  ;;  %v19424_v31 = vpop.permute.xlu0 %11680  ;;  %v14265_v53 = vld [vmem:[%s20212_s1 + $0x1c] sm:$0xf] }
 0x322   : > { %v7299_v32 = vpop.f32.mrf.mxu0  ;;  %v7471_v7 = vpop.f32.mrf.mxu1  ;;  %15879 = vmatmul.mubr.msk.bf16.vlgmr.msra.gmra.mxu1 %vm213_vm2, %v14249_v45 }
 0x323   : > { %15889 = vmatpush3.bf16.msra.mxu1 %v10519_v17  ;;  %15890 = vmatprep.mubr.msk.bf16.mxu1 %vm16331_vm0, %v16330_v0  ;;  %v19462_v27 = vpop.permute.xlu1 %11430  ;;  %v10703_v32 = vsel %vm713_vm10, %v19164_v50, %v19202_v30 }
 0x324   : > { %v15575_v54 = vpop.f32.mrf.mxu0  ;;  %v15592_v14 = vpop.f32.mrf.mxu1  ;;  %15900 = vmatprep.subr.bf16.mxu1 %v16330_v0 }
 0x325   : > { %v19439_v24 = vpop.permute.xlu0 %11743 }
 0x326   : > { %v7422_v59 = vpop.f32.mrf.mxu0  ;;  %15873 = vmatmul.mubr.msk.bf16.vlgmr.msra.gmra.mxu0 %vm213_vm2, %v14245_v55  ;;  %v7474_v23 = vpop.f32.mrf.mxu1 }
 0x327   : > { %v7428_v60 = vadd.f32 %v7422_v59, %v7365_v44  ;;  %15883 = vmatpush3.bf16.msra.mxu0 %v10456_v15  ;;  %15884 = vmatprep.mubr.msk.bf16.mxu0 %vm16331_vm0, %v16330_v0  ;;  %v10757_v44 = vsel %vm217_vm1, %v14272_v28, 0  ;;  %v19482_v15 = vpop.permute.xlu1 %11493  ;;  %v10708_v59 = vsel %vm217_vm1, %v10703_v32, 0  ;;  %v10878_v23 = vsel %vm323_vm4, %v19200_v47, %v19264_v8 }
 0x328   : > { %v15586_v1 = vpop.f32.mrf.mxu0  ;;  %v15593_v37 = vpop.f32.mrf.mxu1  ;;  %15894 = vmatprep.subr.bf16.mxu0 %v16330_v0  ;;  %v10883_v47 = vsel %vm217_vm1, %v10878_v23, 0  ;;  %v10815_v8 = vsel %vm211_vm3, %v19181_v4, %v19234_v2  ;;  %v11004_v4 = vsel %vm453_vm6, %v19245_v20, %v19321_v5  ;;  %v10941_v5 = vsel %vm388_vm5, %v19219_v41, %v19295_v51 }
 0x329   : > { %v7477_v49 = vadd.f32 %v7471_v7, %v7428_v60  ;;  %v19454_v56 = vpop.permute.xlu0 %11806  ;;  %v10820_v28 = vsel %vm217_vm1, %v10815_v8, 0  ;;  %v11009_v20 = vsel %vm217_vm1, %v11004_v4, 0  ;;  %v10946_v23 = vsel %vm217_vm1, %v10941_v5, 0 }
 0x32a   : > { %v7425_v16 = vpop.f32.mrf.mxu0  ;;  %v7597_v21 = vpop.f32.mrf.mxu1  ;;  %15891 = vmatmul.mubr.msk.bf16.vlgmr.msra.gmra.mxu1 %vm213_vm2, %v14257_v22  ;;  %v11256_v4 = vsel %vm713_vm10, %v19319_v35, %v19426_v34  ;;  %v11193_v34 = vsel %vm648_vm9, %v19302_v26, %v19404_v48  ;;  %v11369_v48 = vsel %vm211_vm3, %v19335_v42, %v19441_v61  ;;  %v14307_v61 = vld [vmem:[%s16430_s30 + $0x20] sm:$0x3] }
 0x32b   : > { %15901 = vmatpush3.bf16.msra.mxu1 %v10645_v36  ;;  %15902 = vmatprep.mubr.msk.bf16.mxu1 %vm16331_vm0, %v16330_v0  ;;  %v14273_v36 = vld [vmem:[%s20212_s1 + $0x24] sm:$0xf]  ;;  %v19503_v9 = vpop.permute.xlu1 %11556  ;;  %v11261_v35 = vsel %vm217_vm1, %v11256_v4, 0  ;;  %v11374_v42 = vsel %vm217_vm1, %v11369_v48, 0 }
 0x32c   : > { %v15587_v25 = vpop.f32.mrf.mxu0  ;;  %v15604_v10 = vpop.f32.mrf.mxu1  ;;  %15912 = vmatprep.subr.bf16.mxu1 %v16330_v0 }
 0x32d   : > { %v19466_v13 = vpop.permute.xlu0 %11874  ;;  %v14269_v10 = vld [vmem:[%s20212_s1 + $0x20] sm:$0xf] }
 0x32e   : > { %v7534_v19 = vpop.f32.mrf.mxu0  ;;  %15885 = vmatmul.mubr.msk.bf16.vlgmr.msra.gmra.mxu0 %vm213_vm2, %v14253_v11  ;;  %v7600_v45 = vpop.f32.mrf.mxu1 }
 0x32f   : > { %v7540_v40 = vadd.f32 %v7534_v19, %v7477_v49  ;;  %15895 = vmatpush3.bf16.msra.mxu0 %v10582_v57  ;;  %15896 = vmatprep.mubr.msk.bf16.mxu0 %vm16331_vm0, %v16330_v0 }
 0x330   : > { %v15598_v17 = vpop.f32.mrf.mxu0  ;;  %v15605_v18 = vpop.f32.mrf.mxu1  ;;  %15906 = vmatprep.subr.bf16.mxu0 %v16330_v0 }
 0x331   : > { %v7603_v7 = vadd.f32 %v7597_v21, %v7540_v40  ;;  %v19480_v55 = vpop.permute.xlu0 %11982  ;;  %v19525_v40 = vpop.permute.xlu1 %11619 }
 0x332   : > { %v7537_v54 = vpop.f32.mrf.mxu0  ;;  %v7723_v14 = vpop.f32.mrf.mxu1  ;;  %15903 = vmatmul.mubr.msk.bf16.vlgmr.msra.gmra.mxu1 %vm213_vm2, %v14265_v53 }
 0x333   : > { %15913 = vmatpush3.bf16.msra.mxu1 %v10757_v44  ;;  %15914 = vmatprep.mubr.msk.bf16.mxu1 %vm16331_vm0, %v16330_v0  ;;  %v14280_v44 = vld [vmem:[%s20212_s1 + $0x2c] sm:$0xf] }
 0x334   : > { %v15599_v50 = vpop.f32.mrf.mxu0  ;;  %v15616_v30 = vpop.f32.mrf.mxu1  ;;  %15924 = vmatprep.subr.bf16.mxu1 %v16330_v0 }
 0x335   : > { %v19495_v60 = vpop.permute.xlu0 %12045  ;;  %v14276_v50 = vld [vmem:[%s20212_s1 + $0x28] sm:$0xf]  ;;  %v19546_v30 = vpop.permute.xlu1 %11682 }
 0x336   : > { %v7660_v22 = vpop.f32.mrf.mxu0  ;;  %15897 = vmatmul.mubr.msk.bf16.vlgmr.msra.gmra.mxu0 %vm213_vm2, %v14261_v33  ;;  %v7726_v1 = vpop.f32.mrf.mxu1 }
 0x337   : > { %v7666_v37 = vadd.f32 %v7660_v22, %v7603_v7  ;;  %15907 = vmatpush3.bf16.msra.mxu0 %v10708_v59  ;;  %15908 = vmatprep.mubr.msk.bf16.mxu0 %vm16331_vm0, %v16330_v0  ;;  %v11130_v22 = vsel %vm583_vm8, %v19283_v43, %v19374_v39  ;;  %v11067_v43 = vsel %vm518_vm7, %v19262_v63, %v19348_v46 }
 0x338   : > { %v15610_v49 = vpop.f32.mrf.mxu0  ;;  %v15617_v16 = vpop.f32.mrf.mxu1  ;;  %15918 = vmatprep.subr.bf16.mxu0 %v16330_v0  ;;  %v11072_v63 = vsel %vm217_vm1, %v11067_v43, 0 }
 0x339   : > { %v7729_v21 = vadd.f32 %v7723_v14, %v7666_v37  ;;  %v19510_v11 = vpop.permute.xlu0 %12108  ;;  %v14288_v16 = vld [vmem:[%s20212_s1 + $0x34] sm:$0xf] }
 0x33a   : > { %v7663_v57 = vpop.f32.mrf.mxu0  ;;  %v7849_v25 = vpop.f32.mrf.mxu1  ;;  %15915 = vmatmul.mubr.msk.bf16.vlgmr.msra.gmra.mxu1 %vm213_vm2, %v14273_v36 }
 0x33b   : > { %15925 = vmatpush3.bf16.msra.mxu1 %v10883_v47  ;;  %15926 = vmatprep.mubr.msk.bf16.mxu1 %vm16331_vm0, %v16330_v0 }
 0x33c   : > { %v15611_v19 = vpop.f32.mrf.mxu0  ;;  %v15628_v45 = vpop.f32.mrf.mxu1  ;;  %15936 = vmatprep.subr.bf16.mxu1 %v16330_v0 }
 0x33d   : > { %v19523_v2 = vpop.permute.xlu0 %12171  ;;  %v14284_v19 = vld [vmem:[%s20212_s1 + $0x30] sm:$0xf] }
 0x33e   : > { %v7786_v53 = vpop.f32.mrf.mxu0  ;;  %15909 = vmatmul.mubr.msk.bf16.vlgmr.msra.gmra.mxu0 %vm213_vm2, %v14269_v10  ;;  %v7852_v17 = vpop.f32.mrf.mxu1 }
 0x33f   : > { %v7792_v18 = vadd.f32 %v7786_v53, %v7729_v21  ;;  %15919 = vmatpush3.bf16.msra.mxu0 %v10820_v28  ;;  %15920 = vmatprep.mubr.msk.bf16.mxu0 %vm16331_vm0, %v16330_v0  ;;  %v11135_v21 = vsel %vm217_vm1, %v11130_v22, 0 }
 0x340   : > { %v15622_v32 = vpop.f32.mrf.mxu0  ;;  %v15629_v7 = vpop.f32.mrf.mxu1  ;;  %15930 = vmatprep.subr.bf16.mxu0 %v16330_v0 }
 0x341   : > { %v7855_v54 = vadd.f32 %v7849_v25, %v7792_v18  ;;  %v19538_v14 = vpop.permute.xlu0 %12234  ;;  %v19570_v25 = vpop.permute.xlu1 %11745 }
 0x342   : > { %v7789_v33 = vpop.f32.mrf.mxu0  ;;  %v7975_v59 = vpop.f32.mrf.mxu1  ;;  %15927 = vmatmul.mubr.msk.bf16.vlgmr.msra.gmra.mxu1 %vm213_vm2, %v14280_v44  ;;  %v14296_v44 = vld [vmem:[%s20212_s1 + $0x3c] sm:$0xf] }
 0x343   : > { %15937 = vmatpush3.bf16.msra.mxu1 %v11009_v20  ;;  %15938 = vmatprep.mubr.msk.bf16.mxu1 %vm16331_vm0, %v16330_v0 }
 0x344   : > { %v15623_v41 = vpop.f32.mrf.mxu0  ;;  %v15640_v51 = vpop.f32.mrf.mxu1  ;;  %15948 = vmatprep.subr.bf16.mxu1 %v16330_v0 }
 0x345   : > { %v19553_v1 = vpop.permute.xlu0 %12297  ;;  %v19595_v32 = vpop.permute.xlu1 %11808 }
 0x346   : > { %v7912_v37 = vpop.f32.mrf.mxu0  ;;  %15921 = vmatmul.mubr.msk.bf16.vlgmr.msra.gmra.mxu0 %vm213_vm2, %v14276_v50  ;;  %v7978_v36 = vpop.f32.mrf.mxu1  ;;  %v11198_v50 = vsel %vm217_vm1, %v11193_v34, 0 }
 0x347   : > { %v7918_v49 = vadd.f32 %v7912_v37, %v7855_v54  ;;  %15931 = vmatpush3.bf16.msra.mxu0 %v10946_v23  ;;  %15932 = vmatprep.mubr.msk.bf16.mxu0 %vm16331_vm0, %v16330_v0  ;;  %v14304_v36 = vld [vmem:[%s20212_s1 + $0x44] sm:$0xf] }
 0x348   : > { %v15634_v47 = vpop.f32.mrf.mxu0  ;;  %v15641_v8 = vpop.f32.mrf.mxu1  ;;  %15942 = vmatprep.subr.bf16.mxu0 %v16330_v0 }
 0x349   : > { %v19566_v39 = vadd.f32 %v7975_v59, %v7918_v49  ;;  %v19568_v57 = vpop.permute.xlu0 %12360  ;;  %v14292_v59 = vld [vmem:[%s20212_s1 + $0x38] sm:$0xf]  ;;  %v19619_v51 = vpop.permute.xlu1 %11876 }
 0x34a   : > { %v7915_v10 = vpop.f32.mrf.mxu0  ;;  %v19572_v28 = vpop.f32.mrf.mxu1  ;;  %15939 = vmatmul.mubr.msk.bf16.vlgmr.msra.gmra.mxu1 %vm213_vm2, %v14288_v16 }
 0x34b   : > { %15949 = vmatpush3.bf16.msra.mxu1 %v11135_v21  ;;  %15950 = vmatprep.mubr.msk.bf16.mxu1 %vm16331_vm0, %v16330_v0  ;;  %v14300_v10 = vld [vmem:[%s20212_s1 + $0x40] sm:$0xf] }
 0x34c   : > { %v15635_v46 = vpop.f32.mrf.mxu0  ;;  %v15652_v45 = vpop.f32.mrf.mxu1  ;;  %15960 = vmatprep.subr.bf16.mxu1 %v16330_v0 }
 0x34d   : > { %v19585_v53 = vpop.permute.xlu0 %12472  ;;  %v19634_v8 = vpop.permute.xlu1 %11984  ;;  %v11311_v46 = vsel %vm217_vm1, %v14307_v61, 0  ;;  %v11495_v45 = vsel %vm388_vm5, %v19372_v38, %v19482_v15  ;;  %v11432_v15 = vsel %vm323_vm4, %v19355_v29, %v19462_v27  ;;  %v11621_v29 = vsel %vm518_vm7, %v19411_v62, %v19525_v40 }
 0x34e   : > { %v19587_v17 = vpop.f32.mrf.mxu0  ;;  %15933 = vmatmul.mubr.msk.bf16.vlgmr.msra.gmra.mxu0 %vm213_vm2, %v14284_v19  ;;  %v8091_v18 = vpop.f32.mrf.mxu1  ;;  %v11500_v38 = vsel %vm217_vm1, %v11495_v45, 0  ;;  %v11626_v62 = vsel %vm217_vm1, %v11621_v29, 0  ;;  %v11558_v40 = vsel %vm453_vm6, %v19394_v3, %v19503_v9 }
 0x34f   : > { %15943 = vmatpush3.bf16.msra.mxu0 %v11072_v63  ;;  %15944 = vmatprep.mubr.msk.bf16.mxu0 %vm16331_vm0, %v16330_v0 }
 0x350   : > { %v15646_v7 = vpop.f32.mrf.mxu0  ;;  %v15653_v20 = vpop.f32.mrf.mxu1  ;;  %15954 = vmatprep.subr.bf16.mxu0 %v16330_v0 }
 0x351   : > { %v19602_v5 = vpop.permute.xlu0 %12535  ;;  %v14311_v7 = vld [vmem:[%s20212_s1 + $0x4c] sm:$0xf]  ;;  %v19659_v20 = vpop.permute.xlu1 %12047 }
 0x352   : > { %v8028_v54 = vpop.f32.mrf.mxu0  ;;  %v19604_v33 = vpop.f32.mrf.mxu1  ;;  %15951 = vmatmul.mubr.msk.bf16.vlgmr.msra.gmra.mxu1 %vm213_vm2, %v14296_v44 }
 0x353   : > { %15961 = vmatpush3.bf16.msra.mxu1 %v11261_v35  ;;  %15962 = vmatprep.mubr.msk.bf16.mxu1 %vm16331_vm0, %v16330_v0 }
 0x354   : > { %v15647_v23 = vpop.f32.mrf.mxu0  ;;  %v15664_v26 = vpop.f32.mrf.mxu1  ;;  %15972 = vmatprep.subr.bf16.mxu1 %v16330_v0 }
 0x355   : > { %v19617_v41 = vpop.permute.xlu0 %12598  ;;  %v14308_v23 = vld [vmem:[%s20212_s1 + $0x48] sm:$0xf]  ;;  %v11437_v26 = vsel %vm217_vm1, %v11432_v15, 0  ;;  %v14327_v15 = vld [vmem:[%s20212_s1 + $0x5c] sm:$0xf] }
 0x356   : > { %v19621_v22 = vpop.f32.mrf.mxu0  ;;  %15945 = vmatmul.mubr.msk.bf16.vlgmr.msra.gmra.mxu0 %vm213_vm2, %v14292_v59  ;;  %v8217_v37 = vpop.f32.mrf.mxu1 }
 0x357   : > { %15955 = vmatpush3.bf16.msra.mxu0 %v11198_v50  ;;  %15956 = vmatprep.mubr.msk.bf16.mxu0 %vm16331_vm0, %v16330_v0 }
 0x358   : > { %v15658_v49 = vpop.f32.mrf.mxu0  ;;  %v15665_v16 = vpop.f32.mrf.mxu1  ;;  %15966 = vmatprep.subr.bf16.mxu0 %v16330_v0 }
 0x359   : > { %v19632_v47 = vpop.permute.xlu0 %12661 }
 0x35a   : > { %v8154_v21 = vpop.f32.mrf.mxu0  ;;  %v19636_v43 = vpop.f32.mrf.mxu1  ;;  %15963 = vmatmul.mubr.msk.bf16.vlgmr.msra.gmra.mxu1 %vm213_vm2, %v14304_v36 }
 0x35b   : > { %15973 = vmatpush3.bf16.msra.mxu1 %v11374_v42  ;;  %15974 = vmatprep.mubr.msk.bf16.mxu1 %vm16331_vm0, %v16330_v0  ;;  %v19683_v36 = vpop.permute.xlu1 %12110  ;;  %v14319_v42 = vld [vmem:[%s20212_s1 + $0x54] sm:$0xf] }
 0x35c   : > { %v15659_v19 = vpop.f32.mrf.mxu0  ;;  %v15676_v63 = vpop.f32.mrf.mxu1  ;;  %15984 = vmatprep.subr.bf16.mxu1 %v16330_v0 }
 0x35d   : > { %v19649_v4 = vpop.permute.xlu0 %12724 }
 0x35e   : > { %v19651_v18 = vpop.f32.mrf.mxu0  ;;  %15957 = vmatmul.mubr.msk.bf16.vlgmr.msra.gmra.mxu0 %vm213_vm2, %v14300_v10  ;;  %v8343_v44 = vpop.f32.mrf.mxu1 }
 0x35f   : > { %15967 = vmatpush3.bf16.msra.mxu0 %v11311_v46  ;;  %15968 = vmatprep.mubr.msk.bf16.mxu0 %vm16331_vm0, %v16330_v0  ;;  %v14315_v46 = vld [vmem:[%s20212_s1 + $0x50] sm:$0xf]  ;;  %v19708_v45 = vpop.permute.xlu1 %12173  ;;  %v11563_v44 = vsel %vm217_vm1, %v11558_v40, 0 }
 0x360   : > { %v15670_v35 = vpop.f32.mrf.mxu0  ;;  %v15677_v34 = vpop.f32.mrf.mxu1  ;;  %15978 = vmatprep.subr.bf16.mxu0 %v16330_v0 }
 0x361   : > { %v19666_v54 = vpop.permute.xlu0 %12787 }
 0x362   : > { %v8280_v59 = vpop.f32.mrf.mxu0  ;;  %v19668_v50 = vpop.f32.mrf.mxu1  ;;  %15975 = vmatmul.mubr.msk.bf16.vlgmr.msra.gmra.mxu1 %vm213_vm2, %v14311_v7  ;;  %v11747_v7 = vsel %vm648_vm9, %v19439_v24, %v19570_v25  ;;  %v11684_v24 = vsel %vm583_vm8, %v19424_v31, %v19546_v30 }
 0x363   : > { %15985 = vmatpush3.bf16.msra.mxu1 %v11500_v38  ;;  %15986 = vmatprep.mubr.msk.bf16.mxu1 %vm16331_vm0, %v16330_v0 }
 0x364   : > { %v15671_v48 = vpop.f32.mrf.mxu0  ;;  %v15688_v37 = vpop.f32.mrf.mxu1  ;;  %15996 = vmatprep.subr.bf16.mxu1 %v16330_v0 }
 0x365   : > { %v19681_v27 = vpop.permute.xlu0 %12850  ;;  %v19732_v48 = vpop.permute.xlu1 %12236 }
 0x366   : > { %v19685_v49 = vpop.f32.mrf.mxu0  ;;  %15969 = vmatmul.mubr.msk.bf16.vlgmr.msra.gmra.mxu0 %vm213_vm2, %v14308_v23  ;;  %v8469_v16 = vpop.f32.mrf.mxu1 }
 0x367   : > { %15979 = vmatpush3.bf16.msra.mxu0 %v11437_v26  ;;  %15980 = vmatprep.mubr.msk.bf16.mxu0 %vm16331_vm0, %v16330_v0  ;;  %v11752_v26 = vsel %vm217_vm1, %v11747_v7, 0  ;;  %v14323_v16 = vld [vmem:[%s20212_s1 + $0x58] sm:$0xf] }
 0x368   : > { %v15682_v61 = vpop.f32.mrf.mxu0  ;;  %v15689_v21 = vpop.f32.mrf.mxu1  ;;  %15990 = vmatprep.subr.bf16.mxu0 %v16330_v0 }
 0x369   : > { %v19698_v10 = vpop.permute.xlu0 %12913  ;;  %v11878_v61 = vsel %vm211_vm3, %v19466_v13, %v19619_v51  ;;  %v11810_v51 = vsel %vm713_vm10, %v19454_v56, %v19595_v32  ;;  %v8031_v56 = vadd.f32 %v19587_v17, %v19566_v39  ;;  %v11986_v32 = vsel %vm323_vm4, %v19480_v55, %v19634_v8 }
 0x36a   : > { %v8406_v19 = vpop.f32.mrf.mxu0  ;;  %v19700_v63 = vpop.f32.mrf.mxu1  ;;  %15987 = vmatmul.mubr.msk.bf16.vlgmr.msra.gmra.mxu1 %vm213_vm2, %v14319_v42  ;;  %v11689_v42 = vsel %vm217_vm1, %v11684_v24, 0  ;;  %v11883_v13 = vsel %vm217_vm1, %v11878_v61, 0  ;;  %v11991_v55 = vsel %vm217_vm1, %v11986_v32, 0 }
 0x36b   : > { %15997 = vmatpush3.bf16.msra.mxu1 %v11626_v62  ;;  %15998 = vmatprep.mubr.msk.bf16.mxu1 %vm16331_vm0, %v16330_v0  ;;  %v14335_v19 = vld [vmem:[%s20212_s1 + $0x64] sm:$0xf]  ;;  %v8094_v8 = vadd.f32 %v19572_v28, %v8031_v56 }
 0x36c   : > { %v15683_v3 = vpop.f32.mrf.mxu0  ;;  %v15700_v9 = vpop.f32.mrf.mxu1  ;;  %16008 = vmatprep.subr.bf16.mxu1 %v16330_v0 }
 0x36d   : > { %v19715_v35 = vpop.permute.xlu0 %13026 }
 0x36e   : > { %v19717_v34 = vpop.f32.mrf.mxu0  ;;  %15981 = vmatmul.mubr.msk.bf16.vlgmr.msra.gmra.mxu0 %vm213_vm2, %v14315_v46  ;;  %v8600_v38 = vpop.f32.mrf.mxu1 }
 0x36f   : > { %15991 = vmatpush3.bf16.msra.mxu0 %v11563_v44  ;;  %15992 = vmatprep.mubr.msk.bf16.mxu0 %vm16331_vm0, %v16330_v0  ;;  %v19757_v46 = vpop.permute.xlu1 %12299 }
 0x370   : > { %v15694_v59 = vpop.f32.mrf.mxu0  ;;  %v15701_v23 = vpop.f32.mrf.mxu1  ;;  %16002 = vmatprep.subr.bf16.mxu0 %v16330_v0 }
 0x371   : > { %v19730_v25 = vpop.permute.xlu0 %13089  ;;  %v11815_v59 = vsel %vm217_vm1, %v11810_v51, 0 }
 0x372   : > { %v8532_v37 = vpop.f32.mrf.mxu0  ;;  %v19734_v29 = vpop.f32.mrf.mxu1  ;;  %15999 = vmatmul.mubr.msk.bf16.vlgmr.msra.gmra.mxu1 %vm213_vm2, %v14327_v15  ;;  %v14331_v15 = vld [vmem:[%s20212_s1 + $0x60] sm:$0xf] }
 0x373   : > { %16009 = vmatpush3.bf16.msra.mxu1 %v11752_v26  ;;  %16010 = vmatprep.mubr.msk.bf16.mxu1 %vm16331_vm0, %v16330_v0  ;;  %v19783_v37 = vpop.permute.xlu1 %12362 }
 0x374   : > { %v15695_v31 = vpop.f32.mrf.mxu0  ;;  %v15712_v30 = vpop.f32.mrf.mxu1  ;;  %16020 = vmatprep.subr.bf16.mxu1 %v16330_v0 }
 0x375   : > { %v19747_v21 = vpop.permute.xlu0 %13152  ;;  %v14345_v31 = vld [vmem:[%s20212_s1 + $0x4] sm:$0xf]  ;;  %v14343_v30 = vld [vmem:[%s16430_s30 + $0x1c] sm:$0x3] }
 0x376   : > { %v19749_v62 = vpop.f32.mrf.mxu0  ;;  %15993 = vmatmul.mubr.msk.bf16.vlgmr.msra.gmra.mxu0 %vm213_vm2, %v14323_v16  ;;  %v8708_v40 = vpop.f32.mrf.mxu1 }
 0x377   : > { %16003 = vmatpush3.bf16.msra.mxu0 %v11689_v42  ;;  %16004 = vmatprep.mubr.msk.bf16.mxu0 %vm16331_vm0, %v16330_v0  ;;  %v19797_v61 = vpop.permute.xlu1 %12474 }
 0x378   : > { %v15706_v44 = vpop.f32.mrf.mxu0  ;;  %v15713_v3 = vpop.f32.mrf.mxu1  ;;  %16014 = vmatprep.subr.bf16.mxu0 %v16330_v0 }
 0x379   : > { %v19764_v9 = vpop.permute.xlu0 %13215  ;;  %v8157_v44 = vadd.f32 %v19621_v22, %v8094_v8  ;;  %v14339_v3 = vld [vmem:[%s20212_s1 + $0x68] sm:$0xf]  ;;  %v12112_v22 = vsel %vm453_vm6, %v19510_v11, %v19683_v36 }
 0x37a   : > { %v8646_v7 = vpop.f32.mrf.mxu0  ;;  %v19766_v38 = vpop.f32.mrf.mxu1  ;;  %16011 = vmatmul.mubr.msk.bf16.vlgmr.msra.gmra.mxu1 %vm213_vm2, %v14335_v19  ;;  %v12117_v11 = vsel %vm217_vm1, %v12112_v22, 0 }
 0x37b   : > { %16021 = vmatpush3.bf16.msra.mxu1 %v11883_v13  ;;  %16022 = vmatprep.mubr.msk.bf16.mxu1 %vm16331_vm0, %v16330_v0  ;;  %v11929_v7 = vsel %vm217_vm1, %v14343_v30, 0  ;;  %v19824_v56 = vpop.permute.xlu1 %12537  ;;  %v12238_v30 = vsel %vm583_vm8, %v19538_v14, %v19732_v48  ;;  %v14358_v14 = vld [vmem:[%s20212_s1 + $0x10] sm:$0xf] }
 0x37c   : > { %v15707_v23 = vpop.f32.mrf.mxu0  ;;  %v15724_v26 = vpop.f32.mrf.mxu1  ;;  %16032 = vmatprep.subr.bf16.mxu1 %v16330_v0  ;;  %v12243_v22 = vsel %vm217_vm1, %v12238_v30, 0 }
 0x37d   : > { %v19781_v24 = vpop.permute.xlu0 %13278  ;;  %v8220_v23 = vadd.f32 %v19604_v33, %v8157_v44  ;;  %v14350_v26 = vld [vmem:[%s20212_s1 + $0x8] sm:$0xf]  ;;  %v12049_v33 = vsel %vm388_vm5, %v19495_v60, %v19659_v20 }
 0x37e   : > { %v19785_v16 = vpop.f32.mrf.mxu0  ;;  %16005 = vmatmul.mubr.msk.bf16.vlgmr.msra.gmra.mxu0 %vm213_vm2, %v14331_v15  ;;  %v8834_v42 = vpop.f32.mrf.mxu1 }
 0x37f   : > { %16015 = vmatpush3.bf16.msra.mxu0 %v11815_v59  ;;  %16016 = vmatprep.mubr.msk.bf16.mxu0 %vm16331_vm0, %v16330_v0  ;;  %v8283_v36 = vadd.f32 %v19651_v18, %v8220_v23  ;;  %v12054_v18 = vsel %vm217_vm1, %v12049_v33, 0 }
 0x380   : > { %v15718_v39 = vpop.f32.mrf.mxu0  ;;  %v15725_v17 = vpop.f32.mrf.mxu1  ;;  %16026 = vmatprep.subr.bf16.mxu0 %v16330_v0 }
 0x381   : > { %v19806_v13 = vpop.permute.xlu0 %13341  ;;  %v8346_v20 = vadd.f32 %v19636_v43, %v8283_v36  ;;  %v12364_v36 = vsel %vm713_vm10, %v19568_v57, %v19783_v37  ;;  %v12301_v37 = vsel %vm648_vm9, %v19553_v1, %v19757_v46 }
 0x382   : > { %v8771_v40 = vpop.f32.mrf.mxu0  ;;  %v19799_v19 = vpop.f32.mrf.mxu1  ;;  %16023 = vmatmul.mubr.msk.bf16.vlgmr.msra.gmra.mxu1 %vm213_vm2, %v14345_v31 }
 0x383   : > { %16033 = vmatpush3.bf16.msra.mxu1 %v11991_v55  ;;  %16034 = vmatprep.mubr.msk.bf16.mxu1 %vm16331_vm0, %v16330_v0  ;;  %v11862_v55 = vld [vmem:[%s20212_s1] sm:$0xf]  ;;  %v19848_v40 = vpop.permute.xlu1 %12600 }
 0x384   : > { %v15719_v28 = vpop.f32.mrf.mxu0  ;;  %v15736_v51 = vpop.f32.mrf.mxu1  ;;  %16044 = vmatprep.subr.bf16.mxu1 %v16330_v0 }
 0x385   : > { %v19832_v31 = vpop.permute.xlu0 %13404  ;;  %v8409_v28 = vadd.f32 %v19685_v49, %v8346_v20  ;;  %v8644_v51 = vadd.f32 %v19749_v62, %v19700_v63  ;;  %v12175_v49 = vsel %vm518_vm7, %v19523_v2, %v19708_v45 }
 0x386   : > { %v19815_v15 = vpop.f32.mrf.mxu0  ;;  %16017 = vmatmul.mubr.msk.bf16.vlgmr.msra.gmra.mxu0 %vm213_vm2, %v14339_v3  ;;  %v8960_v59 = vpop.f32.mrf.mxu1  ;;  %v12180_v45 = vsel %vm217_vm1, %v12175_v49, 0 }
 0x387   : > { %16027 = vmatpush3.bf16.msra.mxu0 %v11929_v7  ;;  %16028 = vmatprep.mubr.msk.bf16.mxu0 %vm16331_vm0, %v16330_v0  ;;  %v8472_v59 = vadd.f32 %v19668_v50, %v8409_v28  ;;  %v8711_v23 = vadd.f32 %v19734_v29, %v8644_v51  ;;  %v19881_v2 = vpop.permute.xlu1 %12663  ;;  %v14362_v28 = vld [vmem:[%s20212_s1 + $0x14] sm:$0xf]  ;;  %v12476_v51 = vsel %vm211_vm3, %v19585_v53, %v19797_v61 }
 0x388   : > { %v15730_v32 = vpop.f32.mrf.mxu0  ;;  %v15737_v42 = vpop.f32.mrf.mxu1  ;;  %16038 = vmatprep.subr.bf16.mxu0 %v16330_v0  ;;  %v12481_v53 = vsel %vm217_vm1, %v12476_v51, 0 }
 0x389   : > { %v19856_v7 = vpop.permute.xlu0 %13467  ;;  %v8535_v50 = vadd.f32 %v19717_v34, %v8472_v59  ;;  %v8774_v29 = vadd.f32 %v19785_v16, %v8711_v23  ;;  %v14377_v59 = vld [vmem:[%s16430_s30 + $0x20] sm:$0x3] }
 0x38a   : > { %v8897_v39 = vpop.f32.mrf.mxu0  ;;  %v19834_v17 = vpop.f32.mrf.mxu1  ;;  %16035 = vmatmul.mubr.msk.bf16.vlgmr.msra.gmra.mxu1 %vm213_vm2, %v14350_v26  ;;  %v14354_v26 = vld [vmem:[%s20212_s1 + $0xc] sm:$0xf] }
 0x38b   : > { %16045 = vmatpush3.bf16.msra.mxu1 %v12117_v11  ;;  %16046 = vmatprep.mubr.msk.bf16.mxu1 %vm16331_vm0, %v16330_v0  ;;  %v8837_v57 = vadd.f32 %v19766_v38, %v8774_v29  ;;  %v12306_v38 = vsel %vm217_vm1, %v12301_v37, 0 }
 0x38c   : > { %v15731_v8 = vpop.f32.mrf.mxu0  ;;  %v15748_v60 = vpop.f32.mrf.mxu1  ;;  %16056 = vmatprep.subr.bf16.mxu1 %v16330_v0 }
 0x38d   : > { %v19920_v60 = vpop.permute.xlu1 %12726 }
 0x38e   : > { %v19850_v44 = vpop.f32.mrf.mxu0  ;;  %16029 = vmatmul.mubr.msk.bf16.vlgmr.msra.gmra.mxu0 %vm213_vm2, %v11862_v55  ;;  %v9086_v3 = vpop.f32.mrf.mxu1 }
 0x38f   : > { %16039 = vmatpush3.bf16.msra.mxu0 %v12054_v18  ;;  %16040 = vmatprep.mubr.msk.bf16.mxu0 %vm16331_vm0, %v16330_v0  ;;  %v8900_v3 = vadd.f32 %v19815_v15, %v8837_v57  ;;  %v12728_v57 = vsel %vm518_vm7, %v19649_v4, %v19920_v60  ;;  %v12665_v60 = vsel %vm453_vm6, %v19632_v47, %v19881_v2 }
 0x390   : > { %v15742_v43 = vpop.f32.mrf.mxu0  ;;  %v15749_v48 = vpop.f32.mrf.mxu1  ;;  %16050 = vmatprep.subr.bf16.mxu0 %v16330_v0 }
 0x391   : > { %v8963_v43 = vadd.f32 %v19799_v19, %v8900_v3  ;;  %v14374_v48 = vld [vmem:[%s20212_s1 + $0x20] sm:$0xf] }
 0x392   : > { %v9023_v63 = vpop.f32.mrf.mxu0  ;;  %v19869_v62 = vpop.f32.mrf.mxu1  ;;  %16047 = vmatmul.mubr.msk.bf16.vlgmr.msra.gmra.mxu1 %vm213_vm2, %v14358_v14 }
 0x393   : > { %16057 = vmatpush3.bf16.msra.mxu1 %v12243_v22  ;;  %16058 = vmatprep.mubr.msk.bf16.mxu1 %vm16331_vm0, %v16330_v0  ;;  %v19943_v22 = vpop.permute.xlu1 %12789  ;;  %v9026_v61 = vadd.f32 %v19850_v44, %v8963_v43  ;;  %v12670_v43 = vsel %vm217_vm1, %v12665_v60, 0 }
 0x394   : > { %v15743_v32 = vpop.f32.mrf.mxu0  ;;  %v15760_v42 = vpop.f32.mrf.mxu1  ;;  %16068 = vmatprep.subr.bf16.mxu1 %v16330_v0 }
 0x395   : > { %v19887_v11 = vpop.permute.xlu0 %1890  ;;  %v12418_v42 = vsel %vm217_vm1, %v14377_v59, 0  ;;  %v9089_v44 = vadd.f32 %v19834_v17, %v9026_v61  ;;  %v14397_v61 = vld [vmem:[%s20212_s1 + $0x38] sm:$0xf] }
 0x396   : > { %v1893_v33 = vadd.f32 %v19887_v11, %v17718_v52  ;;  %v3553_v39 = vadd.f32 %v18231_v6, %v19887_v11  ;;  %v5214_v55 = vadd.f32 %v18764_v58, %v19887_v11  ;;  %v6875_v34 = vadd.f32 %v19278_v12, %v19887_v11  ;;  %v9132_v18 = vpop.f32.mrf.mxu0  ;;  %16041 = vmatmul.mubr.msk.bf16.vlgmr.msra.gmra.mxu0 %vm213_vm2, %v14354_v26  ;;  %v9198_v16 = vpop.f32.mrf.mxu1  ;;  %v14366_v52 = vld [vmem:[%s20212_s1 + $0x18] sm:$0xf]  ;;  %v14370_v26 = vld [vmem:[%s20212_s1 + $0x1c] sm:$0xf] }
 0x397   : > { %v8536_v8 = vadd.f32 %v8535_v50, %v19887_v11  ;;  %16051 = vmatpush3.bf16.msra.mxu0 %v12180_v45  ;;  %16052 = vmatprep.mubr.msk.bf16.mxu0 %vm16331_vm0, %v16330_v0  ;;  %v12369_v12 = vsel %vm217_vm1, %v12364_v36, 0  ;;  %v12602_v50 = vsel %vm388_vm5, %v19617_v41, %v19848_v40  ;;  %v12853_v29 = vpop.permute.xlu1 %12852  ;;  %v12539_v41 = vsel %vm323_vm4, %v19602_v5, %v19824_v56 }
 0x398   : > { %1894 = vst [vmem:[%s19907_s19] sm:$0xff] %v1893_v33  ;;  %13817 = vst [vmem:[%s19907_s19 + $0x8] sm:$0xff] %v3553_v39  ;;  %v15754_v6 = vpop.f32.mrf.mxu0  ;;  %v15761_v58 = vpop.f32.mrf.mxu1  ;;  %16062 = vmatprep.subr.bf16.mxu0 %v16330_v0  ;;  %v9138_v39 = vadd.f32 %v9132_v18, %v9089_v44  ;;  %v12607_v16 = vsel %vm217_vm1, %v12602_v50, 0  ;;  %v12854_v47 = vsel %vm648_vm9, %v19681_v27, %v12853_v29 }
 0x399   : > { %13922 = vst [vmem:[%s19907_s19 + $0x10] sm:$0xff] %v5214_v55  ;;  %14027 = vst [vmem:[%s19907_s19 + $0x18] sm:$0xff] %v6875_v34  ;;  %v14381_v55 = vld [vmem:[%s20212_s1 + $0x28] sm:$0xf]  ;;  %v14378_v6 = vld [vmem:[%s20212_s1 + $0x24] sm:$0xf] }
 0x39a   : > { %14132 = vst [vmem:[%s19907_s19 + $0x20] sm:$0xff] %v8536_v8  ;;  %v9135_v20 = vpop.f32.mrf.mxu0  ;;  %v19922_v30 = vpop.f32.mrf.mxu1  ;;  %16059 = vmatmul.mubr.msk.bf16.vlgmr.msra.gmra.mxu1 %vm213_vm2, %v14366_v52  ;;  %v9201_v52 = vadd.f32 %v19869_v62, %v9138_v39  ;;  %v12544_v58 = vsel %vm217_vm1, %v12539_v41, 0 }
 0x39b   : > { %16069 = vmatpush3.bf16.msra.mxu1 %v12369_v12  ;;  %16070 = vmatprep.mubr.msk.bf16.mxu1 %vm16331_vm0, %v16330_v0  ;;  %v19974_v40 = vpop.permute.xlu1 %12915  ;;  %v14389_v20 = vld [vmem:[%s20212_s1 + $0x30] sm:$0xf] }
 0x39c   : > { %v15755_v1 = vpop.f32.mrf.mxu0  ;;  %v15772_v46 = vpop.f32.mrf.mxu1  ;;  %16080 = vmatprep.subr.bf16.mxu1 %v16330_v0 }
 0x39d   : > { %v12733_v1 = vsel %vm217_vm1, %v12728_v57, 0 }
 0x39e   : > { %v9258_v15 = vpop.f32.mrf.mxu0  ;;  %16053 = vmatmul.mubr.msk.bf16.vlgmr.msra.gmra.mxu0 %vm213_vm2, %v14362_v28  ;;  %v9324_v14 = vpop.f32.mrf.mxu1 }
 0x39f   : > { %16063 = vmatpush3.bf16.msra.mxu0 %v12306_v38  ;;  %16064 = vmatprep.mubr.msk.bf16.mxu0 %vm16331_vm0, %v16330_v0  ;;  %v9264_v56 = vadd.f32 %v9258_v15, %v9201_v52  ;;  %v19994_v3 = vpop.permute.xlu1 %13028  ;;  %v14385_v14 = vld [vmem:[%s20212_s1 + $0x2c] sm:$0xf] }
 0x3a0   : > { %v15766_v49 = vpop.f32.mrf.mxu0  ;;  %v15773_v63 = vpop.f32.mrf.mxu1  ;;  %16074 = vmatprep.subr.bf16.mxu0 %v16330_v0  ;;  %v13030_v60 = vsel %vm211_vm3, %v19715_v35, %v19994_v3 }
 0x3a1   : > { %v9327_v4 = vadd.f32 %v19922_v30, %v9264_v56 }
 0x3a2   : > { %v9261_v19 = vpop.f32.mrf.mxu0  ;;  %v19949_v23 = vpop.f32.mrf.mxu1  ;;  %16071 = vmatmul.mubr.msk.bf16.vlgmr.msra.gmra.mxu1 %vm213_vm2, %v14374_v48 }
 0x3a3   : > { %16081 = vmatpush3.bf16.msra.mxu1 %v12481_v53  ;;  %16082 = vmatprep.mubr.msk.bf16.mxu1 %vm16331_vm0, %v16330_v0  ;;  %v13092_v2 = vpop.permute.xlu1 %13091 }
 0x3a4   : > { %v15767_v45 = vpop.f32.mrf.mxu0  ;;  %v15784_v32 = vpop.f32.mrf.mxu1  ;;  %16092 = vmatprep.subr.bf16.mxu1 %v16330_v0 }
 0x3a6   : > { %v9384_v36 = vpop.f32.mrf.mxu0  ;;  %16065 = vmatmul.mubr.msk.bf16.vlgmr.msra.gmra.mxu0 %vm213_vm2, %v14370_v26  ;;  %v9450_v33 = vpop.f32.mrf.mxu1  ;;  %v12859_v26 = vsel %vm217_vm1, %v12854_v47, 0 }
 0x3a7   : > { %16075 = vmatpush3.bf16.msra.mxu0 %v12418_v42  ;;  %16076 = vmatprep.mubr.msk.bf16.mxu0 %vm16331_vm0, %v16330_v0  ;;  %v9390_v15 = vadd.f32 %v9384_v36, %v9327_v4  ;;  %v14393_v42 = vld [vmem:[%s20212_s1 + $0x34] sm:$0xf]  ;;  %v20030_v44 = vpop.permute.xlu1 %13154 }
 0x3a8   : > { %v15778_v34 = vpop.f32.mrf.mxu0  ;;  %v15785_v17 = vpop.f32.mrf.mxu1  ;;  %16086 = vmatprep.subr.bf16.mxu0 %v16330_v0 }
 0x3a9   : > { %v9453_v53 = vadd.f32 %v19949_v23, %v9390_v15  ;;  %v12791_v23 = vsel %vm583_vm8, %v19666_v54, %v19943_v22  ;;  %v14412_v22 = vld [vmem:[%s16430_s30 + $0x24] sm:$0x3]  ;;  %v14405_v34 = vld [vmem:[%s20212_s1 + $0x40] sm:$0xf]  ;;  %s16258_s30 = scalar_lea.vmem %s16257_s9, 2048 }
 0x3aa   : > { %v9387_v18 = vpop.f32.mrf.mxu0  ;;  %v9573_v8 = vpop.f32.mrf.mxu1  ;;  %16083 = vmatmul.mubr.msk.bf16.vlgmr.msra.gmra.mxu1 %vm213_vm2, %v14381_v55  ;;  %v12796_v50 = vsel %vm217_vm1, %v12791_v23, 0  ;;  %v12972_v41 = vsel %vm217_vm1, %v14412_v22, 0  ;;  %v14416_v23 = vld [vmem:[%s20212_s1 + $0x4c] sm:$0xf]  ;;  %v14428_v22 = vld [vmem:[%s20212_s1 + $0x58] sm:$0xf]  ;;  %p16260_p2 = scmp.lt.s32.totalorder %s16258_s30, %s16252_s8 }
 0x3ab   : > { %16093 = vmatpush3.bf16.msra.mxu1 %v12607_v16  ;;  %16094 = vmatprep.mubr.msk.bf16.mxu1 %vm16331_vm0, %v16330_v0  ;;  %v12917_v18 = vsel %vm713_vm10, %v19698_v10, %v19974_v40  ;;  %v13093_v40 = vsel %vm323_vm4, %v19730_v25, %v13092_v2 }
 0x3ac   : > { %v15779_v12 = vpop.f32.mrf.mxu0  ;;  %v15796_v5 = vpop.f32.mrf.mxu1  ;;  %16104 = vmatprep.subr.bf16.mxu1 %v16330_v0  ;;  %v13098_v4 = vsel %vm217_vm1, %v13093_v40, 0  ;;  %p16261_p3 = por %p16260_p2, %p16259_p1 }
 0x3ad   : > { %v14401_v12 = vld [vmem:[%s20212_s1 + $0x3c] sm:$0xf]  ;;  %v12922_v5 = vsel %vm217_vm1, %v12917_v18, 0 }
 0x3ae   : > { %v9510_v62 = vpop.f32.mrf.mxu0  ;;  %16077 = vmatmul.mubr.msk.bf16.vlgmr.msra.gmra.mxu0 %vm213_vm2, %v14378_v6  ;;  %v9576_v37 = vpop.f32.mrf.mxu1  ;;  %p16262_p5 = pnand %p16261_p3, %p16255_p0 }
 0x3af   : > { %16087 = vmatpush3.bf16.msra.mxu0 %v12544_v58  ;;  %16088 = vmatprep.mubr.msk.bf16.mxu0 %vm16331_vm0, %v16330_v0  ;;  %v9516_v27 = vadd.f32 %v9510_v62, %v9453_v53 }
 0x3b0   : > { %v15790_v28 = vpop.f32.mrf.mxu0  ;;  %v15797_v38 = vpop.f32.mrf.mxu1  ;;  %16098 = vmatprep.subr.bf16.mxu0 %v16330_v0 }
 0x3b1   : > { %v9579_v54 = vadd.f32 %v9573_v8, %v9516_v27  ;;  %v13218_v8 = vpop.permute.xlu1 %13217 }
 0x3b2   : > { %v9513_v46 = vpop.f32.mrf.mxu0  ;;  %v9686_v51 = vpop.f32.mrf.mxu1  ;;  %16095 = vmatmul.mubr.msk.bf16.vlgmr.msra.gmra.mxu1 %vm213_vm2, %v14389_v20  ;;  %v14413_v20 = vld [vmem:[%s20212_s1 + $0x48] sm:$0xf]  ;;  %v13219_v35 = vsel %vm453_vm6, %v19764_v9, %v13218_v8  ;;  %v14424_v8 = vld [vmem:[%s20212_s1 + $0x54] sm:$0xf] }
 0x3b3   : > { %16105 = vmatpush3.bf16.msra.mxu1 %v12733_v1  ;;  %16106 = vmatprep.mubr.msk.bf16.mxu1 %vm16331_vm0, %v16330_v0 }
 0x3b4   : > { %v15791_v30 = vpop.f32.mrf.mxu0  ;;  %v15808_v48 = vpop.f32.mrf.mxu1  ;;  %16116 = vmatprep.subr.bf16.mxu1 %v16330_v0 }
 0x3b5   : > { %v13281_v28 = vpop.permute.xlu1 %13280 }
 0x3b6   : > { %v9636_v49 = vpop.f32.mrf.mxu0  ;;  %16089 = vmatmul.mubr.msk.bf16.vlgmr.msra.gmra.mxu0 %vm213_vm2, %v14385_v14  ;;  %v9689_v63 = vpop.f32.mrf.mxu1  ;;  %v14409_v14 = vld [vmem:[%s20212_s1 + $0x44] sm:$0xf] }
 0x3b7   : > { %16099 = vmatpush3.bf16.msra.mxu0 %v12670_v43  ;;  %16100 = vmatprep.mubr.msk.bf16.mxu0 %vm16331_vm0, %v16330_v0  ;;  %v9642_v55 = vadd.f32 %v9636_v49, %v9579_v54  ;;  %v13035_v43 = vsel %vm217_vm1, %v13030_v60, 0  ;;  %v14420_v63 = vld [vmem:[%s20212_s1 + $0x50] sm:$0xf] }
 0x3b8   : > { %v15802_v59 = vpop.f32.mrf.mxu0  ;;  %v15809_v19 = vpop.f32.mrf.mxu1  ;;  %16110 = vmatprep.subr.bf16.mxu0 %v16330_v0 }
 0x3b9   : > { %v9692_v58 = vadd.f32 %v9686_v51, %v9642_v55  ;;  %v13344_v3 = vpop.permute.xlu1 %13343  ;;  %v13224_v59 = vsel %vm217_vm1, %v13219_v35, 0  ;;  %v13156_v19 = vsel %vm388_vm5, %v19747_v21, %v20030_v44 }
 0x3ba   : > { %v9639_v45 = vpop.f32.mrf.mxu0  ;;  %v9812_v32 = vpop.f32.mrf.mxu1  ;;  %16107 = vmatmul.mubr.msk.bf16.vlgmr.msra.gmra.mxu1 %vm213_vm2, %v14397_v61  ;;  %v13345_v44 = vsel %vm583_vm8, %v19806_v13, %v13344_v3 }
 0x3bb   : > { %16117 = vmatpush3.bf16.msra.mxu1 %v12859_v26  ;;  %16118 = vmatprep.mubr.msk.bf16.mxu1 %vm16331_vm0, %v16330_v0  ;;  %v13350_v55 = vsel %vm217_vm1, %v13345_v44, 0 }
 0x3bc   : > { %v15803_v29 = vpop.f32.mrf.mxu0  ;;  %v15820_v36 = vpop.f32.mrf.mxu1  ;;  %16128 = vmatprep.subr.bf16.mxu1 %v16330_v0 }
 0x3bd   : > { %v13407_v45 = vpop.permute.xlu1 %13406 }
 0x3be   : > { %v9749_v33 = vpop.f32.mrf.mxu0  ;;  %16101 = vmatmul.mubr.msk.bf16.vlgmr.msra.gmra.mxu0 %vm213_vm2, %v14393_v42  ;;  %v9815_v39 = vpop.f32.mrf.mxu1 }
 0x3bf   : > { %16111 = vmatpush3.bf16.msra.mxu0 %v12796_v50  ;;  %16112 = vmatprep.mubr.msk.bf16.mxu0 %vm16331_vm0, %v16330_v0  ;;  %v9755_v10 = vadd.f32 %v9749_v33, %v9692_v58 }
 0x3c0   : > { %v15814_v17 = vpop.f32.mrf.mxu0  ;;  %v15821_v16 = vpop.f32.mrf.mxu1  ;;  %16122 = vmatprep.subr.bf16.mxu0 %v16330_v0 }
 0x3c1   : > { %v9818_v25 = vadd.f32 %v9812_v32, %v9755_v10  ;;  %v13161_v32 = vsel %vm217_vm1, %v13156_v19, 0  ;;  %v13470_v17 = vpop.permute.xlu1 %13469 }
 0x3c2   : > { %v9752_v52 = vpop.f32.mrf.mxu0  ;;  %v9938_v6 = vpop.f32.mrf.mxu1  ;;  %16119 = vmatmul.mubr.msk.bf16.vlgmr.msra.gmra.mxu1 %vm213_vm2, %v14405_v34  ;;  %v13282_v34 = vsel %vm518_vm7, %v19781_v24, %v13281_v28  ;;  %v13471_v58 = vsel %vm713_vm10, %v19856_v7, %v13470_v17  ;;  %v13408_v7 = vsel %vm648_vm9, %v19832_v31, %v13407_v45 }
 0x3c3   : > { %16129 = vmatpush3.bf16.msra.mxu1 %v12972_v41  ;;  %16130 = vmatprep.mubr.msk.bf16.mxu1 %vm16331_vm0, %v16330_v0  ;;  %v13287_v52 = vsel %vm217_vm1, %v13282_v34, 0  ;;  %v13476_v40 = vsel %vm217_vm1, %v13471_v58, 0  ;;  %v13413_v28 = vsel %vm217_vm1, %v13408_v7, 0 }
 0x3c4   : > { %v15815_v56 = vpop.f32.mrf.mxu0  ;;  %v15832_v57 = vpop.f32.mrf.mxu1  ;;  %16140 = vmatprep.subr.bf16.mxu1 %v16330_v0 }
 0x3c5   : > { %v14436_v56 = vld [vmem:[%s20212_s1 + $0x60] sm:$0xf] }
 0x3c6   : > { %v9875_v62 = vpop.f32.mrf.mxu0  ;;  %16113 = vmatmul.mubr.msk.bf16.vlgmr.msra.gmra.mxu0 %vm213_vm2, %v14401_v12  ;;  %v9941_v37 = vpop.f32.mrf.mxu1 }
 0x3c7   : > { %16123 = vmatpush3.bf16.msra.mxu0 %v12922_v5  ;;  %16124 = vmatprep.mubr.msk.bf16.mxu0 %vm16331_vm0, %v16330_v0  ;;  %v9881_v15 = vadd.f32 %v9875_v62, %v9818_v25  ;;  %v14444_v25 = vld [vmem:[%s20212_s1 + $0x68] sm:$0xf] }
 0x3c8   : > { %v15826_v38 = vpop.f32.mrf.mxu0  ;;  %v15833_v1 = vpop.f32.mrf.mxu1  ;;  %16134 = vmatprep.subr.bf16.mxu0 %v16330_v0 }
 0x3c9   : > { %v9944_v49 = vadd.f32 %v9938_v6, %v9881_v15 }
 0x3ca   : > { %v9878_v46 = vpop.f32.mrf.mxu0  ;;  %v10064_v51 = vpop.f32.mrf.mxu1  ;;  %16131 = vmatmul.mubr.msk.bf16.vlgmr.msra.gmra.mxu1 %vm213_vm2, %v14413_v20  ;;  %v14432_v20 = vld [vmem:[%s20212_s1 + $0x5c] sm:$0xf] }
 0x3cb   : > { %16141 = vmatpush3.bf16.msra.mxu1 %v13098_v4  ;;  %16142 = vmatprep.mubr.msk.bf16.mxu1 %vm16331_vm0, %v16330_v0 }
 0x3cc   : > { %v15827_v30 = vpop.f32.mrf.mxu0  ;;  %v15844_v48 = vpop.f32.mrf.mxu1  ;;  %16152 = vmatprep.subr.bf16.mxu1 %v16330_v0 }
 0x3ce   : > { %v10001_v47 = vpop.f32.mrf.mxu0  ;;  %16125 = vmatmul.mubr.msk.bf16.vlgmr.msra.gmra.mxu0 %vm213_vm2, %v14409_v14  ;;  %v10067_v2 = vpop.f32.mrf.mxu1  ;;  %v14440_v14 = vld [vmem:[%s20212_s1 + $0x64] sm:$0xf] }
 0x3cf   : > { %16135 = vmatpush3.bf16.msra.mxu0 %v13035_v43  ;;  %16136 = vmatprep.mubr.msk.bf16.mxu0 %vm16331_vm0, %v16330_v0  ;;  %v10007_v9 = vadd.f32 %v10001_v47, %v9944_v49 }
 0x3d0   : > { %v15838_v53 = vpop.f32.mrf.mxu0  ;;  %v15845_v61 = vpop.f32.mrf.mxu1  ;;  %16146 = vmatprep.subr.bf16.mxu0 %v16330_v0 }
 0x3d1   : > { %v10070_v21 = vadd.f32 %v10064_v51, %v10007_v9 }
 0x3d2   : > { %v10004_v26 = vpop.f32.mrf.mxu0  ;;  %v10190_v27 = vpop.f32.mrf.mxu1  ;;  %16143 = vmatmul.mubr.msk.bf16.vlgmr.msra.gmra.mxu1 %vm213_vm2, %v14420_v63 }
 0x3d3   : > { %16153 = vmatpush3.bf16.msra.mxu1 %v13224_v59  ;;  %16154 = vmatprep.mubr.msk.bf16.mxu1 %vm16331_vm0, %v16330_v0 }
 0x3d4   : > { %v15839_v42 = vpop.f32.mrf.mxu0  ;;  %v15856_v50 = vpop.f32.mrf.mxu1  ;;  %16164 = vmatprep.subr.bf16.mxu1 %v16330_v0 }
 0x3d6   : > { %v10127_v29 = vpop.f32.mrf.mxu0  ;;  %16137 = vmatmul.mubr.msk.bf16.vlgmr.msra.gmra.mxu0 %vm213_vm2, %v14416_v23  ;;  %v10193_v36 = vpop.f32.mrf.mxu1 }
 0x3d7   : > { %v10133_v54 = vadd.f32 %v10127_v29, %v10070_v21  ;;  %16147 = vmatpush3.bf16.msra.mxu0 %v13161_v32  ;;  %16148 = vmatprep.mubr.msk.bf16.mxu0 %vm16331_vm0, %v16330_v0 }
 0x3d8   : > { %v15850_v33 = vpop.f32.mrf.mxu0  ;;  %v15857_v39 = vpop.f32.mrf.mxu1  ;;  %16158 = vmatprep.subr.bf16.mxu0 %v16330_v0 }
 0x3d9   : > { %v10196_v13 = vadd.f32 %v10190_v27, %v10133_v54 }
 0x3da   : > { %v10130_v16 = vpop.f32.mrf.mxu0  ;;  %v20108_v41 = vpop.f32.mrf.mxu1  ;;  %16155 = vmatmul.mubr.msk.bf16.vlgmr.msra.gmra.mxu1 %vm213_vm2, %v14428_v22 }
 0x3db   : > { %v10197_v18 = vadd.f32 %v10196_v13, %v19887_v11  ;;  %16165 = vmatpush3.bf16.msra.mxu1 %v13350_v55  ;;  %16166 = vmatprep.mubr.msk.bf16.mxu1 %vm16331_vm0, %v16330_v0 }
 0x3dc   : > { %v15851_v6 = vpop.f32.mrf.mxu0  ;;  %v15868_v24 = vpop.f32.mrf.mxu1  ;;  %16176 = vmatprep.subr.bf16.mxu1 %v16330_v0 }
 0x3dd   : > { %14237 = vst [vmem:[%s19907_s19 + $0x28] sm:$0xff] %v10197_v18 }
 0x3de   : > { %v10258_v12 = vpop.f32.mrf.mxu0  ;;  %16149 = vmatmul.mubr.msk.bf16.vlgmr.msra.gmra.mxu0 %vm213_vm2, %v14424_v8  ;;  %v10307_v5 = vpop.f32.mrf.mxu1 }
 0x3df   : > { %16159 = vmatpush3.bf16.msra.mxu0 %v13287_v52  ;;  %16160 = vmatprep.mubr.msk.bf16.mxu0 %vm16331_vm0, %v16330_v0  ;;  %v10305_v45 = vadd.f32 %v20108_v41, %v10258_v12 }
 0x3e0   : > { %v15862_v57 = vpop.f32.mrf.mxu0  ;;  %v15869_v10 = vpop.f32.mrf.mxu1  ;;  %16170 = vmatprep.subr.bf16.mxu0 %v16330_v0 }
 0x3e2   : > { %v10261_v62 = vpop.f32.mrf.mxu0  ;;  %v10429_v37 = vpop.f32.mrf.mxu1  ;;  %16167 = vmatmul.mubr.msk.bf16.vlgmr.msra.gmra.mxu1 %vm213_vm2, %v14436_v56 }
 0x3e3   : > { %16177 = vmatpush3.bf16.msra.mxu1 %v13476_v40  ;;  %16178 = vmatprep.mubr.msk.bf16.mxu1 %vm16331_vm0, %v16330_v0 }
 0x3e4   : > { %v15863_v38 = vpop.f32.mrf.mxu0  ;;  %v15880_v1 = vpop.f32.mrf.mxu1 }
 0x3e6   : > { %v10366_v4 = vpop.f32.mrf.mxu0  ;;  %16161 = vmatmul.mubr.msk.bf16.vlgmr.msra.gmra.mxu0 %vm213_vm2, %v14432_v20  ;;  %v10432_v31 = vpop.f32.mrf.mxu1 }
 0x3e7   : > { %16171 = vmatpush3.bf16.msra.mxu0 %v13413_v28  ;;  %16172 = vmatprep.mubr.msk.bf16.mxu0 %vm16331_vm0, %v16330_v0  ;;  %v10372_v50 = vadd.f32 %v10366_v4, %v10305_v45 }
 0x3e8   : > { %v15874_v60 = vpop.f32.mrf.mxu0  ;;  %v15881_v46 = vpop.f32.mrf.mxu1 }
 0x3e9   : > { %v10435_v54 = vadd.f32 %v10429_v37, %v10372_v50 }
 0x3ea   : > { %v10369_v51 = vpop.f32.mrf.mxu0  ;;  %v10555_v15 = vpop.f32.mrf.mxu1  ;;  %16179 = vmatmul.mubr.msk.bf16.vlgmr.msra.gmra.mxu1 %vm213_vm2, %v14444_v25 }
 0x3ec   : > { %v15875_v43 = vpop.f32.mrf.mxu0  ;;  %v15892_v30 = vpop.f32.mrf.mxu1 }
 0x3ee   : > { %v10492_v48 = vpop.f32.mrf.mxu0  ;;  %16173 = vmatmul.mubr.msk.bf16.vlgmr.msra.gmra.mxu0 %vm213_vm2, %v14440_v14  ;;  %v10558_v35 = vpop.f32.mrf.mxu1 }
 0x3ef   : > { %v10498_v39 = vadd.f32 %v10492_v48, %v10435_v54 }
 0x3f0   : > { %v15886_v3 = vpop.f32.mrf.mxu0  ;;  %v15893_v47 = vpop.f32.mrf.mxu1 }
 0x3f1   : > { %v10561_v16 = vadd.f32 %v10555_v15, %v10498_v39 }
 0x3f2   : > { %v10495_v2 = vpop.f32.mrf.mxu0  ;;  %v10681_v0 = vpop.f32.mrf.mxu1 }
 0x3f4   : > { %v15887_v49 = vpop.f32.mrf.mxu0  ;;  %v15904_v63 = vpop.f32.mrf.mxu1 }
 0x3f6   : > { %v10618_v53 = vpop.f32.mrf.mxu0  ;;  %v10684_v61 = vpop.f32.mrf.mxu1 }
 0x3f7   : > { %v10624_v52 = vadd.f32 %v10618_v53, %v10561_v16 }
 0x3f8   : > { %v15898_v59 = vpop.f32.mrf.mxu0  ;;  %v15905_v9 = vpop.f32.mrf.mxu1 }
 0x3f9   : > { %v10687_v12 = vadd.f32 %v10681_v0, %v10624_v52 }
 0x3fa   : > { %v10621_v19 = vpop.f32.mrf.mxu0  ;;  %v10793_v26 = vpop.f32.mrf.mxu1 }
 0x3fc   : > { %v15899_v27 = vpop.f32.mrf.mxu0  ;;  %v15916_v23 = vpop.f32.mrf.mxu1 }
 0x3fe   : > { %v10744_v32 = vpop.f32.mrf.mxu0  ;;  %v10796_v42 = vpop.f32.mrf.mxu1 }
 0x3ff   : > { %v10750_v57 = vadd.f32 %v10744_v32, %v10687_v12 }
 0x400   : > { %v15910_v21 = vpop.f32.mrf.mxu0  ;;  %v15917_v44 = vpop.f32.mrf.mxu1 }
 0x401   : > { %v10799_v37 = vadd.f32 %v10793_v26, %v10750_v57 }
 0x402   : > { %v10747_v29 = vpop.f32.mrf.mxu0  ;;  %v10919_v36 = vpop.f32.mrf.mxu1 }
 0x404   : > { %v15911_v22 = vpop.f32.mrf.mxu0  ;;  %v15928_v33 = vpop.f32.mrf.mxu1 }
 0x406   : > { %v10856_v55 = vpop.f32.mrf.mxu0  ;;  %v10922_v13 = vpop.f32.mrf.mxu1 }
 0x407   : > { %v10862_v38 = vadd.f32 %v10856_v55, %v10799_v37 }
 0x408   : > { %v15922_v34 = vpop.f32.mrf.mxu0  ;;  %v15929_v17 = vpop.f32.mrf.mxu1 }
 0x409   : > { %v10925_v60 = vadd.f32 %v10919_v36, %v10862_v38 }
 0x40a   : > { %v10859_v18 = vpop.f32.mrf.mxu0  ;;  %v11045_v8 = vpop.f32.mrf.mxu1 }
 0x40c   : > { %v15923_v41 = vpop.f32.mrf.mxu0  ;;  %v15940_v6 = vpop.f32.mrf.mxu1 }
 0x40e   : > { %v10982_v24 = vpop.f32.mrf.mxu0  ;;  %v11048_v58 = vpop.f32.mrf.mxu1 }
 0x40f   : > { %v10988_v15 = vadd.f32 %v10982_v24, %v10925_v60 }
 0x410   : > { %v15934_v5 = vpop.f32.mrf.mxu0  ;;  %v15941_v56 = vpop.f32.mrf.mxu1 }
 0x411   : > { %v11051_v35 = vadd.f32 %v11045_v8, %v10988_v15 }
 0x412   : > { %v10985_v10 = vpop.f32.mrf.mxu0  ;;  %v11171_v40 = vpop.f32.mrf.mxu1 }
 0x414   : > { %v15935_v7 = vpop.f32.mrf.mxu0  ;;  %v15952_v62 = vpop.f32.mrf.mxu1 }
 0x416   : > { %v11108_v20 = vpop.f32.mrf.mxu0  ;;  %v11174_v28 = vpop.f32.mrf.mxu1 }
 0x417   : > { %v11114_v2 = vadd.f32 %v11108_v20, %v11051_v35 }
 0x418   : > { %v15946_v1 = vpop.f32.mrf.mxu0  ;;  %v15953_v4 = vpop.f32.mrf.mxu1 }
 0x419   : > { %v11177_v61 = vadd.f32 %v11171_v40, %v11114_v2 }
 0x41a   : > { %v11111_v31 = vpop.f32.mrf.mxu0  ;;  %v11297_v25 = vpop.f32.mrf.mxu1 }
 0x41c   : > { %v15947_v46 = vpop.f32.mrf.mxu0  ;;  %v15964_v51 = vpop.f32.mrf.mxu1 }
 0x41e   : > { %v11234_v14 = vpop.f32.mrf.mxu0  ;;  %v11300_v43 = vpop.f32.mrf.mxu1 }
 0x41f   : > { %v11240_v19 = vadd.f32 %v11234_v14, %v11177_v61 }
 0x420   : > { %v15958_v30 = vpop.f32.mrf.mxu0  ;;  %v15965_v48 = vpop.f32.mrf.mxu1 }
 0x421   : > { %v11303_v32 = vadd.f32 %v11297_v25, %v11240_v19 }
 0x422   : > { %v11237_v3 = vpop.f32.mrf.mxu0  ;;  %v11410_v47 = vpop.f32.mrf.mxu1 }
 0x424   : > { %v15959_v0 = vpop.f32.mrf.mxu0  ;;  %v15976_v49 = vpop.f32.mrf.mxu1 }
 0x426   : > { %v11347_v63 = vpop.f32.mrf.mxu0  ;;  %v11413_v53 = vpop.f32.mrf.mxu1 }
 0x427   : > { %v11353_v21 = vadd.f32 %v11347_v63, %v11303_v32 }
 0x428   : > { %v15970_v59 = vpop.f32.mrf.mxu0  ;;  %v15977_v9 = vpop.f32.mrf.mxu1 }
 0x429   : > { %v11416_v22 = vadd.f32 %v11410_v47, %v11353_v21 }
 0x42a   : > { %v11350_v26 = vpop.f32.mrf.mxu0  ;;  %v11536_v27 = vpop.f32.mrf.mxu1 }
 0x42c   : > { %v15971_v23 = vpop.f32.mrf.mxu0  ;;  %v15988_v45 = vpop.f32.mrf.mxu1 }
 0x42e   : > { %v11473_v42 = vpop.f32.mrf.mxu0  ;;  %v11539_v50 = vpop.f32.mrf.mxu1 }
 0x42f   : > { %v11479_v55 = vadd.f32 %v11473_v42, %v11416_v22 }
 0x430   : > { %v15982_v44 = vpop.f32.mrf.mxu0  ;;  %v15989_v29 = vpop.f32.mrf.mxu1 }
 0x431   : > { %v11542_v18 = vadd.f32 %v11536_v27, %v11479_v55 }
 0x432   : > { %v11476_v36 = vpop.f32.mrf.mxu0  ;;  %v11662_v54 = vpop.f32.mrf.mxu1 }
 0x434   : > { %v15983_v33 = vpop.f32.mrf.mxu0  ;;  %v16000_v39 = vpop.f32.mrf.mxu1 }
 0x436   : > { %v11599_v13 = vpop.f32.mrf.mxu0  ;;  %v11665_v34 = vpop.f32.mrf.mxu1 }
 0x437   : > { %v11605_v41 = vadd.f32 %v11599_v13, %v11542_v18 }
 0x438   : > { %v15994_v17 = vpop.f32.mrf.mxu0  ;;  %v16001_v16 = vpop.f32.mrf.mxu1 }
 0x439   : > { %v11668_v5 = vadd.f32 %v11662_v54, %v11605_v41 }
 0x43a   : > { %v11602_v8 = vpop.f32.mrf.mxu0  ;;  %v11788_v52 = vpop.f32.mrf.mxu1 }
 0x43c   : > { %v15995_v6 = vpop.f32.mrf.mxu0  ;;  %v16012_v24 = vpop.f32.mrf.mxu1 }
 0x43e   : > { %v11725_v58 = vpop.f32.mrf.mxu0  ;;  %v11791_v12 = vpop.f32.mrf.mxu1 }
 0x43f   : > { %v11731_v10 = vadd.f32 %v11725_v58, %v11668_v5 }
 0x440   : > { %v16006_v56 = vpop.f32.mrf.mxu0  ;;  %v16013_v57 = vpop.f32.mrf.mxu1 }
 0x441   : > { %v11794_v20 = vadd.f32 %v11788_v52, %v11731_v10 }
 0x442   : > { %v11728_v40 = vpop.f32.mrf.mxu0  ;;  %v11919_v7 = vpop.f32.mrf.mxu1 }
 0x444   : > { %v16007_v62 = vpop.f32.mrf.mxu0  ;;  %v16024_v37 = vpop.f32.mrf.mxu1 }
 0x446   : > { %v11851_v28 = vpop.f32.mrf.mxu0  ;;  %v11922_v38 = vpop.f32.mrf.mxu1 }
 0x447   : > { %v11857_v1 = vadd.f32 %v11851_v28, %v11794_v20 }
 0x448   : > { %v16018_v4 = vpop.f32.mrf.mxu0  ;;  %v16025_v31 = vpop.f32.mrf.mxu1 }
 0x449   : > { %v11858_v25 = vadd.f32 %v11857_v1, %v19887_v11 }
 0x44a   : > { %v11854_v60 = vpop.f32.mrf.mxu0  ;;  %v12027_v46 = vpop.f32.mrf.mxu1 }
 0x44b   : > { %14342 = vst [vmem:[%s19907_s19 + $0x30] sm:$0xff] %v11858_v25 }
 0x44c   : > { %v16019_v51 = vpop.f32.mrf.mxu0  ;;  %v16036_v15 = vpop.f32.mrf.mxu1 }
 0x44e   : > { %v11965_v14 = vpop.f32.mrf.mxu0  ;;  %v12030_v43 = vpop.f32.mrf.mxu1 }
 0x44f   : > { %v11966_v36 = vadd.f32 %v11965_v14, %v11919_v7 }
 0x450   : > { %v16030_v30 = vpop.f32.mrf.mxu0  ;;  %v16037_v48 = vpop.f32.mrf.mxu1 }
 0x451   : > { %v12033_v55 = vadd.f32 %v12027_v46, %v11966_v36 }
 0x452   : > { %v11968_v35 = vpop.f32.mrf.mxu0  ;;  %v12153_v3 = vpop.f32.mrf.mxu1 }
 0x454   : > { %v16031_v47 = vpop.f32.mrf.mxu0  ;;  %v16048_v2 = vpop.f32.mrf.mxu1 }
 0x456   : > { %v12090_v0 = vpop.f32.mrf.mxu0  ;;  %v12156_v49 = vpop.f32.mrf.mxu1 }
 0x457   : > { %v12096_v17 = vadd.f32 %v12090_v0, %v12033_v55 }
 0x458   : > { %v16042_v63 = vpop.f32.mrf.mxu0  ;;  %v16049_v53 = vpop.f32.mrf.mxu1 }
 0x459   : > { %v12159_v41 = vadd.f32 %v12153_v3, %v12096_v17 }
 0x45a   : > { %v12093_v61 = vpop.f32.mrf.mxu0  ;;  %v12279_v59 = vpop.f32.mrf.mxu1 }
 0x45c   : > { %v16043_v9 = vpop.f32.mrf.mxu0  ;;  %v16060_v19 = vpop.f32.mrf.mxu1 }
 0x45e   : > { %v12216_v26 = vpop.f32.mrf.mxu0  ;;  %v12282_v27 = vpop.f32.mrf.mxu1 }
 0x45f   : > { %v12222_v58 = vadd.f32 %v12216_v26, %v12159_v41 }
 0x460   : > { %v16054_v23 = vpop.f32.mrf.mxu0  ;;  %v16061_v45 = vpop.f32.mrf.mxu1 }
 0x461   : > { %v12285_v10 = vadd.f32 %v12279_v59, %v12222_v58 }
 0x462   : > { %v12219_v32 = vpop.f32.mrf.mxu0  ;;  %v12405_v42 = vpop.f32.mrf.mxu1 }
 0x464   : > { %v16055_v50 = vpop.f32.mrf.mxu0  ;;  %v16072_v21 = vpop.f32.mrf.mxu1 }
 0x466   : > { %v12342_v44 = vpop.f32.mrf.mxu0  ;;  %v12408_v29 = vpop.f32.mrf.mxu1 }
 0x467   : > { %v12348_v62 = vadd.f32 %v12342_v44, %v12285_v10 }
 0x468   : > { %v16066_v54 = vpop.f32.mrf.mxu0  ;;  %v16073_v22 = vpop.f32.mrf.mxu1 }
 0x469   : > { %v12411_v1 = vadd.f32 %v12405_v42, %v12348_v62 }
 0x46a   : > { %v12345_v33 = vpop.f32.mrf.mxu0  ;;  %v12517_v39 = vpop.f32.mrf.mxu1 }
 0x46c   : > { %v16067_v13 = vpop.f32.mrf.mxu0  ;;  %v16084_v34 = vpop.f32.mrf.mxu1 }
 0x46e   : > { %v12454_v16 = vpop.f32.mrf.mxu0  ;;  %v12520_v18 = vpop.f32.mrf.mxu1 }
 0x46f   : > { %v12460_v25 = vadd.f32 %v12454_v16, %v12411_v1 }
 0x470   : > { %v16078_v8 = vpop.f32.mrf.mxu0  ;;  %v16085_v52 = vpop.f32.mrf.mxu1 }
 0x471   : > { %v12523_v14 = vadd.f32 %v12517_v39, %v12460_v25 }
 0x472   : > { %v12457_v6 = vpop.f32.mrf.mxu0  ;;  %v12643_v24 = vpop.f32.mrf.mxu1 }
 0x474   : > { %v16079_v12 = vpop.f32.mrf.mxu0  ;;  %v16096_v5 = vpop.f32.mrf.mxu1 }
 0x476   : > { %v12580_v56 = vpop.f32.mrf.mxu0  ;;  %v12646_v57 = vpop.f32.mrf.mxu1 }
 0x477   : > { %v12586_v48 = vadd.f32 %v12580_v56, %v12523_v14 }
 0x478   : > { %v16090_v40 = vpop.f32.mrf.mxu0  ;;  %v16097_v7 = vpop.f32.mrf.mxu1 }
 0x479   : > { %v12649_v0 = vadd.f32 %v12643_v24, %v12586_v48 }
 0x47a   : > { %v12583_v37 = vpop.f32.mrf.mxu0  ;;  %v12769_v20 = vpop.f32.mrf.mxu1 }
 0x47c   : > { %v16091_v28 = vpop.f32.mrf.mxu0  ;;  %v16108_v38 = vpop.f32.mrf.mxu1 }
 0x47e   : > { %v12706_v4 = vpop.f32.mrf.mxu0  ;;  %v12772_v31 = vpop.f32.mrf.mxu1 }
 0x47f   : > { %v12712_v53 = vadd.f32 %v12706_v4, %v12649_v0 }
 0x480   : > { %v16102_v60 = vpop.f32.mrf.mxu0  ;;  %v16109_v46 = vpop.f32.mrf.mxu1 }
 0x481   : > { %v12775_v26 = vadd.f32 %v12769_v20, %v12712_v53 }
 0x482   : > { %v12709_v51 = vpop.f32.mrf.mxu0  ;;  %v12895_v15 = vpop.f32.mrf.mxu1 }
 0x484   : > { %v16103_v43 = vpop.f32.mrf.mxu0  ;;  %v16120_v30 = vpop.f32.mrf.mxu1 }
 0x486   : > { %v12832_v35 = vpop.f32.mrf.mxu0  ;;  %v12898_v3 = vpop.f32.mrf.mxu1 }
 0x487   : > { %v12838_v45 = vadd.f32 %v12832_v35, %v12775_v26 }
 0x488   : > { %v16114_v47 = vpop.f32.mrf.mxu0  ;;  %v16121_v2 = vpop.f32.mrf.mxu1 }
 0x489   : > { %v12901_v44 = vadd.f32 %v12895_v15, %v12838_v45 }
 0x48a   : > { %v12835_v49 = vpop.f32.mrf.mxu0  ;;  %v13008_v63 = vpop.f32.mrf.mxu1 }
 0x48c   : > { %v16115_v61 = vpop.f32.mrf.mxu0  ;;  %v16132_v59 = vpop.f32.mrf.mxu1 }
 0x48e   : > { %v12958_v9 = vpop.f32.mrf.mxu0  ;;  %v13011_v19 = vpop.f32.mrf.mxu1 }
 0x48f   : > { %v12964_v54 = vadd.f32 %v12958_v9, %v12901_v44 }
 0x490   : > { %v16126_v27 = vpop.f32.mrf.mxu0  ;;  %v16133_v23 = vpop.f32.mrf.mxu1 }
 0x491   : > { %v13014_v13 = vadd.f32 %v13008_v63, %v12964_v54 }
 0x492   : > { %v12961_v32 = vpop.f32.mrf.mxu0  ;;  %v13134_v42 = vpop.f32.mrf.mxu1 }
 0x494   : > { %v16127_v50 = vpop.f32.mrf.mxu0  ;;  %v16144_v21 = vpop.f32.mrf.mxu1 }
 0x496   : > { %v13071_v29 = vpop.f32.mrf.mxu0  ;;  %v13137_v36 = vpop.f32.mrf.mxu1 }
 0x497   : > { %v13077_v16 = vadd.f32 %v13071_v29, %v13014_v13 }
 0x498   : > { %v16138_v22 = vpop.f32.mrf.mxu0  ;;  %v16145_v33 = vpop.f32.mrf.mxu1 }
 0x499   : > { %v13140_v6 = vadd.f32 %v13134_v42, %v13077_v16 }
 0x49a   : > { %v13074_v39 = vpop.f32.mrf.mxu0  ;;  %v13260_v55 = vpop.f32.mrf.mxu1 }
 0x49c   : > { %v16139_v34 = vpop.f32.mrf.mxu0  ;;  %v16156_v17 = vpop.f32.mrf.mxu1 }
 0x49e   : > { %v13197_v18 = vpop.f32.mrf.mxu0  ;;  %v13263_v8 = vpop.f32.mrf.mxu1 }
 0x49f   : > { %v13203_v12 = vadd.f32 %v13197_v18, %v13140_v6 }
 0x4a0   : > { %v16150_v52 = vpop.f32.mrf.mxu0  ;;  %v16157_v41 = vpop.f32.mrf.mxu1 }
 0x4a1   : > { %v13266_v40 = vadd.f32 %v13260_v55, %v13203_v12 }
 0x4a2   : > { %v13200_v24 = vpop.f32.mrf.mxu0  ;;  %v13386_v58 = vpop.f32.mrf.mxu1 }
 0x4a4   : > { %v16151_v5 = vpop.f32.mrf.mxu0  ;;  %v16168_v56 = vpop.f32.mrf.mxu1 }
 0x4a6   : > { %v13323_v57 = vpop.f32.mrf.mxu0  ;;  %v13389_v10 = vpop.f32.mrf.mxu1 }
 0x4a7   : > { %v13329_v37 = vadd.f32 %v13323_v57, %v13266_v40 }
 0x4a8   : > { %v16162_v7 = vpop.f32.mrf.mxu0  ;;  %v16169_v62 = vpop.f32.mrf.mxu1 }
 0x4a9   : > { %v13392_v4 = vadd.f32 %v13386_v58, %v13329_v37 }
 0x4aa   : > { %v13326_v20 = vpop.f32.mrf.mxu0  ;;  %v13512_v28 = vpop.f32.mrf.mxu1 }
 0x4ac   : > { %v16163_v38 = vpop.f32.mrf.mxu0  ;;  %v16180_v1 = vpop.f32.mrf.mxu1 }
 0x4ae   : > { %v13449_v31 = vpop.f32.mrf.mxu0  ;;  %v13515_v25 = vpop.f32.mrf.mxu1 }
 0x4af   : > { %v13455_v60 = vadd.f32 %v13449_v31, %v13392_v4 }
 0x4b0   : > { %v16174_v46 = vpop.f32.mrf.mxu0  ;;  %v16181_v51 = vpop.f32.mrf.mxu1 }
 0x4b1   : > { %v13518_v15 = vadd.f32 %v13512_v28, %v13455_v60 }
 0x4b2   : > { %v13452_v14 = vpop.f32.mrf.mxu0 }
 0x4b3   : > { %v13519_v43 = vadd.f32 %v13518_v15, %v19887_v11 }
 0x4b4   : > { %v16175_v30 = vpop.f32.mrf.mxu0 }
 0x4b5   : > { %14447 = vst [vmem:[%s19907_s19 + $0x38] sm:$0xff] %v13519_v43 }
 0x4b6   : > { %16265 = shalt.err (!%p16262_p5)
}
 0x4b7   : > { %s16266_s11 = scalar_lea.hbm %s20158_s23, 1024  ;;  %s16270_s10 = scalar_lea.hbm %s20214_s3, 2048 }
 0x4b8   : > { %p16267_p6 = scmp.ne.s32.totalorder %s20158_s23, %s16266_s11  ;;  %p16271_p10 = scmp.lt.s32.totalorder %s20158_s23, %s20214_s3 }
 0x4b9   : > { %p16272_p11 = scmp.lt.s32.totalorder %s16270_s10, %s16266_s11 }
 0x4ba   : > { %p16268_p7 = pnand %p16267_p6, %p16404_p4 }
 0x4bb   : > { %p16273_p12 = por %p16272_p11, %p16271_p10 }
 0x4bc   : > { %p16269_p9 = pneg %p16268_p7 }
 0x4be   : > { %p16274_p13 = pnand %p16273_p12, %p16269_p9 }
 0x4c0   : > { %16277 = shalt.err (!%p16274_p13)
}
 0x4c1   : > { %s16342_s6 = smov 128   ;;  %s16343_s7 = smov 8  }
 0x4c2   : > { %16183 = dma.vmem_to_hbm [thread:$0]  (%p16404_p4), %s20160_s5, 1024, %s20158_s23, %s20166_s15, %s16342_s6, %s16342_s6, %s16343_s7  }
 0x4c3 PF: > { %p16189_p0 = scmp.ge.s32.totalorder %s16328_s17, 2  ;;  %s13553_s18 = sand.u32 1, %s16308_s12  }
 0x4c4   : > { %s13554_s21 = scalar_lea.sflag [#allocation3], %s13553_s18 }
 0x4c5   : > { %p16186_p1 = pnand %p16189_p0, %p16411_p8 }
 0x4c7   : > { %p16187_p2 = pneg %p16186_p1 }
 0x4c9   : > { %16303 = dma.done.wait (%p16187_p2), %s13554_s21, 1024  }
 0x4ca   : > { %16305 = vsyncadd (%p16187_p2), %s13554_s21, 4294966272  ;;  %s16_s17 = sadd.s32 1, %s16328_s17   ;;  %s20217_s12 = smov %s16312_s13 }
 0x4cb   : > { %p13_p3 = scmp.ge.s32.totalorder %s16_s17, 4   ;;  %s20218_s13 = smov %s16316_s14 }
 0x4cc   : > { %s20219_s14 = smov %s16417_s25  ;;  %s20220_s15 = smov %s16324_s16 }
 0x4cd   : > { %s20221_s16 = smov %s20223_s20  ;;  %15 = sbr.rel (!%p13_p3) target bundleno = 4 (0x4), region = 109 }
 0x4d2   :  { %13559 = vsyncpa [#allocation3], 1 }
 0x4d3   :  { %13561 = vsyncpa [#allocation3 + $0x1], 1 }

</bundles_post_ra>
